<compile_context>
chip_gen: v5e
topology: v5e:2x2
jax: 0.10.0
libtpu: 0.0.40
codegen_flags: <defaults>
</compile_context>

<pallas_src>
import numpy as np
import jax
import jax.numpy as jnp
from jax.experimental import pallas as pl
from jax.experimental.pallas import tpu as pltpu

_EPS = 1e-5
_TARGET_M_ROWS = 2048   # target rows (of H*W) per MXU dot chunk


# ---------------------------------------------------------------------------
# Shared in-kernel helper: 3x3 SAME conv from a padded VMEM buffer.
#   pad_ref : (H+2, W+2, C)   bf16   padded activation
#   cols_ref: (H+2, W, 3*C)   bf16   kx-shifted column slabs (scratch)
#   w_ref   : (3, 3*C, Cout)  bf16   weights grouped by ky
#   y_ref   : (1, H, W, Cout) bf16   output block
#   s_ref   : (1, 2, Cout)    f32    per-image BN partials (sum, sum of sq)
# ---------------------------------------------------------------------------
def _conv3x3_rowchunked(pad_ref, cols_ref, w_ref, y_ref, s_ref, H, W):
    C = pad_ref.shape[-1]
    Cout = w_ref.shape[-1]

    # 3 kx-shifted copies (instead of 9 full im2col taps).
    for kx in range(3):
        cols_ref[:, :, kx * C:(kx + 1) * C] = pad_ref[:, kx:kx + W, :]

    w = w_ref[...]                                     # (3, 3*C, Cout) bf16
    th = max(1, min(H, max(1, _TARGET_M_ROWS // max(W, 1))))
    ssum = jnp.zeros((1, Cout), jnp.float32)
    ssq = jnp.zeros((1, Cout), jnp.float32)
    for r0 in range(0, H, th):                          # static row chunks
        rows = min(th, H - r0)
        acc = None
        for ky in range(3):                             # 3 accumulated dots, K=3*C
            a = cols_ref[r0 + ky:r0 + ky + rows, :, :].reshape(rows * W, 3 * C)
            d = jnp.dot(a, w[ky], preferred_element_type=jnp.float32)
            acc = d if acc is None else acc + d
        ssum = ssum + jnp.sum(acc, axis=0, keepdims=True)
        ssq = ssq + jnp.sum(acc * acc, axis=0, keepdims=True)
        y_ref[0:1, r0:r0 + rows, :, :] = (
            acc.reshape(1, rows, W, Cout).astype(y_ref.dtype))
    s_ref[0, 0:1, :] = ssum
    s_ref[0, 1:2, :] = ssq


# ---------------------------------------------------------------------------
# Kernel 1: fused concat + F.pad + SAME pad + conv1 + BN1 partials.
# Grid: (N,) -- one image per grid step.  (No conv bias: it cancels exactly in
# the batch-stat BatchNorm that follows.)
# ---------------------------------------------------------------------------
def _conv1_stats_kernel(x2_ref, x1_ref, w_ref, y_ref, s_ref, xpad_ref, cols_ref):
    _, H, W, C2 = x2_ref.shape
    _, H1, W1, C1 = x1_ref.shape
    Hp, Wp, Cin = xpad_ref.shape
    bf16 = xpad_ref.dtype
    top, left = (H - H1) // 2, (W - W1) // 2

    # Zero only the 1-pixel halo border (interior is fully overwritten below,
    # so the persistent scratch never exposes stale data).
    xpad_ref[0:1, :, :] = jnp.zeros((1, Wp, Cin), bf16)
    xpad_ref[Hp - 1:Hp, :, :] = jnp.zeros((1, Wp, Cin), bf16)
    xpad_ref[:, 0:1, :] = jnp.zeros((Hp, 1, Cin), bf16)
    xpad_ref[:, Wp - 1:Wp, :] = jnp.zeros((Hp, 1, Cin), bf16)

    # Fused torch.cat([x2, x1], C) + F.pad(x1) + SAME pad: both inputs are
    # written straight into the padded VMEM buffer (no HBM round trip).
    xpad_ref[1:H + 1, 1:W + 1, 0:C2] = x2_ref[0]
    if (H1, W1) != (H, W):   # static branch: x1 smaller than the skip tensor
        xpad_ref[1:H + 1, 1:W + 1, C2:Cin] = jnp.zeros((H, W, C1), bf16)
    xpad_ref[1 + top:1 + top + H1, 1 + left:1 + left + W1, C2:Cin] = x1_ref[0]

    _conv3x3_rowchunked(xpad_ref, cols_ref, w_ref, y_ref, s_ref, H, W)


# ---------------------------------------------------------------------------
# Kernel 2: BN1 (affine-folded, f32) + ReLU -> conv2 + BN2 partials.
# ---------------------------------------------------------------------------
def _bn_conv2_stats_kernel(y1_ref, a_ref, c_ref, w_ref, y_ref, s_ref,
                           hpad_ref, cols_ref):
    _, H, W, Cmid = y1_ref.shape
    Hp, Wp, _ = hpad_ref.shape
    bf16 = hpad_ref.dtype

    hpad_ref[0:1, :, :] = jnp.zeros((1, Wp, Cmid), bf16)
    hpad_ref[Hp - 1:Hp, :, :] = jnp.zeros((1, Wp, Cmid), bf16)
    hpad_ref[:, 0:1, :] = jnp.zeros((Hp, 1, Cmid), bf16)
    hpad_ref[:, Wp - 1:Wp, :] = jnp.zeros((Hp, 1, Cmid), bf16)

    # BatchNorm1 (folded scale/shift, f32 math) + ReLU on the bf16-stored
    # conv1 output, cast to bf16 only at the padded-buffer store.
    h = jnp.maximum(y1_ref[0].astype(jnp.float32) * a_ref[...] + c_ref[...], 0.0)
    hpad_ref[1:H + 1, 1:W + 1, :] = h.astype(bf16)

    _conv3x3_rowchunked(hpad_ref, cols_ref, w_ref, y_ref, s_ref, H, W)


# ---------------------------------------------------------------------------
# JAX glue.
# ---------------------------------------------------------------------------
def _upsample_matrix(n_in, n_out):
    # align_corners=True interpolation matrix (n_out, n_in).
    A = np.zeros((n_out, n_in), np.float32)
    if n_in == 1:
        A[:, 0] = 1.0
        return jnp.asarray(A)
    src = (np.arange(n_out, dtype=np.float32) * np.float32(n_in - 1)
           / np.float32(n_out - 1))
    lo = np.clip(np.floor(src).astype(np.int64), 0, n_in - 2)
    frac = src - lo.astype(np.float32)
    A[np.arange(n_out), lo] += (1.0 - frac)
    A[np.arange(n_out), lo + 1] += frac
    return jnp.asarray(A)


def _bilinear_up2x_matrix(x):
    # De-gathered 2x bilinear upsample (align_corners=True): two fixed-weight
    # matmuls instead of fancy indexing / gathers.  NHWC.
    N, H, W, C = x.shape
    Ah = _upsample_matrix(H, 2 * H)
    Aw = _upsample_matrix(W, 2 * W)
    x = jnp.einsum('ph,nhwc->npwc', Ah, x)
    x = jnp.einsum('qw,npwc->npqc', Aw, x)
    return x


def _bn_affine(partials, gamma, beta, count):
    # Reduce per-image (sum, sumsq) partials -> global batch stats, then fold
    # BatchNorm into a per-channel scale/shift: y*scale + shift.
    # TODO(synk): for very large N*H*W switch to a Welford-style combine to
    # avoid E[x^2]-E[x]^2 cancellation.
    s = jnp.sum(partials, axis=0)                        # (2, C)
    mean = s[0] / count
    var = jnp.maximum(s[1] / count - mean * mean, 0.0)
    scale = gamma * jax.lax.rsqrt(var + _EPS)
    shift = beta - mean * scale
    return (scale.reshape(1, -1).astype(jnp.float32),
            shift.reshape(1, -1).astype(jnp.float32))


def _vmem_limit(scratch_bytes, block_bytes):
    # scratch + double-buffered pipeline blocks, ~2x headroom, capped to stay
    # inside v7x's 64 MiB physical VMEM.
    need = scratch_bytes + 2 * block_bytes
    return int(min(64 * 2 ** 20, max(4 * 2 ** 20, 2 * need)))


def up_forward(x1_nchw, x2_nchw, p):
    x1 = jnp.transpose(x1_nchw, (0, 2, 3, 1)).astype(jnp.float32)
    x2 = jnp.transpose(x2_nchw, (0, 2, 3, 1)).astype(jnp.float32)
    # Upsample in f32, emit bf16 directly (XLA fuses the cast, so exactly one
    # bf16 x1u tensor touches HBM).
    x1u = _bilinear_up2x_matrix(x1).astype(jnp.bfloat16)
    x2b = x2.astype(jnp.bfloat16)

    N, H, W, C2 = x2.shape
    _, H1, W1, C1 = x1u.shape
    if H1 > H or W1 > W:
        raise NotImplementedError("negative pad (crop) not supported")
    Cin = C2 + C1
    Cmid = p['w1'].shape[-1]
    Cout = p['w2'].shape[-1]
    count = float(N * H * W)
    bpe = 2   # bf16 bytes

    # Weights regrouped for the kx-shifted-column dot: [ky, kx*Cin + c, m].
    w1g = p['w1'].reshape(3, 3 * Cin, Cmid).astype(jnp.bfloat16)
    w2g = p['w2'].reshape(3, 3 * Cmid, Cout).astype(jnp.bfloat16)
    # Conv biases b1/b2 are intentionally NOT passed: they cancel exactly
    # under the batch-statistics BatchNorm that follows each conv.

    # ---- pass 1: fused concat/pad + conv1 + BN1 partial stats --------------
    scratch1 = ((H + 2) * (W + 2) * Cin + (H + 2) * W * 3 * Cin) * bpe
    blocks1 = (H * W * C2 + H1 * W1 * C1 + 9 * Cin * Cmid
               + H * W * Cmid) * bpe + 2 * Cmid * 4
    y1, s1 = pl.pallas_call(
        _conv1_stats_kernel,
        grid=(N,),
        in_specs=[
            pl.BlockSpec((1, H, W, C2), lambda n: (n, 0, 0, 0)),
            pl.BlockSpec((1, H1, W1, C1), lambda n: (n, 0, 0, 0)),
            pl.BlockSpec((3, 3 * Cin, Cmid), lambda n: (0, 0, 0)),
        ],
        out_specs=(
            pl.BlockSpec((1, H, W, Cmid), lambda n: (n, 0, 0, 0)),
            pl.BlockSpec((1, 2, Cmid), lambda n: (n, 0, 0)),
        ),
        out_shape=(
            jax.ShapeDtypeStruct((N, H, W, Cmid), jnp.bfloat16),   # bf16 inter-pass
            jax.ShapeDtypeStruct((N, 2, Cmid), jnp.float32),
        ),
        scratch_shapes=[
            pltpu.VMEM((H + 2, W + 2, Cin), jnp.bfloat16),          # padded concat
            pltpu.VMEM((H + 2, W, 3 * Cin), jnp.bfloat16),          # kx column slabs
        ],
        compiler_params=pltpu.CompilerParams(
            dimension_semantics=("parallel",),
            vmem_limit_bytes=_vmem_limit(scratch1, blocks1)),
        cost_estimate=pl.CostEstimate(
            flops=2 * N * H * W * 9 * Cin * Cmid,
            transcendentals=0,
            bytes_accessed=int(N * (H * W * C2 + H1 * W1 * C1 + H * W * Cmid) * bpe
                               + 9 * Cin * Cmid * bpe + N * 2 * Cmid * 4)),
    )(x2b, x1u, w1g)

    a1, c1 = _bn_affine(s1, p['g1'], p['be1'], count)

    # ---- pass 2: BN1+ReLU -> conv2 + BN2 partial stats ----------------------
    scratch2 = ((H + 2) * (W + 2) * Cmid + (H + 2) * W * 3 * Cmid) * bpe
    blocks2 = (H * W * Cmid + 9 * Cmid * Cout + H * W * Cout) * bpe \
        + (2 * Cmid + 2 * Cout) * 4
    y2, s2 = pl.pallas_call(
        _bn_conv2_stats_kernel,
        grid=(N,),
        in_specs=[
            pl.BlockSpec((1, H, W, Cmid), lambda n: (n, 0, 0, 0)),
            pl.BlockSpec((1, Cmid), lambda n: (0, 0)),
            pl.BlockSpec((1, Cmid), lambda n: (0, 0)),
            pl.BlockSpec((3, 3 * Cmid, Cout), lambda n: (0, 0, 0)),
        ],
        out_specs=(
            pl.BlockSpec((1, H, W, Cout), lambda n: (n, 0, 0, 0)),
            pl.BlockSpec((1, 2, Cout), lambda n: (n, 0, 0)),
        ),
        out_shape=(
            jax.ShapeDtypeStruct((N, H, W, Cout), jnp.bfloat16),    # bf16 inter-pass
            jax.ShapeDtypeStruct((N, 2, Cout), jnp.float32),
        ),
        scratch_shapes=[
            pltpu.VMEM((H + 2, W + 2, Cmid), jnp.bfloat16),
            pltpu.VMEM((H + 2, W, 3 * Cmid), jnp.bfloat16),
        ],
        compiler_params=pltpu.CompilerParams(
            dimension_semantics=("parallel",),
            vmem_limit_bytes=_vmem_limit(scratch2, blocks2)),
        cost_estimate=pl.CostEstimate(
            flops=2 * N * H * W * 9 * Cmid * Cout,
            transcendentals=0,
            bytes_accessed=int(N * (H * W * Cmid + H * W * Cout) * bpe
                               + 9 * Cmid * Cout * bpe + N * 2 * Cout * 4)),
    )(y1, a1, c1, w2g)

    a2, c2 = _bn_affine(s2, p['g2'], p['be2'], count)

    # ---- epilogue: BN2 + ReLU fused by XLA into the NHWC->NCHW transpose ----
    # (one bf16 read of y2 + one f32 NCHW write; replaces the previous
    # standalone Pallas pass 3 + separate layout transpose.)
    out = jnp.maximum(y2.astype(jnp.float32) * a2.reshape(1, 1, 1, -1)
                      + c2.reshape(1, 1, 1, -1), 0.0)
    return jnp.transpose(out, (0, 3, 1, 2))


# ---------------------------------------------------------------------------
# Pure-JAX references for correctness checks.
# ---------------------------------------------------------------------------
def _bilinear_up2x_gather(x):
    # Independent PyTorch-style gather+lerp formulation (NHWC).
    N, H, W, C = x.shape
    Ho, Wo = 2 * H, 2 * W

    def coords(n_in, n_out):
        if n_in == 1:
            z = jnp.zeros((n_out,), jnp.int32)
            return z, z, jnp.zeros((n_out,), jnp.float32)
        src = jnp.arange(n_out, dtype=jnp.float32) * (n_in - 1) / (n_out - 1)
        lo = jnp.clip(jnp.floor(src).astype(jnp.int32), 0, n_in - 2)
        return lo, lo + 1, src - lo.astype(jnp.float32)

    hlo, hhi, hf = coords(H, Ho)
    wlo, whi, wf = coords(W, Wo)
    xr = (x[:, hlo] * (1.0 - hf)[None, :, None, None]
          + x[:, hhi] * hf[None, :, None, None])
    return (xr[:, :, wlo] * (1.0 - wf)[None, None, :, None]
            + xr[:, :, whi] * wf[None, None, :, None])


def _pad_concat(x1u, x2):
    dY = x2.shape[1] - x1u.shape[1]
    dX = x2.shape[2] - x1u.shape[2]
    x1u = jnp.pad(x1u, ((0, 0), (dY // 2, dY - dY // 2),
                        (dX // 2, dX - dX // 2), (0, 0)))
    return jnp.concatenate([x2, x1u], axis=-1)


def up_forward_ref_matched(x1_nchw, x2_nchw, p):
    # Mirrors the kernel numerics (bf16 MXU inputs, bf16 inter-pass storage,
    # bias dropped under batch-stat BN) so the comparison stays tight.
    x1 = jnp.transpose(x1_nchw, (0, 2, 3, 1)).astype(jnp.float32)
    x2 = jnp.transpose(x2_nchw, (0, 2, 3, 1)).astype(jnp.float32)
    x = _pad_concat(_bilinear_up2x_matrix(x1), x2)

    def conv_bf16(v, w):
        return jax.lax.conv_general_dilated(
            v.astype(jnp.bfloat16), w.astype(jnp.bfloat16), (1, 1), 'SAME',
            dimension_numbers=('NHWC', 'HWIO', 'NHWC'),
            preferred_element_type=jnp.float32)

    def bn_affine(y, g, be):
        mean = jnp.mean(y, axis=(0, 1, 2))
        var = jnp.maximum(jnp.mean(y * y, axis=(0, 1, 2)) - mean * mean, 0.0)
        scale = g * jax.lax.rsqrt(var + _EPS)
        return scale.reshape(1, 1, 1, -1), (be - mean * scale).reshape(1, 1, 1, -1)

    y1 = conv_bf16(x, p['w1'])                               # bias cancels in BN
    a1, c1 = bn_affine(y1, p['g1'], p['be1'])
    y1q = y1.astype(jnp.bfloat16).astype(jnp.float32)        # bf16 inter-pass
    h = jnp.maximum(y1q * a1 + c1, 0.0)
    y2 = conv_bf16(h, p['w2'])
    a2, c2 = bn_affine(y2, p['g2'], p['be2'])
    y2q = y2.astype(jnp.bfloat16).astype(jnp.float32)
    out = jnp.maximum(y2q * a2 + c2, 0.0)
    return jnp.transpose(out, (0, 3, 1, 2))


def up_forward_ref_f32(x1_nchw, x2_nchw, p):
    # Fully independent f32 reference with exact PyTorch semantics.
    x1 = jnp.transpose(x1_nchw, (0, 2, 3, 1)).astype(jnp.float32)
    x2 = jnp.transpose(x2_nchw, (0, 2, 3, 1)).astype(jnp.float32)
    x = _pad_concat(_bilinear_up2x_gather(x1), x2)

    def conv_bn_relu(v, w, b, g, be):
        y = jax.lax.conv_general_dilated(
            v, w, (1, 1), 'SAME', dimension_numbers=('NHWC', 'HWIO', 'NHWC'),
            preferred_element_type=jnp.float32) + b.reshape(1, 1, 1, -1)
        mean = jnp.mean(y, axis=(0, 1, 2), keepdims=True)
        var = jnp.mean((y - mean) ** 2, axis=(0, 1, 2), keepdims=True)
        y = (y - mean) * jax.lax.rsqrt(var + _EPS) * g.reshape(1, 1, 1, -1) \
            + be.reshape(1, 1, 1, -1)
        return jnp.maximum(y, 0.0)

    h = conv_bn_relu(x, p['w1'], p['b1'], p['g1'], p['be1'])
    o = conv_bn_relu(h, p['w2'], p['b2'], p['g2'], p['be2'])
    return jnp.transpose(o, (0, 3, 1, 2))


def init_up_params(key, in_channels, out_channels):
    mid = in_channels // 2  # bilinear=True => mid_channels = in_channels // 2
    k1, k2, k3, k4 = jax.random.split(key, 4)
    return dict(
        w1=jax.random.normal(k1, (3, 3, in_channels, mid), jnp.float32) * 0.1,
        b1=jax.random.normal(k2, (mid,), jnp.float32) * 0.1,
        g1=jnp.ones((mid,), jnp.float32),
        be1=jnp.zeros((mid,), jnp.float32),
        w2=jax.random.normal(k3, (3, 3, mid, out_channels), jnp.float32) * 0.1,
        b2=jax.random.normal(k4, (out_channels,), jnp.float32) * 0.1,
        g2=jnp.ones((out_channels,), jnp.float32),
        be2=jnp.zeros((out_channels,), jnp.float32),
    )


if __name__ == "__main__":
    key = jax.random.PRNGKey(0)
    kx1, kx2, kp = jax.random.split(key, 3)

    in_channels, out_channels = 8, 4
    N = 2
    # UNet convention: x1 (decoder, low res) and x2 (skip) each carry
    # in_channels // 2 channels; after the channel concat conv1 sees in_channels.
    x1 = jax.random.normal(kx1, (N, in_channels // 2, 8, 8), jnp.float32)    # NCHW
    x2 = jax.random.normal(kx2, (N, in_channels // 2, 16, 16), jnp.float32)  # NCHW
    params = init_up_params(kp, in_channels, out_channels)

    out = jax.block_until_ready(jax.jit(up_forward)(x1, x2, params))
    assert out.shape == (N, out_channels, 16, 16), out.shape

    # Tight check vs. a reference that mirrors the kernel's bf16 rounding
    # points (validates conv/column-dots, fused concat/pad, upsample, BN, ReLU).
    ref_m = jax.block_until_ready(up_forward_ref_matched(x1, x2, params))
    np.testing.assert_allclose(np.asarray(out), np.asarray(ref_m),
                               rtol=2e-3, atol=2e-3)
    # Loose sanity check vs. the fully independent pure-f32 PyTorch-semantics
    # reference (differences are the documented bf16 roundings).
    ref_f = jax.block_until_ready(up_forward_ref_f32(x1, x2, params))
    np.testing.assert_allclose(np.asarray(out), np.asarray(ref_f),
                               rtol=1e-1, atol=1e-1)
    print("KERNEL_OK")
</pallas_src>

<mosaic_0001>
module attributes {stable_mosaic.version = 11 : i64} {
  func.func @_conv1_stats_kernel(%arg0: i32, %arg1: memref<1x16x16x4xbf16, #tpu.memory_space<vmem>>, %arg2: memref<1x16x16x4xbf16, #tpu.memory_space<vmem>>, %arg3: memref<3x24x4xbf16, #tpu.memory_space<vmem>>, %arg4: memref<1x16x16x4xbf16, #tpu.memory_space<vmem>>, %arg5: memref<1x2x4xf32, #tpu.memory_space<vmem>>, %arg6: memref<18x18x8xbf16, #tpu.memory_space<vmem>>, %arg7: memref<18x16x24xbf16, #tpu.memory_space<vmem>>) attributes {dimension_semantics = [#tpu.dimension_semantics<parallel>], iteration_bounds = array<i64: 2>, scalar_prefetch = 0 : i64, scratch_operands = 2 : i64, tpu.core_type = #tpu.core_type<tc>, window_params = [{transform_indices = @transform_0, window_bounds = array<i64: 1, 16, 16, 4>}, {transform_indices = @transform_1, window_bounds = array<i64: 1, 16, 16, 4>}, {pipeline_mode = #tpu.pipeline_mode<synchronous>, transform_indices = @transform_2, window_bounds = array<i64: 3, 24, 4>}, {transform_indices = @transform_3, window_bounds = array<i64: 1, 16, 16, 4>}, {transform_indices = @transform_4, window_bounds = array<i64: 1, 2, 4>}]} {
    %cst = arith.constant 0.000000e+00 : bf16
    %0 = vector.broadcast %cst : bf16 to vector<1x18x8xbf16>
    %c0 = arith.constant 0 : index
    %c0_0 = arith.constant 0 : index
    %c0_1 = arith.constant 0 : index
    %1 = vector.load %arg6[%c0, %c0_0, %c0_1] : memref<18x18x8xbf16, #tpu.memory_space<vmem>>, vector<1x18x8xbf16>
    tpu.vector_store %arg6[%c0, %c0_0, %c0_1], %0 {strides = array<i32>} : memref<18x18x8xbf16, #tpu.memory_space<vmem>>, vector<1x18x8xbf16>,
    %cst_2 = arith.constant 0.000000e+00 : bf16
    %2 = vector.broadcast %cst_2 : bf16 to vector<1x18x8xbf16>
    %c17 = arith.constant 17 : index
    %c0_3 = arith.constant 0 : index
    %c0_4 = arith.constant 0 : index
    %3 = vector.load %arg6[%c17, %c0_3, %c0_4] : memref<18x18x8xbf16, #tpu.memory_space<vmem>>, vector<1x18x8xbf16>
    tpu.vector_store %arg6[%c17, %c0_3, %c0_4], %2 {strides = array<i32>} : memref<18x18x8xbf16, #tpu.memory_space<vmem>>, vector<1x18x8xbf16>,
    %cst_5 = arith.constant 0.000000e+00 : bf16
    %4 = vector.broadcast %cst_5 : bf16 to vector<18x1x8xbf16>
    %c0_6 = arith.constant 0 : index
    %c0_7 = arith.constant 0 : index
    %c0_8 = arith.constant 0 : index
    %5 = vector.load %arg6[%c0_6, %c0_7, %c0_8] : memref<18x18x8xbf16, #tpu.memory_space<vmem>>, vector<18x1x8xbf16>
    tpu.vector_store %arg6[%c0_6, %c0_7, %c0_8], %4 {strides = array<i32>} : memref<18x18x8xbf16, #tpu.memory_space<vmem>>, vector<18x1x8xbf16>,
    %cst_9 = arith.constant 0.000000e+00 : bf16
    %6 = vector.broadcast %cst_9 : bf16 to vector<18x1x8xbf16>
    %c0_10 = arith.constant 0 : index
    %c17_11 = arith.constant 17 : index
    %c0_12 = arith.constant 0 : index
    %7 = vector.load %arg6[%c0_10, %c17_11, %c0_12] : memref<18x18x8xbf16, #tpu.memory_space<vmem>>, vector<18x1x8xbf16>
    tpu.vector_store %arg6[%c0_10, %c17_11, %c0_12], %6 {strides = array<i32>} : memref<18x18x8xbf16, #tpu.memory_space<vmem>>, vector<18x1x8xbf16>,
    %c0_13 = arith.constant 0 : index
    %c0_14 = arith.constant 0 : index
    %c0_15 = arith.constant 0 : index
    %c0_16 = arith.constant 0 : index
    %8 = vector.load %arg1[%c0_13, %c0_14, %c0_15, %c0_16] : memref<1x16x16x4xbf16, #tpu.memory_space<vmem>>, vector<1x16x16x4xbf16>
    %9 = vector.shape_cast %8 : vector<1x16x16x4xbf16> to vector<16x16x4xbf16>
    %c1 = arith.constant 1 : index
    %c1_17 = arith.constant 1 : index
    %c0_18 = arith.constant 0 : index
    %10 = vector.load %arg6[%c1, %c1_17, %c0_18] : memref<18x18x8xbf16, #tpu.memory_space<vmem>>, vector<16x16x4xbf16>
    tpu.vector_store %arg6[%c1, %c1_17, %c0_18], %9 {strides = array<i32>} : memref<18x18x8xbf16, #tpu.memory_space<vmem>>, vector<16x16x4xbf16>,
    %c0_19 = arith.constant 0 : index
    %c0_20 = arith.constant 0 : index
    %c0_21 = arith.constant 0 : index
    %c0_22 = arith.constant 0 : index
    %11 = vector.load %arg2[%c0_19, %c0_20, %c0_21, %c0_22] : memref<1x16x16x4xbf16, #tpu.memory_space<vmem>>, vector<1x16x16x4xbf16>
    %12 = vector.shape_cast %11 : vector<1x16x16x4xbf16> to vector<16x16x4xbf16>
    %c1_23 = arith.constant 1 : index
    %c1_24 = arith.constant 1 : index
    %c4 = arith.constant 4 : index
    %13 = vector.load %arg6[%c1_23, %c1_24, %c4] : memref<18x18x8xbf16, #tpu.memory_space<vmem>>, vector<16x16x4xbf16>
    tpu.vector_store %arg6[%c1_23, %c1_24, %c4], %12 {strides = array<i32>} : memref<18x18x8xbf16, #tpu.memory_space<vmem>>, vector<16x16x4xbf16>,
    %c0_25 = arith.constant 0 : index
    %c0_26 = arith.constant 0 : index
    %c0_27 = arith.constant 0 : index
    %14 = vector.load %arg6[%c0_25, %c0_26, %c0_27] : memref<18x18x8xbf16, #tpu.memory_space<vmem>>, vector<18x16x8xbf16>
    %c0_28 = arith.constant 0 : index
    %c0_29 = arith.constant 0 : index
    %c0_30 = arith.constant 0 : index
    %15 = vector.load %arg7[%c0_28, %c0_29, %c0_30] : memref<18x16x24xbf16, #tpu.memory_space<vmem>>, vector<18x16x8xbf16>
    tpu.vector_store %arg7[%c0_28, %c0_29, %c0_30], %14 {strides = array<i32>} : memref<18x16x24xbf16, #tpu.memory_space<vmem>>, vector<18x16x8xbf16>,
    %c0_31 = arith.constant 0 : index
    %c1_32 = arith.constant 1 : index
    %c0_33 = arith.constant 0 : index
    %16 = vector.load %arg6[%c0_31, %c1_32, %c0_33] : memref<18x18x8xbf16, #tpu.memory_space<vmem>>, vector<18x16x8xbf16>
    %c0_34 = arith.constant 0 : index
    %c0_35 = arith.constant 0 : index
    %c8 = arith.constant 8 : index
    %17 = vector.load %arg7[%c0_34, %c0_35, %c8] : memref<18x16x24xbf16, #tpu.memory_space<vmem>>, vector<18x16x8xbf16>
    tpu.vector_store %arg7[%c0_34, %c0_35, %c8], %16 {strides = array<i32>} : memref<18x16x24xbf16, #tpu.memory_space<vmem>>, vector<18x16x8xbf16>,
    %c0_36 = arith.constant 0 : index
    %c2 = arith.constant 2 : index
    %c0_37 = arith.constant 0 : index
    %18 = vector.load %arg6[%c0_36, %c2, %c0_37] : memref<18x18x8xbf16, #tpu.memory_space<vmem>>, vector<18x16x8xbf16>
    %c0_38 = arith.constant 0 : index
    %c0_39 = arith.constant 0 : index
    %c16 = arith.constant 16 : index
    %19 = vector.load %arg7[%c0_38, %c0_39, %c16] : memref<18x16x24xbf16, #tpu.memory_space<vmem>>, vector<18x16x8xbf16>
    tpu.vector_store %arg7[%c0_38, %c0_39, %c16], %18 {strides = array<i32>} : memref<18x16x24xbf16, #tpu.memory_space<vmem>>, vector<18x16x8xbf16>,
    %c0_40 = arith.constant 0 : index
    %c0_41 = arith.constant 0 : index
    %c0_42 = arith.constant 0 : index
    %20 = vector.load %arg3[%c0_40, %c0_41, %c0_42] : memref<3x24x4xbf16, #tpu.memory_space<vmem>>, vector<3x24x4xbf16>
    %cst_43 = arith.constant 0.000000e+00 : f32
    %21 = vector.broadcast %cst_43 : f32 to vector<1x4xf32>
    %cst_44 = arith.constant 0.000000e+00 : f32
    %22 = vector.broadcast %cst_44 : f32 to vector<1x4xf32>
    %c0_45 = arith.constant 0 : index
    %c0_46 = arith.constant 0 : index
    %c0_47 = arith.constant 0 : index
    %23 = vector.load %arg7[%c0_45, %c0_46, %c0_47] : memref<18x16x24xbf16, #tpu.memory_space<vmem>>, vector<16x16x24xbf16>
    %24 = vector.shape_cast %23 : vector<16x16x24xbf16> to vector<256x24xbf16>
    %25 = vector.extract_strided_slice %20 {offsets = [0, 0, 0], sizes = [1, 24, 4], strides = [1, 1, 1]} : vector<3x24x4xbf16> to vector<1x24x4xbf16>
    %26 = vector.shape_cast %25 : vector<1x24x4xbf16> to vector<24x4xbf16>
    %cst_48 = arith.constant dense<0.000000e+00> : vector<256x4xf32>
    %27 = tpu.matmul %24, %26, %cst_48 {dimension_numbers = #tpu.dot_dimension_numbers<[1], [0], [0], [1], [0, 0, 1, 1], [], []>} : vector<256x24xbf16>, vector<24x4xbf16>, vector<256x4xf32> -> vector<256x4xf32>
    %c1_49 = arith.constant 1 : index
    %c0_50 = arith.constant 0 : index
    %c0_51 = arith.constant 0 : index
    %28 = vector.load %arg7[%c1_49, %c0_50, %c0_51] : memref<18x16x24xbf16, #tpu.memory_space<vmem>>, vector<16x16x24xbf16>
    %29 = vector.shape_cast %28 : vector<16x16x24xbf16> to vector<256x24xbf16>
    %30 = vector.extract_strided_slice %20 {offsets = [1, 0, 0], sizes = [1, 24, 4], strides = [1, 1, 1]} : vector<3x24x4xbf16> to vector<1x24x4xbf16>
    %31 = vector.shape_cast %30 : vector<1x24x4xbf16> to vector<24x4xbf16>
    %cst_52 = arith.constant dense<0.000000e+00> : vector<256x4xf32>
    %32 = tpu.matmul %29, %31, %cst_52 {dimension_numbers = #tpu.dot_dimension_numbers<[1], [0], [0], [1], [0, 0, 1, 1], [], []>} : vector<256x24xbf16>, vector<24x4xbf16>, vector<256x4xf32> -> vector<256x4xf32>
    %33 = arith.addf %27, %32 : vector<256x4xf32>
    %c2_53 = arith.constant 2 : index
    %c0_54 = arith.constant 0 : index
    %c0_55 = arith.constant 0 : index
    %34 = vector.load %arg7[%c2_53, %c0_54, %c0_55] : memref<18x16x24xbf16, #tpu.memory_space<vmem>>, vector<16x16x24xbf16>
    %35 = vector.shape_cast %34 : vector<16x16x24xbf16> to vector<256x24xbf16>
    %36 = vector.extract_strided_slice %20 {offsets = [2, 0, 0], sizes = [1, 24, 4], strides = [1, 1, 1]} : vector<3x24x4xbf16> to vector<1x24x4xbf16>
    %37 = vector.shape_cast %36 : vector<1x24x4xbf16> to vector<24x4xbf16>
    %cst_56 = arith.constant dense<0.000000e+00> : vector<256x4xf32>
    %38 = tpu.matmul %35, %37, %cst_56 {dimension_numbers = #tpu.dot_dimension_numbers<[1], [0], [0], [1], [0, 0, 1, 1], [], []>} : vector<256x24xbf16>, vector<24x4xbf16>, vector<256x4xf32> -> vector<256x4xf32>
    %39 = arith.addf %33, %38 : vector<256x4xf32>
    %cst_57 = arith.constant dense<0.000000e+00> : vector<4xf32>
    %40 = vector.multi_reduction <add>, %39, %cst_57 [0] : vector<256x4xf32> to vector<4xf32>
    %41 = vector.shape_cast %40 : vector<4xf32> to vector<1x4xf32>
    %42 = arith.addf %21, %41 : vector<1x4xf32>
    %43 = arith.mulf %39, %39 : vector<256x4xf32>
    %cst_58 = arith.constant dense<0.000000e+00> : vector<4xf32>
    %44 = vector.multi_reduction <add>, %43, %cst_58 [0] : vector<256x4xf32> to vector<4xf32>
    %45 = vector.shape_cast %44 : vector<4xf32> to vector<1x4xf32>
    %46 = arith.addf %22, %45 : vector<1x4xf32>
    %47 = vector.shape_cast %39 : vector<256x4xf32> to vector<1x16x16x4xf32>
    %48 = arith.truncf %47 : vector<1x16x16x4xf32> to vector<1x16x16x4xbf16>
    %c0_59 = arith.constant 0 : index
    %c0_60 = arith.constant 0 : index
    %c0_61 = arith.constant 0 : index
    %c0_62 = arith.constant 0 : index
    %49 = vector.load %arg4[%c0_59, %c0_60, %c0_61, %c0_62] : memref<1x16x16x4xbf16, #tpu.memory_space<vmem>>, vector<1x16x16x4xbf16>
    tpu.vector_store %arg4[%c0_59, %c0_60, %c0_61, %c0_62], %48 {strides = array<i32>} : memref<1x16x16x4xbf16, #tpu.memory_space<vmem>>, vector<1x16x16x4xbf16>,
    %c0_63 = arith.constant 0 : index
    %c0_64 = arith.constant 0 : index
    %c0_65 = arith.constant 0 : index
    %50 = vector.load %arg5[%c0_63, %c0_64, %c0_65] : memref<1x2x4xf32, #tpu.memory_space<vmem>>, vector<1x1x4xf32>
    %51 = vector.shape_cast %50 : vector<1x1x4xf32> to vector<1x4xf32>
    %52 = vector.shape_cast %42 : vector<1x4xf32> to vector<1x1x4xf32>
    tpu.vector_store %arg5[%c0_63, %c0_64, %c0_65], %52 {strides = array<i32>} : memref<1x2x4xf32, #tpu.memory_space<vmem>>, vector<1x1x4xf32>,
    %c0_66 = arith.constant 0 : index
    %c1_67 = arith.constant 1 : index
    %c0_68 = arith.constant 0 : index
    %53 = vector.load %arg5[%c0_66, %c1_67, %c0_68] : memref<1x2x4xf32, #tpu.memory_space<vmem>>, vector<1x1x4xf32>
    %54 = vector.shape_cast %53 : vector<1x1x4xf32> to vector<1x4xf32>
    %55 = vector.shape_cast %46 : vector<1x4xf32> to vector<1x1x4xf32>
    tpu.vector_store %arg5[%c0_66, %c1_67, %c0_68], %55 {strides = array<i32>} : memref<1x2x4xf32, #tpu.memory_space<vmem>>, vector<1x1x4xf32>,
    return
  }
  func.func @transform_0(%arg0: i32) -> (i32, i32, i32, i32) {
    %c0_i32 = arith.constant 0 : i32
    %c0_i32_0 = arith.constant 0 : i32
    %c0_i32_1 = arith.constant 0 : i32
    %c0_i32_2 = arith.constant 0 : i32
    return %arg0, %c0_i32, %c0_i32_0, %c0_i32_1 : i32, i32, i32, i32
  }
  func.func @transform_1(%arg0: i32) -> (i32, i32, i32, i32) {
    %c0_i32 = arith.constant 0 : i32
    %c0_i32_0 = arith.constant 0 : i32
    %c0_i32_1 = arith.constant 0 : i32
    %c0_i32_2 = arith.constant 0 : i32
    return %arg0, %c0_i32, %c0_i32_0, %c0_i32_1 : i32, i32, i32, i32
  }
  func.func @transform_2(%arg0: i32) -> (i32, i32, i32) {
    %c0_i32 = arith.constant 0 : i32
    %c0_i32_0 = arith.constant 0 : i32
    %c0_i32_1 = arith.constant 0 : i32
    %c0_i32_2 = arith.constant 0 : i32
    return %c0_i32, %c0_i32_0, %c0_i32_1 : i32, i32, i32
  }
  func.func @transform_3(%arg0: i32) -> (i32, i32, i32, i32) {
    %c0_i32 = arith.constant 0 : i32
    %c0_i32_0 = arith.constant 0 : i32
    %c0_i32_1 = arith.constant 0 : i32
    %c0_i32_2 = arith.constant 0 : i32
    return %arg0, %c0_i32, %c0_i32_0, %c0_i32_1 : i32, i32, i32, i32
  }
  func.func @transform_4(%arg0: i32) -> (i32, i32, i32) {
    %c0_i32 = arith.constant 0 : i32
    %c0_i32_0 = arith.constant 0 : i32
    %c0_i32_1 = arith.constant 0 : i32
    return %arg0, %c0_i32, %c0_i32_0 : i32, i32, i32
  }
}

module attributes {stable_mosaic.version = 11 : i64} {
  func.func @_bn_conv2_stats_kernel(%arg0: i32, %arg1: memref<1x16x16x4xbf16, #tpu.memory_space<vmem>>, %arg2: memref<1x4xf32, #tpu.memory_space<vmem>>, %arg3: memref<1x4xf32, #tpu.memory_space<vmem>>, %arg4: memref<3x12x4xbf16, #tpu.memory_space<vmem>>, %arg5: memref<1x16x16x4xbf16, #tpu.memory_space<vmem>>, %arg6: memref<1x2x4xf32, #tpu.memory_space<vmem>>, %arg7: memref<18x18x4xbf16, #tpu.memory_space<vmem>>, %arg8: memref<18x16x12xbf16, #tpu.memory_space<vmem>>) attributes {dimension_semantics = [#tpu.dimension_semantics<parallel>], iteration_bounds = array<i64: 2>, scalar_prefetch = 0 : i64, scratch_operands = 2 : i64, tpu.core_type = #tpu.core_type<tc>, window_params = [{transform_indices = @transform_0, window_bounds = array<i64: 1, 16, 16, 4>}, {pipeline_mode = #tpu.pipeline_mode<synchronous>, transform_indices = @transform_1, window_bounds = array<i64: 1, 4>}, {pipeline_mode = #tpu.pipeline_mode<synchronous>, transform_indices = @transform_2, window_bounds = array<i64: 1, 4>}, {pipeline_mode = #tpu.pipeline_mode<synchronous>, transform_indices = @transform_3, window_bounds = array<i64: 3, 12, 4>}, {transform_indices = @transform_4, window_bounds = array<i64: 1, 16, 16, 4>}, {transform_indices = @transform_5, window_bounds = array<i64: 1, 2, 4>}]} {
    %cst = arith.constant 0.000000e+00 : bf16
    %0 = vector.broadcast %cst : bf16 to vector<1x18x4xbf16>
    %c0 = arith.constant 0 : index
    %c0_0 = arith.constant 0 : index
    %c0_1 = arith.constant 0 : index
    %1 = vector.load %arg7[%c0, %c0_0, %c0_1] : memref<18x18x4xbf16, #tpu.memory_space<vmem>>, vector<1x18x4xbf16>
    tpu.vector_store %arg7[%c0, %c0_0, %c0_1], %0 {strides = array<i32>} : memref<18x18x4xbf16, #tpu.memory_space<vmem>>, vector<1x18x4xbf16>,
    %cst_2 = arith.constant 0.000000e+00 : bf16
    %2 = vector.broadcast %cst_2 : bf16 to vector<1x18x4xbf16>
    %c17 = arith.constant 17 : index
    %c0_3 = arith.constant 0 : index
    %c0_4 = arith.constant 0 : index
    %3 = vector.load %arg7[%c17, %c0_3, %c0_4] : memref<18x18x4xbf16, #tpu.memory_space<vmem>>, vector<1x18x4xbf16>
    tpu.vector_store %arg7[%c17, %c0_3, %c0_4], %2 {strides = array<i32>} : memref<18x18x4xbf16, #tpu.memory_space<vmem>>, vector<1x18x4xbf16>,
    %cst_5 = arith.constant 0.000000e+00 : bf16
    %4 = vector.broadcast %cst_5 : bf16 to vector<18x1x4xbf16>
    %c0_6 = arith.constant 0 : index
    %c0_7 = arith.constant 0 : index
    %c0_8 = arith.constant 0 : index
    %5 = vector.load %arg7[%c0_6, %c0_7, %c0_8] : memref<18x18x4xbf16, #tpu.memory_space<vmem>>, vector<18x1x4xbf16>
    tpu.vector_store %arg7[%c0_6, %c0_7, %c0_8], %4 {strides = array<i32>} : memref<18x18x4xbf16, #tpu.memory_space<vmem>>, vector<18x1x4xbf16>,
    %cst_9 = arith.constant 0.000000e+00 : bf16
    %6 = vector.broadcast %cst_9 : bf16 to vector<18x1x4xbf16>
    %c0_10 = arith.constant 0 : index
    %c17_11 = arith.constant 17 : index
    %c0_12 = arith.constant 0 : index
    %7 = vector.load %arg7[%c0_10, %c17_11, %c0_12] : memref<18x18x4xbf16, #tpu.memory_space<vmem>>, vector<18x1x4xbf16>
    tpu.vector_store %arg7[%c0_10, %c17_11, %c0_12], %6 {strides = array<i32>} : memref<18x18x4xbf16, #tpu.memory_space<vmem>>, vector<18x1x4xbf16>,
    %c0_13 = arith.constant 0 : index
    %c0_14 = arith.constant 0 : index
    %c0_15 = arith.constant 0 : index
    %c0_16 = arith.constant 0 : index
    %8 = vector.load %arg1[%c0_13, %c0_14, %c0_15, %c0_16] : memref<1x16x16x4xbf16, #tpu.memory_space<vmem>>, vector<1x16x16x4xbf16>
    %9 = vector.shape_cast %8 : vector<1x16x16x4xbf16> to vector<16x16x4xbf16>
    %10 = arith.extf %9 : vector<16x16x4xbf16> to vector<16x16x4xf32>
    %c0_17 = arith.constant 0 : index
    %c0_18 = arith.constant 0 : index
    %11 = vector.load %arg2[%c0_17, %c0_18] : memref<1x4xf32, #tpu.memory_space<vmem>>, vector<1x4xf32>
    %12 = vector.shape_cast %11 : vector<1x4xf32> to vector<1x1x4xf32>
    %13 = vector.broadcast %12 : vector<1x1x4xf32> to vector<16x16x4xf32>
    %14 = arith.mulf %10, %13 : vector<16x16x4xf32>
    %c0_19 = arith.constant 0 : index
    %c0_20 = arith.constant 0 : index
    %15 = vector.load %arg3[%c0_19, %c0_20] : memref<1x4xf32, #tpu.memory_space<vmem>>, vector<1x4xf32>
    %16 = vector.shape_cast %15 : vector<1x4xf32> to vector<1x1x4xf32>
    %17 = vector.broadcast %16 : vector<1x1x4xf32> to vector<16x16x4xf32>
    %18 = arith.addf %14, %17 : vector<16x16x4xf32>
    %cst_21 = arith.constant 0.000000e+00 : f32
    %19 = vector.broadcast %cst_21 : f32 to vector<16x16x4xf32>
    %20 = arith.maximumf %18, %19 : vector<16x16x4xf32>
    %21 = arith.truncf %20 : vector<16x16x4xf32> to vector<16x16x4xbf16>
    %c1 = arith.constant 1 : index
    %c1_22 = arith.constant 1 : index
    %c0_23 = arith.constant 0 : index
    %22 = vector.load %arg7[%c1, %c1_22, %c0_23] : memref<18x18x4xbf16, #tpu.memory_space<vmem>>, vector<16x16x4xbf16>
    tpu.vector_store %arg7[%c1, %c1_22, %c0_23], %21 {strides = array<i32>} : memref<18x18x4xbf16, #tpu.memory_space<vmem>>, vector<16x16x4xbf16>,
    %c0_24 = arith.constant 0 : index
    %c0_25 = arith.constant 0 : index
    %c0_26 = arith.constant 0 : index
    %23 = vector.load %arg7[%c0_24, %c0_25, %c0_26] : memref<18x18x4xbf16, #tpu.memory_space<vmem>>, vector<18x16x4xbf16>
    %c0_27 = arith.constant 0 : index
    %c0_28 = arith.constant 0 : index
    %c0_29 = arith.constant 0 : index
    %24 = vector.load %arg8[%c0_27, %c0_28, %c0_29] : memref<18x16x12xbf16, #tpu.memory_space<vmem>>, vector<18x16x4xbf16>
    tpu.vector_store %arg8[%c0_27, %c0_28, %c0_29], %23 {strides = array<i32>} : memref<18x16x12xbf16, #tpu.memory_space<vmem>>, vector<18x16x4xbf16>,
    %c0_30 = arith.constant 0 : index
    %c1_31 = arith.constant 1 : index
    %c0_32 = arith.constant 0 : index
    %25 = vector.load %arg7[%c0_30, %c1_31, %c0_32] : memref<18x18x4xbf16, #tpu.memory_space<vmem>>, vector<18x16x4xbf16>
    %c0_33 = arith.constant 0 : index
    %c0_34 = arith.constant 0 : index
    %c4 = arith.constant 4 : index
    %26 = vector.load %arg8[%c0_33, %c0_34, %c4] : memref<18x16x12xbf16, #tpu.memory_space<vmem>>, vector<18x16x4xbf16>
    tpu.vector_store %arg8[%c0_33, %c0_34, %c4], %25 {strides = array<i32>} : memref<18x16x12xbf16, #tpu.memory_space<vmem>>, vector<18x16x4xbf16>,
    %c0_35 = arith.constant 0 : index
    %c2 = arith.constant 2 : index
    %c0_36 = arith.constant 0 : index
    %27 = vector.load %arg7[%c0_35, %c2, %c0_36] : memref<18x18x4xbf16, #tpu.memory_space<vmem>>, vector<18x16x4xbf16>
    %c0_37 = arith.constant 0 : index
    %c0_38 = arith.constant 0 : index
    %c8 = arith.constant 8 : index
    %28 = vector.load %arg8[%c0_37, %c0_38, %c8] : memref<18x16x12xbf16, #tpu.memory_space<vmem>>, vector<18x16x4xbf16>
    tpu.vector_store %arg8[%c0_37, %c0_38, %c8], %27 {strides = array<i32>} : memref<18x16x12xbf16, #tpu.memory_space<vmem>>, vector<18x16x4xbf16>,
    %c0_39 = arith.constant 0 : index
    %c0_40 = arith.constant 0 : index
    %c0_41 = arith.constant 0 : index
    %29 = vector.load %arg4[%c0_39, %c0_40, %c0_41] : memref<3x12x4xbf16, #tpu.memory_space<vmem>>, vector<3x12x4xbf16>
    %cst_42 = arith.constant 0.000000e+00 : f32
    %30 = vector.broadcast %cst_42 : f32 to vector<1x4xf32>
    %cst_43 = arith.constant 0.000000e+00 : f32
    %31 = vector.broadcast %cst_43 : f32 to vector<1x4xf32>
    %c0_44 = arith.constant 0 : index
    %c0_45 = arith.constant 0 : index
    %c0_46 = arith.constant 0 : index
    %32 = vector.load %arg8[%c0_44, %c0_45, %c0_46] : memref<18x16x12xbf16, #tpu.memory_space<vmem>>, vector<16x16x12xbf16>
    %33 = vector.shape_cast %32 : vector<16x16x12xbf16> to vector<256x12xbf16>
    %34 = vector.extract_strided_slice %29 {offsets = [0, 0, 0], sizes = [1, 12, 4], strides = [1, 1, 1]} : vector<3x12x4xbf16> to vector<1x12x4xbf16>
    %35 = vector.shape_cast %34 : vector<1x12x4xbf16> to vector<12x4xbf16>
    %cst_47 = arith.constant dense<0.000000e+00> : vector<256x4xf32>
    %36 = tpu.matmul %33, %35, %cst_47 {dimension_numbers = #tpu.dot_dimension_numbers<[1], [0], [0], [1], [0, 0, 1, 1], [], []>} : vector<256x12xbf16>, vector<12x4xbf16>, vector<256x4xf32> -> vector<256x4xf32>
    %c1_48 = arith.constant 1 : index
    %c0_49 = arith.constant 0 : index
    %c0_50 = arith.constant 0 : index
    %37 = vector.load %arg8[%c1_48, %c0_49, %c0_50] : memref<18x16x12xbf16, #tpu.memory_space<vmem>>, vector<16x16x12xbf16>
    %38 = vector.shape_cast %37 : vector<16x16x12xbf16> to vector<256x12xbf16>
    %39 = vector.extract_strided_slice %29 {offsets = [1, 0, 0], sizes = [1, 12, 4], strides = [1, 1, 1]} : vector<3x12x4xbf16> to vector<1x12x4xbf16>
    %40 = vector.shape_cast %39 : vector<1x12x4xbf16> to vector<12x4xbf16>
    %cst_51 = arith.constant dense<0.000000e+00> : vector<256x4xf32>
    %41 = tpu.matmul %38, %40, %cst_51 {dimension_numbers = #tpu.dot_dimension_numbers<[1], [0], [0], [1], [0, 0, 1, 1], [], []>} : vector<256x12xbf16>, vector<12x4xbf16>, vector<256x4xf32> -> vector<256x4xf32>
    %42 = arith.addf %36, %41 : vector<256x4xf32>
    %c2_52 = arith.constant 2 : index
    %c0_53 = arith.constant 0 : index
    %c0_54 = arith.constant 0 : index
    %43 = vector.load %arg8[%c2_52, %c0_53, %c0_54] : memref<18x16x12xbf16, #tpu.memory_space<vmem>>, vector<16x16x12xbf16>
    %44 = vector.shape_cast %43 : vector<16x16x12xbf16> to vector<256x12xbf16>
    %45 = vector.extract_strided_slice %29 {offsets = [2, 0, 0], sizes = [1, 12, 4], strides = [1, 1, 1]} : vector<3x12x4xbf16> to vector<1x12x4xbf16>
    %46 = vector.shape_cast %45 : vector<1x12x4xbf16> to vector<12x4xbf16>
    %cst_55 = arith.constant dense<0.000000e+00> : vector<256x4xf32>
    %47 = tpu.matmul %44, %46, %cst_55 {dimension_numbers = #tpu.dot_dimension_numbers<[1], [0], [0], [1], [0, 0, 1, 1], [], []>} : vector<256x12xbf16>, vector<12x4xbf16>, vector<256x4xf32> -> vector<256x4xf32>
    %48 = arith.addf %42, %47 : vector<256x4xf32>
    %cst_56 = arith.constant dense<0.000000e+00> : vector<4xf32>
    %49 = vector.multi_reduction <add>, %48, %cst_56 [0] : vector<256x4xf32> to vector<4xf32>
    %50 = vector.shape_cast %49 : vector<4xf32> to vector<1x4xf32>
    %51 = arith.addf %30, %50 : vector<1x4xf32>
    %52 = arith.mulf %48, %48 : vector<256x4xf32>
    %cst_57 = arith.constant dense<0.000000e+00> : vector<4xf32>
    %53 = vector.multi_reduction <add>, %52, %cst_57 [0] : vector<256x4xf32> to vector<4xf32>
    %54 = vector.shape_cast %53 : vector<4xf32> to vector<1x4xf32>
    %55 = arith.addf %31, %54 : vector<1x4xf32>
    %56 = vector.shape_cast %48 : vector<256x4xf32> to vector<1x16x16x4xf32>
    %57 = arith.truncf %56 : vector<1x16x16x4xf32> to vector<1x16x16x4xbf16>
    %c0_58 = arith.constant 0 : index
    %c0_59 = arith.constant 0 : index
    %c0_60 = arith.constant 0 : index
    %c0_61 = arith.constant 0 : index
    %58 = vector.load %arg5[%c0_58, %c0_59, %c0_60, %c0_61] : memref<1x16x16x4xbf16, #tpu.memory_space<vmem>>, vector<1x16x16x4xbf16>
    tpu.vector_store %arg5[%c0_58, %c0_59, %c0_60, %c0_61], %57 {strides = array<i32>} : memref<1x16x16x4xbf16, #tpu.memory_space<vmem>>, vector<1x16x16x4xbf16>,
    %c0_62 = arith.constant 0 : index
    %c0_63 = arith.constant 0 : index
    %c0_64 = arith.constant 0 : index
    %59 = vector.load %arg6[%c0_62, %c0_63, %c0_64] : memref<1x2x4xf32, #tpu.memory_space<vmem>>, vector<1x1x4xf32>
    %60 = vector.shape_cast %59 : vector<1x1x4xf32> to vector<1x4xf32>
    %61 = vector.shape_cast %51 : vector<1x4xf32> to vector<1x1x4xf32>
    tpu.vector_store %arg6[%c0_62, %c0_63, %c0_64], %61 {strides = array<i32>} : memref<1x2x4xf32, #tpu.memory_space<vmem>>, vector<1x1x4xf32>,
    %c0_65 = arith.constant 0 : index
    %c1_66 = arith.constant 1 : index
    %c0_67 = arith.constant 0 : index
    %62 = vector.load %arg6[%c0_65, %c1_66, %c0_67] : memref<1x2x4xf32, #tpu.memory_space<vmem>>, vector<1x1x4xf32>
    %63 = vector.shape_cast %62 : vector<1x1x4xf32> to vector<1x4xf32>
    %64 = vector.shape_cast %55 : vector<1x4xf32> to vector<1x1x4xf32>
    tpu.vector_store %arg6[%c0_65, %c1_66, %c0_67], %64 {strides = array<i32>} : memref<1x2x4xf32, #tpu.memory_space<vmem>>, vector<1x1x4xf32>,
    return
  }
  func.func @transform_0(%arg0: i32) -> (i32, i32, i32, i32) {
    %c0_i32 = arith.constant 0 : i32
    %c0_i32_0 = arith.constant 0 : i32
    %c0_i32_1 = arith.constant 0 : i32
    %c0_i32_2 = arith.constant 0 : i32
    return %arg0, %c0_i32, %c0_i32_0, %c0_i32_1 : i32, i32, i32, i32
  }
  func.func @transform_1(%arg0: i32) -> (i32, i32) {
    %c0_i32 = arith.constant 0 : i32
    %c0_i32_0 = arith.constant 0 : i32
    %c0_i32_1 = arith.constant 0 : i32
    return %c0_i32, %c0_i32_0 : i32, i32
  }
  func.func @transform_2(%arg0: i32) -> (i32, i32) {
    %c0_i32 = arith.constant 0 : i32
    %c0_i32_0 = arith.constant 0 : i32
    %c0_i32_1 = arith.constant 0 : i32
    return %c0_i32, %c0_i32_0 : i32, i32
  }
  func.func @transform_3(%arg0: i32) -> (i32, i32, i32) {
    %c0_i32 = arith.constant 0 : i32
    %c0_i32_0 = arith.constant 0 : i32
    %c0_i32_1 = arith.constant 0 : i32
    %c0_i32_2 = arith.constant 0 : i32
    return %c0_i32, %c0_i32_0, %c0_i32_1 : i32, i32, i32
  }
  func.func @transform_4(%arg0: i32) -> (i32, i32, i32, i32) {
    %c0_i32 = arith.constant 0 : i32
    %c0_i32_0 = arith.constant 0 : i32
    %c0_i32_1 = arith.constant 0 : i32
    %c0_i32_2 = arith.constant 0 : i32
    return %arg0, %c0_i32, %c0_i32_0, %c0_i32_1 : i32, i32, i32, i32
  }
  func.func @transform_5(%arg0: i32) -> (i32, i32, i32) {
    %c0_i32 = arith.constant 0 : i32
    %c0_i32_0 = arith.constant 0 : i32
    %c0_i32_1 = arith.constant 0 : i32
    return %arg0, %c0_i32, %c0_i32_0 : i32, i32, i32
  }
}

</mosaic_0001>

<bundles_post_ra>
// kernel: up_forward.3
= control target key start
LH: loop header
LB: loop body
LE: loop exit
PB: predicated region body
PF: predicated region fallthrough
CT: control target
= control target key end

     0   :  { %s3695_s18 = smov 0   ;;  %s4998_s0 = inlined_call_operand.vmem [shape: bf16[2,16,16,4], index: 0, kind: input, shape index: {}]   ;;  %s4999_s1 = inlined_call_operand.vmem [shape: f32[1,4], index: 1, kind: input, shape index: {}]   ;;  %s5000_s2 = inlined_call_operand.vmem [shape: f32[1,4], index: 2, kind: input, shape index: {}]   ;;  %s5001_s3 = inlined_call_operand.vmem [shape: bf16[3,12,4], index: 3, kind: input, shape index: {}]   ;;  %s5002_s4 = inlined_call_operand.vmem [shape: bf16[2,16,16,4], index: 4, kind: output, shape index: {0}]   ;;  %s5003_s5 = inlined_call_operand.vmem [shape: f32[2,2,4], index: 5, kind: output, shape index: {1}]  }
   0x1 LB: > { %s3222_s19 = sadd.s32 4294967295, %s3660_s18   ;;  %p3226_p0 = scmp.ge.s32.totalorder %s3660_s18, 1  ;;  %s3660_s18 = sphi %s3695_s18, %s16_s18  }
   0x2   : > { %p190_p1 = scmp.lt.s32.totalorder %s3660_s18, 3 }
   0x4   : > { %p191_p2 = pnand %p3226_p0, %p190_p1 }
   0x5   : > { %p222_p3 = scmp.lt.s32.totalorder (!%p191_p2), %s3222_s19, 1  ;;  %s3663_s28 = smov (!%p191_p2), 8  }
   0x6   : > { %194 = sbr.rel (%p191_p2) target bundleno = 582 (0x246), region = 36  ;;  %s3664_s29 = smov (!%p191_p2), 4  }
   0xb   : > { %vm237_vm0 = vcmask 27648   ;;  %vm240_vm1 = vcmask 24576   ;;  %vm247_vm2 = vsmask.f32 256  ;;  %v3662_v0 = vmov 0   ;;  %s5017_s19 = smov (!%p222_p3, %s3222_s19), 1 }
   0xc   : > { %239 = vst.msk [vmem:[#allocation2 + $0x4] sm:$0xf] %vm237_vm0, %v3662_v0  ;;  %vm3706_vm3 = vmand %vm240_vm1, %vm247_vm2  ;;  %v255_v2 = vld [vmem:[#allocation2 + $0x18] sm:$0x1]  ;;  %vm303_vm4 = vsmask.f32 7938 }
   0xd   : > { %241 = vst.msk [vmem:[#allocation2 + $0x8] sm:$0x1] %vm240_vm1, %v3662_v0  ;;  %v256_v3 = vsel %vm3706_vm3, 0, %v255_v2  ;;  %vm1810_vm5 = vcmask 1042432   ;;  %s3504_s20 = sshll.u32 %s5017_s19, 7  ;;  %vm3722_vm6 = vmand %vm240_vm1, %vm303_vm4  ;;  %vm1811_vm7 = vcmask 1046532  }
   0xe   : > { %238 = vst.msk [vmem:[#allocation2] sm:$0xf] %vm237_vm0, %v3662_v0  ;;  %s3731_s23 = scalar_lea.vmem %s4998_s0, %s3504_s20  ;;  %v3736_v5 = vld [vmem:[%s4999_s1] ss:$0 sm:$0xff]  ;;  %v252_v15 = vld [vmem:[#allocation2 + $0xc] sm:$0x1]  ;;  %vm3753_vm11 = vmor %vm1810_vm5, %vm1811_vm7  ;;  %s4732_s26 = scalar_lea.vmem %s5002_s4, %s3504_s20 }
   0xf   : > { %243 = vst.msk [vmem:[#allocation2 + $0xcc] sm:$0xf] %vm237_vm0, %v3662_v0  ;;  %v3741_v6 = vld [vmem:[%s5000_s2] ss:$0 sm:$0xff]  ;;  %v3621_v8 = vld [vmem:[%s3731_s23 + $0x8] sm:$0xff]   ;;  %v253_v19 = vsel %vm3706_vm3, 0, %v252_v15  ;;  %vm3786_vm12 = vmand %vm237_vm0, %vm303_vm4 }
  0x10   : > { %244 = vst.msk [vmem:[#allocation2 + $0xd0] sm:$0xf] %vm237_vm0, %v3662_v0  ;;  %v3563_v12 = vunpack.c.l.bf16 %v3621_v8  ;;  %v3564_v13 = vunpack.c.h.bf16 %v3621_v8  ;;  %vm1122_vm8 = vsmask.f32 3328  ;;  %vm1123_vm9 = vsmask.f32 7440 }
  0x11   : > { %245 = vst.msk [vmem:[#allocation2 + $0xd4] sm:$0x1] %vm240_vm1, %v3662_v0  ;;  %v3558_v20 = vld [vmem:[%s3731_s23] sm:$0xff]   ;;  %vm559_vm10 = vsmask.f32 4368  ;;  %v3622_v37 = vld [vmem:[%s3731_s23 + $0x10] sm:$0xff]   ;;  %vm3794_vm13 = vmor %vm1122_vm8, %vm1123_vm9 }
  0x12   : > { %257 = vst [vmem:[#allocation2 + $0x18] sm:$0x1] %v256_v3  ;;  %v429_v23 = vmul.f32 %v3736_v5, %v3563_v12  ;;  %v430_v24 = vmul.f32 %v3736_v5, %v3564_v13  ;;  %v3559_v29 = vunpack.c.l.bf16 %v3558_v20  ;;  %v3560_v30 = vunpack.c.h.bf16 %v3558_v20  ;;  %v311_v31 = vld [vmem:[#allocation2 + $0x20] sm:$0x1]  ;;  %v258_v36 = vld [vmem:[#allocation2 + $0x24] sm:$0x1]  ;;  %vm3802_vm14 = vmor %vm247_vm2, %vm559_vm10 }
  0x13   : > { %v1703_v7 = vld [vmem:[#allocation2 + $0x4] sm:$0xf]  ;;  %254 = vst [vmem:[#allocation2 + $0xc] sm:$0x1] %v253_v19  ;;  %v312_v41 = vsel %vm3722_vm6, 0, %v311_v31  ;;  %v259_v44 = vsel %vm3706_vm3, 0, %v258_v36  ;;  %v3567_v45 = vunpack.c.l.bf16 %v3622_v37  ;;  %v3568_v50 = vunpack.c.h.bf16 %v3622_v37 }
  0x14   : > { %v1069_v9 = vld [vmem:[#allocation2 + $0x4] sm:$0xf]  ;;  %v305_v10 = vld [vmem:[#allocation2 + $0x8] sm:$0x1]  ;;  %v1815_v11 = vrot.slane %v1703_v7, 5  ;;  %v465_v33 = vadd.f32 %v3741_v6, %v429_v23  ;;  %v466_v34 = vadd.f32 %v3741_v6, %v430_v24  ;;  %v427_v39 = vmul.f32 %v3736_v5, %v3559_v29  ;;  %s3231_s20 = sshll.u32 %s5017_s19, 1 }
  0x15   : > { %v1135_v14 = vshll.u32 %v1069_v9, 16  ;;  %v306_v16 = vsel %vm3722_vm6, 0, %v305_v10  ;;  %v1702_v17 = vld [vmem:[#allocation2] sm:$0xe]  ;;  %v1139_v18 = vshrl.u32 %v1069_v9, 16  ;;  %v428_v40 = vmul.f32 %v3736_v5, %v3560_v30 }
  0x16   : > { %307 = vst [vmem:[#allocation2 + $0x8] sm:$0x1] %v306_v16  ;;  %v1817_v21 = vrot.slane %v1815_v11, 4  ;;  %v3232_v22 = vrot.slane %v1702_v17, 9  ;;  %v249_v25 = vld [vmem:[#allocation2] sm:$0x1]  ;;  %v463_v48 = vadd.f32 %v3741_v6, %v427_v39  ;;  %v431_v54 = vmul.f32 %v3736_v5, %v3567_v45 }
  0x17   : > { %v3757_v27 = vrot.slane %v1135_v14, 5  ;;  %v1141_v28 = vrot.slane %v1139_v18, 4  ;;  %v250_v35 = vsel %vm3706_vm3, 0, %v249_v25  ;;  %v497_v42 = vmax.f32 %v465_v33, 0.0  ;;  %313 = vst [vmem:[#allocation2 + $0x20] sm:$0x1] %v312_v41 }
  0x18   : > { %v1816_v32 = vsel %vm3753_vm11, %v3232_v22, %v1815_v11  ;;  %251 = vst [vmem:[#allocation2] sm:$0x1] %v250_v35  ;;  %v498_v43 = vmax.f32 %v466_v34, 0.0  ;;  %v3775_v46 = vld [vmem:[%s3731_s23 + $0x60] sm:$0xff]   ;;  %v464_v49 = vadd.f32 %v3741_v6, %v428_v40  ;;  %v308_v51 = vld [vmem:[#allocation2 + $0x14] sm:$0x1]  ;;  %v432_v60 = vmul.f32 %v3736_v5, %v3568_v50 }
  0x19   : > { %1939 = vrot.lane.b32.xlu2 %v1816_v32, %s3663_s28  ;;  %v1142_v38 = vor.u32 %v1141_v28, %v3757_v27  ;;  %260 = vst [vmem:[#allocation2 + $0x24] sm:$0x1] %v259_v44  ;;  %v529_v52 = vpack.c.bf16 %v497_v42, %v497_v42  ;;  %v309_v55 = vsel %vm3722_vm6, 0, %v308_v51  ;;  %v495_v58 = vmax.f32 %v463_v48, 0.0  ;;  %v891_v14 = vld [vmem:[#allocation2 + $0x18] sm:$0xf] }
  0x1a   : > { %v530_v53 = vpack.c.bf16 %v498_v43, %v498_v43  ;;  %v496_v59 = vmax.f32 %v464_v49, 0.0  ;;  %v3607_v61 = vunpack.c.l.bf16 %v3775_v46  ;;  %310 = vst [vmem:[#allocation2 + $0x14] sm:$0x1] %v309_v55  ;;  %v467_v16 = vadd.f32 %v3741_v6, %v431_v54  ;;  %v884_v36 = vld [vmem:[#allocation2 + $0xc] sm:$0xf]  ;;  %v3818_v49 = vld [vmem:[%s3731_s23 + $0x18] sm:$0xff]  }
  0x1b   : > { %v1143_v47 = vrot.slane %v1142_v38, 4  ;;  %v579_v63 = vshrl.u32 %v529_v52, 16  ;;  %v582_v0 = vshll.u32 %v529_v52, 16  ;;  %v527_v9 = vpack.c.bf16 %v495_v58, %v495_v58  ;;  %v344_v39 = vld [vmem:[#allocation2 + $0xa4] sm:$0x1] }
  0x1c   : > { %v587_v2 = vshrl.u32 %v530_v53, 16  ;;  %v590_v7 = vshll.u32 %v530_v53, 16  ;;  %v528_v10 = vpack.c.bf16 %v496_v59, %v496_v59  ;;  %v499_v48 = vmax.f32 %v467_v16, 0.0  ;;  %v3827_v59 = vld [vmem:[#allocation2 + $0x2c] sm:$0x1] }
  0x1d   : > { %v1704_v56 = vld [vmem:[#allocation2 + $0x8] sm:$0x1]  ;;  %v581_v12 = vrot.slane %v579_v63, 7  ;;  %v562_v19 = vshrl.u32 %v527_v9, 16  ;;  %v565_v20 = vshll.u32 %v527_v9, 16  ;;  %v345_v54 = vsel %vm3722_vm6, 0, %v344_v39 }
  0x1e   : > { %v1070_v57 = vld [vmem:[#allocation2 + $0x8] sm:$0x1]  ;;  %v1818_v62 = vrot.slane %v1704_v56, 5  ;;  %v589_v13 = vrot.slane %v587_v2, 7  ;;  %v895_v29 = vld [vmem:[#allocation2 + $0x20] sm:$0x1]  ;;  %v3608_v58 = vunpack.c.h.bf16 %v3775_v46  ;;  %v3571_v63 = vunpack.c.l.bf16 %v3818_v49 }
  0x1f   : > { %v1145_v8 = vshll.u32 %v1070_v57, 16  ;;  %v1068_v22 = vld [vmem:[#allocation2] sm:$0xf]  ;;  %v584_v23 = vor.u32 %v582_v0, %v581_v12  ;;  %v585_v24 = vrot.slane %v581_v12, 4  ;;  %v564_v31 = vrot.slane %v562_v19, 7 }
  0x20   : > { %v1819_v11 = vsel %vm3753_vm11, %v1817_v21, %v1818_v62  ;;  %v570_v21 = vshrl.u32 %v528_v10, 16  ;;  %v592_v25 = vor.u32 %v590_v7, %v589_v13  ;;  %v594_v28 = vrot.slane %v589_v13, 4  ;;  %346 = vst [vmem:[#allocation2 + $0xa4] sm:$0x1] %v345_v54 }
  0x21   : > { %1941 = vrot.lane.b32.xlu0 %v1819_v11, %s3663_s28  ;;  %v1147_v18 = vrot.slane %v1145_v8, 5  ;;  %v573_v33 = vshll.u32 %v528_v10, 16  ;;  %v892_v35 = vsel %vm3786_vm12, %v584_v23, %v891_v14  ;;  %v1126_v37 = vshrl.u32 %v1068_v22, 16  ;;  %v888_v53 = vld [vmem:[#allocation2 + $0x14] sm:$0x1] }
  0x22   : > { %v572_v32 = vrot.slane %v570_v21, 7  ;;  %v593_v34 = vsel %vm3802_vm14, %v585_v24, %v592_v25  ;;  %v1129_v38 = vshll.u32 %v1068_v22, 16  ;;  %893 = vst [vmem:[#allocation2 + $0x18] sm:$0xf] %v892_v35  ;;  %v567_v40 = vor.u32 %v565_v20, %v564_v31  ;;  %v898_v22 = vld [vmem:[#allocation2 + $0x24] sm:$0xf] }
  0x23   : > { %v1148_v30 = vsel %vm3794_vm13, %v1143_v47, %v1147_v18  ;;  %v568_v41 = vrot.slane %v564_v31, 4  ;;  %v896_v43 = vsel %vm3706_vm3, %v594_v28, %v895_v29  ;;  %894 = vst.msk [vmem:[#allocation2 + $0x1c] sm:$0xf] %vm237_vm0, %v593_v34  ;;  %v1128_v44 = vrot.slane %v1126_v37, 4 }
  0x24   : > { %1559 = vrot.lane.b32.xlu2 %v1148_v30, %s3664_s29  ;;  %v575_v42 = vor.u32 %v573_v33, %v572_v32  ;;  %v1131_v45 = vrot.slane %v1129_v38, 5  ;;  %v468_v47 = vadd.f32 %v3741_v6, %v432_v60  ;;  %v885_v51 = vsel %vm3786_vm12, %v567_v40, %v884_v36  ;;  %897 = vst [vmem:[#allocation2 + $0x20] sm:$0x1] %v896_v43 }
  0x25   : > { %v577_v52 = vrot.slane %v572_v32, 4  ;;  %886 = vst [vmem:[#allocation2 + $0xc] sm:$0xf] %v885_v51  ;;  %v531_v57 = vpack.c.bf16 %v499_v48, %v499_v48  ;;  %v451_v62 = vmul.f32 %v3736_v5, %v3607_v61  ;;  %v452_v9 = vmul.f32 %v3736_v5, %v3608_v58 }
  0x26   : > { %v576_v50 = vsel %vm3802_vm14, %v568_v41, %v575_v42  ;;  %v1132_v55 = vor.u32 %v1131_v45, %v1128_v44  ;;  %v500_v56 = vmax.f32 %v468_v47, 0.0  ;;  %v315_v11 = vsel %vm3722_vm6, 0, %v3827_v59 }
  0x27   : > { %887 = vst.msk [vmem:[#allocation2 + $0x10] sm:$0xf] %vm237_vm0, %v576_v50  ;;  %v889_v60 = vsel %vm3706_vm3, %v577_v52, %v888_v53  ;;  %v596_v7 = vshrl.u32 %v531_v57, 16  ;;  %v599_v8 = vshll.u32 %v531_v57, 16  ;;  %v3838_v10 = vadd.f32 %v3741_v6, %v451_v62 }
  0x28   : > { %v1133_v0 = vrot.slane %v1132_v55, 4  ;;  %v532_v2 = vpack.c.bf16 %v500_v56, %v500_v56  ;;  %890 = vst [vmem:[#allocation2 + $0x14] sm:$0x1] %v889_v60  ;;  %v3572_v16 = vunpack.c.h.bf16 %v3818_v49  ;;  %v3849_v23 = vadd.f32 %v3741_v6, %v452_v9 }
  0x29   : > { %v1708_v46 = vld [vmem:[#allocation2 + $0x18] sm:$0xe]  ;;  %v598_v13 = vrot.slane %v596_v7, 7  ;;  %v3852_v24 = vmul.f32 %v3736_v5, %v3571_v63  ;;  %316 = vst [vmem:[#allocation2 + $0x2c] sm:$0x1] %v315_v11  ;;  %vm1665_vm15 = vcmask 60448  }
  0x2a   : > { %v1074_v12 = vld [vmem:[#allocation2 + $0x18] sm:$0xf]  ;;  %v1138_v61 = vsel %vm3794_vm13, %v1133_v0, %v3757_v27  ;;  %v604_v14 = vshrl.u32 %v532_v2, 16  ;;  %v1709_v18 = vld [vmem:[#allocation2 + $0x1c] sm:$0xf]  ;;  %v3234_v19 = vrot.slane %v1708_v46, 9 }
  0x2b   : > { %v1075_v20 = vld [vmem:[#allocation2 + $0x1c] sm:$0xf]  ;;  %v1174_v21 = vshrl.u32 %v1074_v12, 16  ;;  %v1829_v25 = vrot.slane %v1709_v18, 5  ;;  %v1177_v28 = vshll.u32 %v1074_v12, 16  ;;  %v601_v34 = vor.u32 %v599_v8, %v598_v13  ;;  %v3872_v0 = vld [vmem:[%s3731_s23 + $0x68] sm:$0xff]  }
  0x2c   : > { %1557 = vrot.lane.b32.xlu2 %v1138_v61, %s3664_s29  ;;  %v1183_v27 = vshll.u32 %v1075_v20, 16  ;;  %v1187_v29 = vshrl.u32 %v1075_v20, 16  ;;  %v1076_v30 = vld [vmem:[#allocation2 + $0x20] sm:$0x1]  ;;  %v1705_v32 = vld [vmem:[#allocation2 + $0xc] sm:$0xe]  ;;  %v3611_v11 = vunpack.c.l.bf16 %v3872_v0 }
  0x2d   : > { %v1176_v31 = vrot.slane %v1174_v21, 4  ;;  %v1193_v33 = vshll.u32 %v1076_v30, 16  ;;  %v602_v35 = vrot.slane %v598_v13, 4  ;;  %v1830_v36 = vsel %vm3753_vm11, %v3234_v19, %v1829_v25  ;;  %v1071_v45 = vld [vmem:[#allocation2 + $0xc] sm:$0xf] }
  0x2e   : > { %v1179_v37 = vrot.slane %v1177_v28, 5  ;;  %v1185_v38 = vrot.slane %v1183_v27, 5  ;;  %v3856_v39 = vld [vmem:[#allocation2 + $0x10] sm:$0xf]  ;;  %v3233_v40 = vrot.slane %v1705_v32, 9  ;;  %1947 = vrot.lane.b32.xlu1 %v1830_v36, %s3663_s28  ;;  %v1189_v42 = vrot.slane %v1187_v29, 4 }
  0x2f   : > { %v1822_v41 = vrot.slane %v3856_v39, 5  ;;  %v3860_v43 = vrot.slane %v1193_v33, 5  ;;  %v3862_v44 = vrot.slane %v604_v14, 7  ;;  %v607_v48 = vshll.u32 %v532_v2, 16  ;;  %v1072_v51 = vld [vmem:[#allocation2 + $0x10] sm:$0xf] }
  0x30   : > { %v1180_v47 = vor.u32 %v1179_v37, %v1176_v31  ;;  %v899_v50 = vsel %vm3786_vm12, %v601_v34, %v898_v22  ;;  %v1150_v52 = vshrl.u32 %v1071_v45, 16  ;;  %v1190_v54 = vor.u32 %v1189_v42, %v1185_v38  ;;  %v1710_v57 = vld [vmem:[#allocation2 + $0x20] sm:$0x1]  ;;  %v1073_v63 = vld [vmem:[#allocation2 + $0x14] sm:$0x1] }
  0x31   : > { %v1823_v53 = vsel %vm3753_vm11, %v3233_v40, %v1822_v41  ;;  %900 = vst [vmem:[#allocation2 + $0x24] sm:$0xf] %v899_v50  ;;  %v1153_v55 = vshll.u32 %v1071_v45, 16  ;;  %v1159_v56 = vshll.u32 %v1072_v51, 16  ;;  %v609_v59 = vor.u32 %v607_v48, %v3862_v44  ;;  %v288_v14 = vld [vmem:[#allocation2 + $0x9c] sm:$0x1] }
  0x32   : > { %v1181_v58 = vrot.slane %v1180_v47, 4  ;;  %v1152_v60 = vrot.slane %v1150_v52, 4  ;;  %v1163_v62 = vshrl.u32 %v1072_v51, 16  ;;  %v1191_v2 = vrot.slane %v1190_v54, 4  ;;  %v317_v21 = vld [vmem:[#allocation2 + $0x38] sm:$0x1] }
  0x33   : > { %v1155_v7 = vrot.slane %v1153_v55, 5  ;;  %v3874_v8 = vrot.slane %v1159_v56, 5  ;;  %v1831_v9 = vrot.slane %v1829_v25, 4  ;;  %v610_v12 = vsel %vm3802_vm14, %v602_v35, %v609_v59  ;;  %v902_v45 = vld [vmem:[#allocation2 + $0x2c] sm:$0x1] }
  0x34   : > { %v1186_v46 = vsel %vm3794_vm13, %v1181_v58, %v1185_v38  ;;  %v1832_v61 = vrot.slane %v1710_v57, 5  ;;  %v1165_v13 = vrot.slane %v1163_v62, 4  ;;  %901 = vst.msk [vmem:[#allocation2 + $0x28] sm:$0xf] %vm237_vm0, %v610_v12  ;;  %v1169_v19 = vshll.u32 %v1073_v63, 16 }
  0x35   : > { %1565 = vrot.lane.b32.xlu0 %v1186_v46, %s3664_s29  ;;  %v1156_v18 = vor.u32 %v1155_v7, %v1152_v60  ;;  %v519_v20 = vmax.f32 %v3838_v10, 0.0  ;;  %v1196_v22 = vsel %vm3794_vm13, %v1191_v2, %v3860_v43  ;;  %v520_v28 = vmax.f32 %v3849_v23, 0.0  ;;  %v972_v50 = vld [vmem:[#allocation2 + $0xa4] sm:$0x1]  ;;  %v1707_v46 = vld [vmem:[#allocation2 + $0x14] sm:$0x1] }
  0x36   : > { %v1166_v25 = vor.u32 %v1165_v13, %v3874_v8  ;;  %v434_v27 = vmul.f32 %v3736_v5, %v3572_v16  ;;  %1943 = vrot.lane.b32.xlu1 %v1823_v53, %s3663_s28  ;;  %v611_v30 = vrot.slane %v3862_v44, 4  ;;  %v289_v31 = vsel %vm3706_vm3, 0, %v288_v14 }
  0x37   : > { %v3893_v29 = vrot.slane %v1156_v18, 4  ;;  %v551_v10 = vpack.c.bf16 %v519_v20, %v519_v20  ;;  %v3900_v33 = vsel %vm3753_vm11, %v1831_v9, %v1832_v61  ;;  %v3902_v34 = vrot.slane %v1169_v19, 5  ;;  %290 = vst [vmem:[#allocation2 + $0x9c] sm:$0x1] %v289_v31  ;;  %v291_v18 = vld [vmem:[#allocation2 + $0xa8] sm:$0x1] }
  0x38   : > { %v1711_v32 = vld [vmem:[#allocation2 + $0x24] sm:$0xe]  ;;  %v552_v49 = vpack.c.bf16 %v520_v28, %v520_v28  ;;  %v318_v16 = vsel %vm3722_vm6, 0, %v317_v21  ;;  %v3906_v37 = vrot.slane %v1166_v25, 4  ;;  %v469_v38 = vadd.f32 %v3741_v6, %v3852_v24  ;;  %v261_v28 = vld [vmem:[#allocation2 + $0x30] sm:$0x1] }
  0x39   : > { %v1077_v23 = vld [vmem:[#allocation2 + $0x24] sm:$0xf]  ;;  %v3235_v40 = vrot.slane %v1711_v32, 9  ;;  %v766_v42 = vshrl.u32 %v551_v10, 16  ;;  %v903_v51 = vsel %vm3706_vm3, %v611_v30, %v902_v45  ;;  %v769_v52 = vshll.u32 %v551_v10, 16 }
  0x3a   : > { %v1198_v35 = vshrl.u32 %v1077_v23, 16  ;;  %v1201_v36 = vshll.u32 %v1077_v23, 16  ;;  %v774_v43 = vshrl.u32 %v552_v49, 16  ;;  %v777_v44 = vshll.u32 %v552_v49, 16  ;;  %319 = vst [vmem:[#allocation2 + $0x38] sm:$0x1] %v318_v16 }
  0x3b   : > { %v1712_v53 = vld [vmem:[#allocation2 + $0x28] sm:$0xf]  ;;  %v768_v55 = vrot.slane %v766_v42, 7  ;;  %v470_v57 = vadd.f32 %v3741_v6, %v434_v27  ;;  %v3612_v24 = vunpack.c.h.bf16 %v3872_v0  ;;  %904 = vst [vmem:[#allocation2 + $0x2c] sm:$0x1] %v903_v51  ;;  %v1825_v25 = vrot.slane %v1707_v46, 5 }
  0x3c   : > { %v1200_v47 = vrot.slane %v1198_v35, 4  ;;  %v1203_v48 = vrot.slane %v1201_v36, 5  ;;  %v1078_v54 = vld [vmem:[#allocation2 + $0x28] sm:$0xf]  ;;  %v776_v56 = vrot.slane %v774_v43, 7  ;;  %v1836_v58 = vrot.slane %v1712_v53, 5 }
  0x3d   : > { %1567 = vrot.lane.b32.xlu0 %v1196_v22, %s3664_s29  ;;  %v1207_v60 = vshll.u32 %v1078_v54, 16  ;;  %v1211_v62 = vshrl.u32 %v1078_v54, 16  ;;  %v772_v63 = vrot.slane %v768_v55, 4  ;;  %v771_v9 = vor.u32 %v769_v52, %v768_v55  ;;  %v3952_v35 = vld [vmem:[%s3731_s23 + $0x20] sm:$0xff]  }
  0x3e   : > { %v1204_v59 = vor.u32 %v1203_v48, %v1200_v47  ;;  %v779_v2 = vor.u32 %v777_v44, %v776_v56  ;;  %v781_v7 = vrot.slane %v776_v56, 4  ;;  %v1837_v12 = vsel %vm3753_vm11, %v3235_v40, %v1836_v58  ;;  %v968_v21 = vld [vmem:[#allocation2 + $0x9c] sm:$0xf] }
  0x3f   : > { %v3919_v13 = vrot.slane %v1207_v60, 5  ;;  %v1213_v14 = vrot.slane %v1211_v62, 4  ;;  %1951 = vrot.lane.b32.xlu1 %v1837_v12, %s3663_s28  ;;  %v1824_v22 = vrot.slane %v1822_v41, 4  ;;  %v1162_v27 = vsel %vm3794_vm13, %v3893_v29, %v3874_v8 }
  0x40   : > { %v3917_v61 = vrot.slane %v1204_v59, 4  ;;  %v780_v19 = vsel %vm3802_vm14, %v772_v63, %v779_v2  ;;  %v973_v20 = vsel %vm3706_vm3, %v781_v7, %v972_v50  ;;  %v969_v30 = vsel %vm3786_vm12, %v771_v9, %v968_v21 }
  0x41   : > { %971 = vst.msk [vmem:[#allocation2 + $0xa0] sm:$0xf] %vm237_vm0, %v780_v19  ;;  %v1214_v10 = vor.u32 %v1213_v14, %v3919_v13  ;;  %v501_v31 = vmax.f32 %v469_v38, 0.0  ;;  %v1826_v39 = vsel %vm3753_vm11, %v1824_v22, %v1825_v25  ;;  %v502_v41 = vmax.f32 %v470_v57, 0.0  ;;  %v909_v14 = vld [vmem:[#allocation2 + $0x38] sm:$0x1] }
  0x42   : > { %974 = vst [vmem:[#allocation2 + $0xa4] sm:$0x1] %v973_v20  ;;  %v292_v32 = vsel %vm3706_vm3, 0, %v291_v18  ;;  %v453_v8 = vmul.f32 %v3736_v5, %v3611_v11  ;;  %1945 = vrot.lane.b32.xlu2 %v1826_v39, %s3663_s28  ;;  %v454_v49 = vmul.f32 %v3736_v5, %v3612_v24  ;;  %v262_v16 = vsel %vm3706_vm3, 0, %v261_v28  ;;  %v1079_v36 = vld [vmem:[#allocation2 + $0x2c] sm:$0x1] }
  0x43   : > { %v3943_v29 = vrot.slane %v1214_v10, 4  ;;  %970 = vst [vmem:[#allocation2 + $0x9c] sm:$0xf] %v969_v30  ;;  %v3946_v23 = vpack.c.bf16 %v501_v31, %v501_v31  ;;  %v1210_v0 = vsel %vm3794_vm13, %v3917_v61, %v3919_v13  ;;  %v1172_v11 = vsel %vm3794_vm13, %v3906_v37, %v3902_v34  ;;  %v1713_v40 = vld [vmem:[#allocation2 + $0x2c] sm:$0x1]  ;;  %v3634_v34 = vld [vmem:[%s3731_s23 + $0x70] sm:$0xff]  }
  0x44   : > { %v534_v38 = vpack.c.bf16 %v502_v41, %v502_v41  ;;  %293 = vst [vmem:[#allocation2 + $0xa8] sm:$0x1] %v292_v32  ;;  %v489_v42 = vadd.f32 %v3741_v6, %v453_v8  ;;  %v1217_v43 = vshll.u32 %v1079_v36, 16  ;;  %v1838_v45 = vrot.slane %v1836_v58, 4  ;;  %v264_v25 = vld [vmem:[#allocation2 + $0x3c] sm:$0x1] }
  0x45   : > { %1561 = vrot.lane.b32.xlu0 %v1162_v27, %s3664_s29  ;;  %v613_v44 = vshrl.u32 %v3946_v23, 16  ;;  %v1839_v47 = vrot.slane %v1713_v40, 5  ;;  %263 = vst [vmem:[#allocation2 + $0x30] sm:$0x1] %v262_v16  ;;  %v490_v51 = vadd.f32 %v3741_v6, %v454_v49  ;;  %v616_v55 = vshll.u32 %v3946_v23, 16 }
  0x46   : > { %v621_v48 = vshrl.u32 %v534_v38, 16  ;;  %v624_v50 = vshll.u32 %v534_v38, 16  ;;  %v521_v52 = vmax.f32 %v489_v42, 0.0  ;;  %v3966_v53 = vrot.slane %v1217_v43, 5  ;;  %v347_v39 = vld [vmem:[#allocation2 + $0xb0] sm:$0x1] }
  0x47   : > { %v615_v54 = vrot.slane %v613_v44, 7  ;;  %v3575_v56 = vunpack.c.l.bf16 %v3952_v35  ;;  %1949 = vrot.lane.b32.xlu1 %v3900_v33, %s3663_s28  ;;  %v1840_v59 = vsel %vm3753_vm11, %v1838_v45, %v1839_v47  ;;  %v522_v60 = vmax.f32 %v490_v51, 0.0  ;;  %v294_v40 = vld [vmem:[#allocation2 + $0xb4] sm:$0x1] }
  0x48   : > { %v1108_v57 = vld [vmem:[#allocation2 + $0xa0] sm:$0xf]  ;;  %v623_v58 = vrot.slane %v621_v48, 7  ;;  %v3576_v62 = vunpack.c.h.bf16 %v3952_v35  ;;  %v553_v46 = vpack.c.bf16 %v521_v52, %v521_v52  ;;  %v1220_v32 = vsel %vm3794_vm13, %v3943_v29, %v3966_v53 }
  0x49   : > { %v3972_v24 = vld [vmem:[#allocation2 + $0xa0] sm:$0xf]  ;;  %v1109_v63 = vld [vmem:[#allocation2 + $0xa4] sm:$0x1]  ;;  %v1447_v2 = vshll.u32 %v1108_v57, 16  ;;  %v1451_v7 = vshrl.u32 %v1108_v57, 16  ;;  %v554_v18 = vpack.c.bf16 %v522_v60, %v522_v60  ;;  %v435_v28 = vmul.f32 %v3736_v5, %v3575_v56 }
  0x4a   : > { %v1906_v9 = vrot.slane %v3972_v24, 5  ;;  %v1457_v12 = vshll.u32 %v1109_v63, 16  ;;  %v3978_v61 = vld [vmem:[#allocation2 + $0x9c] sm:$0xe]  ;;  %v619_v33 = vrot.slane %v615_v54, 4  ;;  %v626_v13 = vor.u32 %v624_v50, %v623_v58  ;;  %1953 = vrot.lane.b32.xlu2 %v1840_v59, %s3663_s28 }
  0x4b   : > { %v3980_v19 = vrot.slane %v1447_v2, 5  ;;  %v1453_v20 = vrot.slane %v1451_v7, 4  ;;  %v3245_v21 = vrot.slane %v3978_v61, 9  ;;  %v3983_v22 = vld [vmem:[#allocation2 + $0xa4] sm:$0x1]  ;;  %v628_v31 = vrot.slane %v623_v58, 4 }
  0x4c   : > { %v1459_v27 = vrot.slane %v1457_v12, 5  ;;  %v3989_v10 = vrot.slane %v1906_v9, 4  ;;  %v627_v30 = vsel %vm3802_vm14, %v619_v33, %v626_v13  ;;  %v783_v8 = vshrl.u32 %v553_v46, 16  ;;  %v1107_v49 = vld [vmem:[#allocation2 + $0x9c] sm:$0xf] }
  0x4d   : > { %1569 = vrot.lane.b32.xlu0 %v1210_v0, %s3664_s29  ;;  %v1454_v41 = vor.u32 %v1453_v20, %v3980_v19  ;;  %908 = vst.msk [vmem:[#allocation2 + $0x34] sm:$0xf] %vm237_vm0, %v627_v30  ;;  %v786_v23 = vshll.u32 %v553_v46, 16  ;;  %v1909_v16 = vrot.slane %v3983_v22, 5  ;;  %v910_v35 = vsel %vm3706_vm3, %v628_v31, %v909_v14  ;;  %v905_v0 = vld [vmem:[#allocation2 + $0x30] sm:$0xf] }
  0x4e   : > { %v791_v36 = vshrl.u32 %v554_v18, 16  ;;  %v794_v38 = vshll.u32 %v554_v18, 16  ;;  %911 = vst [vmem:[#allocation2 + $0x38] sm:$0x1] %v910_v35  ;;  %v785_v43 = vrot.slane %v783_v8, 7  ;;  %v618_v44 = vor.u32 %v616_v55, %v615_v54 }
  0x4f   : > { %v1455_v42 = vrot.slane %v1454_v41, 4  ;;  %v1438_v29 = vshrl.u32 %v1107_v49, 16  ;;  %1563 = vrot.lane.b32.xlu1 %v1172_v11, %s3664_s29  ;;  %v975_v47 = vld [vmem:[#allocation2 + $0xa8] sm:$0xf]  ;;  %v1441_v48 = vshll.u32 %v1107_v49, 16  ;;  %v348_v50 = vsel %vm3722_vm6, 0, %v347_v39 }
  0x50   : > { %v793_v45 = vrot.slane %v791_v36, 7  ;;  %v265_v51 = vsel %vm3706_vm3, 0, %v264_v25  ;;  %v788_v53 = vor.u32 %v786_v23, %v785_v43  ;;  %v789_v54 = vrot.slane %v785_v43, 4  ;;  %349 = vst [vmem:[#allocation2 + $0xb0] sm:$0x1] %v348_v50 }
  0x51   : > { %v1460_v52 = vsel %vm3794_vm13, %v1455_v42, %v1459_v27  ;;  %v906_v55 = vsel %vm3786_vm12, %v618_v44, %v905_v0  ;;  %v1440_v11 = vrot.slane %v1438_v29, 4  ;;  %v1443_v56 = vrot.slane %v1441_v48, 5  ;;  %266 = vst [vmem:[#allocation2 + $0x3c] sm:$0x1] %v265_v51 }
  0x52   : > { %v796_v37 = vor.u32 %v794_v38, %v793_v45  ;;  %907 = vst [vmem:[#allocation2 + $0x30] sm:$0xf] %v906_v55  ;;  %v798_v57 = vrot.slane %v793_v45, 4  ;;  %v976_v58 = vsel %vm3786_vm12, %v788_v53, %v975_v47  ;;  %v436_v59 = vmul.f32 %v3736_v5, %v3576_v62 }
  0x53   : > { %v471_v60 = vadd.f32 %v3741_v6, %v435_v28  ;;  %v295_v63 = vsel %vm3706_vm3, 0, %v294_v40  ;;  %977 = vst [vmem:[#allocation2 + $0xa8] sm:$0xf] %v976_v58  ;;  %v1444_v12 = vor.u32 %v1443_v56, %v1440_v11  ;;  %v3615_v33 = vunpack.c.l.bf16 %v3634_v34 }
  0x54   : > { %v1081_v2 = vld [vmem:[#allocation2 + $0x34] sm:$0xf]  ;;  %v797_v7 = vsel %vm3802_vm14, %v789_v54, %v796_v37  ;;  %v3616_v13 = vunpack.c.h.bf16 %v3634_v34  ;;  %v472_v20 = vadd.f32 %v3741_v6, %v436_v59  ;;  %v1907_v25 = vsel %vm3753_vm11, %v3245_v21, %v1906_v9  ;;  %296 = vst [vmem:[#allocation2 + $0xb4] sm:$0x1] %v295_v63 }
  0x55   : > { %v1715_v46 = vld [vmem:[#allocation2 + $0x34] sm:$0xf]  ;;  %1611 = vrot.lane.b32.xlu0 %v1460_v52, %s3664_s29  ;;  %v1231_v14 = vshll.u32 %v1081_v2, 16  ;;  %v1235_v18 = vshrl.u32 %v1081_v2, 16  ;;  %978 = vst.msk [vmem:[#allocation2 + $0xac] sm:$0xf] %vm237_vm0, %v797_v7  ;;  %v455_v39 = vmul.f32 %v3736_v5, %v3615_v33  ;;  %v1910_v36 = vsel %vm3753_vm11, %v3989_v10, %v1909_v16 }
  0x56   : > { %v1843_v62 = vrot.slane %v1715_v46, 5  ;;  %v1082_v28 = vld [vmem:[#allocation2 + $0x38] sm:$0x1]  ;;  %v1445_v27 = vrot.slane %v1444_v12, 4  ;;  %v503_v31 = vmax.f32 %v471_v60, 0.0  ;;  %v504_v21 = vmax.f32 %v472_v20, 0.0 }
  0x57   : > { %v1716_v30 = vld [vmem:[#allocation2 + $0x38] sm:$0x1]  ;;  %v4036_v41 = vrot.slane %v1231_v14, 5  ;;  %v1237_v8 = vrot.slane %v1235_v18, 4  ;;  %v1241_v23 = vshll.u32 %v1082_v28, 16  ;;  %1571 = vrot.lane.b32.xlu1 %v1220_v32, %s3664_s29  ;;  %vm2047_vm2 = vcmask 93248  }
  0x58   : > { %v1845_v49 = vrot.slane %v1843_v62, 4  ;;  %v1450_v24 = vsel %vm3794_vm13, %v1445_v27, %v3980_v19  ;;  %v1846_v61 = vrot.slane %v1716_v30, 5  ;;  %v979_v9 = vld [vmem:[#allocation2 + $0xb0] sm:$0x1]  ;;  %v535_v35 = vpack.c.bf16 %v503_v31, %v503_v31  ;;  %v912_v33 = vld [vmem:[#allocation2 + $0x3c] sm:$0xf] }
  0x59   : > { %v1238_v38 = vor.u32 %v1237_v8, %v4036_v41  ;;  %v1714_v0 = vld [vmem:[#allocation2 + $0x30] sm:$0xe]  ;;  %1609 = vrot.lane.b32.xlu2 %v1450_v24, %s3664_s29  ;;  %v980_v32 = vsel %vm3706_vm3, %v798_v57, %v979_v9  ;;  %v456_v19 = vmul.f32 %v3736_v5, %v3616_v13  ;;  %v1243_v42 = vrot.slane %v1241_v23, 5  ;;  %v350_v30 = vld [vmem:[#allocation2 + $0xbc] sm:$0x1] }
  0x5a   : > { %v1080_v40 = vld [vmem:[#allocation2 + $0x30] sm:$0xf]  ;;  %v3236_v43 = vrot.slane %v1714_v0, 9  ;;  %981 = vst [vmem:[#allocation2 + $0xb0] sm:$0x1] %v980_v32  ;;  %v536_v47 = vpack.c.bf16 %v504_v21, %v504_v21  ;;  %v630_v10 = vshrl.u32 %v535_v35, 16  ;;  %v4054_v52 = vsel %vm3753_vm11, %v1845_v49, %v1846_v61 }
  0x5b   : > { %v1222_v44 = vshrl.u32 %v1080_v40, 16  ;;  %v1225_v22 = vshll.u32 %v1080_v40, 16  ;;  %v1239_v29 = vrot.slane %v1238_v38, 4  ;;  %v1110_v45 = vld [vmem:[#allocation2 + $0xa8] sm:$0xf]  ;;  %v633_v16 = vshll.u32 %v535_v35, 16 }
  0x5c   : > { %v1111_v48 = vld [vmem:[#allocation2 + $0xac] sm:$0xf]  ;;  %v1462_v50 = vshrl.u32 %v1110_v45, 16  ;;  %v1465_v51 = vshll.u32 %v1110_v45, 16  ;;  %v491_v5 = vadd.f32 %v3741_v6, %v455_v39  ;;  %v4062_v34 = vsel %vm3753_vm11, %v3236_v43, %v1843_v62  ;;  %v320_v24 = vld [vmem:[#allocation2 + $0x44] sm:$0x1] }
  0x5d   : > { %v4056_v53 = vld [vmem:[#allocation2 + $0xac] sm:$0xf]  ;;  %1991 = vrot.lane.b32.xlu0 %v1907_v25, %s3663_s28  ;;  %v1471_v54 = vshll.u32 %v1111_v48, 16  ;;  %v1475_v55 = vshrl.u32 %v1111_v48, 16  ;;  %v492_v37 = vadd.f32 %v3741_v6, %v456_v19  ;;  %v1224_v57 = vrot.slane %v1222_v44, 4 }
  0x5e   : > { %v1464_v11 = vrot.slane %v1462_v50, 4  ;;  %v1467_v56 = vrot.slane %v1465_v51, 5  ;;  %v1227_v58 = vrot.slane %v1225_v22, 5  ;;  %v1913_v60 = vrot.slane %v4056_v53, 5  ;;  %v267_v38 = vld [vmem:[#allocation2 + $0x48] sm:$0x1] }
  0x5f   : > { %v1473_v59 = vrot.slane %v1471_v54, 5  ;;  %v632_v63 = vrot.slane %v630_v10, 7  ;;  %v638_v2 = vshrl.u32 %v536_v47, 16  ;;  %1993 = vrot.lane.b32.xlu1 %v1910_v36, %s3663_s28  ;;  %v641_v12 = vshll.u32 %v536_v47, 16  ;;  %v1744_v43 = vld [vmem:[#allocation2 + $0xa8] sm:$0xe] }
  0x60   : > { %v1468_v7 = vor.u32 %v1467_v56, %v1464_v11  ;;  %v1228_v46 = vor.u32 %v1227_v58, %v1224_v57  ;;  %v523_v13 = vmax.f32 %v491_v5, 0.0  ;;  %v524_v6 = vmax.f32 %v492_v37, 0.0  ;;  %v3625_v45 = vld [vmem:[%s3731_s23 + $0x28] sm:$0xff]   ;;  %v4089_v47 = vld [vmem:[#allocation2 + $0x50] sm:$0x1]  ;;  %v3635_v11 = vld [vmem:[%s3731_s23 + $0x78] sm:$0xff]  }
  0x61   : > { %v635_v14 = vor.u32 %v633_v16, %v632_v63  ;;  %v636_v18 = vrot.slane %v632_v63, 4  ;;  %v4067_v62 = vrot.slane %v638_v2, 7  ;;  %v1244_v20 = vsel %vm3794_vm13, %v1239_v29, %v1243_v42  ;;  %v1112_v23 = vld [vmem:[#allocation2 + $0xb0] sm:$0x1]  ;;  %v982_v42 = vld [vmem:[#allocation2 + $0xb4] sm:$0xf] }
  0x62   : > { %v1469_v25 = vrot.slane %v1468_v7, 4  ;;  %v1229_v28 = vrot.slane %v1228_v46, 4  ;;  %v555_v27 = vpack.c.bf16 %v523_v13, %v523_v13  ;;  %v556_v8 = vpack.c.bf16 %v524_v6, %v524_v6  ;;  %v1746_v9 = vld [vmem:[#allocation2 + $0xb0] sm:$0x1]  ;;  %v4091_v10 = vld [vmem:[#allocation2 + $0xc8] sm:$0x1] }
  0x63   : > { %v643_v31 = vor.u32 %v641_v12, %v4067_v62  ;;  %v913_v39 = vsel %vm3786_vm12, %v635_v14, %v912_v33  ;;  %v1477_v49 = vrot.slane %v1475_v55, 4  ;;  %v1915_v21 = vrot.slane %v1913_v60, 4  ;;  %v4141_v53 = vld [vmem:[%s5000_s2] ss:$0 sm:$0xff] }
  0x64   : > { %v1474_v61 = vsel %vm3794_vm13, %v1469_v25, %v1473_v59  ;;  %v1234_v35 = vsel %vm3794_vm13, %v1229_v28, %v4036_v41  ;;  %914 = vst [vmem:[#allocation2 + $0x3c] sm:$0xf] %v913_v39  ;;  %v800_v36 = vshrl.u32 %v555_v27, 16  ;;  %v803_v32 = vshll.u32 %v555_v27, 16  ;;  %v4121_v27 = vld [vmem:[%s3731_s23 + $0x30] sm:$0xff]  }
  0x65   : > { %1575 = vrot.lane.b32.xlu0 %v1244_v20, %s3664_s29  ;;  %1573 = vrot.lane.b32.xlu2 %v1234_v35, %s3664_s29  ;;  %v644_v0 = vsel %vm3802_vm14, %v636_v18, %v643_v31  ;;  %v808_v40 = vshrl.u32 %v556_v8, 16  ;;  %v811_v19 = vshll.u32 %v556_v8, 16  ;;  %v1478_v41 = vor.u32 %v1477_v49, %v1473_v59  ;;  %v4116_v20 = vld [vmem:[%s4999_s1] ss:$0 sm:$0xff] }
  0x66   : > { %915 = vst.msk [vmem:[#allocation2 + $0x40] sm:$0xf] %vm237_vm0, %v644_v0  ;;  %v802_v44 = vrot.slane %v800_v36, 7  ;;  %v1481_v22 = vshll.u32 %v1112_v23, 16  ;;  %v351_v29 = vsel %vm3722_vm6, 0, %v350_v30  ;;  %v1916_v16 = vrot.slane %v1746_v9, 5 }
  0x67   : > { %v810_v48 = vrot.slane %v808_v40, 7  ;;  %352 = vst [vmem:[#allocation2 + $0xbc] sm:$0x1] %v351_v29  ;;  %v321_v50 = vsel %vm3722_vm6, 0, %v320_v24  ;;  %v645_v51 = vrot.slane %v4067_v62, 4  ;;  %1613 = vrot.lane.b32.xlu1 %v1474_v61, %s3664_s29  ;;  %v1479_v55 = vrot.slane %v1478_v41, 4 }
  0x68   : > { %v805_v5 = vor.u32 %v803_v32, %v802_v44  ;;  %v806_v54 = vrot.slane %v802_v44, 4  ;;  %v1483_v37 = vrot.slane %v1481_v22, 5  ;;  %322 = vst [vmem:[#allocation2 + $0x44] sm:$0x1] %v321_v50  ;;  %v3246_v58 = vrot.slane %v1744_v43, 9 }
  0x69   : > { %v813_v56 = vor.u32 %v811_v19, %v810_v48  ;;  %v815_v57 = vrot.slane %v810_v48, 4  ;;  %v268_v59 = vsel %vm3706_vm3, 0, %v267_v38  ;;  %v3579_v7 = vunpack.c.l.bf16 %v3625_v45  ;;  %v997_v23 = vld [vmem:[#allocation2 + $0x4] sm:$0xf]  ;;  %v297_v61 = vld [vmem:[#allocation2 + $0xc0] sm:$0x1] }
  0x6a   : > { %v983_v63 = vsel %vm3786_vm12, %v805_v5, %v982_v42  ;;  %v1484_v2 = vsel %vm3794_vm13, %v1479_v55, %v1483_v37  ;;  %269 = vst [vmem:[#allocation2 + $0x48] sm:$0x1] %v268_v59  ;;  %v3580_v46 = vunpack.c.h.bf16 %v3625_v45  ;;  %v324_v13 = vsel %vm3722_vm6, 0, %v4089_v47 }
  0x6b   : > { %v1083_v12 = vld [vmem:[#allocation2 + $0x3c] sm:$0xf]  ;;  %v814_v33 = vsel %vm3802_vm14, %v806_v54, %v813_v56  ;;  %984 = vst [vmem:[#allocation2 + $0xb4] sm:$0xf] %v983_v63  ;;  %v354_v14 = vsel %vm3722_vm6, 0, %v4091_v10  ;;  %v3619_v18 = vunpack.c.l.bf16 %v3635_v11  ;;  %v437_v25 = vmul.f32 %v4116_v20, %v3579_v7 }
  0x6c   : > { %v1246_v62 = vshrl.u32 %v1083_v12, 16  ;;  %v1249_v6 = vshll.u32 %v1083_v12, 16  ;;  %985 = vst.msk [vmem:[#allocation2 + $0xb8] sm:$0xf] %vm237_vm0, %v814_v33  ;;  %v438_v28 = vmul.f32 %v4116_v20, %v3580_v46  ;;  %v1917_v30 = vsel %vm3753_vm11, %v1915_v21, %v1916_v16 }
  0x6d   : > { %1955 = vrot.lane.b32.xlu0 %v4062_v34, %s3663_s28  ;;  %v1084_v31 = vld [vmem:[#allocation2 + $0x40] sm:$0xf]  ;;  %1615 = vrot.lane.b32.xlu2 %v1484_v2, %s3664_s29  ;;  %v1914_v8 = vsel %vm3753_vm11, %v3246_v58, %v1913_v60  ;;  %v3620_v49 = vunpack.c.h.bf16 %v3635_v11  ;;  %v457_v24 = vmul.f32 %v4116_v20, %v3619_v18  ;;  %v473_v60 = vadd.f32 %v4141_v53, %v437_v25 }
  0x6e   : > { %v4128_v39 = vld [vmem:[#allocation2 + $0x40] sm:$0xf]  ;;  %v1248_v9 = vrot.slane %v1246_v62, 4  ;;  %v1251_v34 = vrot.slane %v1249_v6, 5  ;;  %v1255_v35 = vshll.u32 %v1084_v31, 16  ;;  %v1259_v36 = vshrl.u32 %v1084_v31, 16 }
  0x6f   : > { %v986_v21 = vld [vmem:[#allocation2 + $0xbc] sm:$0x1]  ;;  %v916_v0 = vld [vmem:[#allocation2 + $0x44] sm:$0x1]  ;;  %v1850_v32 = vrot.slane %v4128_v39, 5  ;;  %v474_v40 = vadd.f32 %v4141_v53, %v438_v28  ;;  %1957 = vrot.lane.b32.xlu1 %v4054_v52, %s3663_s28  ;;  %v3583_v44 = vunpack.c.l.bf16 %v4121_v27  ;;  %v505_v22 = vmax.f32 %v473_v60, 0.0 }
  0x70   : > { %v987_v38 = vsel %vm3706_vm3, %v815_v57, %v986_v21  ;;  %1033 = vst.msk [vmem:[#allocation3 + $0x4] sm:$0xf] %vm237_vm0, %v997_v23  ;;  %v1252_v19 = vor.u32 %v1251_v34, %v1248_v9  ;;  %v4148_v42 = vrot.slane %v1255_v35, 5  ;;  %v917_v43 = vsel %vm3706_vm3, %v645_v51, %v916_v0  ;;  %v1007_v17 = vld [vmem:[#allocation2 + $0x40] sm:$0xf] }
  0x71   : > { %988 = vst [vmem:[#allocation2 + $0xbc] sm:$0x1] %v987_v38  ;;  %v4155_v41 = vrot.slane %v1850_v32, 4  ;;  %v506_v29 = vmax.f32 %v474_v40, 0.0  ;;  %v1261_v45 = vrot.slane %v1259_v36, 4  ;;  %v458_v5 = vmul.f32 %v4116_v20, %v3620_v49 }
  0x72   : > { %918 = vst [vmem:[#allocation2 + $0x44] sm:$0x1] %v917_v43  ;;  %v1253_v16 = vrot.slane %v1252_v19, 4  ;;  %v1113_v48 = vld [vmem:[#allocation2 + $0xb4] sm:$0xf]  ;;  %v298_v51 = vsel %vm3706_vm3, 0, %v297_v61  ;;  %v3584_v54 = vunpack.c.h.bf16 %v4121_v27  ;;  %v537_v57 = vpack.c.bf16 %v505_v22, %v505_v22 }
  0x73   : > { %v4157_v52 = vpop.permute.xlu2 %1939  ;;  %v1747_v50 = vld [vmem:[#allocation2 + $0xb4] sm:$0xe]  ;;  %v1114_v55 = vld [vmem:[#allocation2 + $0xb8] sm:$0xf]  ;;  %v1486_v37 = vshrl.u32 %v1113_v48, 16  ;;  %v1489_v11 = vshll.u32 %v1113_v48, 16  ;;  %v538_v58 = vpack.c.bf16 %v506_v29, %v506_v29  ;;  %v493_v61 = vadd.f32 %v4141_v53, %v457_v24 }
  0x74   : > { %v4163_v56 = vld [vmem:[#allocation2 + $0xb8] sm:$0xf]  ;;  %v1258_v59 = vsel %vm3794_vm13, %v1253_v16, %v4148_v42  ;;  %v1495_v63 = vshll.u32 %v1114_v55, 16  ;;  %v1499_v2 = vshrl.u32 %v1114_v55, 16  ;;  %v3247_v7 = vrot.slane %v1747_v50, 9 }
  0x75   : > { %1997 = vrot.lane.b32.xlu0 %v1917_v30, %s3663_s28  ;;  %v1488_v46 = vrot.slane %v1486_v37, 4  ;;  %v1491_v12 = vrot.slane %v1489_v11, 5  ;;  %1995 = vrot.lane.b32.xlu2 %v1914_v8, %s3663_s28  ;;  %v1920_v33 = vrot.slane %v4163_v56, 5  ;;  %v647_v18 = vshrl.u32 %v537_v57, 16  ;;  %325 = vst [vmem:[#allocation2 + $0x50] sm:$0x1] %v324_v13 }
  0x76   : > { %v1497_v62 = vrot.slane %v1495_v63, 5  ;;  %v1501_v6 = vrot.slane %v1499_v2, 4  ;;  %v650_v25 = vshll.u32 %v537_v57, 16  ;;  %v655_v28 = vshrl.u32 %v538_v58, 16  ;;  %v919_v31 = vld [vmem:[#allocation2 + $0x48] sm:$0xf] }
  0x77   : > { %355 = vst [vmem:[#allocation2 + $0xc8] sm:$0x1] %v354_v14  ;;  %v1492_v30 = vor.u32 %v1491_v12, %v1488_v46  ;;  %v649_v23 = vrot.slane %v647_v18, 7  ;;  %v658_v49 = vshll.u32 %v538_v58, 16  ;;  %1577 = vrot.lane.b32.xlu1 %v1258_v59, %s3664_s29  ;;  %v1262_v36 = vor.u32 %v1261_v45, %v4148_v42  ;;  %v996_v19 = vld [vmem:[#allocation2] sm:$0xf] }
  0x78   : > { %v1115_v8 = vld [vmem:[#allocation2 + $0xbc] sm:$0x1]  ;;  %299 = vst [vmem:[#allocation2 + $0xc0] sm:$0x1] %v298_v51  ;;  %v1502_v47 = vor.u32 %v1501_v6, %v1497_v62  ;;  %v657_v34 = vrot.slane %v655_v28, 7  ;;  %v4186_v10 = vsel %vm3753_vm11, %v3247_v7, %v1920_v33  ;;  %v494_v11 = vadd.f32 %v4141_v53, %v458_v5 }
  0x79   : > { %v1505_v13 = vshll.u32 %v1115_v8, 16  ;;  %v1719_v9 = vld [vmem:[#allocation2 + $0x44] sm:$0x1]  ;;  %v1493_v21 = vrot.slane %v1492_v30, 4  ;;  %v652_v14 = vor.u32 %v650_v25, %v649_v23  ;;  %v653_v38 = vrot.slane %v649_v23, 4 }
  0x7a   : > { %v1085_v35 = vld [vmem:[#allocation2 + $0x44] sm:$0x1]  ;;  %v1503_v24 = vrot.slane %v1502_v47, 4  ;;  %v1853_v60 = vrot.slane %v1719_v9, 5  ;;  %v660_v40 = vor.u32 %v658_v49, %v657_v34  ;;  %v1263_v22 = vrot.slane %v1262_v36, 4 }
  0x7b   : > { %v1507_v0 = vrot.slane %v1505_v13, 5  ;;  %v1498_v43 = vsel %vm3794_vm13, %v1493_v21, %v1497_v62  ;;  %v920_v42 = vsel %vm3786_vm12, %v652_v14, %v919_v31  ;;  %v1265_v29 = vshll.u32 %v1085_v35, 16  ;;  %1032 = vst.msk [vmem:[#allocation3] sm:$0xf] %vm237_vm0, %v996_v19  ;;  %v1717_v45 = vld [vmem:[#allocation2 + $0x3c] sm:$0xe] }
  0x7c   : > { %v285_v16 = vld [vmem:[#allocation2 + $0x90] sm:$0x1]  ;;  %v661_v50 = vsel %vm3802_vm14, %v653_v38, %v660_v40  ;;  %921 = vst [vmem:[#allocation2 + $0x48] sm:$0xf] %v920_v42  ;;  %v662_v55 = vrot.slane %v657_v34, 4  ;;  %v525_v58 = vmax.f32 %v493_v61, 0.0  ;;  %v439_v63 = vmul.f32 %v4116_v20, %v3583_v44 }
  0x7d   : > { %v1508_v48 = vsel %vm3794_vm13, %v1503_v24, %v1507_v0  ;;  %v923_v37 = vld [vmem:[#allocation2 + $0x50] sm:$0x1]  ;;  %1617 = vrot.lane.b32.xlu0 %v1498_v43, %s3664_s29  ;;  %922 = vst.msk [vmem:[#allocation2 + $0x4c] sm:$0xf] %vm237_vm0, %v661_v50  ;;  %v1267_v57 = vrot.slane %v1265_v29, 5  ;;  %v440_v2 = vmul.f32 %v4116_v20, %v3584_v54  ;;  %v1854_v5 = vsel %vm3753_vm11, %v4155_v41, %v1853_v60  ;;  %v4221_v41 = vld [vmem:[%s3731_s23 + $0x58] sm:$0xff]  }
  0x7e   : > { %v1560_v51 = vpop.permute.xlu2 %1559  ;;  %v326_v59 = vld [vmem:[#allocation2 + $0x5c] sm:$0x1]  ;;  %v924_v7 = vsel %vm3706_vm3, %v662_v55, %v923_v37  ;;  %v526_v46 = vmax.f32 %v494_v11, 0.0  ;;  %v557_v44 = vpack.c.bf16 %v525_v58, %v525_v58  ;;  %v3237_v18 = vrot.slane %v1717_v45, 9  ;;  %v3400_v27 = vld [vmem:[%s5001_s3] sm:$0xf] }
  0x7f   : > { %1667 = vst.msk [vmem:[#allocation3 + $0x4] sm:$0xf] %vm1665_vm15, %v1560_v51  ;;  %v1268_v12 = vsel %vm3794_vm13, %v1263_v22, %v1267_v57  ;;  %v4218_v54 = vadd.f32 %v4141_v53, %v439_v63  ;;  %1619 = vrot.lane.b32.xlu1 %v1508_v48, %s3664_s29  ;;  %v3506_v6 = vld [vmem:[%s5001_s3] sm:$0x30]  ;;  %v1749_v25 = vld [vmem:[#allocation2 + $0xbc] sm:$0x1]  ;;  %v4231_v31 = vadd.f32 %v4141_v53, %v440_v2  ;;  %v3603_v24 = vunpack.c.l.bf16 %v4221_v41 }
  0x80   : > { %925 = vst [vmem:[#allocation2 + $0x50] sm:$0x1] %v924_v7  ;;  %1579 = vrot.lane.b32.xlu2 %v1268_v12, %s3664_s29  ;;  %v558_v62 = vpack.c.bf16 %v526_v46, %v526_v46  ;;  %v327_v28 = vsel %vm3722_vm6, 0, %v326_v59  ;;  %v286_v30 = vsel %vm3706_vm3, 0, %v285_v16  ;;  %v817_v8 = vshrl.u32 %v557_v44, 16  ;;  %v3627_v2 = vld [vmem:[%s3731_s23 + $0x38] sm:$0xff]  }
  0x81   : > { %v820_v23 = vshll.u32 %v557_v44, 16  ;;  %vm2289_vm4 = vcmask 1045504   ;;  %v3401_v49 = vor.u32 %v3506_v6, %v3400_v27  ;;  %328 = vst [vmem:[#allocation2 + $0x5c] sm:$0x1] %v327_v28  ;;  %v1922_v13 = vrot.slane %v1920_v33, 4 }
  0x82   : > { %v825_v61 = vshrl.u32 %v558_v62, 16  ;;  %v828_v47 = vshll.u32 %v558_v62, 16  ;;  %v1923_v9 = vrot.slane %v1749_v25, 5  ;;  %287 = vst [vmem:[#allocation2 + $0x90] sm:$0x1] %v286_v30  ;;  %v819_v35 = vrot.slane %v817_v8, 7 }
  0x83   : > { %v1086_v34 = vld [vmem:[#allocation2 + $0x48] sm:$0xf]  ;;  %v1851_v21 = vsel %vm3753_vm11, %v3237_v18, %v1850_v32  ;;  %v4244_v38 = vsel %vm2289_vm4, %v3401_v49, 0  ;;  %v989_v40 = vld [vmem:[#allocation2 + $0xc0] sm:$0xf]  ;;  %v3604_v19 = vunpack.c.h.bf16 %v4221_v41  ;;  %v507_v18 = vmax.f32 %v4218_v54, 0.0 }
  0x84   : > { %v993_v36 = vld [vmem:[#allocation2 + $0xc8] sm:$0x1]  ;;  %v4241_v14 = vld [vmem:[#allocation2 + $0x48] sm:$0xe]  ;;  %v1087_v0 = vld [vmem:[#allocation2 + $0x4c] sm:$0xf]  ;;  %2525 = vmatpush.bf16.msra.mxu1 %v4244_v38  ;;  %v822_v29 = vor.u32 %v820_v23, %v819_v35  ;;  %v1924_v44 = vsel %vm3753_vm11, %v1922_v13, %v1923_v9  ;;  %v449_v62 = vmul.f32 %v4116_v20, %v3603_v24  ;;  %v3587_v25 = vunpack.c.l.bf16 %v3627_v2 }
  0x85   : > { %v1270_v56 = vshrl.u32 %v1086_v34, 16  ;;  %v1273_v33 = vshll.u32 %v1086_v34, 16  ;;  %v827_v60 = vrot.slane %v825_v61, 7  ;;  %1961 = vrot.lane.b32.xlu0 %v1854_v5, %s3663_s28  ;;  %v1279_v39 = vshll.u32 %v1087_v0, 16  ;;  %v4250_v22 = vld [vmem:[#allocation2 + $0x4c] sm:$0xf] }
  0x86   : > { %v1283_v32 = vshrl.u32 %v1087_v0, 16  ;;  %v823_v43 = vrot.slane %v819_v35, 4  ;;  %v1558_v42 = vpop.permute.xlu2 %1557  ;;  %v3238_v57 = vrot.slane %v4241_v14, 9  ;;  %v1857_v46 = vrot.slane %v4250_v22, 5  ;;  %v1000_v41 = vld [vmem:[#allocation2 + $0x18] sm:$0xf] }
  0x87   : > { %v1272_v45 = vrot.slane %v1270_v56, 4  ;;  %v1275_v16 = vrot.slane %v1273_v33, 5  ;;  %v1088_v48 = vld [vmem:[#allocation2 + $0x50] sm:$0x1]  ;;  %v830_v50 = vor.u32 %v828_v47, %v827_v60  ;;  %v832_v51 = vrot.slane %v827_v60, 4  ;;  %1999 = vrot.lane.b32.xlu1 %v4186_v10, %s3663_s28 }
  0x88   : > { %v1281_v55 = vrot.slane %v1279_v39, 5  ;;  %v1285_v37 = vrot.slane %v1283_v32, 4  ;;  %v1289_v11 = vshll.u32 %v1088_v48, 16  ;;  %1666 = vst.msk [vmem:[#allocation3] sm:$0xf] %vm1665_vm15, %v1558_v42  ;;  %1959 = vrot.lane.b32.xlu2 %v1851_v21, %s3663_s28  ;;  %v990_v10 = vsel %vm3786_vm12, %v822_v29, %v989_v40 }
  0x89   : > { %v1276_v58 = vor.u32 %v1275_v16, %v1272_v45  ;;  %v831_v59 = vsel %vm3802_vm14, %v823_v43, %v830_v50  ;;  %v994_v63 = vsel %vm3706_vm3, %v832_v51, %v993_v36  ;;  %2048 = vst.msk [vmem:[#allocation3] sm:$0xf] %vm2047_vm2, %v4157_v52  ;;  %v508_v52 = vmax.f32 %v4231_v31, 0.0  ;;  %v270_v23 = vld [vmem:[#allocation2 + $0x54] sm:$0x1] }
  0x8a   : > { %v1286_v5 = vor.u32 %v1285_v37, %v1281_v55  ;;  %v1291_v7 = vrot.slane %v1289_v11, 5  ;;  %992 = vst.msk [vmem:[#allocation2 + $0xc4] sm:$0xf] %vm237_vm0, %v831_v59  ;;  %v450_v6 = vmul.f32 %v4116_v20, %v3604_v19  ;;  %v4276_v30 = vpack.c.bf16 %v507_v18, %v507_v18  ;;  %v4279_v54 = vld [vmem:[#allocation2 + $0x98] sm:$0x1] }
  0x8b   : > { %v1277_v12 = vrot.slane %v1276_v58, 4  ;;  %995 = vst [vmem:[#allocation2 + $0xc8] sm:$0x1] %v994_v63  ;;  %v540_v8 = vpack.c.bf16 %v508_v52, %v508_v52  ;;  %v3588_v31 = vunpack.c.h.bf16 %v3627_v2  ;;  %v485_v61 = vadd.f32 %v4141_v53, %v449_v62  ;;  %v4288_v9 = vld [vmem:[#allocation2 + $0x60] sm:$0x1] }
  0x8c   : > { %v1287_v27 = vrot.slane %v1286_v5, 4  ;;  %991 = vst [vmem:[#allocation2 + $0xc0] sm:$0xf] %v990_v10  ;;  %v486_v47 = vadd.f32 %v4141_v53, %v450_v6  ;;  %v271_v13 = vsel %vm3706_vm3, 0, %v270_v23  ;;  %v664_v34 = vshrl.u32 %v4276_v30, 16 }
  0x8d   : > { %v1282_v28 = vsel %vm3794_vm13, %v1277_v12, %v1281_v55  ;;  %1036 = vst.msk [vmem:[#allocation3 + $0x10] sm:$0xf] %vm237_vm0, %v1000_v41  ;;  %v672_v35 = vshrl.u32 %v540_v8, 16  ;;  %v675_v36 = vshll.u32 %v540_v8, 16  ;;  %v667_v21 = vshll.u32 %v4276_v30, 16 }
  0x8e   : > { %1581 = vrot.lane.b32.xlu0 %v1282_v28, %s3664_s29  ;;  %v1292_v49 = vsel %vm3794_vm13, %v1287_v27, %v1291_v7  ;;  %272 = vst [vmem:[#allocation2 + $0x54] sm:$0x1] %v271_v13  ;;  %v517_v14 = vmax.f32 %v485_v61, 0.0  ;;  %v518_v24 = vmax.f32 %v486_v47, 0.0  ;;  %v342_v0 = vsel %vm3722_vm6, 0, %v4279_v54 }
  0x8f   : > { %v274_v56 = vsel %vm3706_vm3, 0, %v4288_v9  ;;  %1583 = vrot.lane.b32.xlu1 %v1292_v49, %s3664_s29  ;;  %v1858_v60 = vsel %vm3753_vm11, %v3238_v57, %v1857_v46  ;;  %vm2240_vm5 = vcmask 97280   ;;  %v666_v19 = vrot.slane %v664_v34, 7  ;;  %v930_v48 = vld [vmem:[#allocation2 + $0x5c] sm:$0x1] }
  0x90   : > { %2001 = vrot.lane.b32.xlu2 %v1924_v44, %s3663_s28  ;;  %v674_v39 = vrot.slane %v672_v35, 7  ;;  %v441_v32 = vmul.f32 %v4116_v20, %v3587_v25  ;;  %v4306_v50 = vmul.f32 %v4116_v20, %v3588_v31  ;;  %v549_v57 = vpack.c.bf16 %v517_v14, %v517_v14  ;;  %v1001_v23 = vld [vmem:[#allocation2 + $0x1c] sm:$0xf]  ;;  %v961_v47 = vld [vmem:[#allocation2 + $0x90] sm:$0xf] }
  0x91   : > { %v1117_v33 = vld [vmem:[#allocation2 + $0xc4] sm:$0xf]  ;;  %v670_v37 = vrot.slane %v666_v19, 4  ;;  %v550_v5 = vpack.c.bf16 %v518_v24, %v518_v24  ;;  %1037 = vst.msk [vmem:[#allocation3 + $0x14] sm:$0xf] %vm237_vm0, %v1001_v23 }
  0x92   : > { %v1751_v40 = vld [vmem:[#allocation2 + $0xc4] sm:$0xf]  ;;  %v1118_v43 = vld [vmem:[#allocation2 + $0xc8] sm:$0x1]  ;;  %v1519_v42 = vshll.u32 %v1117_v33, 16  ;;  %v1523_v29 = vshrl.u32 %v1117_v33, 16  ;;  %v677_v11 = vor.u32 %v675_v36, %v674_v39  ;;  %v669_v36 = vor.u32 %v667_v21, %v666_v19 }
  0x93   : > { %v1942_v45 = vpop.permute.xlu0 %1941  ;;  %v1927_v16 = vrot.slane %v1751_v40, 5  ;;  %v1529_v51 = vshll.u32 %v1118_v43, 16  ;;  %v1750_v55 = vld [vmem:[#allocation2 + $0xc0] sm:$0xe]  ;;  %v1752_v2 = vld [vmem:[#allocation2 + $0xc8] sm:$0x1]  ;;  %v477_v19 = vadd.f32 %v4141_v53, %v441_v32  ;;  %v478_v9 = vadd.f32 %v4141_v53, %v4306_v50 }
  0x94   : > { %2049 = vst.msk [vmem:[#allocation3 + $0x4] sm:$0xf] %vm2047_vm2, %v1942_v45  ;;  %v4309_v58 = vrot.slane %v1519_v42, 5  ;;  %v1525_v59 = vrot.slane %v1523_v29, 4  ;;  %v3248_v63 = vrot.slane %v1750_v55, 9  ;;  %v1930_v10 = vrot.slane %v1752_v2, 5 }
  0x95   : > { %v1929_v7 = vrot.slane %v1927_v16, 4  ;;  %v678_v12 = vsel %vm3802_vm14, %v670_v37, %v677_v11  ;;  %v679_v44 = vrot.slane %v674_v39, 4  ;;  %v1116_v18 = vld [vmem:[#allocation2 + $0xc0] sm:$0xf]  ;;  %v1531_v27 = vrot.slane %v1529_v51, 5 }
  0x96   : > { %v1526_v52 = vor.u32 %v1525_v59, %v4309_v58  ;;  %929 = vst.msk [vmem:[#allocation2 + $0x58] sm:$0xf] %vm237_vm0, %v678_v12  ;;  %v1510_v41 = vshrl.u32 %v1116_v18, 16  ;;  %v1513_v62 = vshll.u32 %v1116_v18, 16  ;;  %v4317_v6 = vsel %vm3753_vm11, %v3248_v63, %v1927_v16  ;;  %v926_v8 = vld [vmem:[#allocation2 + $0x54] sm:$0xf] }
  0x97   : > { %v931_v25 = vsel %vm3706_vm3, %v679_v44, %v930_v48  ;;  %v749_v28 = vshrl.u32 %v549_v57, 16  ;;  %v752_v30 = vshll.u32 %v549_v57, 16  ;;  %v757_v61 = vshrl.u32 %v550_v5, 16  ;;  %1963 = vrot.lane.b32.xlu1 %v1858_v60, %s3663_s28  ;;  %v1722_v14 = vld [vmem:[#allocation2 + $0x50] sm:$0x1]  ;;  %v3628_v16 = vld [vmem:[%s3731_s23 + $0x40] sm:$0xff]  }
  0x98   : > { %v1527_v54 = vrot.slane %v1526_v52, 4  ;;  %932 = vst [vmem:[#allocation2 + $0x5c] sm:$0x1] %v931_v25  ;;  %v1512_v31 = vrot.slane %v1510_v41, 4  ;;  %v1515_v49 = vrot.slane %v1513_v62, 5  ;;  %v1931_v13 = vsel %vm3753_vm11, %v1929_v7, %v1930_v10 }
  0x99   : > { %v751_v34 = vrot.slane %v749_v28, 7  ;;  %v760_v35 = vshll.u32 %v550_v5, 16  ;;  %v759_v39 = vrot.slane %v757_v61, 7  ;;  %v1859_v43 = vrot.slane %v1857_v46, 4  ;;  %343 = vst [vmem:[#allocation2 + $0x98] sm:$0x1] %v342_v0 }
  0x9a   : > { %v1532_v24 = vsel %vm3794_vm13, %v1527_v54, %v1531_v27  ;;  %v1516_v40 = vor.u32 %v1515_v49, %v1512_v31  ;;  %v927_v21 = vsel %vm3786_vm12, %v669_v36, %v926_v8  ;;  %275 = vst [vmem:[#allocation2 + $0x60] sm:$0x1] %v274_v56  ;;  %v4337_v29 = vld [vmem:[#allocation2 + $0x68] sm:$0x1]  ;;  %v1860_v0 = vrot.slane %v1722_v14, 5 }
  0x9b   : > { %v3509_v33 = vld [vmem:[#allocation3] sm:$0xff]  ;;  %1623 = vrot.lane.b32.xlu0 %v1532_v24, %s3664_s29  ;;  %v754_v60 = vor.u32 %v752_v30, %v751_v34  ;;  %v755_v42 = vrot.slane %v751_v34, 4  ;;  %v762_v46 = vor.u32 %v760_v35, %v759_v39  ;;  %928 = vst [vmem:[#allocation2 + $0x54] sm:$0xf] %v927_v21  ;;  %v764_v45 = vrot.slane %v759_v39, 4 }
  0x9c   : > { %3402 = vmatmul.msk.bf16.vlgmr.msra.gmra.mxu1 %vm2240_vm5, %v3509_v33  ;;  %v1517_v22 = vrot.slane %v1516_v40, 4  ;;  %v509_v56 = vmax.f32 %v477_v19, 0.0  ;;  %v330_v32 = vsel %vm3722_vm6, 0, %v4337_v29  ;;  %v998_v63 = vld [vmem:[#allocation2 + $0xc] sm:$0xf]  ;;  %v510_v5 = vmax.f32 %v478_v9, 0.0  ;;  %v4362_v52 = vpop.permute.xlu2 %1945 }
  0x9d   : > { %v1090_v48 = vld [vmem:[#allocation2 + $0x58] sm:$0xf]  ;;  %v962_v51 = vsel %vm3786_vm12, %v754_v60, %v961_v47  ;;  %v763_v59 = vsel %vm3802_vm14, %v755_v42, %v762_v46  ;;  %v3591_v10 = vunpack.c.l.bf16 %v3628_v16  ;;  %v3592_v27 = vunpack.c.h.bf16 %v3628_v16  ;;  %1034 = vst.msk [vmem:[#allocation3 + $0x8] sm:$0xf] %vm237_vm0, %v998_v63 }
  0x9e   : > { %v4343_v55 = vld [vmem:[#allocation2 + $0x58] sm:$0xf]  ;;  %v1303_v37 = vshll.u32 %v1090_v48, 16  ;;  %v1307_v11 = vshrl.u32 %v1090_v48, 16  ;;  %v1522_v57 = vsel %vm3794_vm13, %v1517_v22, %v4309_v58  ;;  %963 = vst [vmem:[#allocation2 + $0x90] sm:$0xf] %v962_v51  ;;  %v541_v7 = vpack.c.bf16 %v509_v56, %v509_v56 }
  0x9f   : > { %v1091_v2 = vld [vmem:[#allocation2 + $0x5c] sm:$0x1]  ;;  %1621 = vrot.lane.b32.xlu2 %v1522_v57, %s3664_s29  ;;  %964 = vst.msk [vmem:[#allocation2 + $0x94] sm:$0xf] %vm237_vm0, %v763_v59  ;;  %v1864_v50 = vrot.slane %v4343_v55, 5  ;;  %2005 = vrot.lane.b32.xlu1 %v1931_v13, %s3663_s28  ;;  %v542_v28 = vpack.c.bf16 %v510_v5, %v510_v5  ;;  %v1861_v47 = vsel %vm3753_vm11, %v1859_v43, %v1860_v0 }
  0xa0   : > { %v4358_v12 = vrot.slane %v1303_v37, 5  ;;  %v1309_v44 = vrot.slane %v1307_v11, 4  ;;  %v1313_v18 = vshll.u32 %v1091_v2, 16  ;;  %v4360_v58 = vld [vmem:[#allocation2 + $0x5c] sm:$0x1]  ;;  %v681_v30 = vshrl.u32 %v541_v7, 16  ;;  %v1948_v8 = vpop.permute.xlu1 %1947 }
  0xa1   : > { %v4367_v41 = vrot.slane %v1864_v50, 4  ;;  %v1867_v62 = vrot.slane %v4360_v58, 5  ;;  %v965_v25 = vld [vmem:[#allocation2 + $0x98] sm:$0x1]  ;;  %v684_v49 = vshll.u32 %v541_v7, 16  ;;  %v689_v34 = vshrl.u32 %v542_v28, 16 }
  0xa2   : > { %v1310_v23 = vor.u32 %v1309_v44, %v4358_v12  ;;  %v1315_v54 = vrot.slane %v1313_v18, 5  ;;  %v966_v31 = vsel %vm3706_vm3, %v764_v45, %v965_v25  ;;  %v4376_v61 = vld [vmem:[#allocation2 + $0x54] sm:$0xe]  ;;  %v683_v13 = vrot.slane %v681_v30, 7  ;;  %v933_v35 = vld [vmem:[#allocation2 + $0x60] sm:$0xf] }
  0xa3   : > { %2003 = vrot.lane.b32.xlu0 %v4317_v6, %s3663_s28  ;;  %967 = vst [vmem:[#allocation2 + $0x98] sm:$0x1] %v966_v31  ;;  %v3239_v14 = vrot.slane %v4376_v61, 9  ;;  %v692_v24 = vshll.u32 %v542_v28, 16  ;;  %v1089_v33 = vld [vmem:[#allocation2 + $0x54] sm:$0xf]  ;;  %v443_v40 = vmul.f32 %v4116_v20, %v3591_v10  ;;  %v444_v0 = vmul.f32 %v4116_v20, %v3592_v27 }
  0xa4   : > { %v1311_v36 = vrot.slane %v1310_v23, 4  ;;  %v686_v60 = vor.u32 %v684_v49, %v683_v13  ;;  %v687_v42 = vrot.slane %v683_v13, 4  ;;  %v691_v6 = vrot.slane %v689_v34, 7  ;;  %331 = vst [vmem:[#allocation2 + $0x68] sm:$0x1] %v330_v32  ;;  %v4395_v7 = vld [vmem:[%s3731_s23 + $0x48] sm:$0xff]   ;;  %v4402_v27 = vpop.permute.xlu2 %1953 }
  0xa5   : > { %v1104_v39 = vld [vmem:[#allocation2 + $0x90] sm:$0xf]  ;;  %v1294_v21 = vshrl.u32 %v1089_v33, 16  ;;  %v1297_v2 = vshll.u32 %v1089_v33, 16  ;;  %v1002_v5 = vld [vmem:[#allocation2 + $0x24] sm:$0xf]  ;;  %v479_v28 = vadd.f32 %v4141_v53, %v443_v40 }
  0xa6   : > { %v1316_v19 = vsel %vm3794_vm13, %v1311_v36, %v1315_v54  ;;  %v1105_v43 = vld [vmem:[#allocation2 + $0x94] sm:$0xf]  ;;  %v1414_v29 = vshrl.u32 %v1104_v39, 16  ;;  %v1417_v22 = vshll.u32 %v1104_v39, 16  ;;  %v694_v51 = vor.u32 %v692_v24, %v691_v6  ;;  %1038 = vst.msk [vmem:[#allocation3 + $0x18] sm:$0xf] %vm237_vm0, %v1002_v5 }
  0xa7   : > { %v4384_v46 = vld [vmem:[#allocation2 + $0x94] sm:$0xf]  ;;  %v1423_v45 = vshll.u32 %v1105_v43, 16  ;;  %v1427_v16 = vshrl.u32 %v1105_v43, 16  ;;  %1965 = vrot.lane.b32.xlu2 %v1861_v47, %s3663_s28  ;;  %v1566_v9 = vpop.permute.xlu0 %1565  ;;  %v934_v11 = vsel %vm3786_vm12, %v686_v60, %v933_v35  ;;  %v1296_v57 = vrot.slane %v1294_v21, 4 }
  0xa8   : > { %v1899_v48 = vrot.slane %v4384_v46, 5  ;;  %v1416_v56 = vrot.slane %v1414_v29, 4  ;;  %v1419_v37 = vrot.slane %v1417_v22, 5  ;;  %1670 = vst.msk [vmem:[#allocation3 + $0x10] sm:$0xf] %vm1665_vm15, %v1566_v9  ;;  %v695_v63 = vsel %vm3802_vm14, %v687_v42, %v694_v51  ;;  %v4398_v10 = vpop.permute.xlu1 %1943 }
  0xa9   : > { %v1425_v59 = vrot.slane %v1423_v45, 5  ;;  %2052 = vst.msk [vmem:[#allocation3 + $0x10] sm:$0xf] %vm2047_vm2, %v1948_v8  ;;  %v1429_v25 = vrot.slane %v1427_v16, 4  ;;  %v1299_v30 = vrot.slane %v1297_v2, 5  ;;  %v696_v23 = vrot.slane %v691_v6, 4 }
  0xaa   : > { %v1420_v32 = vor.u32 %v1419_v37, %v1416_v56  ;;  %v1740_v44 = vld [vmem:[#allocation2 + $0x98] sm:$0x1]  ;;  %v1901_v18 = vrot.slane %v1899_v48, 4  ;;  %935 = vst [vmem:[#allocation2 + $0x60] sm:$0xf] %v934_v11  ;;  %v480_v47 = vadd.f32 %v4141_v53, %v444_v0  ;;  %v511_v13 = vmax.f32 %v479_v28, 0.0 }
  0xab   : > { %1587 = vrot.lane.b32.xlu0 %v1316_v19, %s3664_s29  ;;  %v3484_v8 = vld [vmem:[%s5001_s3 + $0x10] sm:$0xf]  ;;  %936 = vst.msk [vmem:[#allocation2 + $0x64] sm:$0xf] %vm237_vm0, %v695_v63  ;;  %v3508_v31 = vld [vmem:[%s5001_s3 + $0x10] sm:$0x30]  ;;  %v1430_v49 = vor.u32 %v1429_v25, %v1425_v59  ;;  %v1300_v34 = vor.u32 %v1299_v30, %v1296_v57  ;;  %v3595_v42 = vunpack.c.l.bf16 %v4395_v7  ;;  %v1865_v22 = vsel %vm3753_vm11, %v3239_v14, %v1864_v50 }
  0xac   : > { %v1421_v54 = vrot.slane %v1420_v32, 4  ;;  %v3485_v35 = vor.u32 %v3508_v31, %v3484_v8  ;;  %v999_v36 = vld [vmem:[#allocation2 + $0x10] sm:$0xf]  ;;  %v1106_v24 = vld [vmem:[#allocation2 + $0x98] sm:$0x1]  ;;  %v1902_v40 = vrot.slane %v1740_v44, 5  ;;  %v3596_v9 = vunpack.c.h.bf16 %v4395_v7 }
  0xad   : > { %v937_v39 = vld [vmem:[#allocation2 + $0x68] sm:$0x1]  ;;  %1035 = vst.msk [vmem:[#allocation3 + $0xc] sm:$0xf] %vm237_vm0, %v999_v36  ;;  %v1433_v60 = vshll.u32 %v1106_v24, 16  ;;  %v1301_v6 = vrot.slane %v1300_v34, 4  ;;  %v4445_v14 = vpack.c.bf16 %v511_v13, %v511_v13  ;;  %v445_v57 = vmul.f32 %v4116_v20, %v3595_v42 }
  0xae   : > { %v1426_v33 = vsel %vm3794_vm13, %v1421_v54, %v1425_v59  ;;  %v938_v21 = vsel %vm3706_vm3, %v696_v23, %v937_v39  ;;  %v4423_v19 = vsel %vm2289_vm4, %v3485_v35, 0  ;;  %v4425_v43 = vrot.slane %v1430_v49, 4  ;;  %v1023_v29 = vld [vmem:[#allocation2 + $0xa0] sm:$0xf]  ;;  %v1022_v16 = vld [vmem:[#allocation2 + $0x9c] sm:$0xf] }
  0xaf   : > { %1605 = vrot.lane.b32.xlu1 %v1426_v33, %s3664_s29  ;;  %v1568_v0 = vpop.permute.xlu0 %1567  ;;  %939 = vst [vmem:[#allocation2 + $0x68] sm:$0x1] %v938_v21  ;;  %2783 = vmatpush.bf16.msra.mxu2 %v4423_v19  ;;  %v1435_v45 = vrot.slane %v1433_v60, 5  ;;  %v512_v51 = vmax.f32 %v480_v47, 0.0  ;;  %v1306_v55 = vsel %vm3794_vm13, %v1301_v6, %v4358_v12  ;;  %v3316_v61 = vld [vmem:[%s5001_s3 + $0x8] sm:$0xf]  ;;  %v1868_v12 = vsel %vm3753_vm11, %v4367_v41, %v1867_v62 }
  0xb0   : > { %1671 = vst.msk [vmem:[#allocation3 + $0x14] sm:$0xf] %vm1665_vm15, %v1568_v0  ;;  %v3507_v50 = vld [vmem:[%s5001_s3 + $0x8] sm:$0x30]  ;;  %1585 = vrot.lane.b32.xlu2 %v1306_v55, %s3664_s29  ;;  %v1003_v37 = vld [vmem:[#allocation2 + $0x28] sm:$0xf]  ;;  %v1903_v63 = vsel %vm3753_vm11, %v1901_v18, %v1902_v40  ;;  %v446_v23 = vmul.f32 %v4116_v20, %v3596_v9  ;;  %v481_v47 = vadd.f32 %v4141_v53, %v445_v57 }
  0xb1   : > { %v1092_v56 = vld [vmem:[#allocation2 + $0x60] sm:$0xf]  ;;  %1059 = vst.msk [vmem:[#allocation3 + $0x6c] sm:$0xf] %vm237_vm0, %v1023_v29  ;;  %v3317_v11 = vor.u32 %v3507_v50, %v3316_v61  ;;  %v4456_v59 = vpop.permute.xlu1 %1951  ;;  %v544_v58 = vpack.c.bf16 %v512_v51, %v512_v51  ;;  %v698_v18 = vshrl.u32 %v4445_v14, 16  ;;  %v1436_v31 = vsel %vm3794_vm13, %v4425_v43, %v1435_v45  ;;  %v3630_v0 = vld [vmem:[%s3731_s23 + $0x50] sm:$0xff]  }
  0xb2   : > { %v1093_v2 = vld [vmem:[#allocation2 + $0x64] sm:$0xf]  ;;  %v1318_v5 = vshrl.u32 %v1092_v56, 16  ;;  %v1321_v7 = vshll.u32 %v1092_v56, 16  ;;  %v1726_v28 = vld [vmem:[#allocation2 + $0x60] sm:$0xe]  ;;  %v3599_v51 = vunpack.c.l.bf16 %v3630_v0  ;;  %v3600_v56 = vunpack.c.h.bf16 %v3630_v0 }
  0xb3   : > { %1967 = vrot.lane.b32.xlu0 %v1865_v22, %s3663_s28  ;;  %v1727_v32 = vld [vmem:[#allocation2 + $0x64] sm:$0xf]  ;;  %v1327_v44 = vshll.u32 %v1093_v2, 16  ;;  %1058 = vst.msk [vmem:[#allocation3 + $0x68] sm:$0xf] %vm237_vm0, %v1022_v16  ;;  %v1610_v30 = vpop.permute.xlu2 %1609  ;;  %v2291_v62 = vsel %vm2289_vm4, %v3317_v11, 0  ;;  %v482_v22 = vadd.f32 %v4141_v53, %v446_v23 }
  0xb4   : > { %v1871_v25 = vrot.slane %v1727_v32, 5  ;;  %v1320_v8 = vrot.slane %v1318_v5, 4  ;;  %v1323_v41 = vrot.slane %v1321_v7, 5  ;;  %1692 = vst.msk [vmem:[#allocation3 + $0x68] sm:$0xf] %vm1665_vm15, %v1610_v30  ;;  %v1331_v54 = vshrl.u32 %v1093_v2, 16  ;;  %2300 = vmatpush.bf16.msra.mxu0 %v2291_v62  ;;  %3636 = vmatpush.bf16.msra.mxu3 %v2291_v62 }
  0xb5   : > { %1039 = vst.msk [vmem:[#allocation3 + $0x1c] sm:$0xf] %vm237_vm0, %v1003_v37  ;;  %v1738_v49 = vld [vmem:[#allocation2 + $0x90] sm:$0xe]  ;;  %v4471_v34 = vrot.slane %v1327_v44, 5  ;;  %v3240_v35 = vrot.slane %v1726_v28, 9  ;;  %v447_v46 = vmul.f32 %v4116_v20, %v3599_v51 }
  0xb6   : > { %v1324_v13 = vor.u32 %v1323_v41, %v1320_v8  ;;  %v332_v36 = vld [vmem:[#allocation2 + $0x74] sm:$0x1]  ;;  %v700_v24 = vrot.slane %v698_v18, 7  ;;  %v3244_v40 = vrot.slane %v1738_v49, 9  ;;  %v706_v60 = vshrl.u32 %v544_v58, 16 }
  0xb7   : > { %1969 = vrot.lane.b32.xlu1 %v1868_v12, %s3663_s28  ;;  %v1562_v33 = vpop.permute.xlu0 %1561  ;;  %v333_v39 = vsel %vm3722_vm6, 0, %v332_v36  ;;  %v709_v42 = vshll.u32 %v544_v58, 16  ;;  %v276_v6 = vld [vmem:[#allocation2 + $0x6c] sm:$0x1]  ;;  %v4477_v43 = vrot.slane %v1871_v25, 4  ;;  %v1333_v61 = vrot.slane %v1331_v54, 4 }
  0xb8   : > { %3637 = vmatpush.bf16.msrb.mxu3 %v4244_v38  ;;  %v1325_v21 = vrot.slane %v1324_v13, 4  ;;  %1668 = vst.msk [vmem:[#allocation3 + $0x8] sm:$0xf] %vm1665_vm15, %v1562_v33  ;;  %v704_v29 = vrot.slane %v700_v24, 4  ;;  %1607 = vrot.lane.b32.xlu2 %v1436_v31, %s3664_s29  ;;  %v708_v38 = vrot.slane %v706_v60, 7  ;;  %v277_v45 = vsel %vm3706_vm3, 0, %v276_v6 }
  0xb9   : > { %2050 = vst.msk [vmem:[#allocation3 + $0x8] sm:$0xf] %vm2047_vm2, %v4398_v10  ;;  %v1004_v16 = vld [vmem:[#allocation2 + $0x30] sm:$0xf]  ;;  %v1950_v9 = vpop.permute.xlu1 %1949  ;;  %v1094_v55 = vld [vmem:[#allocation2 + $0x68] sm:$0x1]  ;;  %v1872_v11 = vsel %vm3753_vm11, %v3240_v35, %v1871_v25  ;;  %v1900_v57 = vsel %vm3753_vm11, %v3244_v40, %v1899_v48  ;;  %v448_v48 = vmul.f32 %v4116_v20, %v3600_v56  ;;  %v483_v18 = vadd.f32 %v4141_v53, %v447_v46 }
  0xba   : > { %334 = vst [vmem:[#allocation2 + $0x74] sm:$0x1] %v333_v39  ;;  %v513_v50 = vmax.f32 %v481_v47, 0.0  ;;  %v1330_v10 = vsel %vm3794_vm13, %v1325_v21, %v4471_v34  ;;  %v1728_v37 = vld [vmem:[#allocation2 + $0x68] sm:$0x1]  ;;  %v711_v12 = vor.u32 %v709_v42, %v708_v38  ;;  %v701_v2 = vshll.u32 %v4445_v14, 16 }
  0xbb   : > { %1989 = vrot.lane.b32.xlu0 %v1903_v63, %s3663_s28  ;;  %2053 = vst.msk [vmem:[#allocation3 + $0x14] sm:$0xf] %vm2047_vm2, %v1950_v9  ;;  %v279_v63 = vld [vmem:[#allocation2 + $0x78] sm:$0x1]  ;;  %v514_v7 = vmax.f32 %v482_v22, 0.0  ;;  %v1337_v25 = vshll.u32 %v1094_v55, 16  ;;  %v1334_v14 = vor.u32 %v1333_v61, %v4471_v34  ;;  %v484_v54 = vadd.f32 %v4141_v53, %v448_v48 }
  0xbc   : > { %278 = vst [vmem:[#allocation2 + $0x6c] sm:$0x1] %v277_v45  ;;  %v280_v5 = vsel %vm3706_vm3, 0, %v279_v63  ;;  %v545_v32 = vpack.c.bf16 %v513_v50, %v513_v50  ;;  %v712_v44 = vsel %vm3802_vm14, %v704_v29, %v711_v12  ;;  %v713_v28 = vrot.slane %v708_v38, 4  ;;  %v1005_v51 = vld [vmem:[#allocation2 + $0x34] sm:$0xf] }
  0xbd   : > { %1040 = vst.msk [vmem:[#allocation3 + $0x20] sm:$0xf] %vm237_vm0, %v1004_v16  ;;  %v546_v30 = vpack.c.bf16 %v514_v7, %v514_v7  ;;  %v1874_v23 = vrot.slane %v1728_v37, 5  ;;  %v703_v20 = vor.u32 %v701_v2, %v700_v24  ;;  %v1339_v34 = vrot.slane %v1337_v25, 5  ;;  %v335_v50 = vld [vmem:[#allocation2 + $0x80] sm:$0x1] }
  0xbe   : > { %943 = vst.msk [vmem:[#allocation2 + $0x70] sm:$0xf] %vm237_vm0, %v712_v44  ;;  %v715_v58 = vshrl.u32 %v545_v32, 16  ;;  %v718_v62 = vshll.u32 %v545_v32, 16  ;;  %v515_v35 = vmax.f32 %v483_v18, 0.0  ;;  %v1335_v24 = vrot.slane %v1334_v14, 4 }
  0xbf   : > { %1589 = vrot.lane.b32.xlu1 %v1330_v10, %s3664_s29  ;;  %v1570_v8 = vpop.permute.xlu0 %1569  ;;  %v1574_v41 = vpop.permute.xlu2 %1573  ;;  %281 = vst [vmem:[#allocation2 + $0x78] sm:$0x1] %v280_v5  ;;  %v723_v49 = vshrl.u32 %v546_v30, 16  ;;  %v726_v47 = vshll.u32 %v546_v30, 16  ;;  %v516_v6 = vmax.f32 %v484_v54, 0.0  ;;  %v336_v48 = vsel %vm3722_vm6, 0, %v335_v50 }
  0xc0   : > { %1672 = vst.msk [vmem:[#allocation3 + $0x18] sm:$0xf] %vm1665_vm15, %v1570_v8  ;;  %v717_v31 = vrot.slane %v715_v58, 7  ;;  %1987 = vrot.lane.b32.xlu2 %v1900_v57, %s3663_s28  ;;  %v4530_v22 = vpack.c.bf16 %v515_v35, %v515_v35  ;;  %v1024_v7 = vld [vmem:[#allocation2 + $0xa8] sm:$0xf] }
  0xc1   : > { %2054 = vst.msk [vmem:[#allocation3 + $0x18] sm:$0xf] %vm2047_vm2, %v4456_v59  ;;  %v944_v13 = vld [vmem:[#allocation2 + $0x74] sm:$0x1]  ;;  %v1564_v36 = vpop.permute.xlu1 %1563  ;;  %v4518_v39 = vrot.slane %v723_v49, 7  ;;  %v1875_v59 = vsel %vm3753_vm11, %v4477_v43, %v1874_v23  ;;  %v548_v43 = vpack.c.bf16 %v516_v6, %v516_v6 }
  0xc2   : > { %v3541_v33 = vld [vmem:[#allocation3 + $0x10] sm:$0xff]  ;;  %v945_v53 = vsel %vm3706_vm3, %v713_v28, %v944_v13  ;;  %1674 = vst.msk [vmem:[#allocation3 + $0x20] sm:$0xf] %vm1665_vm15, %v1574_v41  ;;  %v721_v40 = vrot.slane %v717_v31, 4  ;;  %v720_v42 = vor.u32 %v718_v62, %v717_v31  ;;  %v732_v57 = vshrl.u32 %v4530_v22, 16 }
  0xc3   : > { %1971 = vrot.lane.b32.xlu0 %v1872_v11, %s3663_s28  ;;  %1669 = vst.msk [vmem:[#allocation3 + $0xc] sm:$0xf] %vm1665_vm15, %v1564_v36  ;;  %v940_v60 = vld [vmem:[#allocation2 + $0x6c] sm:$0xf]  ;;  %3486 = vmatmul.msk.bf16.vlgmr.msra.gmra.mxu2 %vm2240_vm5, %v3541_v33  ;;  %v728_v29 = vor.u32 %v726_v47, %v4518_v39  ;;  %v740_v63 = vshrl.u32 %v548_v43, 16  ;;  %v743_v44 = vshll.u32 %v548_v43, 16 }
  0xc4   : > { %2051 = vst.msk [vmem:[#allocation3 + $0xc] sm:$0xf] %vm2047_vm2, %v4362_v52  ;;  %v941_v21 = vsel %vm3786_vm12, %v703_v20, %v940_v60  ;;  %v1340_v52 = vsel %vm3794_vm13, %v1335_v24, %v1339_v34  ;;  %v1025_v11 = vld [vmem:[#allocation2 + $0xac] sm:$0xf]  ;;  %v282_v32 = vld [vmem:[#allocation2 + $0x84] sm:$0x1] }
  0xc5   : > { %946 = vst [vmem:[#allocation2 + $0x74] sm:$0x1] %v945_v53  ;;  %v1096_v0 = vld [vmem:[#allocation2 + $0x70] sm:$0xf]  ;;  %v729_v16 = vsel %vm3802_vm14, %v721_v40, %v728_v29  ;;  %v4552_v28 = vrot.slane %v740_v63, 7  ;;  %v734_v58 = vrot.slane %v732_v57, 7 }
  0xc6   : > { %v1351_v38 = vshll.u32 %v1096_v0, 16  ;;  %v1355_v45 = vshrl.u32 %v1096_v0, 16  ;;  %942 = vst [vmem:[#allocation2 + $0x6c] sm:$0xf] %v941_v21  ;;  %v947_v55 = vld [vmem:[#allocation2 + $0x78] sm:$0xf] }
  0xc7   : > { %1973 = vrot.lane.b32.xlu1 %v1875_v59, %s3663_s28  ;;  %v1612_v9 = vpop.permute.xlu0 %1611  ;;  %950 = vst.msk [vmem:[#allocation2 + $0x7c] sm:$0xf] %vm237_vm0, %v729_v16  ;;  %v1616_v61 = vpop.permute.xlu2 %1615  ;;  %v948_v37 = vsel %vm3786_vm12, %v720_v42, %v947_v55  ;;  %v4544_v12 = vld [vmem:[#allocation2 + $0x70] sm:$0xf]  ;;  %v738_v54 = vrot.slane %v734_v58, 4  ;;  %v283_v49 = vsel %vm3706_vm3, 0, %v282_v32 }
  0xc8   : > { %1693 = vst.msk [vmem:[#allocation3 + $0x6c] sm:$0xf] %vm1665_vm15, %v1612_v9  ;;  %v4539_v56 = vrot.slane %v1351_v38, 5  ;;  %v1357_v10 = vrot.slane %v1355_v45, 4  ;;  %1591 = vrot.lane.b32.xlu2 %v1340_v52, %s3664_s29  ;;  %v1878_v30 = vrot.slane %v4544_v12, 5  ;;  %v730_v38 = vrot.slane %v4518_v39, 4 }
  0xc9   : > { %949 = vst [vmem:[#allocation2 + $0x78] sm:$0xf] %v948_v37  ;;  %v1572_v2 = vpop.permute.xlu1 %1571  ;;  %v338_v6 = vld [vmem:[#allocation2 + $0x8c] sm:$0x1]  ;;  %v735_v16 = vshll.u32 %v4530_v22, 16 }
  0xca   : > { %v1358_v5 = vor.u32 %v1357_v10, %v4539_v56  ;;  %1041 = vst.msk [vmem:[#allocation3 + $0x24] sm:$0xf] %vm237_vm0, %v1005_v51  ;;  %v339_v55 = vsel %vm3722_vm6, 0, %v338_v6  ;;  %v1006_v39 = vld [vmem:[#allocation2 + $0x3c] sm:$0xf] }
  0xcb   : > { %1673 = vst.msk [vmem:[#allocation3 + $0x1c] sm:$0xf] %vm1665_vm15, %v1572_v2  ;;  %v3525_v25 = vld [vmem:[#allocation3 + $0x8] sm:$0xff]  ;;  %v737_v2 = vor.u32 %v735_v16, %v734_v58 }
  0xcc   : > { %v3510_v46 = vld [vmem:[#allocation3 + $0x8] sm:$0xff]  ;;  %2055 = vst.msk [vmem:[#allocation3 + $0x1c] sm:$0xf] %vm2047_vm2, %v4402_v27  ;;  %v1097_v14 = vld [vmem:[#allocation2 + $0x74] sm:$0x1]  ;;  %3318 = vmatmul.msk.bf16.vlgmr.msra.gmra.mxu0 %vm2240_vm5, %v3525_v25  ;;  %v1359_v23 = vrot.slane %v1358_v5, 4  ;;  %v745_v27 = vor.u32 %v743_v44, %v4552_v28 }
  0xcd   : > { %3403 = vmatmul.msk.bf16.gmra.mxu1 %vm2240_vm5, %v3510_v46  ;;  %v1361_v8 = vshll.u32 %v1097_v14, 16  ;;  %v1729_v41 = vld [vmem:[#allocation2 + $0x6c] sm:$0xe]  ;;  %1061 = vst.msk [vmem:[#allocation3 + $0x74] sm:$0xf] %vm237_vm0, %v1025_v11  ;;  %v1880_v14 = vrot.slane %v1878_v30, 4 }
  0xce   : > { %v3241_v62 = vrot.slane %v1729_v41, 9  ;;  %v1099_v18 = vld [vmem:[#allocation2 + $0x7c] sm:$0xf]  ;;  %1695 = vst.msk [vmem:[#allocation3 + $0x74] sm:$0xf] %vm1665_vm15, %v1616_v61  ;;  %v746_v42 = vsel %vm3802_vm14, %v738_v54, %v745_v27  ;;  %v3526_v25 = vld [vmem:[#allocation3 + $0x10] sm:$0xff] }
  0xcf   : > { %v1363_v20 = vrot.slane %v1361_v8, 5  ;;  %v1992_v31 = vpop.permute.xlu0 %1991  ;;  %1060 = vst.msk [vmem:[#allocation3 + $0x70] sm:$0xf] %vm237_vm0, %v1024_v7  ;;  %v1095_v34 = vld [vmem:[#allocation2 + $0x6c] sm:$0xf]  ;;  %v1996_v35 = vpop.permute.xlu2 %1995  ;;  %v1375_v24 = vshll.u32 %v1099_v18, 16 }
  0xd0   : > { %v1879_v47 = vsel %vm3753_vm11, %v3241_v62, %v1878_v30  ;;  %2074 = vst.msk [vmem:[#allocation3 + $0x68] sm:$0xf] %vm2047_vm2, %v1992_v31  ;;  %v1098_v13 = vld [vmem:[#allocation2 + $0x78] sm:$0xf]  ;;  %v1342_v59 = vshrl.u32 %v1095_v34, 16  ;;  %v1345_v60 = vshll.u32 %v1095_v34, 16 }
  0xd1   : > { %v1364_v36 = vsel %vm3794_vm13, %v1359_v23, %v1363_v20  ;;  %1975 = vrot.lane.b32.xlu1 %v1879_v47, %s3663_s28  ;;  %v1366_v33 = vshrl.u32 %v1098_v13, 16  ;;  %v1369_v53 = vshll.u32 %v1098_v13, 16  ;;  %337 = vst [vmem:[#allocation2 + $0x80] sm:$0x1] %v336_v48  ;;  %v1994_v40 = vpop.permute.xlu1 %1993  ;;  %v1379_v43 = vshrl.u32 %v1099_v18, 16  ;;  %v3511_v46 = vld [vmem:[#allocation3 + $0x10] sm:$0xff] }
  0xd2   : > { %1595 = vrot.lane.b32.xlu0 %v1364_v36, %s3664_s29  ;;  %2075 = vst.msk [vmem:[#allocation3 + $0x6c] sm:$0xf] %vm2047_vm2, %v1994_v40  ;;  %v1344_v45 = vrot.slane %v1342_v59, 4  ;;  %v1347_v52 = vrot.slane %v1345_v60, 5  ;;  %v1377_v9 = vrot.slane %v1375_v24, 5  ;;  %v747_v54 = vrot.slane %v4552_v28, 4 }
  0xd3   : > { %v3542_v21 = vld [vmem:[#allocation3 + $0x18] sm:$0xff]  ;;  %v1368_v29 = vrot.slane %v1366_v33, 4  ;;  %v1371_v0 = vrot.slane %v1369_v53, 5  ;;  %284 = vst [vmem:[#allocation2 + $0x84] sm:$0x1] %v283_v49  ;;  %v1381_v11 = vrot.slane %v1379_v43, 4 }
  0xd4   : > { %3487 = vmatmul.msk.bf16.gmra.mxu2 %vm2240_vm5, %v3542_v21  ;;  %957 = vst.msk [vmem:[#allocation2 + $0x88] sm:$0xf] %vm237_vm0, %v746_v42  ;;  %v1348_v61 = vor.u32 %v1347_v52, %v1344_v45  ;;  %v4583_v50 = vld [vmem:[#allocation2 + $0x7c] sm:$0xf]  ;;  %v1731_v22 = vld [vmem:[#allocation2 + $0x74] sm:$0x1] }
  0xd5   : > { %v1372_v51 = vor.u32 %v1371_v0, %v1368_v29  ;;  %1043 = vst.msk [vmem:[#allocation3 + $0x2c] sm:$0xf] %vm237_vm0, %v1007_v17  ;;  %v1382_v23 = vor.u32 %v1381_v11, %v1377_v9  ;;  %v1885_v8 = vrot.slane %v4583_v50, 5  ;;  %v1881_v41 = vrot.slane %v1731_v22, 5  ;;  %v1026_v18 = vld [vmem:[#allocation2 + $0xb4] sm:$0xf] }
  0xd6   : > { %1042 = vst.msk [vmem:[#allocation3 + $0x28] sm:$0xf] %vm237_vm0, %v1006_v39  ;;  %v1349_v63 = vrot.slane %v1348_v61, 4  ;;  %v1732_v12 = vld [vmem:[#allocation2 + $0x78] sm:$0xe] }
  0xd7   : > { %v1373_v10 = vrot.slane %v1372_v51, 4  ;;  %v1576_v37 = vpop.permute.xlu0 %1575  ;;  %340 = vst [vmem:[#allocation2 + $0x8c] sm:$0x1] %v339_v55  ;;  %v1027_v27 = vld [vmem:[#allocation2 + $0xb8] sm:$0xf]  ;;  %v1383_v20 = vrot.slane %v1382_v23, 4  ;;  %v1882_v47 = vsel %vm3753_vm11, %v1880_v14, %v1881_v41 }
  0xd8   : > { %1675 = vst.msk [vmem:[#allocation3 + $0x24] sm:$0xf] %vm1665_vm15, %v1576_v37  ;;  %v951_v57 = vld [vmem:[#allocation2 + $0x80] sm:$0x1]  ;;  %v1354_v48 = vsel %vm3794_vm13, %v1349_v63, %v4539_v56  ;;  %v1887_v31 = vrot.slane %v1885_v8, 4  ;;  %v3242_v3 = vrot.slane %v1732_v12, 9 }
  0xd9   : > { %v1378_v5 = vsel %vm3794_vm13, %v1373_v10, %v1377_v9  ;;  %v952_v7 = vsel %vm3706_vm3, %v730_v38, %v951_v57  ;;  %v1614_v32 = vpop.permute.xlu1 %1613  ;;  %v3537_v44 = vld [vmem:[#allocation3 + $0x68] sm:$0xff]  ;;  %1593 = vrot.lane.b32.xlu2 %v1354_v48, %s3664_s29  ;;  %1062 = vst.msk [vmem:[#allocation3 + $0x78] sm:$0xf] %vm237_vm0, %v1026_v18  ;;  %v1008_v40 = vld [vmem:[#allocation2 + $0x48] sm:$0xf] }
  0xda   : > { %1597 = vrot.lane.b32.xlu0 %v1378_v5, %s3664_s29  ;;  %953 = vst [vmem:[#allocation2 + $0x80] sm:$0x1] %v952_v7  ;;  %v1580_v58 = vpop.permute.xlu2 %1579  ;;  %v954_v62 = vld [vmem:[#allocation2 + $0x84] sm:$0xf]  ;;  %3330 = vmatmul.msk.bf16.vlgmr.msra.gmra.mxu3 %vm2240_vm5, %v3537_v44  ;;  %v1028_v59 = vld [vmem:[#allocation2 + $0xc0] sm:$0xf]  ;;  %v1886_v39 = vsel %vm3753_vm11, %v3242_v3, %v1885_v8 }
  0xdb   : > { %1694 = vst.msk [vmem:[#allocation3 + $0x70] sm:$0xf] %vm1665_vm15, %v1614_v32  ;;  %v955_v56 = vsel %vm3786_vm12, %v737_v2, %v954_v62  ;;  %v1102_v30 = vld [vmem:[#allocation2 + $0x88] sm:$0xf]  ;;  %3638 = vmatpush.bf16.msra.mxu3 %v4423_v19  ;;  %v1009_v60 = vld [vmem:[#allocation2 + $0x4c] sm:$0xf] }
  0xdc   : > { %2076 = vst.msk [vmem:[#allocation3 + $0x70] sm:$0xf] %vm2047_vm2, %v1996_v35  ;;  %3319 = vmatmul.msk.bf16.gmra.mxu0 %vm2240_vm5, %v3526_v25  ;;  %v1399_v13 = vshll.u32 %v1102_v30, 16  ;;  %v1403_v34 = vshrl.u32 %v1102_v30, 16  ;;  %v1736_v52 = vld [vmem:[#allocation2 + $0x88] sm:$0xf] }
  0xdd   : > { %3404 = vmatmul.msk.bf16.gmra.mxu1 %vm2240_vm5, %v3511_v46  ;;  %956 = vst [vmem:[#allocation2 + $0x84] sm:$0xf] %v955_v56  ;;  %v1029_v9 = vld [vmem:[#allocation2 + $0xc4] sm:$0xf]  ;;  %v1892_v11 = vrot.slane %v1736_v52, 5  ;;  %v3527_v7 = vld [vmem:[#allocation3 + $0x18] sm:$0xff] }
  0xde   : > { %1677 = vst.msk [vmem:[#allocation3 + $0x2c] sm:$0xf] %vm1665_vm15, %v1580_v58  ;;  %v958_v35 = vld [vmem:[#allocation2 + $0x8c] sm:$0x1]  ;;  %v1405_v43 = vrot.slane %v1403_v34, 4  ;;  %v1401_v51 = vrot.slane %v1399_v13, 5 }
  0xdf   : > { %v1956_v49 = vpop.permute.xlu0 %1955  ;;  %v959_v33 = vsel %vm3706_vm3, %v747_v54, %v958_v35  ;;  %1063 = vst.msk [vmem:[#allocation3 + $0x7c] sm:$0xf] %vm237_vm0, %v1027_v27  ;;  %v3512_v32 = vld [vmem:[#allocation3 + $0x18] sm:$0xff]  ;;  %v1894_v41 = vrot.slane %v1892_v11, 4  ;;  %v1011_v54 = vld [vmem:[#allocation2 + $0x58] sm:$0xf] }
  0xe0   : > { %2056 = vst.msk [vmem:[#allocation3 + $0x20] sm:$0xf] %vm2047_vm2, %v1956_v49  ;;  %v1406_v10 = vor.u32 %v1405_v43, %v1401_v51  ;;  %v1010_v30 = vld [vmem:[#allocation2 + $0x54] sm:$0xf]  ;;  %v1017_v26 = vld [vmem:[#allocation2 + $0x7c] sm:$0xf] }
  0xe1   : > { %v1100_v28 = vld [vmem:[#allocation2 + $0x80] sm:$0x1]  ;;  %v1958_v24 = vpop.permute.xlu1 %1957  ;;  %960 = vst [vmem:[#allocation2 + $0x8c] sm:$0x1] %v959_v33  ;;  %1977 = vrot.lane.b32.xlu2 %v1882_v47, %s3663_s28  ;;  %v1020_v47 = vld [vmem:[#allocation2 + $0x90] sm:$0xf] }
  0xe2   : > { %v1734_v36 = vld [vmem:[#allocation2 + $0x80] sm:$0x1]  ;;  %v1385_v19 = vshll.u32 %v1100_v28, 16  ;;  %2057 = vst.msk [vmem:[#allocation3 + $0x24] sm:$0xf] %vm2047_vm2, %v1958_v24  ;;  %v1960_v0 = vpop.permute.xlu2 %1959  ;;  %v1407_v25 = vrot.slane %v1406_v10, 4 }
  0xe3   : > { %v1888_v53 = vrot.slane %v1734_v36, 5  ;;  %1044 = vst.msk [vmem:[#allocation3 + $0x30] sm:$0xf] %vm237_vm0, %v1008_v40  ;;  %v356_v13 = vld [vmem:[#allocation2 + $0xd4] sm:$0x1] }
  0xe4   : > { %v1387_v42 = vrot.slane %v1385_v19, 5  ;;  %v1101_v21 = vld [vmem:[#allocation2 + $0x84] sm:$0xf]  ;;  %1064 = vst.msk [vmem:[#allocation3 + $0x80] sm:$0xf] %vm237_vm0, %v1028_v59  ;;  %v357_v28 = vsel %vm3722_vm6, 0, %v356_v13 }
  0xe5   : > { %v1889_v6 = vsel %vm3753_vm11, %v1887_v31, %v1888_v53  ;;  %v1735_v29 = vld [vmem:[#allocation2 + $0x84] sm:$0xe]  ;;  %v1390_v38 = vshrl.u32 %v1101_v21, 16  ;;  %v1393_v45 = vshll.u32 %v1101_v21, 16  ;;  %1045 = vst.msk [vmem:[#allocation3 + $0x34] sm:$0xf] %vm237_vm0, %v1009_v60 }
  0xe6   : > { %1981 = vrot.lane.b32.xlu0 %v1889_v6, %s3663_s28  ;;  %v1388_v16 = vsel %vm3794_vm13, %v1383_v20, %v1387_v42  ;;  %v3243_v50 = vrot.slane %v1735_v29, 9  ;;  %1065 = vst.msk [vmem:[#allocation3 + $0x84] sm:$0xf] %vm237_vm0, %v1029_v9  ;;  %v1021_v33 = vld [vmem:[#allocation2 + $0x94] sm:$0xf] }
  0xe7   : > { %1599 = vrot.lane.b32.xlu1 %v1388_v16, %s3664_s29  ;;  %v1392_v17 = vrot.slane %v1390_v38, 4  ;;  %v1395_v55 = vrot.slane %v1393_v45, 5  ;;  %v1998_v61 = vpop.permute.xlu0 %1997  ;;  %1046 = vst.msk [vmem:[#allocation3 + $0x38] sm:$0xf] %vm237_vm0, %v1010_v30  ;;  %v1120_v24 = vld [vmem:[#allocation2 + $0xd0] sm:$0xf] }
  0xe8   : > { %2077 = vst.msk [vmem:[#allocation3 + $0x74] sm:$0xf] %vm2047_vm2, %v1998_v61  ;;  %v1103_v22 = vld [vmem:[#allocation2 + $0x8c] sm:$0x1]  ;;  %v1893_v44 = vsel %vm3753_vm11, %v3243_v50, %v1892_v11  ;;  %v1543_v4 = vshll.u32 %v1120_v24, 16  ;;  %v1547_v40 = vshrl.u32 %v1120_v24, 16 }
  0xe9   : > { %v1396_v37 = vor.u32 %v1395_v55, %v1392_v17  ;;  %v1578_v57 = vpop.permute.xlu1 %1577  ;;  %v3543_v63 = vld [vmem:[#allocation3 + $0x20] sm:$0xff]  ;;  %v1409_v2 = vshll.u32 %v1103_v22, 16  ;;  %1979 = vrot.lane.b32.xlu2 %v1886_v39, %s3663_s28  ;;  %v1737_v14 = vld [vmem:[#allocation2 + $0x8c] sm:$0x1]  ;;  %1047 = vst.msk [vmem:[#allocation3 + $0x3c] sm:$0xf] %vm237_vm0, %v1011_v54 }
  0xea   : > { %1676 = vst.msk [vmem:[#allocation3 + $0x28] sm:$0xf] %vm1665_vm15, %v1578_v57  ;;  %3488 = vmatmul.msk.bf16.gmra.mxu2 %vm2240_vm5, %v3543_v63  ;;  %v2002_v58 = vpop.permute.xlu2 %2001  ;;  %v1895_v62 = vrot.slane %v1737_v14, 5  ;;  %v3528_v49 = vld [vmem:[#allocation3 + $0x20] sm:$0xff]  ;;  %v1545_v59 = vrot.slane %v1543_v4, 5  ;;  %v1549_v60 = vrot.slane %v1547_v40, 4 }
  0xeb   : > { %v1397_v5 = vrot.slane %v1396_v37, 4  ;;  %2058 = vst.msk [vmem:[#allocation3 + $0x28] sm:$0xf] %vm2047_vm2, %v1960_v0  ;;  %v1411_v46 = vrot.slane %v1409_v2, 5  ;;  %v3513_v3 = vld [vmem:[#allocation3 + $0x20] sm:$0xff] }
  0xec   : > { %3320 = vmatmul.msk.bf16.gmra.mxu0 %vm2240_vm5, %v3527_v7  ;;  %v1896_v12 = vsel %vm3753_vm11, %v1894_v41, %v1895_v62  ;;  %1056 = vst.msk [vmem:[#allocation3 + $0x60] sm:$0xf] %vm237_vm0, %v1020_v47  ;;  %v1550_v6 = vor.u32 %v1549_v60, %v1545_v59  ;;  %v1753_v29 = vld [vmem:[#allocation2 + $0xcc] sm:$0xe]  ;;  %v1754_v0 = vld [vmem:[#allocation2 + $0xd0] sm:$0xf] }
  0xed   : > { %v1402_v48 = vsel %vm3794_vm13, %v1397_v5, %v1401_v51  ;;  %3405 = vmatmul.msk.bf16.gmra.mxu1 %vm2240_vm5, %v3512_v32  ;;  %v1412_v56 = vsel %vm3794_vm13, %v1407_v25, %v1411_v46  ;;  %358 = vst [vmem:[#allocation2 + $0xd4] sm:$0x1] %v357_v28  ;;  %v3249_v52 = vrot.slane %v1753_v29, 9  ;;  %v1934_v16 = vrot.slane %v1754_v0, 5  ;;  %v300_v55 = vld [vmem:[#allocation2 + $0xcc] sm:$0x1] }
  0xee   : > { %1983 = vrot.lane.b32.xlu0 %v1893_v44, %s3663_s28  ;;  %1057 = vst.msk [vmem:[#allocation3 + $0x64] sm:$0xf] %vm237_vm0, %v1021_v33  ;;  %v1551_v45 = vrot.slane %v1550_v6, 4  ;;  %v301_v39 = vsel %vm3706_vm3, 0, %v300_v55  ;;  %v1012_v37 = vld [vmem:[#allocation2 + $0x60] sm:$0xf] }
  0xef   : > { %1601 = vrot.lane.b32.xlu1 %v1402_v48, %s3664_s29  ;;  %v1618_v23 = vpop.permute.xlu0 %1617  ;;  %v3538_v8 = vld [vmem:[#allocation3 + $0x70] sm:$0xff]  ;;  %v1935_v50 = vsel %vm3753_vm11, %v3249_v52, %v1934_v16  ;;  %1048 = vst.msk [vmem:[#allocation3 + $0x40] sm:$0xf] %vm237_vm0, %v1012_v37  ;;  %v1013_v57 = vld [vmem:[#allocation2 + $0x64] sm:$0xf]  ;;  %vm2897_vm3 = vcmask 31744  }
  0xf0   : > { %1696 = vst.msk [vmem:[#allocation3 + $0x78] sm:$0xf] %vm1665_vm15, %v1618_v23  ;;  %3331 = vmatmul.msk.bf16.gmra.mxu3 %vm2240_vm5, %v3538_v8  ;;  %v1014_v25 = vld [vmem:[#allocation2 + $0x6c] sm:$0xf]  ;;  %v1018_v24 = vld [vmem:[#allocation2 + $0x84] sm:$0xf] }
  0xf1   : > { %v1620_v18 = vpop.permute.xlu1 %1619  ;;  %1603 = vrot.lane.b32.xlu2 %v1412_v56, %s3664_s29  ;;  %302 = vst [vmem:[#allocation2 + $0xcc] sm:$0x1] %v301_v39  ;;  %v3522_v29 = vld [vmem:[#allocation3 + $0x68] sm:$0xff] }
  0xf2   : > { %1697 = vst.msk [vmem:[#allocation3 + $0x7c] sm:$0xf] %vm1665_vm15, %v1620_v18 }
  0xf3   : > { %2079 = vst.msk [vmem:[#allocation3 + $0x7c] sm:$0xf] %vm2047_vm2, %v2002_v58 }
  0xf4   : > { %v1121_v42 = vld [vmem:[#allocation2 + $0xd4] sm:$0x1]  ;;  %1049 = vst.msk [vmem:[#allocation3 + $0x44] sm:$0xf] %vm237_vm0, %v1013_v57 }
  0xf5   : > { %v1553_v21 = vshll.u32 %v1121_v42, 16  ;;  %1050 = vst.msk [vmem:[#allocation3 + $0x48] sm:$0xf] %vm237_vm0, %v1014_v25  ;;  %v1755_v18 = vld [vmem:[#allocation2 + $0xd4] sm:$0x1] }
  0xf6   : > { %v1937_v54 = vrot.slane %v1755_v18, 5  ;;  %1053 = vst.msk [vmem:[#allocation3 + $0x54] sm:$0xf] %vm237_vm0, %v1017_v26 }
  0xf7   : > { %1985 = vrot.lane.b32.xlu1 %v1896_v12, %s3663_s28  ;;  %v1962_v27 = vpop.permute.xlu0 %1961  ;;  %v1555_v17 = vrot.slane %v1553_v21, 5  ;;  %v1936_v12 = vrot.slane %v1934_v16, 4  ;;  %1054 = vst.msk [vmem:[#allocation3 + $0x58] sm:$0xf] %vm237_vm0, %v1018_v24 }
  0xf8   : > { %2059 = vst.msk [vmem:[#allocation3 + $0x2c] sm:$0xf] %vm2047_vm2, %v1962_v27  ;;  %v1119_v2 = vld [vmem:[#allocation2 + $0xcc] sm:$0xf]  ;;  %v1015_v27 = vld [vmem:[#allocation2 + $0x70] sm:$0xf] }
  0xf9   : > { %v1622_v20 = vpop.permute.xlu2 %1621  ;;  %v2000_v31 = vpop.permute.xlu1 %1999  ;;  %v1556_v10 = vsel %vm3794_vm13, %v1551_v45, %v1555_v17  ;;  %v1534_v5 = vshrl.u32 %v1119_v2, 16  ;;  %v1537_v7 = vshll.u32 %v1119_v2, 16  ;;  %v1938_v15 = vsel %vm3753_vm11, %v1936_v12, %v1937_v54  ;;  %1051 = vst.msk [vmem:[#allocation3 + $0x4c] sm:$0xf] %vm237_vm0, %v1015_v27 }
  0xfa   : > { %1698 = vst.msk [vmem:[#allocation3 + $0x80] sm:$0xf] %vm1665_vm15, %v1622_v20  ;;  %1627 = vrot.lane.b32.xlu0 %v1556_v10, %s3664_s29 }
  0xfb   : > { %2078 = vst.msk [vmem:[#allocation3 + $0x78] sm:$0xf] %vm2047_vm2, %v2000_v31  ;;  %v1536_v32 = vrot.slane %v1534_v5, 4  ;;  %v1539_v44 = vrot.slane %v1537_v7, 5  ;;  %v1016_v31 = vld [vmem:[#allocation2 + $0x78] sm:$0xf] }
  0xfc   : > { %3321 = vmatmul.msk.bf16.gmra.mxu0 %vm2240_vm5, %v3528_v49  ;;  %1052 = vst.msk [vmem:[#allocation3 + $0x50] sm:$0xf] %vm237_vm0, %v1016_v31 }
  0xfd   : > { %3406 = vmatmul.msk.bf16.gmra.mxu1 %vm2240_vm5, %v3513_v3  ;;  %v1540_v58 = vor.u32 %v1539_v44, %v1536_v32 }
  0xff   : > { %v3544_v35 = vld [vmem:[#allocation3 + $0x28] sm:$0xff]  ;;  %2007 = vrot.lane.b32.xlu1 %v1935_v50, %s3663_s28  ;;  %v1541_v41 = vrot.slane %v1540_v58, 4 }
 0x100   : > { %v1582_v34 = vpop.permute.xlu0 %1581  ;;  %3489 = vmatmul.msk.bf16.gmra.mxu2 %vm2240_vm5, %v3544_v35  ;;  %v3529_v38 = vld [vmem:[#allocation3 + $0x28] sm:$0xff] }
 0x101   : > { %1678 = vst.msk [vmem:[#allocation3 + $0x30] sm:$0xf] %vm1665_vm15, %v1582_v34  ;;  %v1966_v36 = vpop.permute.xlu2 %1965  ;;  %v1584_v19 = vpop.permute.xlu1 %1583  ;;  %v3514_v51 = vld [vmem:[#allocation3 + $0x28] sm:$0xff]  ;;  %v1546_v62 = vsel %vm3794_vm13, %v1541_v41, %v1545_v59 }
 0x102   : > { %v3539_v53 = vld [vmem:[#allocation3 + $0x78] sm:$0xff]  ;;  %1679 = vst.msk [vmem:[#allocation3 + $0x34] sm:$0xf] %vm1665_vm15, %v1584_v19  ;;  %1625 = vrot.lane.b32.xlu2 %v1546_v62, %s3664_s29  ;;  %s235_s29 = scalar_lea.vmem %s5003_s5, %s3231_s20 }
 0x103   : > { %3332 = vmatmul.msk.bf16.gmra.mxu3 %vm2240_vm5, %v3539_v53  ;;  %2061 = vst.msk [vmem:[#allocation3 + $0x34] sm:$0xf] %vm2047_vm2, %v1966_v36  ;;  %v3524_v26 = vld [vmem:[#allocation3 + $0x78] sm:$0xff] }
 0x109   : > { %v1964_v43 = vpop.permute.xlu1 %1963 }
 0x10a   : > { %2060 = vst.msk [vmem:[#allocation3 + $0x30] sm:$0xf] %vm2047_vm2, %v1964_v43  ;;  %v1586_v9 = vpop.permute.xlu2 %1585  ;;  %2009 = vrot.lane.b32.xlu2 %v1938_v15, %s3663_s28  ;;  %v1019_v43 = vld [vmem:[#allocation2 + $0x88] sm:$0xf] }
 0x10b   : > { %1680 = vst.msk [vmem:[#allocation3 + $0x38] sm:$0xf] %vm1665_vm15, %v1586_v9 }
 0x10c   : > { %3322 = vmatmul.msk.bf16.gmra.mxu0 %vm2240_vm5, %v3529_v38  ;;  %1055 = vst.msk [vmem:[#allocation3 + $0x5c] sm:$0xf] %vm237_vm0, %v1019_v43 }
 0x10d   : > { %v1624_v61 = vpop.permute.xlu0 %1623  ;;  %3407 = vmatmul.msk.bf16.gmra.mxu1 %vm2240_vm5, %v3514_v51 }
 0x10e   : > { %1699 = vst.msk [vmem:[#allocation3 + $0x84] sm:$0xf] %vm1665_vm15, %v1624_v61 }
 0x111   : > { %v2006_v11 = vpop.permute.xlu1 %2005  ;;  %v3545_v1 = vld [vmem:[#allocation3 + $0x30] sm:$0xff] }
 0x112   : > { %2081 = vst.msk [vmem:[#allocation3 + $0x84] sm:$0xf] %vm2047_vm2, %v2006_v11  ;;  %v1608_v22 = vpop.permute.xlu2 %1607  ;;  %3490 = vmatmul.msk.bf16.gmra.mxu2 %vm2240_vm5, %v3545_v1  ;;  %v3530_v46 = vld [vmem:[#allocation3 + $0x30] sm:$0xff] }
 0x113   : > { %1691 = vst.msk [vmem:[#allocation3 + $0x64] sm:$0xf] %vm1665_vm15, %v1608_v22  ;;  %v3515_v48 = vld [vmem:[#allocation3 + $0x30] sm:$0xff] }
 0x114   : > { %v3523_v1 = vld [vmem:[#allocation3 + $0x70] sm:$0xff] }
 0x115   : > { %v2004_v63 = vpop.permute.xlu0 %2003 }
 0x116   : > { %2080 = vst.msk [vmem:[#allocation3 + $0x80] sm:$0xf] %vm2047_vm2, %v2004_v63 }
 0x119   : > { %v2527_v53 = vpop.f32.mrf.mxu1 }
 0x11a   : > { %v1988_v14 = vpop.permute.xlu2 %1987 }
 0x11c   : > { %3323 = vmatmul.msk.bf16.gmra.mxu0 %vm2240_vm5, %v3530_v46 }
 0x11d   : > { %v1588_v23 = vpop.permute.xlu0 %1587  ;;  %v3540_v8 = vld [vmem:[#allocation3 + $0x80] sm:$0xff]  ;;  %3408 = vmatmul.msk.bf16.gmra.mxu1 %vm2240_vm5, %v3515_v48 }
 0x11e   : > { %1681 = vst.msk [vmem:[#allocation3 + $0x3c] sm:$0xf] %vm1665_vm15, %v1588_v23  ;;  %3333 = vmatmul.msk.bf16.gmra.mxu3 %vm2240_vm5, %v3540_v8 }
 0x121   : > { %v1606_v56 = vpop.permute.xlu1 %1605  ;;  %v2529_v42 = vpop.f32.mrf.mxu1 }
 0x122   : > { %1690 = vst.msk [vmem:[#allocation3 + $0x60] sm:$0xf] %vm1665_vm15, %v1606_v56  ;;  %v1592_v30 = vpop.permute.xlu2 %1591 }
 0x123   : > { %2072 = vst.msk [vmem:[#allocation3 + $0x60] sm:$0xf] %vm2047_vm2, %v1988_v14 }
 0x124   : > { %1683 = vst.msk [vmem:[#allocation3 + $0x44] sm:$0xf] %vm1665_vm15, %v1592_v30 }
 0x125   : > { %v1968_v20 = vpop.permute.xlu0 %1967 }
 0x126   : > { %2062 = vst.msk [vmem:[#allocation3 + $0x38] sm:$0xf] %vm2047_vm2, %v1968_v20 }
 0x129   : > { %v1970_v49 = vpop.permute.xlu1 %1969 }
 0x12a   : > { %2063 = vst.msk [vmem:[#allocation3 + $0x3c] sm:$0xf] %vm2047_vm2, %v1970_v49 }
 0x12d   : > { %v1990_v3 = vpop.permute.xlu0 %1989 }
 0x12e   : > { %2073 = vst.msk [vmem:[#allocation3 + $0x64] sm:$0xf] %vm2047_vm2, %v1990_v3 }
 0x131   : > { %v1590_v47 = vpop.permute.xlu1 %1589  ;;  %v3546_v13 = vld [vmem:[#allocation3 + $0x38] sm:$0xff] }
 0x132   : > { %v3531_v34 = vld [vmem:[#allocation3 + $0x38] sm:$0xff]  ;;  %1682 = vst.msk [vmem:[#allocation3 + $0x40] sm:$0xf] %vm1665_vm15, %v1590_v47  ;;  %3491 = vmatmul.msk.bf16.gmra.mxu2 %vm2240_vm5, %v3546_v13 }
 0x133   : > { %v3516_v35 = vld [vmem:[#allocation3 + $0x38] sm:$0xff]  ;;  %3324 = vmatmul.msk.bf16.gmra.mxu0 %vm2240_vm5, %v3531_v34  ;;  %v1594_v33 = vpop.permute.xlu2 %1593 }
 0x134   : > { %3409 = vmatmul.msk.bf16.gmra.mxu1 %vm2240_vm5, %v3516_v35  ;;  %1684 = vst.msk [vmem:[#allocation3 + $0x48] sm:$0xf] %vm1665_vm15, %v1594_v33 }
 0x135   : > { %v1972_v28 = vpop.permute.xlu0 %1971  ;;  %v3521_v36 = vld [vmem:[#allocation3 + $0x60] sm:$0xff] }
 0x136   : > { %2064 = vst.msk [vmem:[#allocation3 + $0x40] sm:$0xf] %vm2047_vm2, %v1972_v28  ;;  %3414 = vmatmul.msk.bf16.vlgmr.msrb.gmra.mxu3 %vm2240_vm5, %v3521_v36 }
 0x139   : > { %v1974_v19 = vpop.permute.xlu1 %1973 }
 0x13a   : > { %2065 = vst.msk [vmem:[#allocation3 + $0x44] sm:$0xf] %vm2047_vm2, %v1974_v19 }
 0x13b   : > { %v1978_v4 = vpop.permute.xlu2 %1977 }
 0x141   : > { %v3547_v40 = vld [vmem:[#allocation3 + $0x40] sm:$0xff] }
 0x142   : > { %v3532_v59 = vld [vmem:[#allocation3 + $0x40] sm:$0xff]  ;;  %3492 = vmatmul.msk.bf16.gmra.mxu2 %vm2240_vm5, %v3547_v40 }
 0x143   : > { %v3517_v60 = vld [vmem:[#allocation3 + $0x40] sm:$0xff]  ;;  %3325 = vmatmul.msk.bf16.gmra.mxu0 %vm2240_vm5, %v3532_v59  ;;  %v1976_v6 = vpop.permute.xlu1 %1975  ;;  %v1980_v0 = vpop.permute.xlu2 %1979 }
 0x144   : > { %3410 = vmatmul.msk.bf16.gmra.mxu1 %vm2240_vm5, %v3517_v60  ;;  %v1596_v21 = vpop.permute.xlu0 %1595  ;;  %2066 = vst.msk [vmem:[#allocation3 + $0x48] sm:$0xf] %vm2047_vm2, %v1976_v6 }
 0x145   : > { %1685 = vst.msk [vmem:[#allocation3 + $0x4c] sm:$0xf] %vm1665_vm15, %v1596_v21 }
 0x146   : > { %2067 = vst.msk [vmem:[#allocation3 + $0x4c] sm:$0xf] %vm2047_vm2, %v1978_v4  ;;  %3415 = vmatmul.msk.bf16.gmra.mxu3 %vm2240_vm5, %v3522_v29  ;;  %v2785_v38 = vpop.f32.mrf.mxu2 }
 0x149   : > { %v2302_v45 = vpop.f32.mrf.mxu0 }
 0x14a   : > { %v2528_v52 = vadd.f32 %v2527_v53, %v2302_v45  ;;  %v2532_v16 = vpop.f32.mrf.mxu1 }
 0x14b   : > { %v1604_v17 = vpop.permute.xlu2 %1603 }
 0x14c   : > { %v1598_v51 = vpop.permute.xlu0 %1597  ;;  %v2865_v9 = vadd.f32 %v2785_v38, %v2528_v52  ;;  %1689 = vst.msk [vmem:[#allocation3 + $0x5c] sm:$0xf] %vm1665_vm15, %v1604_v17 }
 0x14d   : > { %1686 = vst.msk [vmem:[#allocation3 + $0x50] sm:$0xf] %vm1665_vm15, %v1598_v51  ;;  %v3548_v55 = vld [vmem:[#allocation3 + $0x48] sm:$0xff] }
 0x14e   : > { %v3533_v61 = vld [vmem:[#allocation3 + $0x48] sm:$0xff]  ;;  %2068 = vst.msk [vmem:[#allocation3 + $0x50] sm:$0xf] %vm2047_vm2, %v1980_v0  ;;  %v3070_v50 = vpack.c.bf16 %v2865_v9, %v2865_v9  ;;  %v2787_v10 = vpop.f32.mrf.mxu2  ;;  %v2968_v22 = vmul.f32 %v2865_v9, %v2865_v9  ;;  %v2898_v2 = vsel %vm2897_vm3, %v2865_v9, 0.0 }
 0x14f   : > { %v3518_v39 = vld [vmem:[#allocation3 + $0x48] sm:$0xff] }
 0x150   : > { %3102 = vst.msk [vmem:[%s4732_s26] sm:$0xf] %vm237_vm0, %v3070_v50  ;;  %v3000_v46 = vsel %vm2897_vm3, %v2968_v22, 0.0  ;;  %v1030_v50 = vld [vmem:[#allocation2 + $0xcc] sm:$0xf] }
 0x151   : > { %v2304_v37 = vpop.f32.mrf.mxu0  ;;  %1066 = vst.msk [vmem:[#allocation3 + $0x88] sm:$0xf] %vm237_vm0, %v1030_v50 }
 0x152   : > { %3493 = vmatmul.msk.bf16.gmra.mxu2 %vm2240_vm5, %v3548_v55  ;;  %v2530_v11 = vadd.f32 %v2529_v42, %v2304_v37  ;;  %v2534_v63 = vpop.f32.mrf.mxu1  ;;  %v1031_v37 = vld [vmem:[#allocation2 + $0xd0] sm:$0xf] }
 0x153   : > { %3326 = vmatmul.msk.bf16.gmra.mxu0 %vm2240_vm5, %v3533_v61  ;;  %v3553_v61 = vld [vmem:[#allocation3 + $0x70] sm:$0xff]  ;;  %1067 = vst.msk [vmem:[#allocation3 + $0x8c] sm:$0xf] %vm237_vm0, %v1031_v37 }
 0x154   : > { %3411 = vmatmul.msk.bf16.gmra.mxu1 %vm2240_vm5, %v3518_v39  ;;  %v2866_v57 = vadd.f32 %v2787_v10, %v2530_v11 }
 0x156   : > { %3416 = vmatmul.msk.bf16.gmra.mxu3 %vm2240_vm5, %v3523_v1  ;;  %v2899_v5 = vsel %vm2897_vm3, %v2866_v57, 0.0  ;;  %v2969_v7 = vmul.f32 %v2866_v57, %v2866_v57  ;;  %v3071_v32 = vpack.c.bf16 %v2866_v57, %v2866_v57 }
 0x157   : > { %v2900_v25 = vadd.f32 %v2899_v5, %v2898_v2  ;;  %v2790_v23 = vpop.f32.mrf.mxu2 }
 0x158   : > { %v1982_v44 = vpop.permute.xlu0 %1981  ;;  %v3001_v14 = vsel %vm2897_vm3, %v2969_v7, 0.0  ;;  %3103 = vst.msk [vmem:[%s4732_s26 + $0x4] sm:$0xf] %vm237_vm0, %v3071_v32 }
 0x159   : > { %v1600_v48 = vpop.permute.xlu1 %1599  ;;  %v3002_v58 = vadd.f32 %v3001_v14, %v3000_v46  ;;  %v2307_v8 = vpop.f32.mrf.mxu0 }
 0x15a   : > { %1687 = vst.msk [vmem:[#allocation3 + $0x54] sm:$0xf] %vm1665_vm15, %v1600_v48  ;;  %v2533_v41 = vadd.f32 %v2532_v16, %v2307_v8  ;;  %v2537_v30 = vpop.f32.mrf.mxu1 }
 0x15b   : > { %2069 = vst.msk [vmem:[#allocation3 + $0x54] sm:$0xf] %vm2047_vm2, %v1982_v44 }
 0x15c   : > { %v2867_v62 = vadd.f32 %v2790_v23, %v2533_v41  ;;  %v1626_v32 = vpop.permute.xlu2 %1625  ;;  %v3536_v23 = vld [vmem:[#allocation3 + $0x60] sm:$0xff] }
 0x15d   : > { %v4765_v29 = vpop.f32.mrf.mxu3  ;;  %1700 = vst.msk [vmem:[#allocation3 + $0x88] sm:$0xf] %vm1665_vm15, %v1626_v32 }
 0x15e   : > { %v2901_v56 = vsel %vm2897_vm3, %v2867_v62, 0.0  ;;  %v2970_v18 = vmul.f32 %v2867_v62, %v2867_v62  ;;  %v3072_v12 = vpack.c.bf16 %v2867_v62, %v2867_v62 }
 0x15f   : > { %v2902_v54 = vadd.f32 %v2901_v56, %v2900_v25  ;;  %v2792_v35 = vpop.f32.mrf.mxu2 }
 0x160   : > { %v1984_v27 = vpop.permute.xlu0 %1983  ;;  %v3003_v15 = vsel %vm2897_vm3, %v2970_v18, 0.0  ;;  %3104 = vst.msk [vmem:[%s4732_s26 + $0x8] sm:$0xf] %vm237_vm0, %v3072_v12  ;;  %v3554_v18 = vld [vmem:[#allocation3 + $0x78] sm:$0xff] }
 0x161   : > { %v1602_v20 = vpop.permute.xlu1 %1601  ;;  %v3004_v31 = vadd.f32 %v3003_v15, %v3002_v58  ;;  %v2309_v13 = vpop.f32.mrf.mxu0  ;;  %v3551_v58 = vld [vmem:[#allocation3 + $0x60] sm:$0xff] }
 0x162   : > { %1688 = vst.msk [vmem:[#allocation3 + $0x58] sm:$0xf] %vm1665_vm15, %v1602_v20  ;;  %v3549_v49 = vld [vmem:[#allocation3 + $0x50] sm:$0xff]  ;;  %v2535_v34 = vadd.f32 %v2534_v63, %v2309_v13  ;;  %v2539_v40 = vpop.f32.mrf.mxu1 }
 0x163   : > { %v3534_v3 = vld [vmem:[#allocation3 + $0x50] sm:$0xff]  ;;  %2070 = vst.msk [vmem:[#allocation3 + $0x58] sm:$0xf] %vm2047_vm2, %v1984_v27  ;;  %3494 = vmatmul.msk.bf16.gmra.mxu2 %vm2240_vm5, %v3549_v49 }
 0x164   : > { %v3519_v47 = vld [vmem:[#allocation3 + $0x50] sm:$0xff]  ;;  %3327 = vmatmul.msk.bf16.gmra.mxu0 %vm2240_vm5, %v3534_v3  ;;  %v2868_v28 = vadd.f32 %v2792_v35, %v2535_v34  ;;  %v2010_v56 = vpop.permute.xlu2 %2009 }
 0x165   : > { %3412 = vmatmul.msk.bf16.gmra.mxu1 %vm2240_vm5, %v3519_v47  ;;  %v4778_v5 = vpop.f32.mrf.mxu3 }
 0x166   : > { %3417 = vmatmul.msk.bf16.gmra.mxu3 %vm2240_vm5, %v3524_v26  ;;  %v2903_v36 = vsel %vm2897_vm3, %v2868_v28, 0.0  ;;  %v2971_v33 = vmul.f32 %v2868_v28, %v2868_v28  ;;  %v3073_v19 = vpack.c.bf16 %v2868_v28, %v2868_v28 }
 0x167   : > { %v2904_v53 = vadd.f32 %v2903_v36, %v2902_v54 }
 0x168   : > { %v3005_v4 = vsel %vm2897_vm3, %v2971_v33, 0.0  ;;  %3105 = vst.msk [vmem:[%s4732_s26 + $0xc] sm:$0xf] %vm237_vm0, %v3073_v19 }
 0x169   : > { %v1986_v24 = vpop.permute.xlu1 %1985  ;;  %v2312_v59 = vpop.f32.mrf.mxu0  ;;  %v3006_v60 = vadd.f32 %v3005_v4, %v3004_v31  ;;  %v3552_v4 = vld [vmem:[#allocation3 + $0x68] sm:$0xff] }
 0x16a   : > { %2071 = vst.msk [vmem:[#allocation3 + $0x5c] sm:$0xf] %vm2047_vm2, %v1986_v24  ;;  %v2538_v42 = vadd.f32 %v2537_v30, %v2312_v59  ;;  %v2542_v9 = vpop.f32.mrf.mxu1 }
 0x16c   : > { %v1628_v48 = vpop.permute.xlu0 %1627 }
 0x16d   : > { %v2795_v6 = vpop.f32.mrf.mxu2  ;;  %1701 = vst.msk [vmem:[#allocation3 + $0x8c] sm:$0xf] %vm1665_vm15, %v1628_v48 }
 0x16e   : > { %v2869_v21 = vadd.f32 %v2795_v6, %v2538_v42  ;;  %2083 = vst.msk [vmem:[#allocation3 + $0x8c] sm:$0xf] %vm2047_vm2, %v2010_v56 }
 0x170   : > { %v2905_v45 = vsel %vm2897_vm3, %v2869_v21, 0.0  ;;  %v2972_v52 = vmul.f32 %v2869_v21, %v2869_v21  ;;  %v3074_v16 = vpack.c.bf16 %v2869_v21, %v2869_v21 }
 0x171   : > { %v3550_v0 = vld [vmem:[#allocation3 + $0x58] sm:$0xff]  ;;  %v2314_v51 = vpop.f32.mrf.mxu0  ;;  %v2906_v17 = vadd.f32 %v2905_v45, %v2904_v53  ;;  %v2008_v14 = vpop.permute.xlu1 %2007 }
 0x172   : > { %v3535_v43 = vld [vmem:[#allocation3 + $0x58] sm:$0xff]  ;;  %v3007_v55 = vsel %vm2897_vm3, %v2972_v52, 0.0  ;;  %3106 = vst.msk [vmem:[%s4732_s26 + $0x10] sm:$0xf] %vm237_vm0, %v3074_v16  ;;  %v2540_v10 = vadd.f32 %v2539_v40, %v2314_v51  ;;  %v2544_v25 = vpop.f32.mrf.mxu1 }
 0x173   : > { %v3520_v38 = vld [vmem:[#allocation3 + $0x58] sm:$0xff]  ;;  %3495 = vmatmul.msk.bf16.gmra.mxu2 %vm2240_vm5, %v3550_v0  ;;  %v3008_v39 = vadd.f32 %v3007_v55, %v3006_v60  ;;  %2082 = vst.msk [vmem:[#allocation3 + $0x88] sm:$0xf] %vm2047_vm2, %v2008_v14  ;;  %v4786_v41 = vpop.f32.mrf.mxu3  ;;  %v3555_v60 = vld [vmem:[#allocation3 + $0x80] sm:$0xff] }
 0x174   : > { %3328 = vmatmul.msk.bf16.gmra.mxu0 %vm2240_vm5, %v3535_v43 }
 0x175   : > { %3413 = vmatmul.msk.bf16.gmra.mxu1 %vm2240_vm5, %v3520_v38  ;;  %v2797_v11 = vpop.f32.mrf.mxu2 }
 0x176   : > { %3498 = vmatmul.msk.bf16.vlgmr.msra.gmra.mxu3 %vm2240_vm5, %v3553_v61  ;;  %v2870_v1 = vadd.f32 %v2797_v11, %v2540_v10 }
 0x178   : > { %v2907_v22 = vsel %vm2897_vm3, %v2870_v1, 0.0  ;;  %v2973_v57 = vmul.f32 %v2870_v1, %v2870_v1  ;;  %v3075_v63 = vpack.c.bf16 %v2870_v1, %v2870_v1 }
 0x179   : > { %v2317_v2 = vpop.f32.mrf.mxu0  ;;  %v2908_v7 = vadd.f32 %v2907_v22, %v2906_v17 }
 0x17a   : > { %v3009_v44 = vsel %vm2897_vm3, %v2973_v57, 0.0  ;;  %3107 = vst.msk [vmem:[%s4732_s26 + $0x14] sm:$0xf] %vm237_vm0, %v3075_v63  ;;  %v2543_v62 = vadd.f32 %v2542_v9, %v2317_v2  ;;  %v2547_v54 = vpop.f32.mrf.mxu1  ;;  %v3556_v1 = vld [vmem:[#allocation3 + $0x88] sm:$0xff] }
 0x17b   : > { %v3010_v46 = vadd.f32 %v3009_v44, %v3008_v39  ;;  %v4796_v35 = vpop.f32.mrf.mxu3 }
 0x181   : > { %v2319_v8 = vpop.f32.mrf.mxu0 }
 0x182   : > { %v2545_v13 = vadd.f32 %v2544_v25, %v2319_v8  ;;  %v2549_v53 = vpop.f32.mrf.mxu1 }
 0x183   : > { %3496 = vmatmul.msk.bf16.gmra.mxu2 %vm2240_vm5, %v3551_v58  ;;  %v2800_v12 = vpop.f32.mrf.mxu2 }
 0x184   : > { %3329 = vmatmul.msk.bf16.gmra.mxu0 %vm2240_vm5, %v3536_v23  ;;  %v2871_v30 = vadd.f32 %v2800_v12, %v2543_v62 }
 0x186   : > { %3499 = vmatmul.msk.bf16.gmra.mxu3 %vm2240_vm5, %v3554_v18  ;;  %v2909_v27 = vsel %vm2897_vm3, %v2871_v30, 0.0  ;;  %v2974_v20 = vmul.f32 %v2871_v30, %v2871_v30  ;;  %v3076_v15 = vpack.c.bf16 %v2871_v30, %v2871_v30  ;;  %v4803_v42 = vpop.f32.mrf.mxu3 }
 0x187   : > { %v2910_v31 = vadd.f32 %v2909_v27, %v2908_v7 }
 0x188   : > { %v3011_v49 = vsel %vm2897_vm3, %v2974_v20, 0.0  ;;  %3108 = vst.msk [vmem:[%s4732_s26 + $0x18] sm:$0xf] %vm237_vm0, %v3076_v15 }
 0x189   : > { %v3012_v3 = vadd.f32 %v3011_v49, %v3010_v46  ;;  %v2322_v47 = vpop.f32.mrf.mxu0 }
 0x18a   : > { %v2548_v6 = vadd.f32 %v2547_v54, %v2322_v47  ;;  %v2552_v52 = vpop.f32.mrf.mxu1 }
 0x18b   : > { %v2802_v34 = vpop.f32.mrf.mxu2 }
 0x18c   : > { %v2872_v26 = vadd.f32 %v2802_v34, %v2545_v13 }
 0x18e   : > { %v2911_v28 = vsel %vm2897_vm3, %v2872_v26, 0.0  ;;  %v2975_v36 = vmul.f32 %v2872_v26, %v2872_v26  ;;  %v3077_v33 = vpack.c.bf16 %v2872_v26, %v2872_v26  ;;  %v4810_v61 = vpop.f32.mrf.mxu3 }
 0x18f   : > { %v2912_v19 = vadd.f32 %v2911_v28, %v2910_v31 }
 0x190   : > { %v3013_v24 = vsel %vm2897_vm3, %v2975_v36, 0.0  ;;  %3109 = vst.msk [vmem:[%s4732_s26 + $0x1c] sm:$0xf] %vm237_vm0, %v3077_v33 }
 0x191   : > { %v3014_v40 = vadd.f32 %v3013_v24, %v3012_v3  ;;  %v2324_v59 = vpop.f32.mrf.mxu0 }
 0x192   : > { %v2550_v55 = vadd.f32 %v2549_v53, %v2324_v59  ;;  %v2554_v63 = vpop.f32.mrf.mxu1 }
 0x193   : > { %3497 = vmatmul.msk.bf16.gmra.mxu2 %vm2240_vm5, %v3552_v4 }
 0x195   : > { %v2805_v21 = vpop.f32.mrf.mxu2 }
 0x196   : > { %3500 = vmatmul.msk.bf16.gmra.mxu3 %vm2240_vm5, %v3555_v60  ;;  %v2873_v0 = vadd.f32 %v2805_v21, %v2548_v6 }
 0x198   : > { %v2913_v43 = vsel %vm2897_vm3, %v2873_v0, 0.0  ;;  %v2976_v38 = vmul.f32 %v2873_v0, %v2873_v0  ;;  %v3078_v45 = vpack.c.bf16 %v2873_v0, %v2873_v0 }
 0x199   : > { %v2914_v16 = vadd.f32 %v2913_v43, %v2912_v19  ;;  %v2327_v51 = vpop.f32.mrf.mxu0 }
 0x19a   : > { %v3015_v9 = vsel %vm2897_vm3, %v2976_v38, 0.0  ;;  %3110 = vst.msk [vmem:[%s4732_s26 + $0x20] sm:$0xf] %vm237_vm0, %v3078_v45  ;;  %v2557_v44 = vpop.f32.mrf.mxu1  ;;  %v2553_v48 = vadd.f32 %v2552_v52, %v2327_v51 }
 0x19b   : > { %v3016_v17 = vadd.f32 %v3015_v9, %v3014_v40 }
 0x19d   : > { %v2807_v50 = vpop.f32.mrf.mxu2 }
 0x19e   : > { %v2874_v39 = vadd.f32 %v2807_v50, %v2550_v55 }
 0x1a0   : > { %v2915_v10 = vsel %vm2897_vm3, %v2874_v39, 0.0  ;;  %v2977_v37 = vmul.f32 %v2874_v39, %v2874_v39  ;;  %v3079_v11 = vpack.c.bf16 %v2874_v39, %v2874_v39 }
 0x1a1   : > { %v2916_v22 = vadd.f32 %v2915_v10, %v2914_v16  ;;  %v2329_v7 = vpop.f32.mrf.mxu0  ;;  %v4817_v32 = vpop.f32.mrf.mxu3 }
 0x1a2   : > { %v3017_v57 = vsel %vm2897_vm3, %v2977_v37, 0.0  ;;  %3111 = vst.msk [vmem:[%s4732_s26 + $0x24] sm:$0xf] %vm237_vm0, %v3079_v11  ;;  %v2559_v18 = vpop.f32.mrf.mxu1  ;;  %v2555_v20 = vadd.f32 %v2554_v63, %v2329_v7 }
 0x1a3   : > { %v3018_v2 = vadd.f32 %v3017_v57, %v3016_v17 }
 0x1a6   : > { %3501 = vmatmul.msk.bf16.gmra.mxu3 %vm2240_vm5, %v3556_v1 }
 0x1a9   : > { %v4819_v46 = vpop.f32.mrf.mxu3 }
 0x1b0   : > { %v2332_v25 = vpop.f32.mrf.mxu0 }
 0x1b1   : > { %v2562_v36 = vpop.f32.mrf.mxu1  ;;  %v2558_v19 = vadd.f32 %v2557_v44, %v2332_v25 }
 0x1b5   : > { %v2810_v14 = vpop.f32.mrf.mxu2 }
 0x1b6   : > { %v2875_v58 = vadd.f32 %v2810_v14, %v2553_v48 }
 0x1b8   : > { %v2334_v23 = vpop.f32.mrf.mxu0  ;;  %v2917_v8 = vsel %vm2897_vm3, %v2875_v58, 0.0  ;;  %v2978_v62 = vmul.f32 %v2875_v58, %v2875_v58  ;;  %v3080_v56 = vpack.c.bf16 %v2875_v58, %v2875_v58 }
 0x1b9   : > { %v2918_v12 = vadd.f32 %v2917_v8, %v2916_v22  ;;  %v4822_v30 = vpop.f32.mrf.mxu3  ;;  %v2560_v38 = vadd.f32 %v2559_v18, %v2334_v23  ;;  %v2564_v45 = vpop.f32.mrf.mxu1 }
 0x1ba   : > { %v3019_v54 = vsel %vm2897_vm3, %v2978_v62, 0.0  ;;  %3112 = vst.msk [vmem:[%s4732_s26 + $0x28] sm:$0xf] %vm237_vm0, %v3080_v56 }
 0x1bb   : > { %v3020_v27 = vadd.f32 %v3019_v54, %v3018_v2 }
 0x1bd   : > { %v2812_v15 = vpop.f32.mrf.mxu2 }
 0x1be   : > { %v2876_v31 = vadd.f32 %v2812_v15, %v2555_v20 }
 0x1c0   : > { %v2919_v49 = vsel %vm2897_vm3, %v2876_v31, 0.0  ;;  %v2979_v3 = vmul.f32 %v2876_v31, %v2876_v31  ;;  %v3081_v47 = vpack.c.bf16 %v2876_v31, %v2876_v31  ;;  %v2337_v34 = vpop.f32.mrf.mxu0 }
 0x1c1   : > { %v2920_v13 = vadd.f32 %v2919_v49, %v2918_v12  ;;  %v4828_v26 = vpop.f32.mrf.mxu3  ;;  %v2563_v37 = vadd.f32 %v2562_v36, %v2337_v34  ;;  %v2567_v57 = vpop.f32.mrf.mxu1 }
 0x1c2   : > { %v3021_v28 = vsel %vm2897_vm3, %v2979_v3, 0.0  ;;  %3113 = vst.msk [vmem:[%s4732_s26 + $0x2c] sm:$0xf] %vm237_vm0, %v3081_v47 }
 0x1c3   : > { %v3022_v33 = vadd.f32 %v3021_v28, %v3020_v27 }
 0x1c5   : > { %v2815_v53 = vpop.f32.mrf.mxu2 }
 0x1c6   : > { %v2877_v24 = vadd.f32 %v2815_v53, %v2558_v19 }
 0x1c8   : > { %v2921_v4 = vsel %vm2897_vm3, %v2877_v24, 0.0  ;;  %v2980_v40 = vmul.f32 %v2877_v24, %v2877_v24  ;;  %v3082_v59 = vpack.c.bf16 %v2877_v24, %v2877_v24  ;;  %v2339_v43 = vpop.f32.mrf.mxu0 }
 0x1c9   : > { %v2922_v60 = vadd.f32 %v2921_v4, %v2920_v13  ;;  %v4834_v6 = vpop.f32.mrf.mxu3  ;;  %v2565_v7 = vadd.f32 %v2564_v45, %v2339_v43  ;;  %v2569_v58 = vpop.f32.mrf.mxu1 }
 0x1ca   : > { %v3023_v21 = vsel %vm2897_vm3, %v2980_v40, 0.0  ;;  %3114 = vst.msk [vmem:[%s4732_s26 + $0x30] sm:$0xf] %vm237_vm0, %v3082_v59 }
 0x1cb   : > { %v3024_v0 = vadd.f32 %v3023_v21, %v3022_v33  ;;  %v2588_v33 = vadd.f32 %v4822_v30, %v4765_v29  ;;  %v2590_v29 = vadd.f32 %v4828_v26, %v4778_v5  ;;  %v2593_v5 = vadd.f32 %v4834_v6, %v4786_v41 }
 0x1cd   : > { %v2817_v52 = vpop.f32.mrf.mxu2 }
 0x1ce   : > { %v2878_v16 = vadd.f32 %v2817_v52, %v2560_v38 }
 0x1d0   : > { %v2923_v51 = vsel %vm2897_vm3, %v2878_v16, 0.0  ;;  %v2981_v9 = vmul.f32 %v2878_v16, %v2878_v16  ;;  %v3083_v17 = vpack.c.bf16 %v2878_v16, %v2878_v16  ;;  %v2342_v11 = vpop.f32.mrf.mxu0 }
 0x1d1   : > { %v4840_v55 = vadd.f32 %v2923_v51, %v2922_v60  ;;  %v4842_v50 = vpop.f32.mrf.mxu3  ;;  %v2568_v8 = vadd.f32 %v2567_v57, %v2342_v11  ;;  %v2572_v27 = vpop.f32.mrf.mxu1 }
 0x1d2   : > { %v3025_v39 = vsel %vm2897_vm3, %v2981_v9, 0.0  ;;  %3115 = vst.msk [vmem:[%s4732_s26 + $0x34] sm:$0xf] %vm237_vm0, %v3083_v17  ;;  %v2595_v6 = vadd.f32 %v4842_v50, %v4796_v35 }
 0x1d3   : > { %v4847_v10 = vadd.f32 %v3025_v39, %v3024_v0 }
 0x1d5   : > { %v2820_v1 = vpop.f32.mrf.mxu2 }
 0x1d6   : > { %v4849_v22 = vadd.f32 %v2820_v1, %v2563_v37 }
 0x1d8   : > { %v3084_v63 = vpack.c.bf16 %v4849_v22, %v4849_v22  ;;  %v2344_v48 = vpop.f32.mrf.mxu0  ;;  %v2982_v11 = vmul.f32 %v4849_v22, %v4849_v22 }
 0x1d9   : > { %v4853_v2 = vpop.f32.mrf.mxu3  ;;  %v2570_v20 = vadd.f32 %v2569_v58, %v2344_v48  ;;  %v2574_v13 = vpop.f32.mrf.mxu1 }
 0x1da   : > { %3116 = vst.msk [vmem:[%s4732_s26 + $0x38] sm:$0xf] %vm237_vm0, %v3084_v63  ;;  %v2925_v63 = vsel %vm2897_vm3, %v4849_v22, 0.0 }
 0x1dd   : > { %v2822_v44 = vpop.f32.mrf.mxu2 }
 0x1de   : > { %v4857_v25 = vadd.f32 %v2822_v44, %v2565_v7  ;;  %v3027_v44 = vsel %vm2897_vm3, %v2982_v11, 0.0 }
 0x1e0   : > { %v3085_v14 = vpack.c.bf16 %v4857_v25, %v4857_v25  ;;  %v2983_v1 = vmul.f32 %v4857_v25, %v4857_v25  ;;  %v2927_v48 = vsel %vm2897_vm3, %v4857_v25, 0.0 }
 0x1e1   : > { %v4861_v23 = vpop.f32.mrf.mxu3  ;;  %v2347_v18 = vpop.f32.mrf.mxu0 }
 0x1e2   : > { %3117 = vst.msk [vmem:[%s4732_s26 + $0x3c] sm:$0xf] %vm237_vm0, %v3085_v14  ;;  %v2573_v34 = vadd.f32 %v2572_v27, %v2347_v18  ;;  %v2577_v60 = vpop.f32.mrf.mxu1 }
 0x1e6   : > { %v2825_v62 = vpop.f32.mrf.mxu2 }
 0x1e7   : > { %v2881_v56 = vadd.f32 %v2825_v62, %v2568_v8  ;;  %v2926_v8 = vadd.f32 %v2925_v63, %v4840_v55  ;;  %v3029_v62 = vsel %vm2897_vm3, %v2983_v1, 0.0 }
 0x1e9   : > { %v4865_v12 = vpop.f32.mrf.mxu3  ;;  %v3086_v54 = vpack.c.bf16 %v2881_v56, %v2881_v56  ;;  %v2349_v47 = vpop.f32.mrf.mxu0  ;;  %v2984_v14 = vmul.f32 %v2881_v56, %v2881_v56 }
 0x1ea   : > { %v2575_v59 = vadd.f32 %v2574_v13, %v2349_v47  ;;  %v2579_v26 = vpop.f32.mrf.mxu1 }
 0x1eb   : > { %3118 = vst.msk [vmem:[%s4732_s26 + $0x40] sm:$0xf] %vm237_vm0, %v3086_v54  ;;  %v2929_v54 = vsel %vm2897_vm3, %v2881_v56, 0.0 }
 0x1ee   : > { %v2827_v15 = vpop.f32.mrf.mxu2 }
 0x1ef   : > { %v2882_v31 = vadd.f32 %v2827_v15, %v2570_v20  ;;  %v3028_v20 = vadd.f32 %v3027_v44, %v4847_v10  ;;  %v2928_v15 = vadd.f32 %v2927_v48, %v2926_v8 }
 0x1f1   : > { %v4869_v49 = vpop.f32.mrf.mxu3  ;;  %v3087_v3 = vpack.c.bf16 %v2882_v31, %v2882_v31  ;;  %v2352_v4 = vpop.f32.mrf.mxu0  ;;  %v2985_v35 = vmul.f32 %v2882_v31, %v2882_v31  ;;  %v2931_v47 = vsel %vm2897_vm3, %v2882_v31, 0.0  ;;  %v3030_v56 = vadd.f32 %v3029_v62, %v3028_v20 }
 0x1f2   : > { %v2578_v52 = vadd.f32 %v2577_v60, %v2352_v4  ;;  %v2582_v25 = vpop.f32.mrf.mxu1 }
 0x1f3   : > { %3119 = vst.msk [vmem:[%s4732_s26 + $0x44] sm:$0xf] %vm237_vm0, %v3087_v3  ;;  %v3031_v3 = vsel %vm2897_vm3, %v2984_v14, 0.0  ;;  %v2600_v14 = vadd.f32 %v4861_v23, %v4810_v61 }
 0x1f4   : > { %v3032_v31 = vadd.f32 %v3031_v3, %v3030_v56 }
 0x1f6   : > { %v2830_v28 = vpop.f32.mrf.mxu2 }
 0x1f7   : > { %v2883_v36 = vadd.f32 %v2830_v28, %v2573_v34  ;;  %v2930_v34 = vadd.f32 %v2929_v54, %v2928_v15 }
 0x1f9   : > { %v2845_v19 = vpop.f32.mrf.mxu3  ;;  %v3088_v53 = vpack.c.bf16 %v2883_v36, %v2883_v36  ;;  %v2354_v16 = vpop.f32.mrf.mxu0  ;;  %v2986_v55 = vmul.f32 %v2883_v36, %v2883_v36  ;;  %v2932_v4 = vadd.f32 %v2931_v47, %v2930_v34 }
 0x1fa   : > { %v4875_v24 = vadd.f32 %v2845_v19, %v2588_v33  ;;  %v2580_v41 = vadd.f32 %v2579_v26, %v2354_v16  ;;  %v3033_v33 = vsel %vm2897_vm3, %v2985_v35, 0.0  ;;  %v2933_v19 = vsel %vm2897_vm3, %v2883_v36, 0.0  ;;  %v2584_v1 = vpop.f32.mrf.mxu1 }
 0x1fb   : > { %3120 = vst.msk [vmem:[%s4732_s26 + $0x48] sm:$0xf] %vm237_vm0, %v3088_v53  ;;  %v2598_v53 = vadd.f32 %v4853_v2, %v4803_v42 }
 0x1fc   : > { %v3094_v40 = vpack.c.bf16 %v4875_v24, %v4875_v24  ;;  %v2992_v62 = vmul.f32 %v4875_v24, %v4875_v24  ;;  %v2945_v61 = vsel %vm2897_vm3, %v4875_v24, 0.0 }
 0x1fe   : > { %3126 = vst.msk [vmem:[%s4732_s26 + $0x60] sm:$0xf] %vm237_vm0, %v3094_v40  ;;  %v2832_v21 = vpop.f32.mrf.mxu2  ;;  %v3047_v34 = vsel %vm2897_vm3, %v2992_v62, 0.0 }
 0x1ff   : > { %v2884_v0 = vadd.f32 %v2832_v21, %v2575_v59  ;;  %v3035_v59 = vsel %vm2897_vm3, %v2986_v55, 0.0 }
 0x201   : > { %v2847_v30 = vpop.f32.mrf.mxu3  ;;  %v3089_v43 = vpack.c.bf16 %v2884_v0, %v2884_v0  ;;  %v2357_v22 = vpop.f32.mrf.mxu0  ;;  %v2987_v28 = vmul.f32 %v2884_v0, %v2884_v0  ;;  %v2935_v60 = vsel %vm2897_vm3, %v2884_v0, 0.0 }
 0x202   : > { %v4885_v38 = vadd.f32 %v2847_v30, %v2590_v29  ;;  %v2583_v10 = vadd.f32 %v2582_v25, %v2357_v22  ;;  %v3034_v30 = vadd.f32 %v3033_v33, %v3032_v31 }
 0x203   : > { %3121 = vst.msk [vmem:[%s4732_s26 + $0x4c] sm:$0xf] %vm237_vm0, %v3089_v43  ;;  %v2934_v43 = vadd.f32 %v2933_v19, %v2932_v4  ;;  %v3037_v36 = vsel %vm2897_vm3, %v2987_v28, 0.0 }
 0x204   : > { %v3095_v45 = vpack.c.bf16 %v4885_v38, %v4885_v38  ;;  %v3036_v2 = vadd.f32 %v3035_v59, %v3034_v30  ;;  %v2993_v23 = vmul.f32 %v4885_v38, %v4885_v38  ;;  %v2947_v28 = vsel %vm2897_vm3, %v4885_v38, 0.0 }
 0x206   : > { %3127 = vst.msk [vmem:[%s4732_s26 + $0x64] sm:$0xf] %vm237_vm0, %v3095_v45  ;;  %v2835_v51 = vpop.f32.mrf.mxu2 }
 0x207   : > { %v2885_v9 = vadd.f32 %v2835_v51, %v2578_v52 }
 0x209   : > { %v2850_v17 = vpop.f32.mrf.mxu3  ;;  %v3090_v39 = vpack.c.bf16 %v2885_v9, %v2885_v9  ;;  %v2988_v21 = vmul.f32 %v2885_v9, %v2885_v9  ;;  %v2937_v52 = vsel %vm2897_vm3, %v2885_v9, 0.0  ;;  %v2359_v26 = vpop.f32.mrf.mxu0 }
 0x20a   : > { %v4895_v37 = vadd.f32 %v2850_v17, %v2593_v5  ;;  %v2936_v5 = vadd.f32 %v2935_v60, %v2934_v43 }
 0x20b   : > { %3122 = vst.msk [vmem:[%s4732_s26 + $0x50] sm:$0xf] %vm237_vm0, %v3090_v39  ;;  %v3039_v17 = vsel %vm2897_vm3, %v2988_v21, 0.0 }
 0x20c   : > { %v3096_v57 = vpack.c.bf16 %v4895_v37, %v4895_v37  ;;  %v2938_v63 = vadd.f32 %v2937_v52, %v2936_v5  ;;  %v2994_v33 = vmul.f32 %v4895_v37, %v4895_v37  ;;  %v2949_v31 = vsel %vm2897_vm3, %v4895_v37, 0.0 }
 0x20e   : > { %3128 = vst.msk [vmem:[%s4732_s26 + $0x68] sm:$0xf] %vm237_vm0, %v3096_v57  ;;  %v2837_v7 = vpop.f32.mrf.mxu2  ;;  %v3038_v57 = vadd.f32 %v3037_v36, %v3036_v2  ;;  %v3051_v60 = vsel %vm2897_vm3, %v2994_v33, 0.0 }
 0x20f   : > { %v2886_v58 = vadd.f32 %v2837_v7, %v2580_v41  ;;  %v2585_v41 = vadd.f32 %v2584_v1, %v2359_v26 }
 0x210   : > { %v3040_v7 = vadd.f32 %v3039_v17, %v3038_v57  ;;  %v2605_v17 = vadd.f32 %v4869_v49, %v4819_v46 }
 0x211   : > { %v2852_v18 = vpop.f32.mrf.mxu3  ;;  %v3091_v50 = vpack.c.bf16 %v2886_v58, %v2886_v58  ;;  %v2989_v16 = vmul.f32 %v2886_v58, %v2886_v58  ;;  %v2939_v0 = vsel %vm2897_vm3, %v2886_v58, 0.0 }
 0x212   : > { %v4917_v27 = vadd.f32 %v2852_v18, %v2595_v6  ;;  %v2940_v44 = vadd.f32 %v2939_v0, %v2938_v63 }
 0x213   : > { %3123 = vst.msk [vmem:[%s4732_s26 + $0x54] sm:$0xf] %vm237_vm0, %v3091_v50  ;;  %v3041_v9 = vsel %vm2897_vm3, %v2989_v16, 0.0 }
 0x214   : > { %v3097_v13 = vpack.c.bf16 %v4917_v27, %v4917_v27  ;;  %v3042_v22 = vadd.f32 %v3041_v9, %v3040_v7  ;;  %v2995_v4 = vmul.f32 %v4917_v27, %v4917_v27  ;;  %v2951_v21 = vsel %vm2897_vm3, %v4917_v27, 0.0 }
 0x216   : > { %3129 = vst.msk [vmem:[%s4732_s26 + $0x6c] sm:$0xf] %vm237_vm0, %v3097_v13  ;;  %v2840_v40 = vpop.f32.mrf.mxu2  ;;  %v3053_v43 = vsel %vm2897_vm3, %v2995_v4, 0.0 }
 0x217   : > { %v2887_v29 = vadd.f32 %v2840_v40, %v2583_v10  ;;  %v2603_v10 = vadd.f32 %v4865_v12, %v4817_v32 }
 0x219   : > { %v2855_v45 = vpop.f32.mrf.mxu3  ;;  %v3092_v51 = vpack.c.bf16 %v2887_v29, %v2887_v29  ;;  %v2990_v39 = vmul.f32 %v2887_v29, %v2887_v29  ;;  %v2941_v6 = vsel %vm2897_vm3, %v2887_v29, 0.0 }
 0x21a   : > { %v2893_v42 = vadd.f32 %v2855_v45, %v2598_v53  ;;  %v2942_v18 = vadd.f32 %v2941_v6, %v2940_v44  ;;  %v3049_v53 = vsel %vm2897_vm3, %v2993_v23, 0.0 }
 0x21b   : > { %3124 = vst.msk [vmem:[%s4732_s26 + $0x58] sm:$0xf] %vm237_vm0, %v3092_v51  ;;  %v3043_v58 = vsel %vm2897_vm3, %v2990_v39, 0.0 }
 0x21c   : > { %v3098_v11 = vpack.c.bf16 %v2893_v42, %v2893_v42  ;;  %v3044_v25 = vadd.f32 %v3043_v58, %v3042_v22  ;;  %v2996_v29 = vmul.f32 %v2893_v42, %v2893_v42  ;;  %v2953_v37 = vsel %vm2897_vm3, %v2893_v42, 0.0 }
 0x21e   : > { %3130 = vst.msk [vmem:[%s4732_s26 + $0x70] sm:$0xf] %vm237_vm0, %v3098_v11  ;;  %v2842_v48 = vpop.f32.mrf.mxu2  ;;  %v3055_v51 = vsel %vm2897_vm3, %v2996_v29, 0.0 }
 0x21f   : > { %v2888_v8 = vadd.f32 %v2842_v48, %v2585_v41 }
 0x221   : > { %v2857_v54 = vpop.f32.mrf.mxu3  ;;  %v2943_v35 = vsel %vm2897_vm3, %v2888_v8, 0.0  ;;  %v2991_v50 = vmul.f32 %v2888_v8, %v2888_v8  ;;  %v3093_v20 = vpack.c.bf16 %v2888_v8, %v2888_v8 }
 0x222   : > { %v2894_v15 = vadd.f32 %v2857_v54, %v2600_v14  ;;  %v2944_v3 = vadd.f32 %v2943_v35, %v2942_v18 }
 0x223   : > { %v3045_v47 = vsel %vm2897_vm3, %v2991_v50, 0.0  ;;  %3125 = vst.msk [vmem:[%s4732_s26 + $0x5c] sm:$0xf] %vm237_vm0, %v3093_v20 }
 0x224   : > { %v3099_v55 = vpack.c.bf16 %v2894_v15, %v2894_v15  ;;  %v2946_v13 = vadd.f32 %v2945_v61, %v2944_v3  ;;  %v3046_v56 = vadd.f32 %v3045_v47, %v3044_v25  ;;  %v2997_v36 = vmul.f32 %v2894_v15, %v2894_v15 }
 0x225   : > { %v2955_v2 = vsel %vm2897_vm3, %v2894_v15, 0.0 }
 0x226   : > { %3131 = vst.msk [vmem:[%s4732_s26 + $0x74] sm:$0xf] %vm237_vm0, %v3099_v55  ;;  %v2948_v24 = vadd.f32 %v2947_v28, %v2946_v13  ;;  %v3048_v19 = vadd.f32 %v3047_v34, %v3046_v56  ;;  %v3057_v0 = vsel %vm2897_vm3, %v2997_v36, 0.0 }
 0x228   : > { %v3050_v40 = vadd.f32 %v3049_v53, %v3048_v19  ;;  %v2950_v38 = vadd.f32 %v2949_v31, %v2948_v24 }
 0x229   : > { %v2860_v59 = vpop.f32.mrf.mxu3 }
 0x22a   : > { %v2895_v30 = vadd.f32 %v2860_v59, %v2603_v10  ;;  %v2952_v32 = vadd.f32 %v2951_v21, %v2950_v38  ;;  %v3052_v12 = vadd.f32 %v3051_v60, %v3050_v40 }
 0x22c   : > { %v3100_v45 = vpack.c.bf16 %v2895_v30, %v2895_v30  ;;  %v2954_v52 = vadd.f32 %v2953_v37, %v2952_v32  ;;  %v3054_v16 = vadd.f32 %v3053_v43, %v3052_v12  ;;  %v2998_v5 = vmul.f32 %v2895_v30, %v2895_v30 }
 0x22d   : > { %v2957_v42 = vsel %vm2897_vm3, %v2895_v30, 0.0 }
 0x22e   : > { %3132 = vst.msk [vmem:[%s4732_s26 + $0x78] sm:$0xf] %vm237_vm0, %v3100_v45  ;;  %v2956_v27 = vadd.f32 %v2955_v2, %v2954_v52  ;;  %v3056_v26 = vadd.f32 %v3055_v51, %v3054_v16  ;;  %v3059_v1 = vsel %vm2897_vm3, %v2998_v5, 0.0 }
 0x230   : > { %v3058_v39 = vadd.f32 %v3057_v0, %v3056_v26  ;;  %v2958_v63 = vadd.f32 %v2957_v42, %v2956_v27 }
 0x231   : > { %v2862_v11 = vpop.f32.mrf.mxu3 }
 0x232   : > { %v2896_v57 = vadd.f32 %v2862_v11, %v2605_v17  ;;  %v3060_v7 = vadd.f32 %v3059_v1, %v3058_v39 }
 0x234   : > { %v2959_v41 = vsel %vm2897_vm3, %v2896_v57, 0.0  ;;  %v2999_v9 = vmul.f32 %v2896_v57, %v2896_v57  ;;  %v3101_v6 = vpack.c.bf16 %v2896_v57, %v2896_v57 }
 0x235   : > { %v2960_v44 = vadd.f32 %v2959_v41, %v2958_v63 }
 0x236   : > { %v3061_v48 = vsel %vm2897_vm3, %v2999_v9, 0.0  ;;  %3133 = vst.msk [vmem:[%s4732_s26 + $0x7c] sm:$0xf] %vm237_vm0, %v3101_v6 }
 0x237   : > { %v2961_v46 = vrot.slane %v2960_v44, 4  ;;  %v3062_v49 = vadd.f32 %v3061_v48, %v3060_v7 }
 0x239   : > { %v2962_v14 = vadd.f32 %v2961_v46, %v2960_v44  ;;  %v3063_v58 = vrot.slane %v3062_v49, 4 }
 0x23b   : > { %v2963_v8 = vrot.slane %v2962_v14, 2  ;;  %v3064_v62 = vadd.f32 %v3063_v58, %v3062_v49 }
 0x23d   : > { %v2964_v22 = vadd.f32 %v2963_v8, %v2962_v14  ;;  %v3065_v18 = vrot.slane %v3064_v62, 2 }
 0x23f   : > { %v2965_v54 = vrot.slane %v2964_v22, 1  ;;  %v3066_v35 = vadd.f32 %v3065_v18, %v3064_v62 }
 0x241   : > { %v2966_v50 = vadd.f32 %v2965_v54, %v2964_v22  ;;  %v3067_v20 = vrot.slane %v3066_v35, 1 }
 0x243   : > { %v3068_v15 = vadd.f32 %v3067_v20, %v3066_v35  ;;  %3134 = vst.msk [vmem:[%s235_s29] sm:$0x1] %vm240_vm1, %v2966_v50 }
 0x245   : > { %3135 = vst.msk [vmem:[%s235_s29 + $0x1] sm:$0x1] %vm240_vm1, %v3068_v15 }
 0x246 PF: > { %s16_s18 = sadd.s32 1, %s3660_s18  }
 0x247   : > { %p13_p4 = scmp.ge.s32.totalorder %s16_s18, 4  }
 0x249   :  { %15 = sbr.rel (!%p13_p4) target bundleno = 1 (0x1), region = 82 }

// kernel: up_forward.2
= control target key start
LH: loop header
LB: loop body
LE: loop exit
PB: predicated region body
PF: predicated region fallthrough
CT: control target
= control target key end

     0   :  { %s4036_s15 = smov 0   ;;  %s5642_s0 = inlined_call_operand.vmem [shape: bf16[2,16,16,4], index: 0, kind: input, shape index: {}]   ;;  %s5643_s1 = inlined_call_operand.vmem [shape: bf16[2,16,16,4], index: 1, kind: input, shape index: {}]   ;;  %s5644_s2 = inlined_call_operand.vmem [shape: bf16[3,24,4], index: 2, kind: input, shape index: {}]   ;;  %s5645_s3 = inlined_call_operand.vmem [shape: bf16[2,16,16,4], index: 3, kind: output, shape index: {0}]   ;;  %s5646_s4 = inlined_call_operand.vmem [shape: f32[2,2,4], index: 4, kind: output, shape index: {1}]  }
   0x1 LB: > { %s3643_s16 = sadd.s32 4294967295, %s4005_s15   ;;  %p3647_p0 = scmp.ge.s32.totalorder %s4005_s15, 1  ;;  %s4005_s15 = sphi %s4036_s15, %s15_s15  }
   0x2   : > { %p175_p1 = scmp.lt.s32.totalorder %s4005_s15, 3 }
   0x4   : > { %p176_p2 = pnand %p3647_p0, %p175_p1 }
   0x5   : > { %p210_p3 = scmp.lt.s32.totalorder (!%p176_p2), %s3643_s16, 1  ;;  %s4007_s21 = smov (!%p176_p2), 4  }
   0x6   : > { %179 = sbr.rel (%p176_p2) target bundleno = 791 (0x317), region = 32  ;;  %s4009_s25 = smov (!%p176_p2), 16  }
   0x7   : > { %s4010_s26 = smov (!%p176_p2), 8  }
   0xb   : > { %s5669_s16 = smov (!%p210_p3, %s3643_s16), 1  ;;  %vm240_vm0 = vsmask.f32 256  ;;  %vm384_vm1 = vsmask.f32 4368  ;;  %vm230_vm3 = vcmask 60416  }
   0xc   : > { %s4047_s17 = sshll.u32 %s5669_s16, 7  ;;  %vm4064_vm2 = vmor %vm240_vm0, %vm384_vm1  ;;  %vm233_vm4 = vcmask 57344   ;;  %vm296_vm5 = vsmask.f32 7938  ;;  %vm2203_vm8 = vcmask 1042432   ;;  %vm2204_vm9 = vcmask 1046532  }
   0xd   : > { %s4053_s20 = scalar_lea.vmem %s5643_s1, %s4047_s17  ;;  %vm4107_vm6 = vmand %vm233_vm4, %vm296_vm5  ;;  %vm1515_vm10 = vsmask.f32 3328  ;;  %vm1516_vm11 = vsmask.f32 7440  ;;  %s4157_s24 = scalar_lea.vmem %s5642_s0, %s4047_s17  ;;  %vm5647_vm14 = vcmask 24576   ;;  %vm707_vm1 = vcmask 27648  }
   0xe   : > { %v826_v0 = vld [vmem:[%s4053_s20 + $0x8] sm:$0xf]  ;;  %v824_v1 = vld [vmem:[%s4053_s20] sm:$0xf]  ;;  %v827_v2 = vld [vmem:[%s4053_s20 + $0xc] sm:$0xf]  ;;  %s5330_s18 = scalar_lea.vmem %s5645_s3, %s4047_s17 }
   0xf   : > { %v874_v3 = vshrl.u32 %v826_v0, 16  ;;  %v877_v4 = vshll.u32 %v826_v0, 16  ;;  %v857_v5 = vshrl.u32 %v824_v1, 16  ;;  %v860_v6 = vshll.u32 %v824_v1, 16  ;;  %v825_v10 = vld [vmem:[%s4053_s20 + $0x4] sm:$0xf]  ;;  %vm4114_vm7 = vmand %vm233_vm4, %vm240_vm0 }
  0x10   : > { %v882_v7 = vshrl.u32 %v827_v2, 16  ;;  %v885_v12 = vshll.u32 %v827_v2, 16  ;;  %v865_v13 = vshrl.u32 %v825_v10, 16  ;;  %v828_v19 = vld [vmem:[%s4053_s20 + $0x10] sm:$0xf]  ;;  %v868_v21 = vshll.u32 %v825_v10, 16  ;;  %vm4144_vm12 = vmor %vm2203_vm8, %vm2204_vm9 }
  0x11   : > { %v876_v8 = vrot.slane %v874_v3, 7  ;;  %v859_v9 = vrot.slane %v857_v5, 7  ;;  %v848_v20 = vld [vmem:[%s4053_s20 + $0x60] sm:$0xf]  ;;  %v891_v25 = vshrl.u32 %v828_v19, 16  ;;  %v894_v34 = vshll.u32 %v828_v19, 16  ;;  %vm4149_vm13 = vmor %vm1515_vm10, %vm1516_vm11 }
  0x12   : > { %v884_v11 = vrot.slane %v882_v7, 7  ;;  %v867_v16 = vrot.slane %v865_v13, 7  ;;  %v1061_v26 = vshrl.u32 %v848_v20, 16  ;;  %v829_v27 = vld [vmem:[%s4053_s20 + $0x14] sm:$0xf]  ;;  %v1064_v36 = vshll.u32 %v848_v20, 16  ;;  %vm4183_vm15 = vmand %vm5647_vm14, %vm240_vm0 }
  0x13   : > { %v879_v14 = vor.u32 %v877_v4, %v876_v8  ;;  %v862_v15 = vor.u32 %v860_v6, %v859_v9  ;;  %v880_v17 = vrot.slane %v876_v8, 4  ;;  %v863_v28 = vrot.slane %v859_v9, 4  ;;  %v849_v31 = vld [vmem:[%s4053_s20 + $0x64] sm:$0xf]  ;;  %v830_v47 = vld [vmem:[%s4053_s20 + $0x18] sm:$0xf] }
  0x14   : > { %v887_v18 = vor.u32 %v885_v12, %v884_v11  ;;  %v872_v23 = vrot.slane %v867_v16, 4  ;;  %v889_v24 = vrot.slane %v884_v11, 4  ;;  %v870_v30 = vor.u32 %v868_v21, %v867_v16  ;;  %v831_v51 = vld [vmem:[%s4053_s20 + $0x1c] sm:$0xf]  ;;  %v850_v53 = vld [vmem:[%s4053_s20 + $0x68] sm:$0xf] }
  0x15   : > { %1134 = vrot.lane.b32.xlu0 %v879_v14, %s4007_s21  ;;  %1128 = vrot.lane.b32.xlu1 %v862_v15, %s4007_s21  ;;  %v899_v32 = vshrl.u32 %v829_v27, 16  ;;  %v893_v33 = vrot.slane %v891_v25, 7  ;;  %v1063_v35 = vrot.slane %v1061_v26, 7  ;;  %v1069_v37 = vshrl.u32 %v849_v31, 16  ;;  %v851_v57 = vld [vmem:[%s4053_s20 + $0x6c] sm:$0xf] }
  0x16   : > { %1132 = vrot.lane.b32.xlu2 %v872_v23, %s4007_s21  ;;  %v888_v29 = vsel %vm4064_vm2, %v880_v17, %v887_v18  ;;  %v871_v38 = vsel %vm4064_vm2, %v863_v28, %v870_v30  ;;  %v902_v39 = vshll.u32 %v829_v27, 16  ;;  %v1072_v44 = vshll.u32 %v849_v31, 16  ;;  %v852_v13 = vld [vmem:[%s4053_s20 + $0x70] sm:$0xf]  ;;  %v832_v14 = vld [vmem:[%s4053_s20 + $0x20] sm:$0xf] }
  0x17   : > { %v901_v40 = vrot.slane %v899_v32, 7  ;;  %v896_v41 = vor.u32 %v894_v34, %v893_v33  ;;  %v1066_v42 = vor.u32 %v1064_v36, %v1063_v35  ;;  %v1071_v43 = vrot.slane %v1069_v37, 7  ;;  %v833_v15 = vld [vmem:[%s4053_s20 + $0x24] sm:$0xf]  ;;  %v853_v25 = vld [vmem:[%s4053_s20 + $0x74] sm:$0xf] }
  0x18   : > { %v897_v45 = vrot.slane %v893_v33, 4  ;;  %v1067_v48 = vrot.slane %v1063_v35, 4  ;;  %v908_v52 = vshrl.u32 %v830_v47, 16  ;;  %v916_v56 = vshrl.u32 %v831_v51, 16  ;;  %s3654_s17 = sshll.u32 %s5669_s16, 1 }
  0x19   : > { %v904_v46 = vor.u32 %v902_v39, %v901_v40  ;;  %v1074_v49 = vor.u32 %v1072_v44, %v1071_v43  ;;  %v906_v54 = vrot.slane %v901_v40, 4  ;;  %v1078_v58 = vshrl.u32 %v850_v53, 16 }
  0x1a   : > { %v910_v59 = vrot.slane %v908_v52, 7  ;;  %v911_v60 = vshll.u32 %v830_v47, 16  ;;  %v1076_v61 = vrot.slane %v1071_v43, 4  ;;  %v1081_v62 = vshll.u32 %v850_v53, 16 }
  0x1b   : > { %v905_v50 = vsel %vm4064_vm2, %v897_v45, %v904_v46  ;;  %v1075_v55 = vsel %vm4064_vm2, %v1067_v48, %v1074_v49  ;;  %v1086_v63 = vshrl.u32 %v851_v57, 16  ;;  %v918_v0 = vrot.slane %v916_v56, 7 }
  0x1c   : > { %v919_v1 = vshll.u32 %v831_v51, 16  ;;  %v1080_v2 = vrot.slane %v1078_v58, 7  ;;  %v913_v3 = vor.u32 %v911_v60, %v910_v59  ;;  %v1089_v4 = vshll.u32 %v851_v57, 16 }
  0x1d   : > { %1136 = vrot.lane.b32.xlu0 %v888_v29, %s4007_s21  ;;  %1138 = vrot.lane.b32.xlu1 %v889_v24, %s4007_s21  ;;  %v1088_v6 = vrot.slane %v1086_v63, 7  ;;  %v914_v7 = vrot.slane %v910_v59, 4  ;;  %v4008_v9 = vmov 0   ;;  %v923_v17 = vrot.slane %v918_v0, 4 }
  0x1e   : > { %1130 = vrot.lane.b32.xlu2 %v871_v38, %s4007_s21  ;;  %v1083_v5 = vor.u32 %v1081_v62, %v1080_v2  ;;  %v921_v8 = vor.u32 %v919_v1, %v918_v0  ;;  %232 = vst.msk [vmem:[#allocation2 + $0x4] sm:$0xf] %vm230_vm3, %v4008_v9  ;;  %v1084_v10 = vrot.slane %v1080_v2, 4  ;;  %v1095_v18 = vshrl.u32 %v852_v13, 16  ;;  %v834_v1 = vld [vmem:[%s4053_s20 + $0x28] sm:$0xf] }
  0x1f   : > { %234 = vst.msk [vmem:[#allocation2 + $0x8] sm:$0x1] %vm233_vm4, %v4008_v9  ;;  %v1091_v11 = vor.u32 %v1089_v4, %v1088_v6  ;;  %v925_v21 = vshrl.u32 %v832_v14, 16  ;;  %v933_v23 = vshrl.u32 %v833_v15, 16  ;;  %v1093_v29 = vrot.slane %v1088_v6, 4 }
  0x20   : > { %231 = vst.msk [vmem:[#allocation2] sm:$0xf] %vm230_vm3, %v4008_v9  ;;  %v922_v12 = vsel %vm4064_vm2, %v914_v7, %v921_v8  ;;  %v1097_v30 = vrot.slane %v1095_v18, 7  ;;  %v1098_v31 = vshll.u32 %v852_v13, 16  ;;  %v928_v32 = vshll.u32 %v832_v14, 16 }
  0x21   : > { %236 = vst.msk [vmem:[#allocation2 + $0xcc] sm:$0xf] %vm230_vm3, %v4008_v9  ;;  %v1092_v20 = vsel %vm4064_vm2, %v1084_v10, %v1091_v11  ;;  %v927_v33 = vrot.slane %v925_v21, 7  ;;  %v935_v34 = vrot.slane %v933_v23, 7  ;;  %v936_v35 = vshll.u32 %v833_v15, 16 }
  0x22   : > { %237 = vst.msk [vmem:[#allocation2 + $0xd0] sm:$0xf] %vm230_vm3, %v4008_v9  ;;  %v1103_v36 = vshrl.u32 %v853_v25, 16  ;;  %v1100_v37 = vor.u32 %v1098_v31, %v1097_v30  ;;  %v854_v6 = vld [vmem:[%s4053_s20 + $0x78] sm:$0xf]  ;;  %v942_v10 = vshrl.u32 %v834_v1, 16 }
  0x23   : > { %238 = vst.msk [vmem:[#allocation2 + $0xd4] sm:$0x1] %vm233_vm4, %v4008_v9  ;;  %v930_v38 = vor.u32 %v928_v32, %v927_v33  ;;  %v931_v39 = vrot.slane %v927_v33, 4  ;;  %v938_v40 = vor.u32 %v936_v35, %v935_v34  ;;  %v1112_v11 = vshrl.u32 %v854_v6, 16  ;;  %v855_v18 = vld [vmem:[%s4053_s20 + $0x7c] sm:$0xf]  ;;  %vm4199_vm4 = vmand %vm707_vm1, %vm296_vm5 }
  0x24   : > { %v945_v21 = vshll.u32 %v834_v1, 16  ;;  %v835_v23 = vld [vmem:[%s4053_s20 + $0x2c] sm:$0xf]  ;;  %vm1279_vm8 = vcmask 57376   ;;  %vm2440_vm11 = vcmask 191616   ;;  %vm2640_vm14 = vcmask 195584  }
  0x25   : > { %1140 = vrot.lane.b32.xlu0 %v896_v41, %s4007_s21  ;;  %1200 = vrot.lane.b32.xlu1 %v1066_v42, %s4007_s21  ;;  %v1105_v41 = vrot.slane %v1103_v36, 7  ;;  %v1106_v42 = vshll.u32 %v853_v25, 16  ;;  %v1462_v43 = vld [vmem:[#allocation2 + $0x4] sm:$0xf]  ;;  %v939_v49 = vsel %vm4064_vm2, %v931_v39, %v938_v40  ;;  %v4173_v25 = vrot.slane %v942_v10, 7  ;;  %vm4276_vm9 = vmand %vm1279_vm8, %vm240_vm0 }
  0x26   : > { %1142 = vrot.lane.b32.xlu2 %v905_v50, %s4007_s21  ;;  %v298_v24 = vld [vmem:[#allocation2 + $0x8] sm:$0x1]  ;;  %v1528_v45 = vshll.u32 %v1462_v43, 16  ;;  %v1532_v46 = vshrl.u32 %v1462_v43, 16  ;;  %v1101_v50 = vrot.slane %v1097_v30, 4  ;;  %v1120_v30 = vshrl.u32 %v855_v18, 16 }
  0x27   : > { %v299_v26 = vsel %vm4107_vm6, 0, %v298_v24  ;;  %v242_v27 = vld [vmem:[#allocation2] sm:$0x1]  ;;  %v1108_v51 = vor.u32 %v1106_v42, %v1105_v41  ;;  %v4132_v52 = vld [vmem:[#allocation2 + $0x4] sm:$0xf]  ;;  %v1110_v63 = vrot.slane %v1105_v41, 4 }
  0x28   : > { %300 = vst [vmem:[#allocation2 + $0x8] sm:$0x1] %v299_v26  ;;  %v243_v28 = vsel %vm4114_vm7, 0, %v242_v27  ;;  %v1530_v56 = vrot.slane %v1528_v45, 5  ;;  %v1534_v57 = vrot.slane %v1532_v46, 4  ;;  %v2208_v59 = vrot.slane %v4132_v52, 5 }
  0x29   : > { %244 = vst [vmem:[#allocation2] sm:$0x1] %v243_v28  ;;  %v1109_v58 = vsel %vm4064_vm2, %v1101_v50, %v1108_v51  ;;  %v1114_v26 = vrot.slane %v1112_v11, 7  ;;  %v1115_v27 = vshll.u32 %v854_v6, 16  ;;  %v248_v28 = vld [vmem:[#allocation2 + $0x18] sm:$0x1] }
  0x2a   : > { %v1535_v0 = vor.u32 %v1534_v57, %v1530_v56  ;;  %v249_v32 = vsel %vm4114_vm7, 0, %v248_v28  ;;  %v2095_v33 = vld [vmem:[#allocation2] sm:$0xe]  ;;  %v4191_v42 = vrot.slane %v1120_v30, 7  ;;  %v1123_v43 = vshll.u32 %v855_v18, 16 }
  0x2b   : > { %250 = vst [vmem:[#allocation2 + $0x18] sm:$0x1] %v249_v32  ;;  %v1117_v39 = vor.u32 %v1115_v27, %v1114_v26  ;;  %v3655_v41 = vrot.slane %v2095_v33, 9  ;;  %v245_v50 = vld [vmem:[#allocation2 + $0xc] sm:$0x1]  ;;  %v948_v52 = vrot.slane %v4173_v25, 4 }
  0x2c   : > { %v1536_v9 = vrot.slane %v1535_v0, 4  ;;  %v1125_v57 = vor.u32 %v1123_v43, %v4191_v42  ;;  %v837_v10 = vld [vmem:[%s4053_s20 + $0x34] sm:$0xf]  ;;  %v846_v30 = vld [vmem:[%s4053_s20 + $0x58] sm:$0xf]  ;;  %vm1272_vm0 = vcmask 60448  }
  0x2d   : > { %1202 = vrot.lane.b32.xlu0 %v1075_v55, %s4007_s21  ;;  %1144 = vrot.lane.b32.xlu1 %v906_v54, %s4007_s21  ;;  %v940_v55 = vrot.slane %v935_v34, 4  ;;  %v950_v34 = vshrl.u32 %v835_v23, 16  ;;  %v1044_v33 = vshrl.u32 %v846_v30, 16  ;;  %vm4319_vm10 = vmand %vm1272_vm0, %vm296_vm5  ;;  %vm2058_vm5 = vcmask 126016   ;;  %v2146_v19 = vld [vmem:[#allocation2 + $0xcc] sm:$0xe] }
  0x2e   : > { %1204 = vrot.lane.b32.xlu2 %v1076_v61, %s4007_s21  ;;  %vm2689_vm8 = vcmask 1043456  }
  0x2f   : > { %v1463_v61 = vld [vmem:[#allocation2 + $0x8] sm:$0x1]  ;;  %v952_v51 = vrot.slane %v950_v34, 7  ;;  %v4251_v43 = vrot.slane %v1044_v33, 7 }
  0x30   : > { %v1461_v44 = vld [vmem:[#allocation2] sm:$0xf]  ;;  %v2097_v62 = vld [vmem:[#allocation2 + $0x8] sm:$0x1]  ;;  %v1538_v2 = vshll.u32 %v1463_v61, 16 }
  0x31   : > { %v1519_v47 = vshrl.u32 %v1461_v44, 16  ;;  %v1522_v48 = vshll.u32 %v1461_v44, 16  ;;  %v2211_v4 = vrot.slane %v2097_v62, 5  ;;  %v352_v62 = vld [vmem:[%s4157_s24] sm:$0xf]  ;;  %v957_v1 = vrot.slane %v952_v51, 4 }
  0x32   : > { %v1540_v13 = vrot.slane %v1538_v2, 5  ;;  %v387_v0 = vshrl.u32 %v352_v62, 16  ;;  %v355_v2 = vld [vmem:[%s4157_s24 + $0xc] sm:$0xf] }
  0x33   : > { %v1521_v53 = vrot.slane %v1519_v47, 4  ;;  %v1524_v54 = vrot.slane %v1522_v48, 5  ;;  %v953_v48 = vshll.u32 %v835_v23, 16  ;;  %v412_v6 = vshrl.u32 %v355_v2, 16 }
  0x35   : > { %1146 = vrot.lane.b32.xlu0 %v913_v3, %s4007_s21  ;;  %1206 = vrot.lane.b32.xlu1 %v1083_v5, %s4007_s21  ;;  %v1525_v60 = vor.u32 %v1524_v54, %v1521_v53  ;;  %v2210_v3 = vrot.slane %v2208_v59, 4  ;;  %v1118_v53 = vrot.slane %v1114_v26, 4 }
  0x36   : > { %1148 = vrot.lane.b32.xlu2 %v922_v12, %s4007_s21  ;;  %v301_v12 = vld [vmem:[#allocation2 + $0x14] sm:$0x1] }
  0x37   : > { %v1526_v5 = vrot.slane %v1525_v60, 4  ;;  %v2212_v14 = vsel %vm4144_vm12, %v2210_v3, %v2211_v4  ;;  %v304_v60 = vld [vmem:[#allocation2 + $0x20] sm:$0x1]  ;;  %v1126_v3 = vsel %vm4064_vm2, %v1118_v53, %v1125_v57  ;;  %v389_v4 = vrot.slane %v387_v0, 7 }
  0x39   : > { %v1531_v15 = vsel %vm4149_vm13, %v1526_v5, %v1530_v56  ;;  %v2209_v56 = vsel %vm4144_vm12, %v3655_v41, %v2208_v59  ;;  %v955_v59 = vor.u32 %v953_v48, %v952_v51  ;;  %v390_v5 = vshll.u32 %v352_v62, 16  ;;  %v307_v62 = vld [vmem:[#allocation2 + $0x2c] sm:$0x1] }
  0x3a   : > { %v1047_v41 = vshll.u32 %v846_v30, 16 }
  0x3b   : > { %v392_v11 = vor.u32 %v390_v5, %v389_v4 }
  0x3d   : > { %1208 = vrot.lane.b32.xlu0 %v1092_v20, %s4007_s21  ;;  %1150 = vrot.lane.b32.xlu1 %v923_v17, %s4007_s21  ;;  %v302_v17 = vsel %vm4107_vm6, 0, %v301_v12  ;;  %v4167_v20 = vld [vmem:[%s4157_s24 + $0x4] sm:$0xf] }
  0x3e   : > { %1210 = vrot.lane.b32.xlu2 %v1093_v29, %s4007_s21  ;;  %303 = vst [vmem:[#allocation2 + $0x14] sm:$0x1] %v302_v17  ;;  %v395_v24 = vshrl.u32 %v4167_v20, 16  ;;  %v1541_v29 = vsel %vm4149_vm13, %v1536_v9, %v1540_v13  ;;  %v4224_v9 = vld [vmem:[%s4053_s20 + $0x30] sm:$0xf]  ;;  %v967_v13 = vshrl.u32 %v837_v10, 16 }
  0x3f   : > { %v959_v12 = vshrl.u32 %v4224_v9, 16 }
  0x40   : > { %v4177_v31 = vrot.slane %v395_v24, 7  ;;  %v4236_v23 = vrot.slane %v967_v13, 7  ;;  %v970_v24 = vshll.u32 %v837_v10, 16 }
  0x42   : > { %v402_v36 = vrot.slane %v4177_v31, 4  ;;  %v972_v28 = vor.u32 %v970_v24, %v4236_v23  ;;  %v308_v24 = vsel %vm4107_vm6, 0, %v307_v62 }
  0x43   : > { %309 = vst [vmem:[#allocation2 + $0x2c] sm:$0x1] %v308_v24 }
  0x45   : > { %1212 = vrot.lane.b32.xlu1 %v1100_v37, %s4007_s21  ;;  %1152 = vrot.lane.b32.xlu0 %v930_v38, %s4007_s21  ;;  %v354_v37 = vld [vmem:[%s4157_s24 + $0x8] sm:$0xf]  ;;  %v947_v38 = vor.u32 %v945_v21, %v4173_v25  ;;  %v716_v44 = vld [vmem:[#allocation2 + $0x14] sm:$0x1]  ;;  %v4234_v21 = vrot.slane %v959_v12, 7 }
  0x46   : > { %1154 = vrot.lane.b32.xlu2 %v939_v49, %s4007_s21  ;;  %v404_v40 = vshrl.u32 %v354_v37, 16  ;;  %v717_v45 = vsel %vm4183_vm15, %v402_v36, %v716_v44  ;;  %v407_v47 = vshll.u32 %v354_v37, 16  ;;  %v251_v25 = vld [vmem:[#allocation2 + $0x24] sm:$0x1]  ;;  %v356_v36 = vld [vmem:[%s4157_s24 + $0x10] sm:$0xf] }
  0x47   : > { %718 = vst [vmem:[#allocation2 + $0x14] sm:$0x1] %v717_v45  ;;  %v965_v27 = vrot.slane %v4234_v21, 4  ;;  %v252_v37 = vsel %vm4114_vm7, 0, %v251_v25  ;;  %v415_v44 = vshll.u32 %v355_v2, 16  ;;  %v424_v48 = vshll.u32 %v356_v36, 16 }
  0x48   : > { %v4195_v46 = vrot.slane %v404_v40, 7  ;;  %v393_v40 = vrot.slane %v389_v4, 4  ;;  %v4254_v45 = vld [vmem:[%s4053_s20 + $0x5c] sm:$0xf]  ;;  %253 = vst [vmem:[#allocation2 + $0x24] sm:$0x1] %v252_v37 }
  0x49   : > { %v1052_v53 = vshrl.u32 %v4254_v45, 16  ;;  %v377_v12 = vld [vmem:[%s4157_s24 + $0x64] sm:$0xf]  ;;  %v1055_v30 = vshll.u32 %v4254_v45, 16 }
  0x4a   : > { %v409_v54 = vor.u32 %v407_v47, %v4195_v46  ;;  %v421_v47 = vshrl.u32 %v356_v36, 16  ;;  %v410_v51 = vrot.slane %v4195_v46, 4 }
  0x4b   : > { %v1054_v46 = vrot.slane %v1052_v53, 7 }
  0x4c   : > { %v423_v57 = vrot.slane %v421_v47, 7  ;;  %v730_v47 = vld [vmem:[#allocation2 + $0x2c] sm:$0x1] }
  0x4d   : > { %1156 = vrot.lane.b32.xlu1 %v940_v55, %s4007_s21  ;;  %1214 = vrot.lane.b32.xlu0 %v1109_v58, %s4007_s21  ;;  %v246_v55 = vsel %vm4114_vm7, 0, %v245_v50  ;;  %v719_v58 = vld [vmem:[#allocation2 + $0x18] sm:$0xf]  ;;  %v1059_v4 = vrot.slane %v1054_v46, 4 }
  0x4e   : > { %1216 = vrot.lane.b32.xlu2 %v1110_v63, %s4007_s21  ;;  %247 = vst [vmem:[#allocation2 + $0xc] sm:$0x1] %v246_v55  ;;  %v720_v61 = vsel %vm4199_vm4, %v409_v54, %v719_v58  ;;  %v305_v63 = vsel %vm4107_vm6, 0, %v304_v60  ;;  %v1127_v54 = vrot.slane %v4191_v42, 4  ;;  %v1049_v55 = vor.u32 %v1047_v41, %v4251_v43  ;;  %v376_v58 = vld [vmem:[%s4157_s24 + $0x60] sm:$0xf] }
  0x4f   : > { %721 = vst [vmem:[#allocation2 + $0x18] sm:$0xf] %v720_v61  ;;  %v591_v61 = vshrl.u32 %v376_v58, 16  ;;  %v337_v42 = vld [vmem:[#allocation2 + $0xa4] sm:$0x1]  ;;  %v426_v0 = vor.u32 %v424_v48, %v423_v57  ;;  %v427_v10 = vrot.slane %v423_v57, 4 }
  0x50   : > { %306 = vst [vmem:[#allocation2 + $0x20] sm:$0x1] %v305_v63  ;;  %v357_v63 = vld [vmem:[%s4157_s24 + $0x14] sm:$0xf]  ;;  %v602_v41 = vshll.u32 %v377_v12, 16 }
  0x51   : > { %v1281_v2 = vld [vmem:[#allocation2 + $0x14] sm:$0x1]  ;;  %v429_v5 = vshrl.u32 %v357_v63, 16 }
  0x55   : > { %2334 = vrot.lane.b32.xlu0 %v2212_v14, %s4009_s25  ;;  %1950 = vrot.lane.b32.xlu1 %v1531_v15, %s4010_s26  ;;  %v414_v14 = vrot.slane %v412_v6, 7  ;;  %v956_v15 = vsel %vm4064_vm2, %v948_v52, %v955_v59  ;;  %v709_v17 = vld [vmem:[#allocation2 + $0xc] sm:$0xf]  ;;  %v594_v52 = vshll.u32 %v376_v58, 16  ;;  %v338_v59 = vsel %vm4107_vm6, 0, %v337_v42 }
  0x56   : > { %1952 = vrot.lane.b32.xlu2 %v1541_v29, %s4010_s26  ;;  %v710_v18 = vsel %vm4199_vm4, %v392_v11, %v709_v17  ;;  %v398_v29 = vshll.u32 %v4167_v20, 16  ;;  %v432_v6 = vshll.u32 %v357_v63, 16  ;;  %v593_v11 = vrot.slane %v591_v61, 7  ;;  %339 = vst [vmem:[#allocation2 + $0xa4] sm:$0x1] %v338_v59 }
  0x57   : > { %711 = vst [vmem:[#allocation2 + $0xc] sm:$0xf] %v710_v18  ;;  %v419_v26 = vrot.slane %v414_v14, 4  ;;  %v723_v32 = vld [vmem:[#allocation2 + $0x20] sm:$0x1]  ;;  %v599_v18 = vshrl.u32 %v377_v12, 16 }
  0x58   : > { %v400_v20 = vor.u32 %v398_v29, %v4177_v31  ;;  %v726_v17 = vld [vmem:[#allocation2 + $0x24] sm:$0xf]  ;;  %v1284_v61 = vld [vmem:[#allocation2 + $0x18] sm:$0xf]  ;;  %v359_v63 = vld [vmem:[%s4157_s24 + $0x1c] sm:$0xf] }
  0x59   : > { %v724_v34 = vsel %vm4183_vm15, %v419_v26, %v723_v32  ;;  %v596_v26 = vor.u32 %v594_v52, %v593_v11  ;;  %v601_v29 = vrot.slane %v599_v18, 7  ;;  %v446_v52 = vshrl.u32 %v359_v63, 16  ;;  %v284_v12 = vld [vmem:[#allocation2 + $0xa8] sm:$0x1] }
  0x5a   : > { %725 = vst [vmem:[#allocation2 + $0x20] sm:$0x1] %v724_v34  ;;  %v401_v50 = vsel %vm4064_vm2, %v393_v40, %v400_v20  ;;  %v1057_v40 = vor.u32 %v1055_v30, %v1054_v46  ;;  %v449_v59 = vshll.u32 %v359_v63, 16 }
  0x5b   : > { %713 = vst.msk [vmem:[#allocation2 + $0x10] sm:$0xf] %vm707_vm1, %v401_v50  ;;  %v606_v34 = vrot.slane %v601_v29, 4  ;;  %v597_v50 = vrot.slane %v593_v11, 4  ;;  %v4331_v11 = vrot.slane %v446_v52, 7 }
  0x5d   : > { %1158 = vrot.lane.b32.xlu0 %v947_v38, %s4007_s21  ;;  %1218 = vrot.lane.b32.xlu1 %v1117_v39, %s4007_s21  ;;  %v281_v38 = vld [vmem:[#allocation2 + $0x9c] sm:$0x1]  ;;  %v973_v39 = vsel %vm4064_vm2, %v965_v27, %v972_v28 }
  0x5e   : > { %2332 = vrot.lane.b32.xlu2 %v2209_v56, %s4009_s25  ;;  %v282_v31 = vsel %vm4114_vm7, 0, %v281_v38  ;;  %v417_v56 = vor.u32 %v415_v44, %v414_v14  ;;  %v431_v14 = vrot.slane %v429_v5, 7  ;;  %v800_v38 = vld [vmem:[#allocation2 + $0xa4] sm:$0x1]  ;;  %v358_v44 = vld [vmem:[%s4157_s24 + $0x18] sm:$0xf] }
  0x5f   : > { %283 = vst [vmem:[#allocation2 + $0x9c] sm:$0x1] %v282_v31  ;;  %v801_v20 = vsel %vm4183_vm15, %v606_v34, %v800_v38  ;;  %v438_v48 = vshrl.u32 %v358_v44, 16  ;;  %v1274_v62 = vld [vmem:[#allocation2 + $0xc] sm:$0xf] }
  0x60   : > { %v418_v60 = vsel %vm4064_vm2, %v410_v51, %v417_v56  ;;  %v434_v28 = vor.u32 %v432_v6, %v431_v14  ;;  %v436_v36 = vrot.slane %v431_v14, 4  ;;  %802 = vst [vmem:[#allocation2 + $0xa4] sm:$0x1] %v801_v20  ;;  %v604_v51 = vor.u32 %v602_v41, %v601_v29 }
  0x61   : > { %722 = vst.msk [vmem:[#allocation2 + $0x1c] sm:$0xf] %vm707_vm1, %v418_v60  ;;  %v340_v60 = vld [vmem:[#allocation2 + $0xb0] sm:$0x1]  ;;  %v1288_v18 = vld [vmem:[#allocation2 + $0x20] sm:$0x1] }
  0x62   : > { %v435_v33 = vsel %vm4064_vm2, %v427_v10, %v434_v28  ;;  %v731_v53 = vsel %vm4183_vm15, %v436_v36, %v730_v47 }
  0x63   : > { %729 = vst.msk [vmem:[#allocation2 + $0x28] sm:$0xf] %vm707_vm1, %v435_v33 }
  0x64   : > { %732 = vst [vmem:[#allocation2 + $0x2c] sm:$0x1] %v731_v53 }
  0x65   : > { %1220 = vrot.lane.b32.xlu0 %v1126_v3, %s4007_s21  ;;  %1162 = vrot.lane.b32.xlu1 %v957_v1, %s4007_s21  ;;  %v962_v3 = vshll.u32 %v4224_v9, 16  ;;  %v727_v9 = vsel %vm4199_vm4, %v426_v0, %v726_v17  ;;  %v341_v0 = vsel %vm4107_vm6, 0, %v340_v60  ;;  %v451_v17 = vor.u32 %v449_v59, %v4331_v11  ;;  %v361_v59 = vld [vmem:[%s4157_s24 + $0x24] sm:$0xf] }
  0x66   : > { %1160 = vrot.lane.b32.xlu2 %v956_v15, %s4007_s21  ;;  %v974_v15 = vrot.slane %v4236_v23, 4  ;;  %v796_v23 = vld [vmem:[#allocation2 + $0x9c] sm:$0xf]  ;;  %728 = vst [vmem:[#allocation2 + $0x24] sm:$0xf] %v727_v9 }
  0x67   : > { %v964_v27 = vor.u32 %v962_v3, %v4234_v21  ;;  %v797_v32 = vsel %vm4199_vm4, %v596_v26, %v796_v23  ;;  %v254_v21 = vld [vmem:[#allocation2 + $0x30] sm:$0x1]  ;;  %342 = vst [vmem:[#allocation2 + $0xb0] sm:$0x1] %v341_v0  ;;  %v378_v9 = vld [vmem:[%s4157_s24 + $0x68] sm:$0xf] }
  0x68   : > { %798 = vst [vmem:[#allocation2 + $0x9c] sm:$0xf] %v797_v32  ;;  %v255_v37 = vsel %vm4114_vm7, 0, %v254_v21  ;;  %v608_v30 = vshrl.u32 %v378_v9, 16 }
  0x69   : > { %256 = vst [vmem:[#allocation2 + $0x30] sm:$0x1] %v255_v37  ;;  %v611_v37 = vshll.u32 %v378_v9, 16 }
  0x6a   : > { %v610_v36 = vrot.slane %v608_v30, 7 }
  0x6d   : > { %1166 = vrot.lane.b32.xlu1 %v973_v39, %s4007_s21  ;;  %1194 = vrot.lane.b32.xlu0 %v1049_v55, %s4007_s21  ;;  %v1050_v39 = vrot.slane %v4251_v43, 4  ;;  %v440_v43 = vrot.slane %v438_v48, 7  ;;  %v441_v55 = vshll.u32 %v358_v44, 16  ;;  %v613_v48 = vor.u32 %v611_v37, %v610_v36  ;;  %v1295_v37 = vld [vmem:[#allocation2 + $0x2c] sm:$0x1] }
  0x6e   : > { %1222 = vrot.lane.b32.xlu2 %v1127_v54, %s4007_s21  ;;  %v605_v54 = vsel %vm4064_vm2, %v597_v50, %v604_v51  ;;  %v807_v33 = vld [vmem:[#allocation2 + $0xb0] sm:$0x1]  ;;  %v614_v50 = vrot.slane %v610_v36, 4 }
  0x6f   : > { %v1058_v31 = vsel %vm4064_vm2, %v1050_v39, %v1057_v40  ;;  %799 = vst.msk [vmem:[#allocation2 + $0xa0] sm:$0xf] %vm707_vm1, %v605_v54  ;;  %v443_v56 = vor.u32 %v441_v55, %v440_v43  ;;  %v444_v10 = vrot.slane %v440_v43, 4  ;;  %v1361_v52 = vld [vmem:[#allocation2 + $0x9c] sm:$0xf] }
  0x70   : > { %v1133_v13 = vpop.permute.xlu2 %1132  ;;  %v733_v57 = vld [vmem:[#allocation2 + $0x30] sm:$0xf] }
  0x71   : > { %v1282_v25 = vsel %vm4276_vm9, %v1133_v13, %v1281_v2  ;;  %v734_v58 = vsel %vm4199_vm4, %v443_v56, %v733_v57  ;;  %v1365_v13 = vld [vmem:[#allocation2 + $0xa4] sm:$0x1]  ;;  %v452_v29 = vsel %vm4064_vm2, %v444_v10, %v451_v17 }
  0x72   : > { %1283 = vst [vmem:[#allocation2 + $0x14] sm:$0x1] %v1282_v25  ;;  %v1291_v57 = vld [vmem:[#allocation2 + $0x24] sm:$0xf] }
  0x73   : > { %735 = vst [vmem:[#allocation2 + $0x30] sm:$0xf] %v734_v58 }
  0x74   : > { %736 = vst.msk [vmem:[#allocation2 + $0x34] sm:$0xf] %vm707_vm1, %v452_v29 }
  0x75   : > { %1198 = vrot.lane.b32.xlu1 %v1059_v4, %s4007_s21  ;;  %1168 = vrot.lane.b32.xlu0 %v974_v15, %s4007_s21  ;;  %v379_v4 = vld [vmem:[%s4157_s24 + $0x6c] sm:$0xf]  ;;  %v285_v15 = vsel %vm4114_vm7, 0, %v284_v12 }
  0x76   : > { %1164 = vrot.lane.b32.xlu2 %v964_v27, %s4007_s21  ;;  %v616_v14 = vshrl.u32 %v379_v4, 16  ;;  %286 = vst [vmem:[#allocation2 + $0xa8] sm:$0x1] %v285_v15  ;;  %v619_v21 = vshll.u32 %v379_v4, 16 }
  0x78   : > { %v1131_v45 = vpop.permute.xlu2 %1130  ;;  %v618_v25 = vrot.slane %v616_v14, 7 }
  0x79   : > { %1278 = vst.msk [vmem:[#allocation2 + $0x10] sm:$0xf] %vm1272_vm0, %v1131_v45  ;;  %v4341_v23 = vld [vmem:[#allocation2 + $0x14] sm:$0x1] }
  0x7a   : > { %v1466_v32 = vld [vmem:[#allocation2 + $0x14] sm:$0x1]  ;;  %v623_v34 = vrot.slane %v618_v25, 4  ;;  %v621_v44 = vor.u32 %v619_v21, %v618_v25  ;;  %v2218_v53 = vrot.slane %v4341_v23, 5 }
  0x7b   : > { %v1562_v43 = vshll.u32 %v1466_v32, 16 }
  0x7c   : > { %v808_v41 = vsel %vm4183_vm15, %v623_v34, %v807_v33  ;;  %v622_v54 = vsel %vm4064_vm2, %v614_v50, %v621_v44  ;;  %v453_v34 = vrot.slane %v4331_v11, 4  ;;  %v4402_v50 = vld [vmem:[%s4157_s24 + $0x74] sm:$0xf] }
  0x7d   : > { %809 = vst [vmem:[#allocation2 + $0xb0] sm:$0x1] %v808_v41  ;;  %v803_v60 = vld [vmem:[#allocation2 + $0xa8] sm:$0xf] }
  0x7e   : > { %1196 = vrot.lane.b32.xlu2 %v1058_v31, %s4007_s21  ;;  %806 = vst.msk [vmem:[#allocation2 + $0xac] sm:$0xf] %vm707_vm1, %v622_v54  ;;  %v804_v63 = vsel %vm4199_vm4, %v613_v48, %v803_v60  ;;  %v343_v48 = vld [vmem:[#allocation2 + $0xbc] sm:$0x1] }
  0x7f   : > { %805 = vst [vmem:[#allocation2 + $0xa8] sm:$0xf] %v804_v63 }
  0x80   : > { %v1143_v46 = vpop.permute.xlu2 %1142  ;;  %v1465_v26 = vld [vmem:[#allocation2 + $0x10] sm:$0xf] }
  0x81   : > { %1294 = vst.msk [vmem:[#allocation2 + $0x28] sm:$0xf] %vm1272_vm0, %v1143_v46  ;;  %v4337_v27 = vld [vmem:[#allocation2 + $0x10] sm:$0xf]  ;;  %v1552_v38 = vshll.u32 %v1465_v26, 16  ;;  %v1556_v39 = vshrl.u32 %v1465_v26, 16 }
  0x82   : > { %v2215_v47 = vrot.slane %v4337_v27, 5 }
  0x83   : > { %v4355_v55 = vrot.slane %v1552_v38, 5  ;;  %v1558_v56 = vrot.slane %v1556_v39, 4 }
  0x84   : > { %v1372_v29 = vld [vmem:[#allocation2 + $0xb0] sm:$0x1]  ;;  %v2217_v33 = vrot.slane %v2215_v47, 4 }
  0x85   : > { %v1559_v10 = vor.u32 %v1558_v56, %v4355_v55 }
  0x86   : > { %v1368_v23 = vld [vmem:[#allocation2 + $0xa8] sm:$0xf] }
  0x87   : > { %v1135_v2 = vpop.permute.xlu0 %1134  ;;  %v1129_v3 = vpop.permute.xlu1 %1128  ;;  %v4395_v44 = vrot.slane %v1559_v10, 4 }
  0x88   : > { %v1285_v5 = vsel %vm4319_vm10, %v1135_v2, %v1284_v61  ;;  %v1275_v6 = vsel %vm4319_vm10, %v1129_v3, %v1274_v62  ;;  %v1205_v24 = vpop.permute.xlu2 %1204  ;;  %v4362_v62 = vld [vmem:[%s4157_s24 + $0x20] sm:$0xf]  ;;  %v4369_v3 = vrot.slane %v1562_v43, 5  ;;  %v4371_v4 = vld [vmem:[#allocation2 + $0x28] sm:$0xf] }
  0x89   : > { %1286 = vst [vmem:[#allocation2 + $0x18] sm:$0xf] %v1285_v5  ;;  %v1366_v28 = vsel %vm4276_vm9, %v1205_v24, %v1365_v13  ;;  %v455_v2 = vshrl.u32 %v4362_v62, 16  ;;  %v463_v5 = vshrl.u32 %v361_v59, 16 }
  0x8a   : > { %1276 = vst [vmem:[#allocation2 + $0xc] sm:$0xf] %v1275_v6  ;;  %v466_v6 = vshll.u32 %v361_v59, 16 }
  0x8b   : > { %1367 = vst [vmem:[#allocation2 + $0xa4] sm:$0x1] %v1366_v28  ;;  %v4374_v17 = vrot.slane %v455_v2, 7  ;;  %v4380_v27 = vrot.slane %v463_v5, 7  ;;  %v2229_v28 = vrot.slane %v4371_v4, 5 }
  0x8d   : > { %v461_v30 = vrot.slane %v4374_v17, 4  ;;  %v468_v36 = vor.u32 %v466_v6, %v4380_v27  ;;  %v4391_v38 = vrot.slane %v2229_v28, 4  ;;  %v470_v4 = vrot.slane %v4380_v27, 4 }
  0x8f   : > { %v1137_v40 = vpop.permute.xlu0 %1136  ;;  %v1139_v20 = vpop.permute.xlu1 %1138 }
  0x90   : > { %1287 = vst.msk [vmem:[#allocation2 + $0x1c] sm:$0xf] %vm1272_vm0, %v1137_v40  ;;  %v1289_v45 = vsel %vm4276_vm9, %v1139_v20, %v1288_v18  ;;  %v2101_v58 = vld [vmem:[#allocation2 + $0x18] sm:$0xe]  ;;  %v1149_v46 = vpop.permute.xlu2 %1148 }
  0x91   : > { %1290 = vst [vmem:[#allocation2 + $0x20] sm:$0x1] %v1289_v45  ;;  %v2098_v51 = vld [vmem:[#allocation2 + $0xc] sm:$0xe]  ;;  %v1467_v0 = vld [vmem:[#allocation2 + $0x18] sm:$0xf] }
  0x92   : > { %v3656_v31 = vrot.slane %v2098_v51, 9  ;;  %1301 = vst.msk [vmem:[#allocation2 + $0x34] sm:$0xf] %vm1272_vm0, %v1149_v46  ;;  %v3657_v15 = vrot.slane %v2101_v58, 9  ;;  %v1567_v18 = vshrl.u32 %v1467_v0, 16  ;;  %v1570_v24 = vshll.u32 %v1467_v0, 16 }
  0x93   : > { %v4387_v21 = vld [vmem:[#allocation2 + $0xa4] sm:$0x1]  ;;  %v310_v51 = vld [vmem:[#allocation2 + $0x38] sm:$0x1]  ;;  %v344_v58 = vsel %vm4107_vm6, 0, %v343_v48  ;;  %v633_v0 = vshrl.u32 %v4402_v50, 16 }
  0x94   : > { %v2216_v61 = vsel %vm4144_vm12, %v3656_v31, %v2215_v47  ;;  %v1569_v20 = vrot.slane %v1567_v18, 4  ;;  %v1572_v41 = vrot.slane %v1570_v24, 5  ;;  %v469_v47 = vsel %vm4064_vm2, %v461_v30, %v468_v36  ;;  %345 = vst [vmem:[#allocation2 + $0xbc] sm:$0x1] %v344_v58  ;;  %v1502_v27 = vld [vmem:[#allocation2 + $0xa4] sm:$0x1] }
  0x95   : > { %2336 = vrot.lane.b32.xlu1 %v2216_v61, %s4009_s25  ;;  %v2302_v43 = vrot.slane %v4387_v21, 5  ;;  %v458_v31 = vshll.u32 %v4362_v62, 16  ;;  %743 = vst.msk [vmem:[#allocation2 + $0x40] sm:$0xf] %vm707_vm1, %v469_v47  ;;  %v4425_v18 = vrot.slane %v633_v0, 7 }
  0x96   : > { %v1573_v63 = vor.u32 %v1572_v41, %v1569_v20 }
  0x97   : > { %v1141_v12 = vpop.permute.xlu0 %1140  ;;  %v1201_v13 = vpop.permute.xlu1 %1200  ;;  %v2102_v14 = vld [vmem:[#allocation2 + $0x1c] sm:$0xf] }
  0x98   : > { %v1292_v25 = vsel %vm4319_vm10, %v1141_v12, %v1291_v57  ;;  %v1362_v9 = vsel %vm4319_vm10, %v1201_v13, %v1361_v52  ;;  %v2222_v26 = vrot.slane %v2102_v14, 5  ;;  %v1211_v39 = vpop.permute.xlu2 %1210  ;;  %v4393_v40 = vld [vmem:[#allocation2 + $0x20] sm:$0x1]  ;;  %v1468_v54 = vld [vmem:[#allocation2 + $0x1c] sm:$0xf]  ;;  %v311_v52 = vsel %vm4107_vm6, 0, %v310_v51 }
  0x99   : > { %1293 = vst [vmem:[#allocation2 + $0x24] sm:$0xf] %v1292_v25  ;;  %v1373_v45 = vsel %vm4276_vm9, %v1211_v39, %v1372_v29  ;;  %v2225_v56 = vrot.slane %v4393_v40, 5  ;;  %v1469_v57 = vld [vmem:[#allocation2 + $0x20] sm:$0x1]  ;;  %v1576_v5 = vshll.u32 %v1468_v54, 16  ;;  %v2219_v13 = vsel %vm4144_vm12, %v2217_v33, %v2218_v53 }
  0x9a   : > { %1363 = vst [vmem:[#allocation2 + $0x9c] sm:$0xf] %v1362_v9  ;;  %v2223_v32 = vsel %vm4144_vm12, %v3657_v15, %v2222_v26  ;;  %v4410_v61 = vrot.slane %v2222_v26, 4  ;;  %v1580_v10 = vshrl.u32 %v1468_v54, 16  ;;  %v4419_v12 = vld [vmem:[#allocation2 + $0x34] sm:$0xf] }
  0x9b   : > { %2340 = vrot.lane.b32.xlu2 %v2223_v32, %s4009_s25  ;;  %1374 = vst [vmem:[#allocation2 + $0xb0] sm:$0x1] %v1373_v45  ;;  %v1586_v15 = vshll.u32 %v1469_v57, 16  ;;  %v1298_v25 = vld [vmem:[#allocation2 + $0x30] sm:$0xf]  ;;  %v4430_v32 = vrot.slane %v1573_v63, 4 }
  0x9c   : > { %312 = vst [vmem:[#allocation2 + $0x38] sm:$0x1] %v311_v52  ;;  %v1624_v53 = vshll.u32 %v4419_v12, 16  ;;  %v640_v33 = vrot.slane %v4425_v18, 4  ;;  %v4436_v36 = vrot.slane %v1576_v5, 5 }
  0x9d   : > { %v1390_v39 = vld [vmem:[#allocation2 + $0x4] sm:$0xf]  ;;  %v4438_v41 = vrot.slane %v1586_v15, 5  ;;  %v814_v45 = vld [vmem:[#allocation2 + $0xbc] sm:$0x1] }
  0x9e   : > { %1426 = vst.msk [vmem:[#allocation3 + $0x4] sm:$0xf] %vm230_vm3, %v1390_v39  ;;  %v4445_v0 = vrot.slane %v1624_v53, 5  ;;  %v815_v52 = vsel %vm4183_vm15, %v640_v33, %v814_v45 }
  0x9f   : > { %v1203_v46 = vpop.permute.xlu0 %1202  ;;  %v1145_v60 = vpop.permute.xlu1 %1144  ;;  %816 = vst [vmem:[#allocation2 + $0xbc] sm:$0x1] %v815_v52 }
  0xa0   : > { %1364 = vst.msk [vmem:[#allocation2 + $0xa0] sm:$0xf] %vm1272_vm0, %v1203_v46  ;;  %v1296_v59 = vsel %vm4276_vm9, %v1145_v60, %v1295_v37  ;;  %v2104_v2 = vld [vmem:[#allocation2 + $0x24] sm:$0xe]  ;;  %v1155_v30 = vpop.permute.xlu2 %1154  ;;  %v1582_v37 = vrot.slane %v1580_v10, 4 }
  0xa1   : > { %1297 = vst [vmem:[#allocation2 + $0x2c] sm:$0x1] %v1296_v59  ;;  %v3658_v6 = vrot.slane %v2104_v2, 9  ;;  %v1500_v14 = vld [vmem:[#allocation2 + $0x9c] sm:$0xf] }
  0xa2   : > { %v2134_v9 = vld [vmem:[#allocation2 + $0x9c] sm:$0xe]  ;;  %v1831_v26 = vshrl.u32 %v1500_v14, 16  ;;  %v1834_v29 = vshll.u32 %v1500_v14, 16  ;;  %1308 = vst.msk [vmem:[#allocation2 + $0x40] sm:$0xf] %vm1272_vm0, %v1155_v30 }
  0xa3   : > { %2338 = vrot.lane.b32.xlu2 %v2219_v13, %s4009_s25  ;;  %v2230_v24 = vsel %vm4144_vm12, %v3658_v6, %v2229_v28  ;;  %v1464_v28 = vld [vmem:[#allocation2 + $0xc] sm:$0xf]  ;;  %v3668_v20 = vrot.slane %v2134_v9, 9  ;;  %v287_v59 = vld [vmem:[#allocation2 + $0xb4] sm:$0x1]  ;;  %v1583_v6 = vor.u32 %v1582_v37, %v4436_v36 }
  0xa4   : > { %2344 = vrot.lane.b32.xlu1 %v2230_v24, %s4009_s25  ;;  %v1833_v54 = vrot.slane %v1831_v26, 4  ;;  %v1836_v57 = vrot.slane %v1834_v29, 5  ;;  %v737_v10 = vld [vmem:[#allocation2 + $0x38] sm:$0x1]  ;;  %v1543_v13 = vshrl.u32 %v1464_v28, 16  ;;  %v288_v53 = vsel %vm4114_vm7, 0, %v287_v59 }
  0xa5   : > { %v738_v24 = vsel %vm4183_vm15, %v453_v34, %v737_v10  ;;  %v380_v9 = vld [vmem:[%s4157_s24 + $0x70] sm:$0xf]  ;;  %v1628_v34 = vshrl.u32 %v4419_v12, 16  ;;  %v1584_v37 = vrot.slane %v1583_v6, 4  ;;  %289 = vst [vmem:[#allocation2 + $0xb4] sm:$0x1] %v288_v53 }
  0xa6   : > { %v1837_v29 = vor.u32 %v1836_v57, %v1833_v54  ;;  %739 = vst [vmem:[#allocation2 + $0x38] sm:$0x1] %v738_v24  ;;  %v625_v33 = vshrl.u32 %v380_v9, 16  ;;  %v1470_v39 = vld [vmem:[#allocation2 + $0x24] sm:$0xf] }
  0xa7   : > { %v1147_v47 = vpop.permute.xlu0 %1146  ;;  %v2135_v48 = vld [vmem:[#allocation2 + $0xa0] sm:$0xf]  ;;  %v1207_v58 = vpop.permute.xlu1 %1206  ;;  %v1591_v59 = vshrl.u32 %v1470_v39, 16  ;;  %v1594_v10 = vshll.u32 %v1470_v39, 16 }
  0xa8   : > { %v4441_v51 = vld [vmem:[#allocation2 + $0xa0] sm:$0xf]  ;;  %v1299_v46 = vsel %vm4319_vm10, %v1147_v47, %v1298_v25  ;;  %v2299_v60 = vrot.slane %v2135_v48, 5  ;;  %v2106_v63 = vld [vmem:[#allocation2 + $0x2c] sm:$0x1]  ;;  %v1369_v5 = vsel %vm4319_vm10, %v1207_v58, %v1368_v23  ;;  %v1546_v25 = vshll.u32 %v1464_v28, 16  ;;  %v1217_v23 = vpop.permute.xlu2 %1216 }
  0xa9   : > { %1300 = vst [vmem:[#allocation2 + $0x30] sm:$0xf] %v1299_v46  ;;  %v2232_v2 = vrot.slane %v2106_v63, 5  ;;  %v1840_v30 = vshll.u32 %v4441_v51, 16  ;;  %v628_v28 = vshll.u32 %v380_v9, 16  ;;  %v4477_v21 = vrot.slane %v625_v33, 7 }
  0xaa   : > { %v2300_v14 = vsel %vm4144_vm12, %v3668_v20, %v2299_v60  ;;  %v2301_v15 = vrot.slane %v2299_v60, 4  ;;  %1370 = vst [vmem:[#allocation2 + $0xa8] sm:$0xf] %v1369_v5  ;;  %v4473_v20 = vrot.slane %v1543_v13, 4  ;;  %v4475_v45 = vrot.slane %v1546_v25, 5 }
  0xab   : > { %2384 = vrot.lane.b32.xlu0 %v2300_v14, %s4009_s25  ;;  %v2233_v26 = vsel %vm4144_vm12, %v4391_v38, %v2232_v2  ;;  %v1471_v38 = vld [vmem:[#allocation2 + $0x28] sm:$0xf]  ;;  %v313_v47 = vld [vmem:[#allocation2 + $0x44] sm:$0x1]  ;;  %v1838_v48 = vrot.slane %v1837_v29, 4  ;;  %v4479_v54 = vrot.slane %v1840_v30, 5  ;;  %v630_v6 = vor.u32 %v628_v28, %v4477_v21 }
  0xac   : > { %2346 = vrot.lane.b32.xlu2 %v2233_v26, %s4009_s25  ;;  %v2303_v11 = vsel %vm4144_vm12, %v2301_v15, %v2302_v43  ;;  %v4481_v58 = vld [vmem:[#allocation2 + $0xb0] sm:$0x1]  ;;  %v1600_v46 = vshll.u32 %v1471_v38, 16  ;;  %v314_v60 = vsel %vm4107_vm6, 0, %v313_v47  ;;  %v1604_v52 = vshrl.u32 %v1471_v38, 16 }
  0xad   : > { %2386 = vrot.lane.b32.xlu1 %v2303_v11, %s4009_s25  ;;  %315 = vst [vmem:[#allocation2 + $0x44] sm:$0x1] %v314_v60  ;;  %v2226_v13 = vsel %vm4144_vm12, %v4410_v61, %v2225_v56  ;;  %v1844_v14 = vshrl.u32 %v4441_v51, 16  ;;  %v1379_v15 = vld [vmem:[#allocation2 + $0xbc] sm:$0x1]  ;;  %v1874_v24 = vshll.u32 %v4481_v58, 16  ;;  %v1843_v9 = vsel %vm4149_vm13, %v1838_v48, %v4479_v54 }
  0xae   : > { %v1472_v25 = vld [vmem:[#allocation2 + $0x2c] sm:$0x1]  ;;  %v1380_v40 = vsel %vm4276_vm9, %v1217_v23, %v1379_v15  ;;  %v1302_v30 = vld [vmem:[#allocation2 + $0x38] sm:$0x1]  ;;  %v257_v56 = vld [vmem:[#allocation2 + $0x3c] sm:$0x1]  ;;  %v1589_v61 = vsel %vm4149_vm13, %v1584_v37, %v4438_v41  ;;  %v1565_v58 = vsel %vm4149_vm13, %v4395_v44, %v4369_v3 }
  0xaf   : > { %v1209_v43 = vpop.permute.xlu0 %1208  ;;  %v1151_v57 = vpop.permute.xlu1 %1150  ;;  %1381 = vst [vmem:[#allocation2 + $0xbc] sm:$0x1] %v1380_v40  ;;  %v810_v11 = vld [vmem:[#allocation2 + $0xb4] sm:$0xf]  ;;  %v4506_v33 = vrot.slane %v1600_v46, 5  ;;  %v1606_v38 = vrot.slane %v1604_v52, 4  ;;  %v1549_v46 = vor.u32 %v4475_v45, %v4473_v20  ;;  %v460_v45 = vor.u32 %v458_v31, %v4374_v17 }
  0xb0   : > { %1371 = vst.msk [vmem:[#allocation2 + $0xac] sm:$0xf] %vm1272_vm0, %v1209_v43  ;;  %v1473_v63 = vld [vmem:[#allocation2 + $0x30] sm:$0xf]  ;;  %v1953_v53 = vpop.permute.xlu2 %1952  ;;  %v1303_v51 = vsel %vm4276_vm9, %v1151_v57, %v1302_v30  ;;  %v811_v28 = vsel %vm4199_vm4, %v630_v6, %v810_v11  ;;  %v1593_v39 = vrot.slane %v1591_v59, 4  ;;  %v1596_v47 = vrot.slane %v1594_v10, 5 }
  0xb1   : > { %v1615_v2 = vshrl.u32 %v1473_v63, 16  ;;  %v1618_v5 = vshll.u32 %v1473_v63, 16  ;;  %1304 = vst [vmem:[#allocation2 + $0x38] sm:$0x1] %v1303_v51  ;;  %v1503_v43 = vld [vmem:[#allocation2 + $0xa8] sm:$0xf]  ;;  %v1607_v3 = vor.u32 %v1606_v38, %v4506_v33 }
  0xb2   : > { %2060 = vst.msk [vmem:[#allocation3 + $0x4] sm:$0xf] %vm2058_vm5, %v1953_v53  ;;  %v1610_v41 = vshll.u32 %v1472_v25, 16  ;;  %v4512_v37 = vld [vmem:[#allocation2 + $0xa8] sm:$0xe]  ;;  %v258_v48 = vsel %vm4114_vm7, 0, %v257_v56  ;;  %v1597_v44 = vor.u32 %v1596_v47, %v1593_v39 }
  0xb3   : > { %2342 = vrot.lane.b32.xlu0 %v2226_v13, %s4009_s25  ;;  %v1617_v26 = vrot.slane %v1615_v2, 4  ;;  %v1620_v29 = vrot.slane %v1618_v5, 5  ;;  %812 = vst [vmem:[#allocation2 + $0xb4] sm:$0xf] %v811_v28  ;;  %v1846_v59 = vrot.slane %v1844_v14, 4  ;;  %v1855_v10 = vshrl.u32 %v1503_v43, 16 }
  0xb4   : > { %2002 = vrot.lane.b32.xlu2 %v1843_v9, %s4010_s26  ;;  %v744_v6 = vld [vmem:[#allocation2 + $0x44] sm:$0x1]  ;;  %v1858_v13 = vshll.u32 %v1503_v43, 16  ;;  %259 = vst [vmem:[#allocation2 + $0x3c] sm:$0x1] %v258_v48  ;;  %v1579_v14 = vsel %vm4149_vm13, %v4430_v32, %v4436_v36  ;;  %v3669_v62 = vrot.slane %v4512_v37, 9 }
  0xb5   : > { %1960 = vrot.lane.b32.xlu1 %v1589_v61, %s4010_s26  ;;  %v1621_v23 = vor.u32 %v1620_v29, %v1617_v26  ;;  %v745_v20 = vsel %vm4183_vm15, %v470_v4, %v744_v6  ;;  %v1550_v4 = vrot.slane %v1549_v46, 4  ;;  %v1876_v26 = vrot.slane %v1874_v24, 5  ;;  %v4546_v31 = vld [vmem:[%s4157_s24 + $0x28] sm:$0xf]  ;;  %v4552_v53 = vld [vmem:[%s4053_s20 + $0x38] sm:$0xf] }
  0xb6   : > { %746 = vst [vmem:[#allocation2 + $0x44] sm:$0x1] %v745_v20  ;;  %v1612_v29 = vrot.slane %v1610_v41, 5  ;;  %v1857_v36 = vrot.slane %v1855_v10, 4  ;;  %v1860_v40 = vrot.slane %v1858_v13, 5  ;;  %v1847_v30 = vor.u32 %v1846_v59, %v4479_v54 }
  0xb7   : > { %v1622_v57 = vrot.slane %v1621_v23, 4  ;;  %v1504_v60 = vld [vmem:[#allocation2 + $0xac] sm:$0xf]  ;;  %v1213_v63 = vpop.permute.xlu1 %1212  ;;  %v4522_v52 = vpop.permute.xlu0 %1152  ;;  %v1608_v24 = vrot.slane %v1607_v3, 4  ;;  %v4556_v61 = vrot.slane %v1597_v44, 4  ;;  %v1850_v51 = vshll.u32 %v1502_v27, 16 }
  0xb8   : > { %v1864_v2 = vshll.u32 %v1504_v60, 16  ;;  %v1868_v5 = vshrl.u32 %v1504_v60, 16  ;;  %v4543_v17 = vpop.permute.xlu2 %2332  ;;  %v363_v56 = vld [vmem:[%s4157_s24 + $0x2c] sm:$0xf]  ;;  %v472_v11 = vshrl.u32 %v4546_v31, 16  ;;  %v976_v43 = vshrl.u32 %v4552_v53, 16 }
  0xb9   : > { %v1627_v15 = vsel %vm4149_vm13, %v1622_v57, %v4445_v0  ;;  %v4559_v28 = vld [vmem:[#allocation2 + $0xac] sm:$0xf]  ;;  %v480_v39 = vshrl.u32 %v363_v56, 16  ;;  %v483_v48 = vshll.u32 %v363_v56, 16  ;;  %v4566_v60 = vrot.slane %v1847_v30, 4 }
  0xba   : > { %v4539_v25 = vrot.slane %v1864_v2, 5  ;;  %v1870_v9 = vrot.slane %v1868_v5, 4  ;;  %v1375_v23 = vld [vmem:[#allocation2 + $0xb4] sm:$0xf]  ;;  %v4564_v41 = vrot.slane %v472_v11, 7  ;;  %v1555_v13 = vsel %vm4149_vm13, %v1550_v4, %v4355_v55 }
  0xbb   : > { %1958 = vrot.lane.b32.xlu0 %v1579_v14, %s4010_s26  ;;  %v1376_v47 = vsel %vm4319_vm10, %v1213_v63, %v1375_v23  ;;  %v740_v46 = vld [vmem:[#allocation2 + $0x3c] sm:$0xf]  ;;  %v4568_v59 = vrot.slane %v480_v39, 7  ;;  %v2306_v63 = vrot.slane %v4559_v28, 5  ;;  %v346_v20 = vld [vmem:[#allocation2 + $0xc8] sm:$0x1]  ;;  %v1613_v4 = vsel %vm4149_vm13, %v1608_v24, %v1612_v29 }
  0xbc   : > { %1966 = vrot.lane.b32.xlu2 %v1627_v15, %s4010_s26  ;;  %v1871_v32 = vor.u32 %v1870_v9, %v4539_v25  ;;  %1377 = vst [vmem:[#allocation2 + $0xb4] sm:$0xf] %v1376_v47  ;;  %v741_v6 = vsel %vm4199_vm4, %v460_v45, %v740_v46  ;;  %v478_v10 = vrot.slane %v4564_v41, 4  ;;  %v4582_v3 = vld [vmem:[%s4053_s20 + $0x3c] sm:$0xf]  ;;  %v4586_v45 = vrot.slane %v1850_v51, 5 }
  0xbd   : > { %1956 = vrot.lane.b32.xlu1 %v1565_v58, %s4010_s26  ;;  %v1861_v58 = vor.u32 %v1860_v40, %v1857_v36  ;;  %v1309_v5 = vld [vmem:[#allocation2 + $0x44] sm:$0x1]  ;;  %742 = vst [vmem:[#allocation2 + $0x3c] sm:$0xf] %v741_v6  ;;  %v485_v44 = vor.u32 %v483_v48, %v4568_v59  ;;  %v4588_v14 = vrot.slane %v976_v43, 7  ;;  %v631_v55 = vrot.slane %v4477_v21, 4 }
  0xbe   : > { %v1872_v38 = vrot.slane %v1871_v32, 4  ;;  %v636_v27 = vshll.u32 %v4402_v50, 16  ;;  %v1477_v36 = vld [vmem:[#allocation2 + $0x40] sm:$0xf]  ;;  %v347_v40 = vsel %vm4107_vm6, 0, %v346_v20  ;;  %v984_v21 = vshrl.u32 %v4582_v3, 16 }
  0xbf   : > { %v1157_v54 = vpop.permute.xlu1 %1156  ;;  %v1215_v57 = vpop.permute.xlu0 %1214  ;;  %v486_v32 = vsel %vm4064_vm2, %v478_v10, %v485_v44  ;;  %v4600_v30 = vld [vmem:[%s4157_s24 + $0x7c] sm:$0xf]  ;;  %v4605_v50 = vld [vmem:[#allocation2 + $0x34] sm:$0xf]  ;;  %v987_v24 = vshll.u32 %v4582_v3, 16  ;;  %v475_v51 = vshll.u32 %v4546_v31, 16  ;;  %v2307_v48 = vsel %vm4144_vm12, %v3669_v62, %v2306_v63 }
  0xc0   : > { %v1877_v2 = vsel %vm4149_vm13, %v1872_v38, %v1876_v26  ;;  %v1310_v15 = vsel %vm4276_vm9, %v1157_v54, %v1309_v5  ;;  %v1161_v9 = vpop.permute.xlu2 %1160  ;;  %v1862_v26 = vrot.slane %v1861_v58, 4  ;;  %750 = vst.msk [vmem:[#allocation2 + $0x4c] sm:$0xf] %vm707_vm1, %v486_v32  ;;  %v638_v29 = vor.u32 %v636_v27, %v4425_v18  ;;  %v4612_v11 = vld [vmem:[#allocation2 + $0x38] sm:$0x1] }
  0xc1   : > { %1311 = vst [vmem:[#allocation2 + $0x44] sm:$0x1] %v1310_v15  ;;  %v650_v56 = vshrl.u32 %v4600_v30, 16  ;;  %v982_v38 = vrot.slane %v4588_v14, 4  ;;  %v1648_v39 = vshll.u32 %v1477_v36, 16  ;;  %v1603_v18 = vsel %vm4149_vm13, %v4556_v61, %v4506_v33 }
  0xc2   : > { %1315 = vst.msk [vmem:[#allocation2 + $0x4c] sm:$0xf] %vm1272_vm0, %v1161_v9  ;;  %v639_v23 = vsel %vm4064_vm2, %v631_v55, %v638_v29  ;;  %v2236_v47 = vrot.slane %v4605_v50, 5  ;;  %v1652_v54 = vshrl.u32 %v1477_v36, 16  ;;  %v1389_v43 = vld [vmem:[#allocation2] sm:$0xf]  ;;  %v1867_v58 = vsel %vm4149_vm13, %v1862_v26, %v4539_v25 }
  0xc3   : > { %1954 = vrot.lane.b32.xlu0 %v1555_v13, %s4010_s26  ;;  %348 = vst [vmem:[#allocation2 + $0xc8] sm:$0x1] %v347_v40  ;;  %v4635_v33 = vrot.slane %v650_v56, 7  ;;  %v2239_v62 = vrot.slane %v4612_v11, 5  ;;  %v1630_v25 = vrot.slane %v1628_v34, 4  ;;  %v4647_v6 = vrot.slane %v1648_v39, 5 }
  0xc4   : > { %2008 = vrot.lane.b32.xlu2 %v1877_v2, %s4010_s26  ;;  %813 = vst.msk [vmem:[#allocation2 + $0xb8] sm:$0xf] %vm707_vm1, %v639_v23  ;;  %v1305_v46 = vld [vmem:[#allocation2 + $0x3c] sm:$0xf]  ;;  %v4632_v2 = vrot.slane %v984_v21, 7  ;;  %v2238_v37 = vrot.slane %v2236_v47, 4 }
  0xc5   : > { %1964 = vrot.lane.b32.xlu1 %v1613_v4, %s4010_s26  ;;  %1378 = vst.msk [vmem:[#allocation2 + $0xb8] sm:$0xf] %vm1272_vm0, %v1215_v57  ;;  %v1306_v5 = vsel %vm4319_vm10, %v4522_v52, %v1305_v46  ;;  %v1475_v57 = vld [vmem:[#allocation2 + $0x38] sm:$0x1]  ;;  %v657_v52 = vrot.slane %v4635_v33, 4  ;;  %v1654_v15 = vrot.slane %v1652_v54, 4  ;;  %v1631_v21 = vor.u32 %v1630_v25, %v4445_v0 }
  0xc6   : > { %1307 = vst [vmem:[#allocation2 + $0x3c] sm:$0xf] %v1306_v5  ;;  %v263_v13 = vld [vmem:[#allocation2 + $0x54] sm:$0x1]  ;;  %v364_v3 = vld [vmem:[%s4157_s24 + $0x30] sm:$0xf]  ;;  %v989_v44 = vor.u32 %v987_v24, %v4632_v2  ;;  %v2240_v0 = vsel %vm4144_vm12, %v2238_v37, %v2239_v62 }
  0xc7   : > { %v2335_v61 = vpop.permute.xlu0 %2334  ;;  %1425 = vst.msk [vmem:[#allocation3] sm:$0xf] %vm230_vm3, %v1389_v43  ;;  %v1951_v12 = vpop.permute.xlu1 %1950  ;;  %v264_v34 = vsel %vm4114_vm7, 0, %v263_v13  ;;  %v489_v9 = vshrl.u32 %v364_v3, 16  ;;  %v492_v55 = vshll.u32 %v364_v3, 16  ;;  %v1634_v29 = vshll.u32 %v1475_v57, 16 }
  0xc8   : > { %2442 = vst.msk [vmem:[#allocation3 + $0x4] sm:$0xf] %vm2440_vm11, %v2335_v61  ;;  %v4649_v10 = vpop.permute.xlu2 %1222  ;;  %v1478_v20 = vld [vmem:[#allocation2 + $0x44] sm:$0x1]  ;;  %v260_v4 = vld [vmem:[#allocation2 + $0x48] sm:$0x1]  ;;  %v1655_v11 = vor.u32 %v1654_v15, %v4647_v6 }
  0xc9   : > { %2059 = vst.msk [vmem:[#allocation3] sm:$0xf] %vm2058_vm5, %v1951_v12  ;;  %v4664_v32 = vrot.slane %v489_v9, 7  ;;  %v261_v36 = vsel %vm4114_vm7, 0, %v260_v4  ;;  %v290_v40 = vld [vmem:[#allocation2 + $0xc0] sm:$0x1] }
  0xca   : > { %v821_v27 = vld [vmem:[#allocation2 + $0xc8] sm:$0x1]  ;;  %2441 = vst.msk [vmem:[#allocation3] sm:$0xf] %vm2440_vm11, %v4543_v17  ;;  %v291_v56 = vsel %vm4114_vm7, 0, %v290_v40  ;;  %v990_v17 = vsel %vm4064_vm2, %v982_v38, %v989_v44  ;;  %v1658_v23 = vshll.u32 %v1478_v20, 16 }
  0xcb   : > { %1962 = vrot.lane.b32.xlu0 %v1603_v18, %s4010_s26  ;;  %v822_v26 = vsel %vm4183_vm15, %v657_v52, %v821_v27  ;;  %265 = vst [vmem:[#allocation2 + $0x54] sm:$0x1] %v264_v34  ;;  %v382_v24 = vld [vmem:[%s4157_s24 + $0x78] sm:$0xf]  ;;  %v1853_v18 = vsel %vm4149_vm13, %v4566_v60, %v4586_v45  ;;  %v979_v54 = vshll.u32 %v4552_v53, 16  ;;  %v494_v38 = vor.u32 %v492_v55, %v4664_v32 }
  0xcc   : > { %2388 = vrot.lane.b32.xlu2 %v2307_v48, %s4009_s25  ;;  %823 = vst [vmem:[#allocation2 + $0xc8] sm:$0x1] %v822_v26  ;;  %v642_v39 = vshrl.u32 %v382_v24, 16  ;;  %v645_v48 = vshll.u32 %v382_v24, 16  ;;  %v477_v60 = vor.u32 %v475_v51, %v4564_v41  ;;  %v1632_v45 = vrot.slane %v1631_v21, 4 }
  0xcd   : > { %2006 = vrot.lane.b32.xlu1 %v1867_v58, %s4010_s26  ;;  %262 = vst [vmem:[#allocation2 + $0x48] sm:$0x1] %v261_v36  ;;  %v1476_v43 = vld [vmem:[#allocation2 + $0x3c] sm:$0xf]  ;;  %v1636_v53 = vrot.slane %v1634_v29, 5  ;;  %v1656_v25 = vrot.slane %v1655_v11, 4  ;;  %v981_v20 = vor.u32 %v979_v54, %v4588_v14 }
  0xce   : > { %292 = vst [vmem:[#allocation2 + $0xc0] sm:$0x1] %v291_v56  ;;  %v1639_v58 = vshrl.u32 %v1476_v43, 16  ;;  %v1642_v46 = vshll.u32 %v1476_v43, 16  ;;  %v4684_v61 = vrot.slane %v642_v39, 7  ;;  %v1660_v57 = vrot.slane %v1658_v23, 5 }
  0xcf   : > { %v4690_v5 = vld [vmem:[#allocation2 + $0x30] sm:$0xe]  ;;  %v4695_v62 = vld [vmem:[%s4157_s24 + $0x58] sm:$0xf]  ;;  %v4698_v15 = vpop.permute.xlu0 %1158  ;;  %v375_v12 = vld [vmem:[%s4157_s24 + $0x5c] sm:$0xf]  ;;  %v1637_v36 = vsel %vm4149_vm13, %v1632_v45, %v1636_v53 }
  0xd0   : > { %v4692_v37 = vpop.permute.xlu2 %1164  ;;  %v1641_v52 = vrot.slane %v1639_v58, 4  ;;  %v1644_v13 = vrot.slane %v1642_v46, 5  ;;  %v4701_v34 = vld [vmem:[#allocation2 + $0x40] sm:$0xf]  ;;  %v647_v41 = vor.u32 %v645_v48, %v4684_v61  ;;  %v574_v51 = vshrl.u32 %v4695_v62, 16 }
  0xd1   : > { %v653_v3 = vshll.u32 %v4600_v30, 16  ;;  %v3659_v9 = vrot.slane %v4690_v5, 9  ;;  %v4710_v27 = vld [vmem:[#allocation2 + $0xb8] sm:$0xf]  ;;  %v582_v4 = vshrl.u32 %v375_v12, 16  ;;  %v585_v56 = vshll.u32 %v375_v12, 16 }
  0xd2   : > { %v754_v31 = vld [vmem:[#allocation2 + $0x54] sm:$0xf]  ;;  %v1507_v26 = vld [vmem:[#allocation2 + $0xb8] sm:$0xf]  ;;  %v2110_v30 = vld [vmem:[#allocation2 + $0x3c] sm:$0xe]  ;;  %v1661_v24 = vsel %vm4149_vm13, %v1656_v25, %v1660_v57 }
  0xd3   : > { %2004 = vrot.lane.b32.xlu0 %v1853_v18, %s4010_s26  ;;  %v1386_v44 = vld [vmem:[#allocation2 + $0xc8] sm:$0x1]  ;;  %v755_v55 = vsel %vm4199_vm4, %v494_v38, %v754_v31  ;;  %v4717_v14 = vld [vmem:[#allocation2 + $0xb0] sm:$0x1]  ;;  %v4719_v29 = vrot.slane %v574_v51, 7  ;;  %v4725_v39 = vrot.slane %v582_v4, 7  ;;  %v655_v43 = vor.u32 %v653_v3, %v4635_v33 }
  0xd4   : > { %1172 = vrot.lane.b32.xlu2 %v990_v17, %s4007_s21  ;;  %v1387_v40 = vsel %vm4276_vm9, %v4649_v10, %v1386_v44  ;;  %756 = vst [vmem:[#allocation2 + $0x54] sm:$0xf] %v755_v55  ;;  %v747_v21 = vld [vmem:[#allocation2 + $0x48] sm:$0xf]  ;;  %v1645_v17 = vor.u32 %v1644_v13, %v1641_v52  ;;  %v1219_v10 = vpop.permute.xlu1 %1218  ;;  %v1888_v54 = vshll.u32 %v1507_v26, 16  ;;  %v2243_v38 = vrot.slane %v4701_v34, 5 }
  0xd5   : > { %2350 = vrot.lane.b32.xlu1 %v2240_v0, %s4009_s25  ;;  %1388 = vst [vmem:[#allocation2 + $0xc8] sm:$0x1] %v1387_v40  ;;  %v748_v11 = vsel %vm4199_vm4, %v477_v60, %v747_v21  ;;  %v817_v23 = vld [vmem:[#allocation2 + $0xc0] sm:$0xf]  ;;  %v580_v0 = vrot.slane %v4719_v29, 4  ;;  %v4738_v58 = vrot.slane %v2306_v63, 4  ;;  %v587_v46 = vor.u32 %v585_v56, %v4725_v39 }
  0xd6   : > { %749 = vst [vmem:[#allocation2 + $0x48] sm:$0xf] %v748_v11  ;;  %v818_v18 = vsel %vm4199_vm4, %v647_v41, %v817_v23  ;;  %v2479_v48 = vld [vmem:[%s5644_s2 + $0x8] sm:$0xf]  ;;  %v1892_v60 = vshrl.u32 %v1507_v26, 16  ;;  %v2313_v33 = vrot.slane %v4710_v27, 5  ;;  %v2237_v26 = vsel %vm4144_vm12, %v3659_v9, %v2236_v47 }
  0xd7   : > { %819 = vst [vmem:[#allocation2 + $0xc0] sm:$0xf] %v818_v18  ;;  %v648_v45 = vrot.slane %v4684_v61, 4  ;;  %v2867_v53 = vunpack.c.l.b16 %v2479_v48  ;;  %v3660_v5 = vrot.slane %v2110_v30, 9  ;;  %v1646_v25 = vrot.slane %v1645_v17, 4  ;;  %v1221_v51 = vpop.permute.xlu0 %1220  ;;  %v4775_v30 = vld [vmem:[%s5644_s2] sm:$0xff] }
  0xd8   : > { %v2309_v57 = vrot.slane %v4717_v14, 5  ;;  %v588_v28 = vsel %vm4064_vm2, %v580_v0, %v587_v46  ;;  %v1197_v63 = vpop.permute.xlu2 %1196  ;;  %v1508_v52 = vld [vmem:[#allocation2 + $0xbc] sm:$0x1]  ;;  %v4749_v13 = vrot.slane %v1888_v54, 5  ;;  %v1894_v12 = vrot.slane %v1892_v60, 4 }
  0xd9   : > { %792 = vst.msk [vmem:[#allocation2 + $0x94] sm:$0xf] %vm707_vm1, %v588_v28  ;;  %v656_v61 = vsel %vm4064_vm2, %v648_v45, %v655_v43  ;;  %v2869_v31 = vpack.c.b16 %v2867_v53, %v2867_v53  ;;  %v316_v3 = vld [vmem:[#allocation2 + $0x50] sm:$0x1]  ;;  %v2315_v55 = vrot.slane %v2313_v33, 4  ;;  %v1898_v40 = vshll.u32 %v1508_v52, 16 }
  0xda   : > { %1357 = vst.msk [vmem:[#allocation2 + $0x94] sm:$0xf] %vm1272_vm0, %v1197_v63  ;;  %v1651_v50 = vsel %vm4149_vm13, %v1646_v25, %v4647_v6  ;;  %v1895_v21 = vor.u32 %v1894_v12, %v4749_v13  ;;  %v4786_v56 = vld [vmem:[%s4053_s20 + $0x44] sm:$0xf]  ;;  %v365_v23 = vld [vmem:[%s4157_s24 + $0x34] sm:$0xf] }
  0xdb   : > { %1968 = vrot.lane.b32.xlu0 %v1637_v36, %s4010_s26  ;;  %v1319_v41 = vld [vmem:[#allocation2 + $0x54] sm:$0xf]  ;;  %820 = vst.msk [vmem:[#allocation2 + $0xc4] sm:$0xf] %vm707_vm1, %v656_v61  ;;  %v4761_v4 = vsel %vm2689_vm8, %v2869_v31, 0  ;;  %v497_v0 = vshrl.u32 %v365_v23, 16 }
  0xdc   : > { %1972 = vrot.lane.b32.xlu2 %v1661_v24, %s4010_s26  ;;  %v1320_v44 = vsel %vm4319_vm10, %v4692_v37, %v1319_v41  ;;  %v2244_v37 = vsel %vm4144_vm12, %v3660_v5, %v2243_v38  ;;  %2928 = vmatpush.bf16.msra.mxu1 %v4761_v4  ;;  %1385 = vst.msk [vmem:[#allocation2 + $0xc4] sm:$0xf] %vm1272_vm0, %v1221_v51  ;;  %v317_v24 = vsel %vm4107_vm6, 0, %v316_v3  ;;  %v4790_v17 = vpop.permute.xlu1 %1162  ;;  %v1506_v18 = vld [vmem:[#allocation2 + $0xb4] sm:$0xf]  ;;  %v500_v54 = vshll.u32 %v365_v23, 16 }
  0xdd   : > { %1170 = vrot.lane.b32.xlu1 %v981_v20, %s4007_s21  ;;  %v2142_v20 = vld [vmem:[#allocation2 + $0xbc] sm:$0x1]  ;;  %1321 = vst [vmem:[#allocation2 + $0x54] sm:$0xf] %v1320_v44  ;;  %v1312_v36 = vld [vmem:[#allocation2 + $0x48] sm:$0xf] }
  0xde   : > { %v1313_v47 = vsel %vm4319_vm10, %v4698_v15, %v1312_v36  ;;  %v1382_v9 = vld [vmem:[#allocation2 + $0xc0] sm:$0xf]  ;;  %v2316_v11 = vrot.slane %v2142_v20, 5  ;;  %v3933_v15 = vld [vmem:[#allocation3] sm:$0xff]  ;;  %v1900_v43 = vrot.slane %v1898_v40, 5  ;;  %v1896_v46 = vrot.slane %v1895_v21, 4 }
  0xdf   : > { %1314 = vst [vmem:[#allocation2 + $0x48] sm:$0xf] %v1313_v47  ;;  %v1383_v6 = vsel %vm4319_vm10, %v1219_v10, %v1382_v9  ;;  %v278_v48 = vld [vmem:[#allocation2 + $0x90] sm:$0x1]  ;;  %v495_v10 = vrot.slane %v4664_v32, 4  ;;  %v4800_v60 = vrot.slane %v497_v0, 7 }
  0xe0   : > { %1384 = vst [vmem:[#allocation2 + $0xc0] sm:$0xf] %v1383_v6  ;;  %2929 = vmatpush.bf16.msra.mxu1 %v4775_v30  ;;  %v279_v45 = vsel %vm4114_vm7, 0, %v278_v48  ;;  %v577_v53 = vshll.u32 %v4695_v62, 16  ;;  %v1001_v5 = vshrl.u32 %v4786_v56, 16  ;;  %v1879_v25 = vshrl.u32 %v1506_v18, 16 }
  0xe1   : > { %318 = vst [vmem:[#allocation2 + $0x50] sm:$0x1] %v317_v24  ;;  %v1882_v28 = vshll.u32 %v1506_v18, 16  ;;  %v502_v63 = vor.u32 %v500_v54, %v4800_v60  ;;  %v334_v52 = vld [vmem:[#allocation2 + $0x98] sm:$0x1]  ;;  %v487_v32 = vrot.slane %v4568_v59, 4  ;;  %v2317_v12 = vsel %vm4144_vm12, %v2315_v55, %v2316_v11 }
  0xe2   : > { %280 = vst [vmem:[#allocation2 + $0x90] sm:$0x1] %v279_v45  ;;  %v335_v61 = vsel %vm4107_vm6, 0, %v334_v52  ;;  %v2310_v62 = vsel %vm4144_vm12, %v4738_v58, %v2309_v57  ;;  %v1901_v31 = vsel %vm4149_vm13, %v1896_v46, %v1900_v43  ;;  %v4823_v51 = vld [vmem:[%s4053_s20 + $0x40] sm:$0xf]  ;;  %v579_v3 = vor.u32 %v577_v53, %v4719_v29 }
  0xe3   : > { %2348 = vrot.lane.b32.xlu0 %v2237_v26, %s4009_s25  ;;  %3825 = vmatmul.msk.bf16.vlgmr.msra.gmra.mxu1 %vm2640_vm14, %v3933_v15  ;;  %v503_v41 = vsel %vm4064_vm2, %v495_v10, %v502_v63  ;;  %336 = vst [vmem:[#allocation2 + $0x98] sm:$0x1] %v335_v61  ;;  %v319_v59 = vld [vmem:[#allocation2 + $0x5c] sm:$0x1]  ;;  %v589_v14 = vrot.slane %v4725_v39, 4  ;;  %v1003_v44 = vrot.slane %v1001_v5, 7 }
  0xe4   : > { %2352 = vrot.lane.b32.xlu2 %v2244_v37, %s4009_s25  ;;  %v2140_v20 = vld [vmem:[#allocation2 + $0xb4] sm:$0xe]  ;;  %757 = vst.msk [vmem:[#allocation2 + $0x58] sm:$0xf] %vm707_vm1, %v503_v41  ;;  %v1881_v57 = vrot.slane %v1879_v25, 4  ;;  %v1884_v26 = vrot.slane %v1882_v28, 5  ;;  %v1167_v40 = vpop.permute.xlu1 %1166  ;;  %v1195_v25 = vpop.permute.xlu0 %1194 }
  0xe5   : > { %1970 = vrot.lane.b32.xlu1 %v1651_v50, %s4010_s26  ;;  %v4833_v50 = vld [vmem:[#allocation2 + $0xc4] sm:$0xf]  ;;  %1322 = vst.msk [vmem:[#allocation2 + $0x58] sm:$0xf] %vm1272_vm0, %v1167_v40  ;;  %v993_v39 = vshrl.u32 %v4823_v51, 16  ;;  %v320_v47 = vsel %vm4107_vm6, 0, %v319_v59 }
  0xe6   : > { %v991_v6 = vrot.slane %v4632_v2, 4  ;;  %321 = vst [vmem:[#allocation2 + $0x5c] sm:$0x1] %v320_v47  ;;  %v1008_v15 = vrot.slane %v1003_v44, 4  ;;  %v3670_v23 = vrot.slane %v2140_v20, 9  ;;  %v1912_v54 = vshll.u32 %v4833_v50, 16 }
  0xe7   : > { %v1509_v55 = vld [vmem:[#allocation2 + $0xc0] sm:$0xf]  ;;  %v1480_v18 = vld [vmem:[#allocation2 + $0x4c] sm:$0xf]  ;;  %v1004_v43 = vshll.u32 %v4786_v56, 16  ;;  %v1885_v10 = vor.u32 %v1884_v26, %v1881_v57  ;;  %v4844_v45 = vrot.slane %v993_v39, 7 }
  0xe8   : > { %v751_v58 = vld [vmem:[#allocation2 + $0x50] sm:$0x1]  ;;  %v1903_v37 = vshrl.u32 %v1509_v55, 16  ;;  %v1906_v36 = vshll.u32 %v1509_v55, 16  ;;  %v1415_v46 = vld [vmem:[#allocation2 + $0x9c] sm:$0xf]  ;;  %v2314_v63 = vsel %vm4144_vm12, %v3670_v23, %v2313_v33 }
  0xe9   : > { %v752_v29 = vsel %vm4183_vm15, %v487_v32, %v751_v58  ;;  %v789_v24 = vld [vmem:[#allocation2 + $0x90] sm:$0xf]  ;;  %v4846_v53 = vld [vmem:[#allocation2 + $0x4c] sm:$0xf]  ;;  %1451 = vst.msk [vmem:[#allocation3 + $0x68] sm:$0xf] %vm230_vm3, %v1415_v46 }
  0xea   : > { %753 = vst [vmem:[#allocation2 + $0x50] sm:$0x1] %v752_v29  ;;  %v1905_v9 = vrot.slane %v1903_v37, 4  ;;  %v1908_v21 = vrot.slane %v1906_v36, 5  ;;  %v790_v11 = vsel %vm4199_vm4, %v579_v3, %v789_v24  ;;  %v793_v48 = vld [vmem:[#allocation2 + $0x98] sm:$0x1] }
  0xeb   : > { %2390 = vrot.lane.b32.xlu0 %v2310_v62, %s4009_s25  ;;  %791 = vst [vmem:[#allocation2 + $0x90] sm:$0xf] %v790_v11  ;;  %v794_v2 = vsel %vm4183_vm15, %v589_v14, %v793_v48  ;;  %v504_v5 = vrot.slane %v4800_v60, 4  ;;  %v1672_v28 = vshll.u32 %v1480_v18, 16  ;;  %v1676_v56 = vshrl.u32 %v1480_v18, 16 }
  0xec   : > { %2394 = vrot.lane.b32.xlu2 %v2317_v12, %s4009_s25  ;;  %v1909_v0 = vor.u32 %v1908_v21, %v1905_v9  ;;  %795 = vst [vmem:[#allocation2 + $0x98] sm:$0x1] %v794_v2  ;;  %v4861_v61 = vrot.slane %v1912_v54, 5  ;;  %v1006_v60 = vor.u32 %v1004_v43, %v1003_v44  ;;  %v999_v41 = vrot.slane %v4844_v45, 4  ;;  %v2112_v55 = vld [vmem:[#allocation2 + $0x44] sm:$0x1]  ;;  %v1199_v36 = vpop.permute.xlu1 %1198  ;;  %v1169_v21 = vpop.permute.xlu0 %1168 }
  0xed   : > { %2012 = vrot.lane.b32.xlu1 %v1901_v31, %s4010_s26  ;;  %v1886_v31 = vrot.slane %v1885_v10, 4  ;;  %v2250_v27 = vrot.slane %v4846_v53, 5  ;;  %v758_v59 = vld [vmem:[#allocation2 + $0x5c] sm:$0x1]  ;;  %v4868_v3 = vrot.slane %v1672_v28, 5  ;;  %v1678_v14 = vrot.slane %v1676_v56, 4 }
  0xee   : > { %v1910_v12 = vrot.slane %v1909_v0, 4  ;;  %v759_v20 = vsel %vm4183_vm15, %v504_v5, %v758_v59  ;;  %v1397_v58 = vld [vmem:[#allocation2 + $0x30] sm:$0xf]  ;;  %v1007_v26 = vsel %vm4064_vm2, %v999_v41, %v1006_v60  ;;  %v2245_v37 = vrot.slane %v2243_v38, 4  ;;  %v842_v34 = vld [vmem:[%s4053_s20 + $0x48] sm:$0xf] }
  0xef   : > { %760 = vst [vmem:[#allocation2 + $0x5c] sm:$0x1] %v759_v20  ;;  %v1891_v57 = vsel %vm4149_vm13, %v1886_v31, %v4749_v13  ;;  %v2246_v29 = vrot.slane %v2112_v55, 5  ;;  %v2252_v39 = vrot.slane %v2250_v27, 4  ;;  %v1679_v13 = vor.u32 %v1678_v14, %v4868_v3  ;;  %v1418_v38 = vld [vmem:[#allocation2 + $0xac] sm:$0xf] }
  0xf0   : > { %1433 = vst.msk [vmem:[#allocation3 + $0x20] sm:$0xf] %vm230_vm3, %v1397_v58  ;;  %v1482_v24 = vld [vmem:[#allocation2 + $0x54] sm:$0xf]  ;;  %v1479_v23 = vld [vmem:[#allocation2 + $0x48] sm:$0xf] }
  0xf1   : > { %v1316_v52 = vld [vmem:[#allocation2 + $0x50] sm:$0x1]  ;;  %1454 = vst.msk [vmem:[#allocation3 + $0x74] sm:$0xf] %vm230_vm3, %v1418_v38  ;;  %v1680_v0 = vrot.slane %v1679_v13, 4  ;;  %v1010_v48 = vshrl.u32 %v842_v34, 16  ;;  %v2247_v56 = vsel %vm4144_vm12, %v2245_v37, %v2246_v29 }
  0xf2   : > { %v1317_v62 = vsel %vm4276_vm9, %v4790_v17, %v1316_v52  ;;  %v1354_v33 = vld [vmem:[#allocation2 + $0x90] sm:$0xf]  ;;  %v1915_v17 = vsel %vm4149_vm13, %v1910_v12, %v4861_v61  ;;  %v1687_v10 = vshrl.u32 %v1482_v24, 16  ;;  %v1690_v2 = vshll.u32 %v1482_v24, 16  ;;  %v1393_v28 = vld [vmem:[#allocation2 + $0x18] sm:$0xf] }
  0xf3   : > { %1174 = vrot.lane.b32.xlu0 %v991_v6, %s4007_s21  ;;  %1318 = vst [vmem:[#allocation2 + $0x50] sm:$0x1] %v1317_v62  ;;  %v1355_v44 = vsel %vm4319_vm10, %v1195_v25, %v1354_v33  ;;  %v1358_v40 = vld [vmem:[#allocation2 + $0x98] sm:$0x1]  ;;  %v1394_v6 = vld [vmem:[#allocation2 + $0x1c] sm:$0xf] }
  0xf4   : > { %1180 = vrot.lane.b32.xlu2 %v1008_v15, %s4007_s21  ;;  %1356 = vst [vmem:[#allocation2 + $0x90] sm:$0xf] %v1355_v44  ;;  %v1359_v47 = vsel %vm4276_vm9, %v1199_v36, %v1358_v40  ;;  %v1666_v52 = vshll.u32 %v1479_v23, 16  ;;  %v1392_v12 = vld [vmem:[#allocation2 + $0x10] sm:$0xf]  ;;  %v996_v62 = vshll.u32 %v4823_v51, 16 }
  0xf5   : > { %v4858_v32 = vpop.permute.xlu2 %2340  ;;  %2392 = vrot.lane.b32.xlu1 %v2314_v63, %s4009_s25  ;;  %1360 = vst [vmem:[#allocation2 + $0x98] sm:$0x1] %v1359_v47  ;;  %v1663_v63 = vshrl.u32 %v1479_v23, 16  ;;  %v4909_v31 = vrot.slane %v1010_v48, 7  ;;  %v1013_v41 = vshll.u32 %v842_v34, 16  ;;  %v1689_v33 = vrot.slane %v1687_v10, 4 }
  0xf6   : > { %v1323_v43 = vld [vmem:[#allocation2 + $0x5c] sm:$0x1]  ;;  %1430 = vst.msk [vmem:[#allocation3 + $0x14] sm:$0xf] %vm230_vm3, %v1394_v6  ;;  %v2113_v59 = vld [vmem:[#allocation2 + $0x48] sm:$0xe] }
  0xf7   : > { %v1324_v46 = vsel %vm4276_vm9, %v1169_v21, %v1323_v43  ;;  %1429 = vst.msk [vmem:[#allocation3 + $0x10] sm:$0xf] %vm230_vm3, %v1393_v28  ;;  %v1692_v14 = vrot.slane %v1690_v2, 5  ;;  %v4914_v20 = vld [vmem:[#allocation2 + $0x58] sm:$0xf]  ;;  %v3661_v58 = vrot.slane %v2113_v59, 9  ;;  %v1015_v37 = vor.u32 %v1013_v41, %v4909_v31 }
  0xf8   : > { %1325 = vst [vmem:[#allocation2 + $0x5c] sm:$0x1] %v1324_v46  ;;  %v1498_v44 = vld [vmem:[#allocation2 + $0x94] sm:$0xf]  ;;  %v1391_v55 = vld [vmem:[#allocation2 + $0xc] sm:$0xf] }
  0xf9   : > { %1428 = vst.msk [vmem:[#allocation3 + $0xc] sm:$0xf] %vm230_vm3, %v1392_v12  ;;  %v1665_v51 = vrot.slane %v1663_v63, 4  ;;  %v1396_v36 = vld [vmem:[#allocation2 + $0x28] sm:$0xf]  ;;  %v1696_v47 = vshll.u32 %v4914_v20, 16 }
  0xfa   : > { %v2115_v11 = vld [vmem:[#allocation2 + $0x50] sm:$0x1]  ;;  %1427 = vst.msk [vmem:[#allocation3 + $0x8] sm:$0xf] %vm230_vm3, %v1391_v55  ;;  %v1395_v40 = vld [vmem:[#allocation2 + $0x24] sm:$0xf] }
  0xfb   : > { %2010 = vrot.lane.b32.xlu0 %v1891_v57, %s4010_s26  ;;  %v1481_v15 = vld [vmem:[#allocation2 + $0x50] sm:$0x1]  ;;  %v2253_v18 = vrot.slane %v2115_v11, 5  ;;  %v1668_v57 = vrot.slane %v1666_v52, 5  ;;  %v1416_v29 = vld [vmem:[#allocation2 + $0xa0] sm:$0xf] }
  0xfc   : > { %2014 = vrot.lane.b32.xlu2 %v1915_v17, %s4010_s26  ;;  %v1682_v54 = vshll.u32 %v1481_v15, 16  ;;  %v1816_v13 = vshll.u32 %v1498_v44, 16  ;;  %v1820_v34 = vshrl.u32 %v1498_v44, 16  ;;  %1432 = vst.msk [vmem:[#allocation3 + $0x1c] sm:$0xf] %vm230_vm3, %v1396_v36  ;;  %v1916_v38 = vshrl.u32 %v4833_v50, 16 }
  0xfd   : > { %v4893_v9 = vpop.permute.xlu2 %2338  ;;  %1178 = vrot.lane.b32.xlu1 %v1007_v26, %s4007_s21  ;;  %v2254_v5 = vsel %vm4144_vm12, %v2252_v39, %v2253_v18  ;;  %v998_v26 = vor.u32 %v996_v62, %v4844_v45  ;;  %v1693_v39 = vor.u32 %v1692_v14, %v1689_v33  ;;  %1431 = vst.msk [vmem:[#allocation3 + $0x18] sm:$0xf] %vm230_vm3, %v1395_v40  ;;  %v4931_v24 = vld [vmem:[#allocation2 + $0xc4] sm:$0xf]  ;;  %v4936_v15 = vrot.slane %v1696_v47, 5 }
  0xfe   : > { %v1684_v25 = vrot.slane %v1682_v54, 5  ;;  %v1669_v21 = vor.u32 %v1668_v57, %v1665_v51  ;;  %1452 = vst.msk [vmem:[#allocation3 + $0x6c] sm:$0xf] %vm230_vm3, %v1416_v29  ;;  %v2251_v45 = vsel %vm4144_vm12, %v3661_v58, %v2250_v27  ;;  %v2145_v50 = vld [vmem:[#allocation2 + $0xc8] sm:$0x1]  ;;  %v4938_v23 = vrot.slane %v1816_v13, 5 }
  0xff   : > { %v1694_v11 = vrot.slane %v1693_v39, 4  ;;  %v1822_v18 = vrot.slane %v1820_v34, 4  ;;  %v4942_v53 = vld [vmem:[%s4053_s20 + $0x4c] sm:$0xf]  ;;  %v2320_v54 = vrot.slane %v4931_v24, 5  ;;  %v1918_v43 = vrot.slane %v1916_v38, 4 }
 0x100   : > { %v1685_v60 = vsel %vm4149_vm13, %v1680_v0, %v1684_v25  ;;  %v1670_v0 = vrot.slane %v1669_v21, 4  ;;  %v1499_v48 = vld [vmem:[#allocation2 + $0x98] sm:$0x1]  ;;  %v2323_v46 = vrot.slane %v2145_v50, 5  ;;  %v1511_v10 = vld [vmem:[#allocation2 + $0xc8] sm:$0x1] }
 0x101   : > { %v1699_v2 = vsel %vm4149_vm13, %v1694_v11, %v4936_v15  ;;  %v1823_v25 = vor.u32 %v1822_v18, %v4938_v23  ;;  %v1018_v28 = vshrl.u32 %v4942_v53, 16  ;;  %v367_v63 = vld [vmem:[%s4157_s24 + $0x3c] sm:$0xf]  ;;  %v1826_v52 = vshll.u32 %v1499_v48, 16  ;;  %v1497_v12 = vld [vmem:[#allocation2 + $0x90] sm:$0xf] }
 0x102   : > { %v514_v62 = vshrl.u32 %v367_v63, 16  ;;  %v517_v41 = vshll.u32 %v367_v63, 16  ;;  %v1675_v59 = vsel %vm4149_vm13, %v1670_v0, %v4868_v3  ;;  %v1919_v33 = vor.u32 %v1918_v43, %v4861_v61  ;;  %v2485_v44 = vld [vmem:[%s5644_s2 + $0x20] sm:$0xf]  ;;  %v4991_v43 = vld [vmem:[%s5644_s2 + $0x18] sm:$0xff] }
 0x103   : > { %2354 = vrot.lane.b32.xlu0 %v2247_v56, %s4009_s25  ;;  %v4954_v56 = vld [vmem:[%s4157_s24 + $0x38] sm:$0xf]  ;;  %v1922_v14 = vshll.u32 %v1511_v10, 16  ;;  %v3129_v51 = vunpack.c.l.b16 %v2485_v44  ;;  %v1824_v3 = vrot.slane %v1823_v25, 4  ;;  %v1810_v61 = vshll.u32 %v1497_v12, 16 }
 0x104   : > { %2358 = vrot.lane.b32.xlu2 %v2254_v5, %s4009_s25  ;;  %v2322_v5 = vrot.slane %v2320_v54, 4  ;;  %v4968_v58 = vrot.slane %v514_v62, 7  ;;  %v1020_v36 = vrot.slane %v1018_v28, 7  ;;  %v1920_v13 = vrot.slane %v1919_v33, 4  ;;  %v2143_v10 = vld [vmem:[#allocation2 + $0xc0] sm:$0xe] }
 0x105   : > { %1976 = vrot.lane.b32.xlu1 %v1685_v60, %s4010_s26  ;;  %v506_v60 = vshrl.u32 %v4954_v56, 16  ;;  %v1924_v34 = vrot.slane %v1922_v14, 5  ;;  %v3131_v38 = vpack.c.b16 %v3129_v51, %v3129_v51  ;;  %v1812_v50 = vrot.slane %v1810_v61, 5  ;;  %v5001_v25 = vld [vmem:[#allocation2 + $0x94] sm:$0xf] }
 0x106   : > { %v4916_v17 = vpop.permute.xlu2 %2346  ;;  %v2324_v57 = vsel %vm4144_vm12, %v2322_v5, %v2323_v46  ;;  %v519_v29 = vor.u32 %v517_v41, %v4968_v58  ;;  %v1025_v0 = vrot.slane %v1020_v36, 4  ;;  %v2482_v46 = vld [vmem:[%s5644_s2 + $0x14] sm:$0xf]  ;;  %v2131_v5 = vld [vmem:[#allocation2 + $0x90] sm:$0xe]  ;;  %v3671_v62 = vrot.slane %v2143_v10, 9 }
 0x107   : > { %v4934_v6 = vpop.permute.xlu1 %2336  ;;  %v4966_v55 = vrot.slane %v506_v60, 7  ;;  %v4983_v18 = vsel %vm2689_vm8, %v3131_v38, 0  ;;  %v1925_v48 = vsel %vm4149_vm13, %v1920_v13, %v1924_v34  ;;  %v1417_v63 = vld [vmem:[#allocation2 + $0xa8] sm:$0xf]  ;;  %v2292_v33 = vrot.slane %v5001_v25, 5 }
 0x108   : > { %3190 = vmatpush.bf16.msra.mxu2 %v4983_v18  ;;  %1453 = vst.msk [vmem:[#allocation3 + $0x70] sm:$0xf] %vm230_vm3, %v1417_v63  ;;  %v1021_v51 = vshll.u32 %v4942_v53, 16  ;;  %v2321_v61 = vsel %vm4144_vm12, %v3671_v62, %v2320_v54  ;;  %v1016_v24 = vrot.slane %v4909_v31, 4  ;;  %v844_v13 = vld [vmem:[%s4053_s20 + $0x50] sm:$0xf] }
 0x109   : > { %v512_v40 = vrot.slane %v4966_v55, 4  ;;  %v325_v63 = vld [vmem:[#allocation2 + $0x74] sm:$0x1] }
 0x10b   : > { %1176 = vrot.lane.b32.xlu0 %v998_v26, %s4007_s21  ;;  %v1807_v26 = vshrl.u32 %v1497_v12, 16  ;;  %v520_v21 = vsel %vm4064_vm2, %v512_v40, %v519_v29  ;;  %v1023_v40 = vor.u32 %v1021_v51, %v1020_v36 }
 0x10c   : > { %1182 = vrot.lane.b32.xlu2 %v1015_v37, %s4007_s21  ;;  %v1828_v37 = vrot.slane %v1826_v52, 5  ;;  %764 = vst.msk [vmem:[#allocation2 + $0x64] sm:$0xf] %vm707_vm1, %v520_v21  ;;  %3191 = vmatpush.bf16.msra.mxu2 %v4991_v43 }
 0x10d   : > { %2356 = vrot.lane.b32.xlu1 %v2251_v45, %s4009_s25  ;;  %v1400_v45 = vld [vmem:[#allocation2 + $0x40] sm:$0xf]  ;;  %v1809_v11 = vrot.slane %v1807_v26, 4  ;;  %v1700_v26 = vshrl.u32 %v4914_v20, 16  ;;  %v1024_v31 = vsel %vm4064_vm2, %v1016_v24, %v1023_v40 }
 0x10e   : > { %v2003_v27 = vpop.permute.xlu2 %2002  ;;  %1436 = vst.msk [vmem:[#allocation3 + $0x2c] sm:$0xf] %vm230_vm3, %v1400_v45 }
 0x10f   : > { %2085 = vst.msk [vmem:[#allocation3 + $0x68] sm:$0xf] %vm2058_vm5, %v2003_v27  ;;  %v1829_v27 = vsel %vm4149_vm13, %v1824_v3, %v1828_v37  ;;  %v1813_v28 = vor.u32 %v1812_v50, %v1809_v11  ;;  %v5016_v3 = vld [vmem:[#allocation2 + $0x58] sm:$0xf]  ;;  %v1398_v37 = vld [vmem:[#allocation2 + $0x34] sm:$0xf] }
 0x110   : > { %1434 = vst.msk [vmem:[#allocation3 + $0x24] sm:$0xf] %vm230_vm3, %v1398_v37  ;;  %v2257_v54 = vrot.slane %v5016_v3, 5  ;;  %v1702_v38 = vrot.slane %v1700_v26, 4  ;;  %v1027_v11 = vshrl.u32 %v844_v13, 16 }
 0x111   : > { %v1814_v44 = vrot.slane %v1813_v28, 4  ;;  %v2116_v26 = vld [vmem:[#allocation2 + $0x54] sm:$0xe] }
 0x112   : > { %v2259_v36 = vrot.slane %v2257_v54, 4  ;;  %v1703_v50 = vor.u32 %v1702_v38, %v4936_v15 }
 0x113   : > { %1974 = vrot.lane.b32.xlu0 %v1675_v59, %s4010_s26  ;;  %v3667_v59 = vrot.slane %v2131_v5, 9  ;;  %v1819_v20 = vsel %vm4149_vm13, %v1814_v44, %v4938_v23  ;;  %v1484_v23 = vld [vmem:[#allocation2 + $0x5c] sm:$0x1] }
 0x114   : > { %1978 = vrot.lane.b32.xlu2 %v1699_v2, %s4010_s26  ;;  %v2636_v2 = vunpack.c.l.b16 %v2482_v46  ;;  %v1030_v46 = vshll.u32 %v844_v13, 16  ;;  %v1704_v15 = vrot.slane %v1703_v50, 4  ;;  %v2294_v50 = vrot.slane %v2292_v33, 4 }
 0x115   : > { %2398 = vrot.lane.b32.xlu1 %v2324_v57, %s4009_s25  ;;  %v3931_v57 = vld [vmem:[%s5644_s2 + $0xc] sm:$0xff]  ;;  %v2293_v53 = vsel %vm4144_vm12, %v3667_v59, %v2292_v33  ;;  %v266_v59 = vld [vmem:[#allocation2 + $0x60] sm:$0x1] }
 0x116   : > { %v1967_v39 = vpop.permute.xlu2 %1966  ;;  %v4976_v47 = vpop.permute.xlu1 %2344  ;;  %v2638_v12 = vpack.c.b16 %v2636_v2, %v2636_v2 }
 0x117   : > { %2067 = vst.msk [vmem:[#allocation3 + $0x20] sm:$0xf] %vm2058_vm5, %v1967_v39  ;;  %v2118_v39 = vld [vmem:[#allocation2 + $0x5c] sm:$0x1] }
 0x118   : > { %v2691_v14 = vsel %vm2689_vm8, %v2638_v12, 0  ;;  %v2260_v45 = vrot.slane %v2118_v39, 5  ;;  %v3662_v39 = vrot.slane %v2116_v26, 9 }
 0x119   : > { %2699 = vmatpush.bf16.msra.mxu0 %v2691_v14  ;;  %3981 = vmatpush.bf16.msra.mxu3 %v2691_v14 }
 0x11b   : > { %2016 = vrot.lane.b32.xlu0 %v1925_v48, %s4010_s26  ;;  %v1029_v48 = vrot.slane %v1027_v11, 7 }
 0x11c   : > { %2000 = vrot.lane.b32.xlu2 %v1829_v27, %s4010_s26  ;;  %v1706_v27 = vshll.u32 %v1484_v23, 16 }
 0x11d   : > { %v2385_v52 = vpop.permute.xlu0 %2384  ;;  %1186 = vrot.lane.b32.xlu1 %v1025_v0, %s4007_s21  ;;  %2700 = vmatpush.bf16.msra.mxu0 %v3931_v57  ;;  %v845_v0 = vld [vmem:[%s4053_s20 + $0x54] sm:$0xf]  ;;  %v1032_v12 = vor.u32 %v1030_v46, %v1029_v48  ;;  %v1033_v44 = vrot.slane %v1029_v48, 4 }
 0x11e   : > { %2467 = vst.msk [vmem:[#allocation3 + $0x68] sm:$0xf] %vm2440_vm11, %v2385_v52  ;;  %v2009_v60 = vpop.permute.xlu2 %2008  ;;  %3982 = vmatpush.bf16.msra.mxu3 %v3931_v57  ;;  %v1035_v2 = vshrl.u32 %v845_v0, 16  ;;  %v1708_v28 = vrot.slane %v1706_v27, 5  ;;  %v5057_v52 = vld [vmem:[%s4157_s24 + $0x44] sm:$0xf] }
 0x11f   : > { %2088 = vst.msk [vmem:[#allocation3 + $0x74] sm:$0xf] %vm2058_vm5, %v2009_v60  ;;  %v5008_v41 = vpop.permute.xlu1 %2386  ;;  %v326_v60 = vsel %vm4107_vm6, 0, %v325_v63  ;;  %v531_v62 = vshrl.u32 %v5057_v52, 16  ;;  %v1038_v51 = vshll.u32 %v845_v0, 16 }
 0x120   : > { %v5064_v14 = vrot.slane %v1035_v2, 7  ;;  %v1709_v57 = vsel %vm4149_vm13, %v1704_v15, %v1708_v28  ;;  %327 = vst [vmem:[#allocation2 + $0x74] sm:$0x1] %v326_v60  ;;  %v1419_v48 = vld [vmem:[#allocation2 + $0xb4] sm:$0xf] }
 0x121   : > { %1455 = vst.msk [vmem:[#allocation3 + $0x78] sm:$0xf] %vm230_vm3, %v1419_v48  ;;  %v272_v15 = vld [vmem:[#allocation2 + $0x78] sm:$0x1]  ;;  %v370_v28 = vld [vmem:[%s4157_s24 + $0x48] sm:$0xf] }
 0x122   : > { %3983 = vmatpush.bf16.msrb.mxu3 %v4761_v4  ;;  %v2261_v4 = vsel %vm4144_vm12, %v2259_v36, %v2260_v45  ;;  %v1040_v37 = vor.u32 %v1038_v51, %v5064_v14  ;;  %v1042_v2 = vrot.slane %v5064_v14, 4  ;;  %v540_v63 = vshrl.u32 %v370_v28, 16 }
 0x123   : > { %2396 = vrot.lane.b32.xlu0 %v2321_v61, %s4009_s25  ;;  %v5073_v61 = vrot.slane %v531_v62, 7  ;;  %v521_v62 = vrot.slane %v4968_v58, 4 }
 0x124   : > { %2380 = vrot.lane.b32.xlu2 %v2293_v53, %s4009_s25  ;;  %v509_v53 = vshll.u32 %v4954_v56, 16  ;;  %v5131_v60 = vrot.slane %v540_v63, 7  ;;  %v1422_v63 = vld [vmem:[#allocation2 + $0xc4] sm:$0xf] }
 0x125   : > { %v2343_v29 = vpop.permute.xlu0 %2342  ;;  %1998 = vrot.lane.b32.xlu1 %v1819_v20, %s4010_s26  ;;  %v1399_v20 = vld [vmem:[#allocation2 + $0x3c] sm:$0xf]  ;;  %v538_v13 = vrot.slane %v5073_v61, 4  ;;  %1458 = vst.msk [vmem:[#allocation3 + $0x84] sm:$0xf] %vm230_vm3, %v1422_v63 }
 0x126   : > { %v5037_v34 = vpop.permute.xlu2 %2388  ;;  %3984 = vmatpush.bf16.msrb.mxu3 %v4775_v30  ;;  %1435 = vst.msk [vmem:[#allocation3 + $0x28] sm:$0xf] %vm230_vm3, %v1399_v20  ;;  %v511_v38 = vor.u32 %v509_v53, %v4966_v55 }
 0x127   : > { %v1961_v21 = vpop.permute.xlu1 %1960  ;;  %v772_v23 = vld [vmem:[#allocation2 + $0x74] sm:$0x1] }
 0x128   : > { %2064 = vst.msk [vmem:[#allocation3 + $0x14] sm:$0xf] %vm2058_vm5, %v1961_v21  ;;  %v1421_v21 = vld [vmem:[#allocation2 + $0xc0] sm:$0xf]  ;;  %v773_v55 = vsel %vm4183_vm15, %v538_v13, %v772_v23  ;;  %v534_v13 = vshll.u32 %v5057_v52, 16 }
 0x129   : > { %2446 = vst.msk [vmem:[#allocation3 + $0x14] sm:$0xf] %vm2440_vm11, %v2343_v29  ;;  %v1402_v23 = vld [vmem:[#allocation2 + $0x4c] sm:$0xf] }
 0x12a   : > { %1457 = vst.msk [vmem:[#allocation3 + $0x80] sm:$0xf] %vm230_vm3, %v1421_v21 }
 0x12b   : > { %1184 = vrot.lane.b32.xlu0 %v1024_v31, %s4007_s21  ;;  %v2133_v31 = vld [vmem:[#allocation2 + $0x98] sm:$0x1]  ;;  %774 = vst [vmem:[#allocation2 + $0x74] sm:$0x1] %v773_v55 }
 0x12c   : > { %v2295_v27 = vrot.slane %v2133_v31, 5  ;;  %1438 = vst.msk [vmem:[#allocation3 + $0x34] sm:$0xf] %vm230_vm3, %v1402_v23 }
 0x12d   : > { %v1959_v10 = vpop.permute.xlu0 %1958  ;;  %2362 = vrot.lane.b32.xlu1 %v2261_v4, %s4009_s25  ;;  %v1420_v4 = vld [vmem:[#allocation2 + $0xb8] sm:$0xf] }
 0x12e   : > { %2063 = vst.msk [vmem:[#allocation3 + $0x10] sm:$0xf] %vm2058_vm5, %v1959_v10  ;;  %v1173_v5 = vpop.permute.xlu2 %1172  ;;  %v2296_v25 = vsel %vm4144_vm12, %v2294_v50, %v2295_v27 }
 0x12f   : > { %2445 = vst.msk [vmem:[#allocation3 + $0x10] sm:$0xf] %vm2440_vm11, %v4858_v32  ;;  %v1957_v30 = vpop.permute.xlu1 %1956  ;;  %v267_v32 = vsel %vm4114_vm7, 0, %v266_v59 }
 0x130   : > { %1329 = vst.msk [vmem:[#allocation2 + $0x64] sm:$0xf] %vm1272_vm0, %v1173_v5 }
 0x131   : > { %2062 = vst.msk [vmem:[#allocation3 + $0xc] sm:$0xf] %vm2058_vm5, %v1957_v30  ;;  %v273_v30 = vsel %vm4114_vm7, 0, %v272_v15 }
 0x132   : > { %2444 = vst.msk [vmem:[#allocation3 + $0xc] sm:$0xf] %vm2440_vm11, %v4893_v9  ;;  %v1041_v9 = vsel %vm4064_vm2, %v1033_v44, %v1040_v37  ;;  %v1337_v59 = vld [vmem:[#allocation2 + $0x74] sm:$0x1] }
 0x133   : > { %1980 = vrot.lane.b32.xlu0 %v1709_v57, %s4010_s26  ;;  %268 = vst [vmem:[#allocation2 + $0x60] sm:$0x1] %v267_v32  ;;  %1190 = vrot.lane.b32.xlu2 %v1041_v9, %s4007_s21 }
 0x134   : > { %1456 = vst.msk [vmem:[#allocation3 + $0x7c] sm:$0xf] %vm230_vm3, %v1420_v4 }
 0x135   : > { %v1955_v24 = vpop.permute.xlu0 %1954  ;;  %1188 = vrot.lane.b32.xlu1 %v1032_v12, %s4007_s21  ;;  %274 = vst [vmem:[#allocation2 + $0x78] sm:$0x1] %v273_v30  ;;  %v543_v12 = vshll.u32 %v370_v28, 16 }
 0x136   : > { %2061 = vst.msk [vmem:[#allocation3 + $0x8] sm:$0xf] %vm2058_vm5, %v1955_v24  ;;  %v1973_v40 = vpop.permute.xlu2 %1972  ;;  %v3965_v29 = vld [vmem:[#allocation3 + $0x10] sm:$0xff] }
 0x137   : > { %2443 = vst.msk [vmem:[#allocation3 + $0x8] sm:$0xf] %vm2440_vm11, %v4934_v6  ;;  %v1965_v56 = vpop.permute.xlu1 %1964  ;;  %3909 = vmatmul.msk.bf16.vlgmr.msra.gmra.mxu2 %vm2640_vm14, %v3965_v29  ;;  %v2258_v6 = vsel %vm4144_vm12, %v3662_v39, %v2257_v54  ;;  %v545_v44 = vor.u32 %v543_v12, %v5131_v60  ;;  %v3950_v57 = vld [vmem:[#allocation3 + $0x10] sm:$0xff]  ;;  %v1403_v39 = vld [vmem:[#allocation2 + $0x54] sm:$0xf] }
 0x138   : > { %2070 = vst.msk [vmem:[#allocation3 + $0x2c] sm:$0xf] %vm2058_vm5, %v1973_v40  ;;  %v3935_v53 = vld [vmem:[#allocation3 + $0x10] sm:$0xff]  ;;  %v5147_v40 = vld [vmem:[%s4157_s24 + $0x40] sm:$0xf] }
 0x139   : > { %2066 = vst.msk [vmem:[#allocation3 + $0x1c] sm:$0xf] %vm2058_vm5, %v1965_v56  ;;  %v523_v56 = vshrl.u32 %v5147_v40, 16  ;;  %v526_v15 = vshll.u32 %v5147_v40, 16  ;;  %v1413_v40 = vld [vmem:[#allocation2 + $0x90] sm:$0xf] }
 0x13a   : > { %2448 = vst.msk [vmem:[#allocation3 + $0x1c] sm:$0xf] %vm2440_vm11, %v4916_v17  ;;  %v761_v36 = vld [vmem:[#allocation2 + $0x60] sm:$0xf] }
 0x13b   : > { %2360 = vrot.lane.b32.xlu0 %v2258_v6, %s4009_s25  ;;  %v762_v45 = vsel %vm4199_vm4, %v511_v38, %v761_v36  ;;  %v5155_v38 = vld [vmem:[#allocation2 + $0x64] sm:$0xf]  ;;  %v525_v21 = vrot.slane %v523_v56, 7  ;;  %v536_v6 = vor.u32 %v534_v13, %v5073_v61  ;;  %1439 = vst.msk [vmem:[#allocation3 + $0x38] sm:$0xf] %vm230_vm3, %v1403_v39 }
 0x13c   : > { %763 = vst [vmem:[#allocation2 + $0x60] sm:$0xf] %v762_v45  ;;  %v775_v9 = vld [vmem:[#allocation2 + $0x78] sm:$0xf]  ;;  %v2264_v36 = vrot.slane %v5155_v38, 5 }
 0x13d   : > { %v1963_v17 = vpop.permute.xlu0 %1962  ;;  %v776_v29 = vsel %vm4199_vm4, %v545_v44, %v775_v9  ;;  %v529_v55 = vrot.slane %v525_v21, 4  ;;  %1449 = vst.msk [vmem:[#allocation3 + $0x60] sm:$0xf] %vm230_vm3, %v1413_v40 }
 0x13e   : > { %2065 = vst.msk [vmem:[#allocation3 + $0x18] sm:$0xf] %vm2058_vm5, %v1963_v17  ;;  %v5103_v3 = vpop.permute.xlu2 %2352  ;;  %v3949_v54 = vld [vmem:[#allocation3 + $0x8] sm:$0xff]  ;;  %v1414_v17 = vld [vmem:[#allocation2 + $0x94] sm:$0xf] }
 0x13f   : > { %v3934_v11 = vld [vmem:[#allocation3 + $0x8] sm:$0xff]  ;;  %2447 = vst.msk [vmem:[#allocation3 + $0x18] sm:$0xf] %vm2440_vm11, %v4976_v47  ;;  %v2007_v0 = vpop.permute.xlu1 %2006  ;;  %3741 = vmatmul.msk.bf16.vlgmr.msra.gmra.mxu0 %vm2640_vm14, %v3949_v54  ;;  %v322_v47 = vld [vmem:[#allocation2 + $0x68] sm:$0x1]  ;;  %v537_v61 = vsel %vm4064_vm2, %v529_v55, %v536_v6 }
 0x140   : > { %2087 = vst.msk [vmem:[#allocation3 + $0x70] sm:$0xf] %vm2058_vm5, %v2007_v0  ;;  %3826 = vmatmul.msk.bf16.gmra.mxu1 %vm2640_vm14, %v3934_v11  ;;  %v323_v33 = vsel %vm4107_vm6, 0, %v322_v47  ;;  %v1401_v54 = vld [vmem:[#allocation2 + $0x48] sm:$0xf] }
 0x141   : > { %2469 = vst.msk [vmem:[#allocation3 + $0x70] sm:$0xf] %vm2440_vm11, %v5037_v34 }
 0x142   : > { %324 = vst [vmem:[#allocation2 + $0x68] sm:$0x1] %v323_v33  ;;  %v269_v33 = vld [vmem:[#allocation2 + $0x6c] sm:$0x1] }
 0x143   : > { %2382 = vrot.lane.b32.xlu0 %v2296_v25, %s4009_s25  ;;  %v1326_v32 = vld [vmem:[#allocation2 + $0x60] sm:$0xf]  ;;  %777 = vst [vmem:[#allocation2 + $0x78] sm:$0xf] %v776_v29 }
 0x144   : > { %771 = vst.msk [vmem:[#allocation2 + $0x70] sm:$0xf] %vm707_vm1, %v537_v61  ;;  %v328_v61 = vld [vmem:[#allocation2 + $0x80] sm:$0x1] }
 0x145   : > { %v2005_v46 = vpop.permute.xlu0 %2004  ;;  %1450 = vst.msk [vmem:[#allocation3 + $0x64] sm:$0xf] %vm230_vm3, %v1414_v17  ;;  %v329_v38 = vsel %vm4107_vm6, 0, %v328_v61 }
 0x146   : > { %2086 = vst.msk [vmem:[#allocation3 + $0x6c] sm:$0xf] %vm2058_vm5, %v2005_v46  ;;  %v5122_v34 = vpop.permute.xlu2 %2394  ;;  %v3966_v10 = vld [vmem:[#allocation3 + $0x18] sm:$0xff] }
 0x147   : > { %2468 = vst.msk [vmem:[#allocation3 + $0x6c] sm:$0xf] %vm2440_vm11, %v5008_v41  ;;  %v2351_v5 = vpop.permute.xlu1 %2350  ;;  %3910 = vmatmul.msk.bf16.gmra.mxu2 %vm2640_vm14, %v3966_v10  ;;  %v3951_v30 = vld [vmem:[#allocation3 + $0x18] sm:$0xff] }
 0x148   : > { %1437 = vst.msk [vmem:[#allocation3 + $0x30] sm:$0xf] %vm230_vm3, %v1401_v54 }
 0x149   : > { %v765_v14 = vld [vmem:[#allocation2 + $0x68] sm:$0x1]  ;;  %330 = vst [vmem:[#allocation2 + $0x80] sm:$0x1] %v329_v38 }
 0x14a   : > { %v766_v20 = vsel %vm4183_vm15, %v521_v62, %v765_v14  ;;  %v3936_v62 = vld [vmem:[#allocation3 + $0x18] sm:$0xff]  ;;  %v1404_v14 = vld [vmem:[#allocation2 + $0x58] sm:$0xf] }
 0x14b   : > { %1192 = vrot.lane.b32.xlu0 %v1042_v2, %s4007_s21  ;;  %767 = vst [vmem:[#allocation2 + $0x68] sm:$0x1] %v766_v20  ;;  %s228_s21 = scalar_lea.vmem %s5646_s4, %s3654_s17 }
 0x14c   : > { %1440 = vst.msk [vmem:[#allocation3 + $0x3c] sm:$0xf] %vm230_vm3, %v1404_v14 }
 0x14d   : > { %v1969_v41 = vpop.permute.xlu0 %1968 }
 0x14e   : > { %2068 = vst.msk [vmem:[#allocation3 + $0x24] sm:$0xf] %vm2058_vm5, %v1969_v41  ;;  %v1181_v51 = vpop.permute.xlu2 %1180  ;;  %v3961_v26 = vld [vmem:[#allocation3 + $0x68] sm:$0xff] }
 0x14f   : > { %2450 = vst.msk [vmem:[#allocation3 + $0x24] sm:$0xf] %vm2440_vm11, %v2351_v5  ;;  %v1338_v37 = vsel %vm4276_vm9, %v1181_v51, %v1337_v59  ;;  %v1171_v58 = vpop.permute.xlu1 %1170  ;;  %3742 = vmatmul.msk.bf16.gmra.mxu0 %vm2640_vm14, %v3950_v57  ;;  %3753 = vmatmul.msk.bf16.vlgmr.msra.gmra.mxu3 %vm2640_vm14, %v3961_v26  ;;  %v1340_v51 = vld [vmem:[#allocation2 + $0x78] sm:$0xf] }
 0x150   : > { %1339 = vst [vmem:[#allocation2 + $0x74] sm:$0x1] %v1338_v37  ;;  %v1327_v24 = vsel %vm4319_vm10, %v1171_v58, %v1326_v32  ;;  %3827 = vmatmul.msk.bf16.gmra.mxu1 %vm2640_vm14, %v3935_v53  ;;  %3985 = vmatpush.bf16.msra.mxu3 %v4983_v18  ;;  %v5162_v18 = vld [vmem:[#allocation2 + $0x64] sm:$0xf]  ;;  %v528_v32 = vor.u32 %v526_v15, %v525_v21  ;;  %v2266_v21 = vrot.slane %v2264_v36, 4  ;;  %v546_v15 = vrot.slane %v5131_v60, 4 }
 0x151   : > { %1328 = vst [vmem:[#allocation2 + $0x60] sm:$0xf] %v1327_v24  ;;  %v1720_v0 = vshll.u32 %v5162_v18, 16  ;;  %v1724_v26 = vshrl.u32 %v5162_v18, 16 }
 0x152   : > { %v1330_v44 = vld [vmem:[#allocation2 + $0x68] sm:$0x1] }
 0x153   : > { %v1722_v5 = vrot.slane %v1720_v0, 5  ;;  %v1726_v29 = vrot.slane %v1724_v26, 4 }
 0x154   : > { %3986 = vmatpush.bf16.msra.mxu3 %v4991_v43 }
 0x155   : > { %v2349_v31 = vpop.permute.xlu0 %2348  ;;  %v1727_v6 = vor.u32 %v1726_v29, %v1722_v5 }
 0x156   : > { %2449 = vst.msk [vmem:[#allocation3 + $0x20] sm:$0xf] %vm2440_vm11, %v2349_v31  ;;  %v2015_v52 = vpop.permute.xlu2 %2014 }
 0x157   : > { %2091 = vst.msk [vmem:[#allocation3 + $0x80] sm:$0xf] %vm2058_vm5, %v2015_v52  ;;  %v1971_v45 = vpop.permute.xlu1 %1970  ;;  %v1728_v54 = vrot.slane %v1727_v6, 4  ;;  %v372_v6 = vld [vmem:[%s4157_s24 + $0x50] sm:$0xf] }
 0x158   : > { %2069 = vst.msk [vmem:[#allocation3 + $0x28] sm:$0xf] %vm2058_vm5, %v1971_v45  ;;  %v1485_v11 = vld [vmem:[#allocation2 + $0x60] sm:$0xf]  ;;  %v560_v61 = vshll.u32 %v372_v6, 16 }
 0x159   : > { %v2119_v50 = vld [vmem:[#allocation2 + $0x60] sm:$0xe]  ;;  %2451 = vst.msk [vmem:[#allocation3 + $0x28] sm:$0xf] %vm2440_vm11, %v5103_v3  ;;  %v1711_v43 = vshrl.u32 %v1485_v11, 16  ;;  %v1714_v27 = vshll.u32 %v1485_v11, 16 }
 0x15a   : > { %v3663_v4 = vrot.slane %v2119_v50, 9  ;;  %v270_v3 = vsel %vm4114_vm7, 0, %v269_v33 }
 0x15b   : > { %v1713_v48 = vrot.slane %v1711_v43, 4  ;;  %v1716_v25 = vrot.slane %v1714_v27, 5  ;;  %271 = vst [vmem:[#allocation2 + $0x6c] sm:$0x1] %v270_v3 }
 0x15c   : > { %v2265_v47 = vsel %vm4144_vm12, %v3663_v4, %v2264_v36  ;;  %v371_v36 = vld [vmem:[%s4157_s24 + $0x4c] sm:$0xf] }
 0x15d   : > { %2364 = vrot.lane.b32.xlu0 %v2265_v47, %s4009_s25  ;;  %v2391_v46 = vpop.permute.xlu0 %2390  ;;  %v3967_v10 = vld [vmem:[#allocation3 + $0x20] sm:$0xff]  ;;  %v1717_v2 = vor.u32 %v1716_v25, %v1713_v48  ;;  %v548_v50 = vshrl.u32 %v371_v36, 16  ;;  %v1490_v25 = vld [vmem:[#allocation2 + $0x74] sm:$0x1] }
 0x15e   : > { %2470 = vst.msk [vmem:[#allocation3 + $0x74] sm:$0xf] %vm2440_vm11, %v2391_v46  ;;  %v5184_v28 = vpop.permute.xlu2 %2358  ;;  %3911 = vmatmul.msk.bf16.gmra.mxu2 %vm2640_vm14, %v3967_v10  ;;  %v3952_v56 = vld [vmem:[#allocation3 + $0x20] sm:$0xff] }
 0x15f   : > { %v2013_v12 = vpop.permute.xlu1 %2012  ;;  %v1718_v59 = vrot.slane %v1717_v2, 4  ;;  %3743 = vmatmul.msk.bf16.gmra.mxu0 %vm2640_vm14, %v3951_v30  ;;  %v3937_v13 = vld [vmem:[#allocation3 + $0x20] sm:$0xff]  ;;  %v550_v27 = vrot.slane %v548_v50, 7  ;;  %v1754_v2 = vshll.u32 %v1490_v25, 16  ;;  %v551_v30 = vshll.u32 %v371_v36, 16 }
 0x160   : > { %2090 = vst.msk [vmem:[#allocation3 + $0x7c] sm:$0xf] %vm2058_vm5, %v2013_v12  ;;  %3828 = vmatmul.msk.bf16.gmra.mxu1 %vm2640_vm14, %v3936_v62  ;;  %v373_v36 = vld [vmem:[%s4157_s24 + $0x54] sm:$0xf] }
 0x161   : > { %2472 = vst.msk [vmem:[#allocation3 + $0x7c] sm:$0xf] %vm2440_vm11, %v5122_v34  ;;  %v1723_v41 = vsel %vm4149_vm13, %v1718_v59, %v1722_v5  ;;  %v555_v33 = vrot.slane %v550_v27, 4  ;;  %v779_v5 = vld [vmem:[#allocation2 + $0x80] sm:$0x1]  ;;  %v553_v14 = vor.u32 %v551_v30, %v550_v27  ;;  %v568_v27 = vshll.u32 %v373_v36, 16 }
 0x162   : > { %1982 = vrot.lane.b32.xlu1 %v1723_v41, %s4010_s26  ;;  %v768_v57 = vld [vmem:[#allocation2 + $0x6c] sm:$0xf] }
 0x163   : > { %v769_v34 = vsel %vm4199_vm4, %v528_v32, %v768_v57  ;;  %v780_v59 = vsel %vm4183_vm15, %v555_v33, %v779_v5  ;;  %v554_v26 = vsel %vm4064_vm2, %v546_v15, %v553_v14 }
 0x164   : > { %770 = vst [vmem:[#allocation2 + $0x6c] sm:$0xf] %v769_v34 }
 0x165   : > { %v1175_v37 = vpop.permute.xlu0 %1174  ;;  %v3962_v58 = vld [vmem:[#allocation3 + $0x70] sm:$0xff]  ;;  %781 = vst [vmem:[#allocation2 + $0x80] sm:$0x1] %v780_v59 }
 0x166   : > { %v1331_v53 = vsel %vm4276_vm9, %v1175_v37, %v1330_v44  ;;  %v1183_v20 = vpop.permute.xlu2 %1182  ;;  %3754 = vmatmul.msk.bf16.gmra.mxu3 %vm2640_vm14, %v3962_v58  ;;  %v1756_v44 = vrot.slane %v1754_v2, 5  ;;  %778 = vst.msk [vmem:[#allocation2 + $0x7c] sm:$0xf] %vm707_vm1, %v554_v26  ;;  %v2124_v2 = vld [vmem:[#allocation2 + $0x74] sm:$0x1] }
 0x167   : > { %1332 = vst [vmem:[#allocation2 + $0x68] sm:$0x1] %v1331_v53  ;;  %v1341_v24 = vsel %vm4319_vm10, %v1183_v20, %v1340_v51  ;;  %v2393_v9 = vpop.permute.xlu1 %2392 }
 0x168   : > { %1342 = vst [vmem:[#allocation2 + $0x78] sm:$0xf] %v1341_v24 }
 0x16b   : > { %v1333_v63 = vld [vmem:[#allocation2 + $0x6c] sm:$0xf] }
 0x16c   : > { %v1344_v50 = vld [vmem:[#allocation2 + $0x80] sm:$0x1] }
 0x16d   : > { %v2011_v39 = vpop.permute.xlu0 %2010 }
 0x16e   : > { %2089 = vst.msk [vmem:[#allocation3 + $0x78] sm:$0xf] %vm2058_vm5, %v2011_v39  ;;  %v1979_v23 = vpop.permute.xlu2 %1978  ;;  %v2121_v31 = vld [vmem:[#allocation2 + $0x68] sm:$0x1] }
 0x16f   : > { %v1487_v55 = vld [vmem:[#allocation2 + $0x68] sm:$0x1]  ;;  %2471 = vst.msk [vmem:[#allocation3 + $0x78] sm:$0xf] %vm2440_vm11, %v2393_v9  ;;  %v1179_v52 = vpop.permute.xlu1 %1178  ;;  %v2267_v18 = vrot.slane %v2121_v31, 5  ;;  %3744 = vmatmul.msk.bf16.gmra.mxu0 %vm2640_vm14, %v3952_v56 }
 0x170   : > { %v1730_v45 = vshll.u32 %v1487_v55, 16  ;;  %2073 = vst.msk [vmem:[#allocation3 + $0x38] sm:$0xf] %vm2058_vm5, %v1979_v23  ;;  %3829 = vmatmul.msk.bf16.gmra.mxu1 %vm2640_vm14, %v3937_v13  ;;  %v1491_v49 = vld [vmem:[#allocation2 + $0x78] sm:$0xf] }
 0x171   : > { %1336 = vst.msk [vmem:[#allocation2 + $0x70] sm:$0xf] %vm1272_vm0, %v1179_v52  ;;  %v2268_v17 = vsel %vm4144_vm12, %v2266_v21, %v2267_v18  ;;  %v275_v21 = vld [vmem:[#allocation2 + $0x84] sm:$0x1]  ;;  %v1759_v22 = vshrl.u32 %v1491_v49, 16 }
 0x172   : > { %v1732_v11 = vrot.slane %v1730_v45, 5  ;;  %2366 = vrot.lane.b32.xlu1 %v2268_v17, %s4009_s25  ;;  %v276_v52 = vsel %vm4114_vm7, 0, %v275_v21  ;;  %v557_v45 = vshrl.u32 %v372_v6, 16 }
 0x173   : > { %277 = vst [vmem:[#allocation2 + $0x84] sm:$0x1] %v276_v52 }
 0x174   : > { %v1733_v43 = vsel %vm4149_vm13, %v1728_v54, %v1732_v11  ;;  %v559_v17 = vrot.slane %v557_v45, 7  ;;  %v565_v54 = vshrl.u32 %v373_v36, 16 }
 0x175   : > { %1984 = vrot.lane.b32.xlu2 %v1733_v43, %s4010_s26  ;;  %v2355_v0 = vpop.permute.xlu0 %2354 }
 0x176   : > { %2452 = vst.msk [vmem:[#allocation3 + $0x2c] sm:$0xf] %vm2440_vm11, %v2355_v0  ;;  %v2001_v4 = vpop.permute.xlu2 %2000  ;;  %v3963_v48 = vld [vmem:[#allocation3 + $0x78] sm:$0xff]  ;;  %v562_v25 = vor.u32 %v560_v61, %v559_v17 }
 0x177   : > { %2084 = vst.msk [vmem:[#allocation3 + $0x64] sm:$0xf] %vm2058_vm5, %v2001_v4  ;;  %v1977_v47 = vpop.permute.xlu1 %1976  ;;  %3755 = vmatmul.msk.bf16.gmra.mxu3 %vm2640_vm14, %v3963_v48 }
 0x178   : > { %2072 = vst.msk [vmem:[#allocation3 + $0x34] sm:$0xf] %vm2058_vm5, %v1977_v47  ;;  %v1489_v3 = vld [vmem:[#allocation2 + $0x70] sm:$0xf] }
 0x179   : > { %2454 = vst.msk [vmem:[#allocation3 + $0x34] sm:$0xf] %vm2440_vm11, %v5184_v28  ;;  %v1744_v46 = vshll.u32 %v1489_v3, 16  ;;  %v1748_v10 = vshrl.u32 %v1489_v3, 16  ;;  %v2123_v53 = vld [vmem:[#allocation2 + $0x70] sm:$0xf] }
 0x17a   : > { %v2271_v39 = vrot.slane %v2123_v53, 5  ;;  %v563_v3 = vrot.slane %v559_v17, 4  ;;  %v782_v5 = vld [vmem:[#allocation2 + $0x84] sm:$0xf]  ;;  %v2125_v53 = vld [vmem:[#allocation2 + $0x78] sm:$0xe] }
 0x17b   : > { %v5230_v12 = vrot.slane %v1744_v46, 5  ;;  %v1750_v62 = vrot.slane %v1748_v10, 4  ;;  %v567_v46 = vrot.slane %v565_v54, 7  ;;  %v783_v30 = vsel %vm4199_vm4, %v562_v25, %v782_v5 }
 0x17c   : > { %784 = vst [vmem:[#allocation2 + $0x84] sm:$0xf] %v783_v30  ;;  %v3665_v21 = vrot.slane %v2125_v53, 9 }
 0x17d   : > { %v1177_v41 = vpop.permute.xlu0 %1176  ;;  %v3968_v32 = vld [vmem:[#allocation3 + $0x28] sm:$0xff]  ;;  %v1751_v28 = vor.u32 %v1750_v62, %v5230_v12  ;;  %v570_v15 = vor.u32 %v568_v27, %v567_v46  ;;  %v2274_v62 = vrot.slane %v2124_v2, 5 }
 0x17e   : > { %v3953_v51 = vld [vmem:[#allocation3 + $0x28] sm:$0xff]  ;;  %v1334_v60 = vsel %vm4319_vm10, %v1177_v41, %v1333_v63  ;;  %3912 = vmatmul.msk.bf16.gmra.mxu2 %vm2640_vm14, %v3968_v32  ;;  %v2381_v18 = vpop.permute.xlu2 %2380 }
 0x17f   : > { %v3938_v57 = vld [vmem:[#allocation3 + $0x28] sm:$0xff]  ;;  %1335 = vst [vmem:[#allocation2 + $0x6c] sm:$0xf] %v1334_v60  ;;  %v2357_v37 = vpop.permute.xlu1 %2356  ;;  %v1752_v58 = vrot.slane %v1751_v28, 4  ;;  %3745 = vmatmul.msk.bf16.gmra.mxu0 %vm2640_vm14, %v3953_v51  ;;  %v571_v59 = vsel %vm4064_vm2, %v563_v3, %v570_v15  ;;  %v1762_v28 = vshll.u32 %v1491_v49, 16  ;;  %vm3305_vm2 = vcmask 31744  }
 0x180   : > { %3830 = vmatmul.msk.bf16.gmra.mxu1 %vm2640_vm14, %v3938_v57  ;;  %785 = vst.msk [vmem:[#allocation2 + $0x88] sm:$0xf] %vm707_vm1, %v571_v59  ;;  %v1406_v27 = vld [vmem:[#allocation2 + $0x64] sm:$0xf]  ;;  %v1405_v2 = vld [vmem:[#allocation2 + $0x60] sm:$0xf] }
 0x181   : > { %v1757_v34 = vsel %vm4149_vm13, %v1752_v58, %v1756_v44  ;;  %v331_v44 = vld [vmem:[#allocation2 + $0x8c] sm:$0x1]  ;;  %v1764_v58 = vrot.slane %v1762_v28, 5  ;;  %1442 = vst.msk [vmem:[#allocation3 + $0x44] sm:$0xf] %vm230_vm3, %v1406_v27 }
 0x182   : > { %1988 = vrot.lane.b32.xlu0 %v1757_v34, %s4010_s26  ;;  %v332_v51 = vsel %vm4107_vm6, 0, %v331_v44  ;;  %v572_v34 = vrot.slane %v567_v46, 4  ;;  %1441 = vst.msk [vmem:[#allocation3 + $0x40] sm:$0xf] %vm230_vm3, %v1405_v2  ;;  %v1513_v28 = vld [vmem:[#allocation2 + $0xd0] sm:$0xf] }
 0x183   : > { %333 = vst [vmem:[#allocation2 + $0x8c] sm:$0x1] %v332_v51 }
 0x185   : > { %v1975_v20 = vpop.permute.xlu0 %1974 }
 0x186   : > { %2071 = vst.msk [vmem:[#allocation3 + $0x30] sm:$0xf] %vm2058_vm5, %v1975_v20  ;;  %v2122_v24 = vld [vmem:[#allocation2 + $0x6c] sm:$0xe] }
 0x187   : > { %v1488_v9 = vld [vmem:[#allocation2 + $0x6c] sm:$0xf]  ;;  %2453 = vst.msk [vmem:[#allocation3 + $0x30] sm:$0xf] %vm2440_vm11, %v2357_v37  ;;  %v2399_v40 = vpop.permute.xlu1 %2398  ;;  %v3664_v29 = vrot.slane %v2122_v24, 9  ;;  %v1761_v37 = vrot.slane %v1759_v22, 4 }
 0x188   : > { %v1735_v56 = vshrl.u32 %v1488_v9, 16  ;;  %v1738_v13 = vshll.u32 %v1488_v9, 16  ;;  %v349_v22 = vld [vmem:[#allocation2 + $0xd4] sm:$0x1] }
 0x189   : > { %v2272_v23 = vsel %vm4144_vm12, %v3664_v29, %v2271_v39  ;;  %v1765_v20 = vor.u32 %v1764_v58, %v1761_v37  ;;  %v1347_v29 = vld [vmem:[#allocation2 + $0x84] sm:$0xf]  ;;  %v350_v51 = vsel %vm4107_vm6, 0, %v349_v22  ;;  %v2931_v37 = vpop.f32.mrf.mxu1 }
 0x18a   : > { %v1737_v31 = vrot.slane %v1735_v56, 4  ;;  %v1740_v55 = vrot.slane %v1738_v13, 5  ;;  %2368 = vrot.lane.b32.xlu1 %v2272_v23, %s4009_s25  ;;  %v786_v9 = vld [vmem:[#allocation2 + $0x8c] sm:$0x1]  ;;  %351 = vst [vmem:[#allocation2 + $0xd4] sm:$0x1] %v350_v51 }
 0x18b   : > { %v787_v13 = vsel %vm4183_vm15, %v572_v34, %v786_v9  ;;  %v1766_v52 = vrot.slane %v1765_v20, 4 }
 0x18c   : > { %v1741_v38 = vor.u32 %v1740_v55, %v1737_v31  ;;  %788 = vst [vmem:[#allocation2 + $0x8c] sm:$0x1] %v787_v13 }
 0x18d   : > { %v2017_v11 = vpop.permute.xlu0 %2016  ;;  %v1191_v63 = vpop.permute.xlu2 %1190 }
 0x18e   : > { %v1742_v43 = vrot.slane %v1741_v38, 4  ;;  %2092 = vst.msk [vmem:[#allocation3 + $0x84] sm:$0xf] %vm2058_vm5, %v2017_v11  ;;  %v3954_v0 = vld [vmem:[#allocation3 + $0x30] sm:$0xff] }
 0x18f   : > { %v3939_v4 = vld [vmem:[#allocation3 + $0x30] sm:$0xff]  ;;  %2474 = vst.msk [vmem:[#allocation3 + $0x84] sm:$0xf] %vm2440_vm11, %v2399_v40  ;;  %v1187_v47 = vpop.permute.xlu1 %1186  ;;  %3746 = vmatmul.msk.bf16.gmra.mxu0 %vm2640_vm14, %v3954_v0 }
 0x190   : > { %v3969_v48 = vld [vmem:[#allocation3 + $0x30] sm:$0xff]  ;;  %v1747_v33 = vsel %vm4149_vm13, %v1742_v43, %v5230_v12  ;;  %v1345_v10 = vsel %vm4276_vm9, %v1187_v47, %v1344_v50  ;;  %3831 = vmatmul.msk.bf16.gmra.mxu1 %vm2640_vm14, %v3939_v4  ;;  %v2273_v12 = vrot.slane %v2271_v39, 4  ;;  %1350 = vst.msk [vmem:[#allocation2 + $0x88] sm:$0xf] %vm1272_vm0, %v1191_v63 }
 0x191   : > { %1986 = vrot.lane.b32.xlu2 %v1747_v33, %s4010_s26  ;;  %1346 = vst [vmem:[#allocation2 + $0x80] sm:$0x1] %v1345_v10  ;;  %3913 = vmatmul.msk.bf16.gmra.mxu2 %vm2640_vm14, %v3969_v48 }
 0x192   : > { %v2275_v32 = vsel %vm4144_vm12, %v2273_v12, %v2274_v62 }
 0x195   : > { %v2397_v14 = vpop.permute.xlu0 %2396 }
 0x196   : > { %2473 = vst.msk [vmem:[#allocation3 + $0x80] sm:$0xf] %vm2440_vm11, %v2397_v14 }
 0x197   : > { %v1999_v41 = vpop.permute.xlu1 %1998  ;;  %v1495_v43 = vld [vmem:[#allocation2 + $0x88] sm:$0xf] }
 0x198   : > { %2083 = vst.msk [vmem:[#allocation3 + $0x60] sm:$0xf] %vm2058_vm5, %v1999_v41  ;;  %v1493_v24 = vld [vmem:[#allocation2 + $0x80] sm:$0x1]  ;;  %v1792_v47 = vshll.u32 %v1495_v43, 16  ;;  %v1796_v20 = vshrl.u32 %v1495_v43, 16 }
 0x199   : > { %2370 = vrot.lane.b32.xlu2 %v2275_v32, %s4009_s25  ;;  %2465 = vst.msk [vmem:[#allocation3 + $0x60] sm:$0xf] %vm2440_vm11, %v2381_v18  ;;  %v1778_v18 = vshll.u32 %v1493_v24, 16  ;;  %v2127_v42 = vld [vmem:[#allocation2 + $0x80] sm:$0x1] }
 0x19a   : > { %v2281_v48 = vrot.slane %v2127_v42, 5  ;;  %v5299_v33 = vld [vmem:[#allocation2 + $0x88] sm:$0xf]  ;;  %v1794_v49 = vrot.slane %v1792_v47, 5  ;;  %v1351_v24 = vld [vmem:[#allocation2 + $0x8c] sm:$0x1] }
 0x19b   : > { %v1780_v11 = vrot.slane %v1778_v18, 5  ;;  %v2285_v12 = vrot.slane %v5299_v33, 5  ;;  %v3672_v47 = vrot.slane %v2146_v19, 9 }
 0x19d   : > { %v1185_v57 = vpop.permute.xlu0 %1184  ;;  %v3964_v60 = vld [vmem:[#allocation3 + $0x80] sm:$0xff]  ;;  %v2287_v43 = vrot.slane %v2285_v12, 4 }
 0x19e   : > { %1343 = vst.msk [vmem:[#allocation2 + $0x7c] sm:$0xf] %vm1272_vm0, %v1185_v57  ;;  %3756 = vmatmul.msk.bf16.gmra.mxu3 %vm2640_vm14, %v3964_v60  ;;  %v1936_v57 = vshll.u32 %v1513_v28, 16  ;;  %v1940_v60 = vshrl.u32 %v1513_v28, 16 }
 0x19f   : > { %v2363_v26 = vpop.permute.xlu1 %2362 }
 0x1a0   : > { %v5316_v34 = vrot.slane %v1936_v57, 5  ;;  %v1942_v53 = vrot.slane %v1940_v60, 4  ;;  %v3946_v60 = vld [vmem:[#allocation3 + $0x68] sm:$0xff] }
 0x1a2   : > { %v1943_v9 = vor.u32 %v1942_v53, %v5316_v34 }
 0x1a5   : > { %v1981_v40 = vpop.permute.xlu0 %1980  ;;  %v2126_v39 = vld [vmem:[#allocation2 + $0x7c] sm:$0xf] }
 0x1a6   : > { %v1492_v56 = vld [vmem:[#allocation2 + $0x7c] sm:$0xf]  ;;  %2074 = vst.msk [vmem:[#allocation3 + $0x3c] sm:$0xf] %vm2058_vm5, %v1981_v40  ;;  %v2278_v6 = vrot.slane %v2126_v39, 5 }
 0x1a7   : > { %v1768_v23 = vshll.u32 %v1492_v56, 16  ;;  %v1772_v31 = vshrl.u32 %v1492_v56, 16  ;;  %2456 = vst.msk [vmem:[#allocation3 + $0x3c] sm:$0xf] %vm2440_vm11, %v2363_v26  ;;  %v1189_v55 = vpop.permute.xlu1 %1188 }
 0x1a8   : > { %v1348_v45 = vsel %vm4319_vm10, %v1189_v55, %v1347_v29  ;;  %v2279_v61 = vsel %vm4144_vm12, %v3665_v21, %v2278_v6  ;;  %v2280_v4 = vrot.slane %v2278_v6, 4  ;;  %v1798_v21 = vrot.slane %v1796_v20, 4  ;;  %v1514_v6 = vld [vmem:[#allocation2 + $0xd4] sm:$0x1] }
 0x1a9   : > { %v1770_v38 = vrot.slane %v1768_v23, 5  ;;  %v1774_v35 = vrot.slane %v1772_v31, 4  ;;  %1349 = vst [vmem:[#allocation2 + $0x84] sm:$0xf] %v1348_v45  ;;  %2372 = vrot.lane.b32.xlu2 %v2279_v61, %s4009_s25  ;;  %v293_v23 = vld [vmem:[#allocation2 + $0xcc] sm:$0x1]  ;;  %v2933_v61 = vpop.f32.mrf.mxu1 }
 0x1aa   : > { %v2282_v5 = vsel %vm4144_vm12, %v2280_v4, %v2281_v48  ;;  %v1944_v55 = vrot.slane %v1943_v9, 4  ;;  %v294_v18 = vsel %vm4114_vm7, 0, %v293_v23 }
 0x1ab   : > { %v1771_v36 = vsel %vm4149_vm13, %v1766_v52, %v1770_v38  ;;  %v1775_v17 = vor.u32 %v1774_v35, %v1770_v38  ;;  %v1946_v52 = vshll.u32 %v1514_v6, 16  ;;  %295 = vst [vmem:[#allocation2 + $0xcc] sm:$0x1] %v294_v18  ;;  %v1799_v35 = vor.u32 %v1798_v21, %v1794_v49 }
 0x1ac   : > { %1990 = vrot.lane.b32.xlu0 %v1771_v36, %s4010_s26 }
 0x1ad   : > { %v1776_v54 = vrot.slane %v1775_v17, 4  ;;  %v2361_v50 = vpop.permute.xlu0 %2360  ;;  %v1948_v45 = vrot.slane %v1946_v52, 5 }
 0x1ae   : > { %2455 = vst.msk [vmem:[#allocation3 + $0x38] sm:$0xf] %vm2440_vm11, %v2361_v50 }
 0x1af   : > { %v1781_v0 = vsel %vm4149_vm13, %v1776_v54, %v1780_v11  ;;  %v1949_v36 = vsel %vm4149_vm13, %v1944_v55, %v1948_v45  ;;  %v5337_v54 = vld [vmem:[#allocation2 + $0xd0] sm:$0xf] }
 0x1b0   : > { %1992 = vrot.lane.b32.xlu1 %v1781_v0, %s4010_s26  ;;  %v1494_v25 = vld [vmem:[#allocation2 + $0x84] sm:$0xf]  ;;  %v1800_v0 = vrot.slane %v1799_v35, 4  ;;  %v2327_v33 = vrot.slane %v5337_v54, 5 }
 0x1b1   : > { %v1783_v3 = vshrl.u32 %v1494_v25, 16  ;;  %v1786_v46 = vshll.u32 %v1494_v25, 16  ;;  %v2128_v10 = vld [vmem:[#allocation2 + $0x84] sm:$0xe] }
 0x1b2   : > { %v3666_v63 = vrot.slane %v2128_v10, 9  ;;  %v2328_v53 = vsel %vm4144_vm12, %v3672_v47, %v2327_v33  ;;  %v2329_v55 = vrot.slane %v2327_v33, 4 }
 0x1b3   : > { %v1785_v15 = vrot.slane %v1783_v3, 4  ;;  %v1788_v30 = vrot.slane %v1786_v46, 5  ;;  %v1512_v3 = vld [vmem:[#allocation2 + $0xcc] sm:$0xf] }
 0x1b4   : > { %2374 = vrot.lane.b32.xlu0 %v2282_v5, %s4009_s25  ;;  %v2286_v26 = vsel %vm4144_vm12, %v3666_v63, %v2285_v12  ;;  %v1927_v2 = vshrl.u32 %v1512_v3, 16  ;;  %v1930_v5 = vshll.u32 %v1512_v3, 16 }
 0x1b5   : > { %v2383_v62 = vpop.permute.xlu0 %2382  ;;  %v3955_v59 = vld [vmem:[#allocation3 + $0x38] sm:$0xff]  ;;  %v1789_v32 = vor.u32 %v1788_v30, %v1785_v15 }
 0x1b6   : > { %v3940_v14 = vld [vmem:[#allocation3 + $0x38] sm:$0xff]  ;;  %2466 = vst.msk [vmem:[#allocation3 + $0x64] sm:$0xf] %vm2440_vm11, %v2383_v62  ;;  %3747 = vmatmul.msk.bf16.gmra.mxu0 %vm2640_vm14, %v3955_v59  ;;  %v1407_v62 = vld [vmem:[#allocation2 + $0x6c] sm:$0xf] }
 0x1b7   : > { %v3970_v41 = vld [vmem:[#allocation3 + $0x38] sm:$0xff]  ;;  %3832 = vmatmul.msk.bf16.gmra.mxu1 %vm2640_vm14, %v3940_v14  ;;  %v1790_v44 = vrot.slane %v1789_v32, 4  ;;  %v1929_v32 = vrot.slane %v1927_v2, 4  ;;  %1443 = vst.msk [vmem:[#allocation3 + $0x48] sm:$0xf] %vm230_vm3, %v1407_v62 }
 0x1b8   : > { %3914 = vmatmul.msk.bf16.gmra.mxu2 %vm2640_vm14, %v3970_v41 }
 0x1b9   : > { %v1795_v58 = vsel %vm4149_vm13, %v1790_v44, %v1794_v49  ;;  %v1932_v49 = vrot.slane %v1930_v5, 5 }
 0x1ba   : > { %1994 = vrot.lane.b32.xlu1 %v1795_v58, %s4010_s26  ;;  %v3193_v16 = vpop.f32.mrf.mxu2 }
 0x1bc   : > { %2376 = vrot.lane.b32.xlu0 %v2286_v26, %s4009_s25  ;;  %v2702_v29 = vpop.f32.mrf.mxu0  ;;  %v1933_v26 = vor.u32 %v1932_v49, %v1929_v32  ;;  %v1409_v49 = vld [vmem:[#allocation2 + $0x78] sm:$0xf] }
 0x1bd   : > { %v1193_v40 = vpop.permute.xlu0 %1192  ;;  %v3945_v39 = vld [vmem:[#allocation3 + $0x60] sm:$0xff]  ;;  %v2932_v13 = vadd.f32 %v2931_v37, %v2702_v29  ;;  %v2936_v59 = vpop.f32.mrf.mxu1  ;;  %1445 = vst.msk [vmem:[#allocation3 + $0x50] sm:$0xf] %vm230_vm3, %v1409_v49 }
 0x1be   : > { %v1352_v56 = vsel %vm4276_vm9, %v1193_v40, %v1351_v24  ;;  %3837 = vmatmul.msk.bf16.vlgmr.msrb.gmra.mxu3 %vm2640_vm14, %v3945_v39  ;;  %v1934_v20 = vrot.slane %v1933_v26, 4  ;;  %v1408_v24 = vld [vmem:[#allocation2 + $0x70] sm:$0xf] }
 0x1bf   : > { %1353 = vst [vmem:[#allocation2 + $0x8c] sm:$0x1] %v1352_v56  ;;  %v3273_v31 = vadd.f32 %v3193_v16, %v2932_v13  ;;  %v2148_v56 = vld [vmem:[#allocation2 + $0xd4] sm:$0x1] }
 0x1c0   : > { %v1939_v9 = vsel %vm4149_vm13, %v1934_v20, %v5316_v34  ;;  %1444 = vst.msk [vmem:[#allocation3 + $0x4c] sm:$0xf] %vm230_vm3, %v1408_v24  ;;  %v2330_v52 = vrot.slane %v2148_v56, 5  ;;  %v3977_v20 = vld [vmem:[#allocation3 + $0x70] sm:$0xff] }
 0x1c1   : > { %v3478_v1 = vpack.c.bf16 %v3273_v31, %v3273_v31  ;;  %v3376_v48 = vmul.f32 %v3273_v31, %v3273_v31  ;;  %v3306_v15 = vsel %vm3305_vm2, %v3273_v31, 0.0 }
 0x1c2   : > { %v3195_v38 = vpop.f32.mrf.mxu2 }
 0x1c3   : > { %3510 = vst.msk [vmem:[%s5330_s18] sm:$0xf] %vm707_vm1, %v3478_v1  ;;  %v3408_v22 = vsel %vm3305_vm2, %v3376_v48, 0.0 }
 0x1c4   : > { %v2704_v17 = vpop.f32.mrf.mxu0  ;;  %2020 = vrot.lane.b32.xlu0 %v1949_v36, %s4010_s26 }
 0x1c5   : > { %v2934_v11 = vadd.f32 %v2933_v61, %v2704_v17  ;;  %v2938_v8 = vpop.f32.mrf.mxu1  ;;  %v2331_v61 = vsel %vm4144_vm12, %v2329_v55, %v2330_v52 }
 0x1c6   : > { %v2130_v50 = vld [vmem:[#allocation2 + $0x8c] sm:$0x1] }
 0x1c7   : > { %v1496_v42 = vld [vmem:[#allocation2 + $0x8c] sm:$0x1]  ;;  %v2288_v27 = vrot.slane %v2130_v50, 5  ;;  %v3274_v25 = vadd.f32 %v3195_v38, %v2934_v11 }
 0x1c8   : > { %v1802_v4 = vshll.u32 %v1496_v42, 16  ;;  %v3947_v11 = vld [vmem:[#allocation3 + $0x70] sm:$0xff] }
 0x1c9   : > { %v2289_v46 = vsel %vm4144_vm12, %v2287_v43, %v2288_v27  ;;  %v3307_v30 = vsel %vm3305_vm2, %v3274_v25, 0.0  ;;  %v3377_v63 = vmul.f32 %v3274_v25, %v3274_v25  ;;  %v3479_v12 = vpack.c.bf16 %v3274_v25, %v3274_v25 }
 0x1ca   : > { %v1804_v10 = vrot.slane %v1802_v4, 5  ;;  %2378 = vrot.lane.b32.xlu1 %v2289_v46, %s4009_s25  ;;  %v3308_v14 = vadd.f32 %v3307_v30, %v3306_v15  ;;  %v3198_v51 = vpop.f32.mrf.mxu2 }
 0x1cb   : > { %v3409_v28 = vsel %vm3305_vm2, %v3377_v63, 0.0  ;;  %3511 = vst.msk [vmem:[%s5330_s18 + $0x4] sm:$0xf] %vm707_vm1, %v3479_v12 }
 0x1cc   : > { %v1805_v41 = vsel %vm4149_vm13, %v1800_v0, %v1804_v10  ;;  %v3410_v44 = vadd.f32 %v3409_v28, %v3408_v22  ;;  %v2707_v57 = vpop.f32.mrf.mxu0 }
 0x1cd   : > { %1996 = vrot.lane.b32.xlu2 %v1805_v41, %s4010_s26  ;;  %v2937_v58 = vadd.f32 %v2936_v59, %v2707_v57  ;;  %v2941_v42 = vpop.f32.mrf.mxu1  ;;  %v3948_v59 = vld [vmem:[#allocation3 + $0x78] sm:$0xff] }
 0x1ce   : > { %3838 = vmatmul.msk.bf16.gmra.mxu3 %vm2640_vm14, %v3946_v60  ;;  %v1410_v60 = vld [vmem:[#allocation2 + $0x7c] sm:$0xf] }
 0x1cf   : > { %v1985_v37 = vpop.permute.xlu2 %1984  ;;  %v3275_v16 = vadd.f32 %v3198_v51, %v2937_v58  ;;  %v2365_v21 = vpop.permute.xlu0 %2364  ;;  %1446 = vst.msk [vmem:[#allocation3 + $0x54] sm:$0xf] %vm230_vm3, %v1410_v60 }
 0x1d0   : > { %2076 = vst.msk [vmem:[#allocation3 + $0x44] sm:$0xf] %vm2058_vm5, %v1985_v37 }
 0x1d1   : > { %v3309_v40 = vsel %vm3305_vm2, %v3275_v16, 0.0  ;;  %v3378_v29 = vmul.f32 %v3275_v16, %v3275_v16  ;;  %v3480_v39 = vpack.c.bf16 %v3275_v16, %v3275_v16 }
 0x1d2   : > { %2400 = vrot.lane.b32.xlu1 %v2328_v53, %s4009_s25  ;;  %v3310_v13 = vadd.f32 %v3309_v40, %v3308_v14  ;;  %v3200_v1 = vpop.f32.mrf.mxu2  ;;  %v5395_v26 = vpop.f32.mrf.mxu3 }
 0x1d3   : > { %v3411_v6 = vsel %vm3305_vm2, %v3378_v29, 0.0  ;;  %3512 = vst.msk [vmem:[%s5330_s18 + $0x8] sm:$0xf] %vm707_vm1, %v3480_v39 }
 0x1d4   : > { %v1983_v23 = vpop.permute.xlu1 %1982  ;;  %v3412_v34 = vadd.f32 %v3411_v6, %v3410_v44  ;;  %v2709_v31 = vpop.f32.mrf.mxu0 }
 0x1d5   : > { %2018 = vrot.lane.b32.xlu2 %v1939_v9, %s4010_s26  ;;  %2075 = vst.msk [vmem:[#allocation3 + $0x40] sm:$0xf] %vm2058_vm5, %v1983_v23  ;;  %v2939_v18 = vadd.f32 %v2938_v8, %v2709_v31  ;;  %v2943_v10 = vpop.f32.mrf.mxu1  ;;  %v1412_v31 = vld [vmem:[#allocation2 + $0x88] sm:$0xf] }
 0x1d6   : > { %2457 = vst.msk [vmem:[#allocation3 + $0x40] sm:$0xf] %vm2440_vm11, %v2365_v21 }
 0x1d7   : > { %v3276_v45 = vadd.f32 %v3200_v1, %v2939_v18  ;;  %1448 = vst.msk [vmem:[#allocation3 + $0x5c] sm:$0xf] %vm230_vm3, %v1412_v31  ;;  %v1411_v1 = vld [vmem:[#allocation2 + $0x84] sm:$0xf] }
 0x1d8   : > { %1447 = vst.msk [vmem:[#allocation3 + $0x58] sm:$0xf] %vm230_vm3, %v1411_v1 }
 0x1d9   : > { %v3311_v38 = vsel %vm3305_vm2, %v3276_v45, 0.0  ;;  %v3379_v35 = vmul.f32 %v3276_v45, %v3276_v45  ;;  %v3481_v36 = vpack.c.bf16 %v3276_v45, %v3276_v45 }
 0x1da   : > { %v3312_v17 = vadd.f32 %v3311_v38, %v3310_v13  ;;  %v5399_v24 = vpop.f32.mrf.mxu3 }
 0x1db   : > { %v3413_v19 = vsel %vm3305_vm2, %v3379_v35, 0.0  ;;  %3513 = vst.msk [vmem:[%s5330_s18 + $0xc] sm:$0xf] %vm707_vm1, %v3481_v36 }
 0x1dc   : > { %v2712_v54 = vpop.f32.mrf.mxu0  ;;  %v3414_v50 = vadd.f32 %v3413_v19, %v3412_v34  ;;  %v3978_v19 = vld [vmem:[#allocation3 + $0x78] sm:$0xff] }
 0x1dd   : > { %2402 = vrot.lane.b32.xlu2 %v2331_v61, %s4009_s25  ;;  %v2942_v7 = vadd.f32 %v2941_v42, %v2712_v54  ;;  %v2946_v58 = vpop.f32.mrf.mxu1 }
 0x1de   : > { %3839 = vmatmul.msk.bf16.gmra.mxu3 %vm2640_vm14, %v3947_v11 }
 0x1e1   : > { %v3203_v43 = vpop.f32.mrf.mxu2 }
 0x1e2   : > { %v3277_v27 = vadd.f32 %v3203_v43, %v2942_v7 }
 0x1e4   : > { %v2367_v0 = vpop.permute.xlu1 %2366  ;;  %v3313_v4 = vsel %vm3305_vm2, %v3277_v27, 0.0  ;;  %v3380_v48 = vmul.f32 %v3277_v27, %v3277_v27  ;;  %v3482_v25 = vpack.c.bf16 %v3277_v27, %v3277_v27  ;;  %v2714_v3 = vpop.f32.mrf.mxu0 }
 0x1e5   : > { %2458 = vst.msk [vmem:[#allocation3 + $0x44] sm:$0xf] %vm2440_vm11, %v2367_v0  ;;  %v3314_v47 = vadd.f32 %v3313_v4, %v3312_v17  ;;  %v2944_v2 = vadd.f32 %v2943_v10, %v2714_v3  ;;  %v2948_v8 = vpop.f32.mrf.mxu1 }
 0x1e6   : > { %v3415_v33 = vsel %vm3305_vm2, %v3380_v48, 0.0  ;;  %3514 = vst.msk [vmem:[%s5330_s18 + $0x10] sm:$0xf] %vm707_vm1, %v3482_v25 }
 0x1e7   : > { %v3416_v46 = vadd.f32 %v3415_v33, %v3414_v50 }
 0x1e9   : > { %v3205_v15 = vpop.f32.mrf.mxu2  ;;  %v5409_v45 = vpop.f32.mrf.mxu3 }
 0x1ea   : > { %v3278_v30 = vadd.f32 %v3205_v15, %v2944_v2 }
 0x1eb   : > { %v1987_v5 = vpop.permute.xlu2 %1986 }
 0x1ec   : > { %2077 = vst.msk [vmem:[#allocation3 + $0x48] sm:$0xf] %vm2058_vm5, %v1987_v5  ;;  %v3956_v63 = vld [vmem:[#allocation3 + $0x40] sm:$0xff]  ;;  %v3315_v14 = vsel %vm3305_vm2, %v3278_v30, 0.0  ;;  %v3381_v41 = vmul.f32 %v3278_v30, %v3278_v30  ;;  %v3483_v32 = vpack.c.bf16 %v3278_v30, %v3278_v30  ;;  %v2717_v37 = vpop.f32.mrf.mxu0 }
 0x1ed   : > { %v3941_v12 = vld [vmem:[#allocation3 + $0x40] sm:$0xff]  ;;  %3748 = vmatmul.msk.bf16.gmra.mxu0 %vm2640_vm14, %v3956_v63  ;;  %v3316_v22 = vadd.f32 %v3315_v14, %v3314_v47  ;;  %v2947_v16 = vadd.f32 %v2946_v58, %v2717_v37  ;;  %v2951_v42 = vpop.f32.mrf.mxu1  ;;  %v1424_v58 = vld [vmem:[#allocation2 + $0xd0] sm:$0xf] }
 0x1ee   : > { %v3971_v62 = vld [vmem:[#allocation3 + $0x40] sm:$0xff]  ;;  %3833 = vmatmul.msk.bf16.gmra.mxu1 %vm2640_vm14, %v3941_v12  ;;  %3840 = vmatmul.msk.bf16.gmra.mxu3 %vm2640_vm14, %v3948_v59  ;;  %v3417_v28 = vsel %vm3305_vm2, %v3381_v41, 0.0  ;;  %3515 = vst.msk [vmem:[%s5330_s18 + $0x14] sm:$0xf] %vm707_vm1, %v3483_v32 }
 0x1ef   : > { %3915 = vmatmul.msk.bf16.gmra.mxu2 %vm2640_vm14, %v3971_v62  ;;  %v3418_v44 = vadd.f32 %v3417_v28, %v3416_v46  ;;  %v3979_v12 = vld [vmem:[#allocation3 + $0x80] sm:$0xff]  ;;  %1460 = vst.msk [vmem:[#allocation3 + $0x8c] sm:$0xf] %vm230_vm3, %v1424_v58 }
 0x1f1   : > { %v5417_v27 = vpop.f32.mrf.mxu3 }
 0x1f3   : > { %v2371_v57 = vpop.permute.xlu2 %2370 }
 0x1f4   : > { %v1989_v51 = vpop.permute.xlu0 %1988  ;;  %v2719_v29 = vpop.f32.mrf.mxu0 }
 0x1f5   : > { %2078 = vst.msk [vmem:[#allocation3 + $0x4c] sm:$0xf] %vm2058_vm5, %v1989_v51  ;;  %v2949_v18 = vadd.f32 %v2948_v8, %v2719_v29  ;;  %v2953_v10 = vpop.f32.mrf.mxu1 }
 0x1f6   : > { %2460 = vst.msk [vmem:[#allocation3 + $0x4c] sm:$0xf] %vm2440_vm11, %v2371_v57 }
 0x1fa   : > { %v5423_v62 = vpop.f32.mrf.mxu3 }
 0x1fc   : > { %v2369_v53 = vpop.permute.xlu1 %2368  ;;  %v2722_v54 = vpop.f32.mrf.mxu0 }
 0x1fd   : > { %2459 = vst.msk [vmem:[#allocation3 + $0x48] sm:$0xf] %vm2440_vm11, %v2369_v53  ;;  %v2952_v43 = vadd.f32 %v2951_v42, %v2722_v54 }
 0x1fe   : > { %3921 = vmatmul.msk.bf16.vlgmr.msra.gmra.mxu3 %vm2640_vm14, %v3977_v20 }
 0x201   : > { %v3208_v9 = vpop.f32.mrf.mxu2 }
 0x202   : > { %v3279_v40 = vadd.f32 %v3208_v9, %v2947_v16  ;;  %v5436_v37 = vpop.f32.mrf.mxu3 }
 0x203   : > { %v2373_v59 = vpop.permute.xlu2 %2372 }
 0x204   : > { %v3957_v39 = vld [vmem:[#allocation3 + $0x48] sm:$0xff]  ;;  %v3317_v21 = vsel %vm3305_vm2, %v3279_v40, 0.0  ;;  %v3382_v6 = vmul.f32 %v3279_v40, %v3279_v40  ;;  %v3484_v23 = vpack.c.bf16 %v3279_v40, %v3279_v40  ;;  %v2724_v33 = vpop.f32.mrf.mxu0 }
 0x205   : > { %v3942_v56 = vld [vmem:[#allocation3 + $0x48] sm:$0xff]  ;;  %v3318_v34 = vadd.f32 %v3317_v21, %v3316_v22  ;;  %3749 = vmatmul.msk.bf16.gmra.mxu0 %vm2640_vm14, %v3957_v39  ;;  %v2954_v5 = vadd.f32 %v2953_v10, %v2724_v33  ;;  %v2956_v21 = vpop.f32.mrf.mxu1 }
 0x206   : > { %v3972_v13 = vld [vmem:[#allocation3 + $0x48] sm:$0xff]  ;;  %3834 = vmatmul.msk.bf16.gmra.mxu1 %vm2640_vm14, %v3942_v56  ;;  %v3419_v55 = vsel %vm3305_vm2, %v3382_v6, 0.0  ;;  %3516 = vst.msk [vmem:[%s5330_s18 + $0x18] sm:$0xf] %vm707_vm1, %v3484_v23 }
 0x207   : > { %3916 = vmatmul.msk.bf16.gmra.mxu2 %vm2640_vm14, %v3972_v13  ;;  %v3420_v52 = vadd.f32 %v3419_v55, %v3418_v44  ;;  %v1423_v44 = vld [vmem:[#allocation2 + $0xcc] sm:$0xf] }
 0x208   : > { %1459 = vst.msk [vmem:[#allocation3 + $0x88] sm:$0xf] %vm230_vm3, %v1423_v44  ;;  %vm5666_vm3 = vcmask 24576  }
 0x209   : > { %v3210_v61 = vpop.f32.mrf.mxu2  ;;  %vm5667_vm6 = vmmov %vm5666_vm3 }
 0x20a   : > { %v3280_v38 = vadd.f32 %v3210_v61, %v2949_v18 }
 0x20c   : > { %v3319_v35 = vsel %vm3305_vm2, %v3280_v38, 0.0  ;;  %v3383_v36 = vmul.f32 %v3280_v38, %v3280_v38  ;;  %v3485_v17 = vpack.c.bf16 %v3280_v38, %v3280_v38  ;;  %v2727_v56 = vpop.f32.mrf.mxu0 }
 0x20d   : > { %v3320_v11 = vadd.f32 %v3319_v35, %v3318_v34  ;;  %v2957_v23 = vadd.f32 %v2956_v21, %v2727_v56 }
 0x20e   : > { %v3421_v50 = vsel %vm3305_vm2, %v3383_v36, 0.0  ;;  %3517 = vst.msk [vmem:[%s5330_s18 + $0x1c] sm:$0xf] %vm707_vm1, %v3485_v17  ;;  %3922 = vmatmul.msk.bf16.gmra.mxu3 %vm2640_vm14, %v3978_v19  ;;  %v2958_v36 = vpop.f32.mrf.mxu1 }
 0x20f   : > { %v3422_v7 = vadd.f32 %v3421_v50, %v3420_v52 }
 0x214   : > { %v3213_v0 = vpop.f32.mrf.mxu2  ;;  %v2729_v61 = vpop.f32.mrf.mxu0 }
 0x215   : > { %v3281_v4 = vadd.f32 %v3213_v0, %v2952_v43  ;;  %v2959_v19 = vadd.f32 %v2958_v36, %v2729_v61 }
 0x217   : > { %v3321_v48 = vsel %vm3305_vm2, %v3281_v4, 0.0  ;;  %v3384_v25 = vmul.f32 %v3281_v4, %v3281_v4  ;;  %v3486_v47 = vpack.c.bf16 %v3281_v4, %v3281_v4 }
 0x218   : > { %v3322_v3 = vadd.f32 %v3321_v48, %v3320_v11 }
 0x219   : > { %v3423_v46 = vsel %vm3305_vm2, %v3384_v25, 0.0  ;;  %3518 = vst.msk [vmem:[%s5330_s18 + $0x20] sm:$0xf] %vm707_vm1, %v3486_v47 }
 0x21a   : > { %v3424_v2 = vadd.f32 %v3423_v46, %v3422_v7 }
 0x21c   : > { %v3215_v15 = vpop.f32.mrf.mxu2 }
 0x21d   : > { %v3282_v30 = vadd.f32 %v3215_v15, %v2954_v5  ;;  %v3960_v5 = vld [vmem:[#allocation3 + $0x60] sm:$0xff] }
 0x21e   : > { %v1991_v63 = vpop.permute.xlu0 %1990  ;;  %3923 = vmatmul.msk.bf16.gmra.mxu3 %vm2640_vm14, %v3979_v12  ;;  %v3975_v15 = vld [vmem:[#allocation3 + $0x60] sm:$0xff]  ;;  %v3976_v12 = vld [vmem:[#allocation3 + $0x68] sm:$0xff] }
 0x21f   : > { %2079 = vst.msk [vmem:[#allocation3 + $0x50] sm:$0xf] %vm2058_vm5, %v1991_v63  ;;  %v3323_v14 = vsel %vm3305_vm2, %v3282_v30, 0.0  ;;  %v3385_v41 = vmul.f32 %v3282_v30, %v3282_v30  ;;  %v3487_v32 = vpack.c.bf16 %v3282_v30, %v3282_v30 }
 0x220   : > { %2461 = vst.msk [vmem:[#allocation3 + $0x50] sm:$0xf] %vm2440_vm11, %v2373_v59  ;;  %v3324_v49 = vadd.f32 %v3323_v14, %v3322_v3 }
 0x221   : > { %v3425_v22 = vsel %vm3305_vm2, %v3385_v41, 0.0  ;;  %3519 = vst.msk [vmem:[%s5330_s18 + $0x24] sm:$0xf] %vm707_vm1, %v3487_v32  ;;  %v5444_v39 = vpop.f32.mrf.mxu3  ;;  %v2961_v41 = vpop.f32.mrf.mxu1 }
 0x222   : > { %v1993_v28 = vpop.permute.xlu1 %1992  ;;  %v3426_v51 = vadd.f32 %v3425_v22, %v3424_v2 }
 0x223   : > { %2080 = vst.msk [vmem:[#allocation3 + $0x54] sm:$0xf] %vm2058_vm5, %v1993_v28 }
 0x226   : > { %v2375_v57 = vpop.permute.xlu0 %2374 }
 0x227   : > { %2462 = vst.msk [vmem:[#allocation3 + $0x54] sm:$0xf] %vm2440_vm11, %v2375_v57  ;;  %v1997_v60 = vpop.permute.xlu2 %1996 }
 0x228   : > { %2082 = vst.msk [vmem:[#allocation3 + $0x5c] sm:$0xf] %vm2058_vm5, %v1997_v60 }
 0x229   : > { %v5449_v8 = vpop.f32.mrf.mxu3 }
 0x22c   : > { %v1995_v53 = vpop.permute.xlu1 %1994 }
 0x22d   : > { %2081 = vst.msk [vmem:[#allocation3 + $0x58] sm:$0xf] %vm2058_vm5, %v1995_v53 }
 0x22e   : > { %v2377_v20 = vpop.permute.xlu0 %2376  ;;  %v3958_v16 = vld [vmem:[#allocation3 + $0x50] sm:$0xff] }
 0x22f   : > { %v3943_v9 = vld [vmem:[#allocation3 + $0x50] sm:$0xff]  ;;  %2463 = vst.msk [vmem:[#allocation3 + $0x58] sm:$0xf] %vm2440_vm11, %v2377_v20  ;;  %v2019_v29 = vpop.permute.xlu2 %2018  ;;  %3750 = vmatmul.msk.bf16.gmra.mxu0 %vm2640_vm14, %v3958_v16  ;;  %v2963_v20 = vpop.f32.mrf.mxu1 }
 0x230   : > { %v3973_v40 = vld [vmem:[#allocation3 + $0x50] sm:$0xff]  ;;  %3835 = vmatmul.msk.bf16.gmra.mxu1 %vm2640_vm14, %v3943_v9  ;;  %2093 = vst.msk [vmem:[#allocation3 + $0x88] sm:$0xf] %vm2058_vm5, %v2019_v29 }
 0x231   : > { %3917 = vmatmul.msk.bf16.gmra.mxu2 %vm2640_vm14, %v3973_v40 }
 0x233   : > { %v2732_v14 = vpop.f32.mrf.mxu0 }
 0x234   : > { %v2962_v32 = vadd.f32 %v2961_v41, %v2732_v14 }
 0x236   : > { %v2021_v6 = vpop.permute.xlu0 %2020 }
 0x237   : > { %v2403_v13 = vpop.permute.xlu2 %2402  ;;  %2094 = vst.msk [vmem:[#allocation3 + $0x8c] sm:$0xf] %vm2058_vm5, %v2021_v6 }
 0x238   : > { %2476 = vst.msk [vmem:[#allocation3 + $0x8c] sm:$0xf] %vm2440_vm11, %v2403_v13 }
 0x23b   : > { %v3218_v34 = vpop.f32.mrf.mxu2  ;;  %v2734_v60 = vpop.f32.mrf.mxu0 }
 0x23c   : > { %v3283_v31 = vadd.f32 %v3218_v34, %v2957_v23  ;;  %v2379_v55 = vpop.permute.xlu1 %2378  ;;  %v2964_v9 = vadd.f32 %v2963_v20, %v2734_v60 }
 0x23d   : > { %2464 = vst.msk [vmem:[#allocation3 + $0x5c] sm:$0xf] %vm2440_vm11, %v2379_v55 }
 0x23e   : > { %v3325_v52 = vsel %vm3305_vm2, %v3283_v31, 0.0  ;;  %v3386_v18 = vmul.f32 %v3283_v31, %v3283_v31  ;;  %v3488_v1 = vpack.c.bf16 %v3283_v31, %v3283_v31 }
 0x23f   : > { %v3326_v38 = vadd.f32 %v3325_v52, %v3324_v49 }
 0x240   : > { %v3427_v35 = vsel %vm3305_vm2, %v3386_v18, 0.0  ;;  %3520 = vst.msk [vmem:[%s5330_s18 + $0x28] sm:$0xf] %vm707_vm1, %v3488_v1 }
 0x241   : > { %v3428_v17 = vadd.f32 %v3427_v35, %v3426_v51  ;;  %v2991_v54 = vpop.f32.mrf.mxu3 }
 0x242   : > { %v2992_v52 = vadd.f32 %v2991_v54, %v5395_v26 }
 0x243   : > { %v3220_v11 = vpop.f32.mrf.mxu2 }
 0x244   : > { %v3284_v50 = vadd.f32 %v3220_v11, %v2959_v19  ;;  %v2401_v42 = vpop.permute.xlu1 %2400  ;;  %v3959_v7 = vld [vmem:[#allocation3 + $0x58] sm:$0xff] }
 0x245   : > { %v3944_v43 = vld [vmem:[#allocation3 + $0x58] sm:$0xff]  ;;  %2475 = vst.msk [vmem:[#allocation3 + $0x88] sm:$0xf] %vm2440_vm11, %v2401_v42  ;;  %3751 = vmatmul.msk.bf16.gmra.mxu0 %vm2640_vm14, %v3959_v7 }
 0x246   : > { %v3974_v0 = vld [vmem:[#allocation3 + $0x58] sm:$0xff]  ;;  %v3327_v4 = vsel %vm3305_vm2, %v3284_v50, 0.0  ;;  %v3387_v48 = vmul.f32 %v3284_v50, %v3284_v50  ;;  %v3489_v25 = vpack.c.bf16 %v3284_v50, %v3284_v50  ;;  %3836 = vmatmul.msk.bf16.gmra.mxu1 %vm2640_vm14, %v3944_v43 }
 0x247   : > { %v3328_v47 = vadd.f32 %v3327_v4, %v3326_v38  ;;  %3918 = vmatmul.msk.bf16.gmra.mxu2 %vm2640_vm14, %v3974_v0  ;;  %v2966_v38 = vpop.f32.mrf.mxu1 }
 0x248   : > { %v3429_v33 = vsel %vm3305_vm2, %v3387_v48, 0.0  ;;  %3521 = vst.msk [vmem:[%s5330_s18 + $0x2c] sm:$0xf] %vm707_vm1, %v3489_v25 }
 0x249   : > { %v3430_v3 = vadd.f32 %v3429_v33, %v3428_v17  ;;  %v2993_v46 = vpop.f32.mrf.mxu3 }
 0x24a   : > { %v2994_v35 = vadd.f32 %v2993_v46, %v5399_v24 }
 0x24c   : > { %v3980_v10 = vld [vmem:[#allocation3 + $0x88] sm:$0xff] }
 0x24d   : > { %3924 = vmatmul.msk.bf16.gmra.mxu3 %vm2640_vm14, %v3980_v10 }
 0x24f   : > { %v2968_v24 = vpop.f32.mrf.mxu1 }
 0x251   : > { %v2996_v2 = vpop.f32.mrf.mxu3 }
 0x252   : > { %v2997_v25 = vadd.f32 %v2996_v2, %v5409_v45 }
 0x255   : > { %3752 = vmatmul.msk.bf16.gmra.mxu0 %vm2640_vm14, %v3960_v5 }
 0x257   : > { %3919 = vmatmul.msk.bf16.gmra.mxu2 %vm2640_vm14, %v3975_v15 }
 0x259   : > { %v5467_v30 = vpop.f32.mrf.mxu3 }
 0x25a   : > { %v2999_v2 = vadd.f32 %v5467_v30, %v5417_v27 }
 0x261   : > { %v5469_v63 = vpop.f32.mrf.mxu3 }
 0x267   : > { %3920 = vmatmul.msk.bf16.gmra.mxu2 %vm2640_vm14, %v3976_v12 }
 0x269   : > { %v5472_v59 = vpop.f32.mrf.mxu3 }
 0x26a   : > { %v2737_v61 = vpop.f32.mrf.mxu0  ;;  %v3004_v27 = vadd.f32 %v5472_v59, %v5436_v37 }
 0x26b   : > { %v2967_v36 = vadd.f32 %v2966_v38, %v2737_v61 }
 0x271   : > { %v5474_v22 = vpop.f32.mrf.mxu3 }
 0x272   : > { %v3223_v49 = vpop.f32.mrf.mxu2  ;;  %v2739_v7 = vpop.f32.mrf.mxu0 }
 0x273   : > { %v3285_v28 = vadd.f32 %v3223_v49, %v2962_v32 }
 0x275   : > { %v3329_v44 = vsel %vm3305_vm2, %v3285_v28, 0.0  ;;  %v3388_v51 = vmul.f32 %v3285_v28, %v3285_v28  ;;  %v3490_v57 = vpack.c.bf16 %v3285_v28, %v3285_v28 }
 0x276   : > { %v3330_v58 = vadd.f32 %v3329_v44, %v3328_v47  ;;  %v2969_v47 = vadd.f32 %v2968_v24, %v2739_v7 }
 0x277   : > { %v3431_v53 = vsel %vm3305_vm2, %v3388_v51, 0.0  ;;  %3522 = vst.msk [vmem:[%s5330_s18 + $0x30] sm:$0xf] %vm707_vm1, %v3490_v57  ;;  %v3002_v51 = vadd.f32 %v5469_v63, %v5423_v62  ;;  %v2971_v63 = vpop.f32.mrf.mxu1 }
 0x278   : > { %v3432_v16 = vadd.f32 %v3431_v53, %v3430_v3 }
 0x279   : > { %v3008_v29 = vpop.f32.mrf.mxu3 }
 0x27a   : > { %v3225_v40 = vpop.f32.mrf.mxu2  ;;  %v5481_v13 = vadd.f32 %v3008_v29, %v5449_v8 }
 0x27b   : > { %v3286_v56 = vadd.f32 %v3225_v40, %v2964_v9 }
 0x27d   : > { %v3331_v21 = vsel %vm3305_vm2, %v3286_v56, 0.0  ;;  %v3389_v6 = vmul.f32 %v3286_v56, %v3286_v56  ;;  %v3491_v23 = vpack.c.bf16 %v3286_v56, %v3286_v56 }
 0x27e   : > { %v3332_v34 = vadd.f32 %v3331_v21, %v3330_v58 }
 0x27f   : > { %v3433_v31 = vsel %vm3305_vm2, %v3389_v6, 0.0  ;;  %3523 = vst.msk [vmem:[%s5330_s18 + $0x34] sm:$0xf] %vm707_vm1, %v3491_v23  ;;  %v2973_v37 = vpop.f32.mrf.mxu1 }
 0x280   : > { %v3434_v55 = vadd.f32 %v3433_v31, %v3432_v16 }
 0x281   : > { %v3253_v18 = vpop.f32.mrf.mxu3 }
 0x282   : > { %v5488_v1 = vadd.f32 %v3253_v18, %v2992_v52  ;;  %v2742_v20 = vpop.f32.mrf.mxu0 }
 0x283   : > { %v2972_v16 = vadd.f32 %v2971_v63, %v2742_v20 }
 0x284   : > { %v3502_v8 = vpack.c.bf16 %v5488_v1, %v5488_v1 }
 0x286   : > { %3534 = vst.msk [vmem:[%s5330_s18 + $0x60] sm:$0xf] %vm707_vm1, %v3502_v8 }
 0x287   : > { %v2976_v31 = vpop.f32.mrf.mxu1 }
 0x289   : > { %v3255_v19 = vpop.f32.mrf.mxu3 }
 0x28a   : > { %v3228_v17 = vpop.f32.mrf.mxu2  ;;  %v5495_v50 = vadd.f32 %v3255_v19, %v2994_v35  ;;  %v2744_v29 = vpop.f32.mrf.mxu0  ;;  %v3007_v35 = vadd.f32 %v5474_v22, %v5444_v39 }
 0x28b   : > { %v3287_v11 = vadd.f32 %v3228_v17, %v2967_v36  ;;  %v2974_v59 = vadd.f32 %v2973_v37, %v2744_v29 }
 0x28c   : > { %v3503_v0 = vpack.c.bf16 %v5495_v50, %v5495_v50 }
 0x28d   : > { %v3333_v26 = vsel %vm3305_vm2, %v3287_v11, 0.0  ;;  %v3390_v54 = vmul.f32 %v3287_v11, %v3287_v11  ;;  %v3492_v42 = vpack.c.bf16 %v3287_v11, %v3287_v11 }
 0x28e   : > { %v3334_v43 = vadd.f32 %v3333_v26, %v3332_v34  ;;  %3535 = vst.msk [vmem:[%s5330_s18 + $0x64] sm:$0xf] %vm707_vm1, %v3503_v0 }
 0x28f   : > { %v3435_v4 = vsel %vm3305_vm2, %v3390_v54, 0.0  ;;  %3524 = vst.msk [vmem:[%s5330_s18 + $0x38] sm:$0xf] %vm707_vm1, %v3492_v42  ;;  %v2978_v8 = vpop.f32.mrf.mxu1 }
 0x290   : > { %v3436_v48 = vadd.f32 %v3435_v4, %v3434_v55 }
 0x291   : > { %v3258_v3 = vpop.f32.mrf.mxu3 }
 0x292   : > { %v3230_v33 = vpop.f32.mrf.mxu2  ;;  %v5506_v10 = vadd.f32 %v3258_v3, %v2997_v25 }
 0x293   : > { %v3288_v46 = vadd.f32 %v3230_v33, %v2969_v47 }
 0x294   : > { %v3504_v41 = vpack.c.bf16 %v5506_v10, %v5506_v10 }
 0x295   : > { %v3335_v5 = vsel %vm3305_vm2, %v3288_v46, 0.0  ;;  %v3391_v15 = vmul.f32 %v3288_v46, %v3288_v46  ;;  %v3493_v12 = vpack.c.bf16 %v3288_v46, %v3288_v46 }
 0x296   : > { %v5509_v14 = vadd.f32 %v3335_v5, %v3334_v43  ;;  %3536 = vst.msk [vmem:[%s5330_s18 + $0x68] sm:$0xf] %vm707_vm1, %v3504_v41 }
 0x297   : > { %v3437_v32 = vsel %vm3305_vm2, %v3391_v15, 0.0  ;;  %3525 = vst.msk [vmem:[%s5330_s18 + $0x3c] sm:$0xf] %vm707_vm1, %v3493_v12 }
 0x298   : > { %v5516_v45 = vadd.f32 %v3437_v32, %v3436_v48 }
 0x299   : > { %v3260_v49 = vpop.f32.mrf.mxu3 }
 0x29a   : > { %v5522_v28 = vadd.f32 %v3260_v49, %v2999_v2 }
 0x29c   : > { %v3505_v44 = vpack.c.bf16 %v5522_v28, %v5522_v28 }
 0x29e   : > { %3537 = vst.msk [vmem:[%s5330_s18 + $0x6c] sm:$0xf] %vm707_vm1, %v3505_v44 }
 0x2a1   : > { %v3263_v57 = vpop.f32.mrf.mxu3 }
 0x2a2   : > { %v5530_v60 = vadd.f32 %v3263_v57, %v3002_v51 }
 0x2a4   : > { %v3506_v58 = vpack.c.bf16 %v5530_v60, %v5530_v60 }
 0x2a6   : > { %3538 = vst.msk [vmem:[%s5330_s18 + $0x70] sm:$0xf] %vm707_vm1, %v3506_v58 }
 0x2a9   : > { %v3265_v30 = vpop.f32.mrf.mxu3 }
 0x2aa   : > { %v5538_v53 = vadd.f32 %v3265_v30, %v3004_v27 }
 0x2ac   : > { %v3507_v62 = vpack.c.bf16 %v5538_v53, %v5538_v53  ;;  %v2747_v23 = vpop.f32.mrf.mxu0 }
 0x2ad   : > { %v2977_v52 = vadd.f32 %v2976_v31, %v2747_v23  ;;  %v2981_v42 = vpop.f32.mrf.mxu1 }
 0x2ae   : > { %3539 = vst.msk [vmem:[%s5330_s18 + $0x74] sm:$0xf] %vm707_vm1, %v3507_v62 }
 0x2b4   : > { %v3233_v9 = vpop.f32.mrf.mxu2  ;;  %v2749_v55 = vpop.f32.mrf.mxu0 }
 0x2b5   : > { %v3289_v40 = vadd.f32 %v3233_v9, %v2972_v16  ;;  %v2979_v17 = vadd.f32 %v2978_v8, %v2749_v55  ;;  %v2983_v33 = vpop.f32.mrf.mxu1 }
 0x2b7   : > { %v3494_v56 = vpack.c.bf16 %v3289_v40, %v3289_v40  ;;  %v3392_v5 = vmul.f32 %v3289_v40, %v3289_v40  ;;  %v3337_v41 = vsel %vm3305_vm2, %v3289_v40, 0.0 }
 0x2b8   : > { %v3338_v57 = vadd.f32 %v3337_v41, %v5509_v14  ;;  %v3355_v41 = vsel %vm3305_vm2, %v5495_v50, 0.0 }
 0x2b9   : > { %3526 = vst.msk [vmem:[%s5330_s18 + $0x40] sm:$0xf] %vm707_vm1, %v3494_v56  ;;  %v3439_v49 = vsel %vm3305_vm2, %v3392_v5, 0.0 }
 0x2ba   : > { %v3440_v62 = vadd.f32 %v3439_v49, %v5516_v45  ;;  %v3357_v49 = vsel %vm3305_vm2, %v5506_v10, 0.0 }
 0x2bc   : > { %v3235_v21 = vpop.f32.mrf.mxu2 }
 0x2bd   : > { %v3290_v6 = vadd.f32 %v3235_v21, %v2974_v59 }
 0x2bf   : > { %v3495_v34 = vpack.c.bf16 %v3290_v6, %v3290_v6  ;;  %v3339_v44 = vsel %vm3305_vm2, %v3290_v6, 0.0 }
 0x2c0   : > { %v3340_v63 = vadd.f32 %v3339_v44, %v3338_v57  ;;  %v3403_v44 = vmul.f32 %v5522_v28, %v5522_v28 }
 0x2c1   : > { %3527 = vst.msk [vmem:[%s5330_s18 + $0x44] sm:$0xf] %vm707_vm1, %v3495_v34 }
 0x2c2   : > { %v2752_v36 = vpop.f32.mrf.mxu0 }
 0x2c3   : > { %v2982_v0 = vadd.f32 %v2981_v42, %v2752_v36  ;;  %v2986_v2 = vpop.f32.mrf.mxu1 }
 0x2ca   : > { %v3238_v18 = vpop.f32.mrf.mxu2  ;;  %v2754_v22 = vpop.f32.mrf.mxu0 }
 0x2cb   : > { %v3291_v61 = vadd.f32 %v3238_v18, %v2977_v52  ;;  %v2984_v3 = vadd.f32 %v2983_v33, %v2754_v22  ;;  %v3353_v33 = vsel %vm3305_vm2, %v5488_v1, 0.0 }
 0x2cd   : > { %v3496_v38 = vpack.c.bf16 %v3291_v61, %v3291_v61  ;;  %v3394_v51 = vmul.f32 %v3291_v61, %v3291_v61  ;;  %v3341_v27 = vsel %vm3305_vm2, %v3291_v61, 0.0  ;;  %v2988_v61 = vpop.f32.mrf.mxu1 }
 0x2ce   : > { %v3342_v59 = vadd.f32 %v3341_v27, %v3340_v63  ;;  %v3404_v27 = vmul.f32 %v5530_v60, %v5530_v60  ;;  %v3405_v63 = vmul.f32 %v5538_v53, %v5538_v53 }
 0x2cf   : > { %3528 = vst.msk [vmem:[%s5330_s18 + $0x48] sm:$0xf] %vm707_vm1, %v3496_v38  ;;  %v3443_v9 = vsel %vm3305_vm2, %v3394_v51, 0.0 }
 0x2d0   : > { %v3268_v19 = vpop.f32.mrf.mxu3 }
 0x2d1   : > { %v5552_v26 = vadd.f32 %v3268_v19, %v3007_v35 }
 0x2d2   : > { %v3240_v11 = vpop.f32.mrf.mxu2  ;;  %v2757_v12 = vpop.f32.mrf.mxu0 }
 0x2d3   : > { %v3292_v54 = vadd.f32 %v3240_v11, %v2979_v17  ;;  %v3508_v7 = vpack.c.bf16 %v5552_v26, %v5552_v26  ;;  %v2987_v20 = vadd.f32 %v2986_v2, %v2757_v12 }
 0x2d5   : > { %v3497_v43 = vpack.c.bf16 %v3292_v54, %v3292_v54  ;;  %3540 = vst.msk [vmem:[%s5330_s18 + $0x78] sm:$0xf] %vm707_vm1, %v3508_v7  ;;  %v3395_v30 = vmul.f32 %v3292_v54, %v3292_v54  ;;  %v3343_v40 = vsel %vm3305_vm2, %v3292_v54, 0.0 }
 0x2d6   : > { %v3344_v31 = vadd.f32 %v3343_v40, %v3342_v59  ;;  %v3463_v40 = vsel %vm3305_vm2, %v3404_v27, 0.0  ;;  %v3465_v59 = vsel %vm3305_vm2, %v3405_v63, 0.0 }
 0x2d7   : > { %3529 = vst.msk [vmem:[%s5330_s18 + $0x4c] sm:$0xf] %vm707_vm1, %v3497_v43  ;;  %v3445_v14 = vsel %vm3305_vm2, %v3395_v30, 0.0 }
 0x2d8   : > { %v3270_v39 = vpop.f32.mrf.mxu3 }
 0x2d9   : > { %v5561_v24 = vadd.f32 %v3270_v39, %v5481_v13  ;;  %v3393_v13 = vmul.f32 %v3290_v6, %v3290_v6  ;;  %v3400_v39 = vmul.f32 %v5488_v1, %v5488_v1 }
 0x2da   : > { %v3243_v4 = vpop.f32.mrf.mxu2  ;;  %v2759_v45 = vpop.f32.mrf.mxu0 }
 0x2db   : > { %v3293_v48 = vadd.f32 %v3243_v4, %v2982_v0  ;;  %v3509_v25 = vpack.c.bf16 %v5561_v24, %v5561_v24  ;;  %v3441_v58 = vsel %vm3305_vm2, %v3393_v13, 0.0  ;;  %v2989_v35 = vadd.f32 %v2988_v61, %v2759_v45 }
 0x2dc   : > { %v3442_v37 = vadd.f32 %v3441_v58, %v3440_v62  ;;  %v3455_v12 = vsel %vm3305_vm2, %v3400_v39, 0.0  ;;  %v3402_v13 = vmul.f32 %v5506_v10, %v5506_v10  ;;  %v3461_v62 = vsel %vm3305_vm2, %v3403_v44, 0.0 }
 0x2dd   : > { %v3498_v47 = vpack.c.bf16 %v3293_v48, %v3293_v48  ;;  %3541 = vst.msk [vmem:[%s5330_s18 + $0x7c] sm:$0xf] %vm707_vm1, %v3509_v25  ;;  %v3396_v29 = vmul.f32 %v3293_v48, %v3293_v48  ;;  %v3345_v21 = vsel %vm3305_vm2, %v3293_v48, 0.0  ;;  %v3361_v10 = vsel %vm3305_vm2, %v5530_v60, 0.0 }
 0x2de   : > { %v3444_v34 = vadd.f32 %v3443_v9, %v3442_v37  ;;  %v3346_v38 = vadd.f32 %v3345_v21, %v3344_v31  ;;  %v3459_v58 = vsel %vm3305_vm2, %v3402_v13, 0.0  ;;  %v3365_v60 = vsel %vm3305_vm2, %v5552_v26, 0.0 }
 0x2df   : > { %3530 = vst.msk [vmem:[%s5330_s18 + $0x50] sm:$0xf] %vm707_vm1, %v3498_v47  ;;  %v3447_v55 = vsel %vm3305_vm2, %v3396_v29, 0.0  ;;  %v3406_v29 = vmul.f32 %v5552_v26, %v5552_v26 }
 0x2e0   : > { %v3446_v8 = vadd.f32 %v3445_v14, %v3444_v34  ;;  %v3407_v14 = vmul.f32 %v5561_v24, %v5561_v24 }
 0x2e2   : > { %v3245_v46 = vpop.f32.mrf.mxu2  ;;  %v3448_v19 = vadd.f32 %v3447_v55, %v3446_v8  ;;  %v3469_v45 = vsel %vm3305_vm2, %v3407_v14, 0.0 }
 0x2e3   : > { %v3294_v15 = vadd.f32 %v3245_v46, %v2984_v3  ;;  %v3401_v3 = vmul.f32 %v5495_v50, %v5495_v50  ;;  %v3359_v50 = vsel %vm3305_vm2, %v5522_v28, 0.0  ;;  %v3363_v28 = vsel %vm3305_vm2, %v5538_v53, 0.0 }
 0x2e4   : > { %v3367_v53 = vsel %vm3305_vm2, %v5561_v24, 0.0 }
 0x2e5   : > { %v3499_v32 = vpack.c.bf16 %v3294_v15, %v3294_v15  ;;  %v3397_v6 = vmul.f32 %v3294_v15, %v3294_v15  ;;  %v3347_v52 = vsel %vm3305_vm2, %v3294_v15, 0.0  ;;  %v3457_v1 = vsel %vm3305_vm2, %v3401_v3, 0.0 }
 0x2e6   : > { %v3348_v11 = vadd.f32 %v3347_v52, %v3346_v38 }
 0x2e7   : > { %3531 = vst.msk [vmem:[%s5330_s18 + $0x54] sm:$0xf] %vm707_vm1, %v3499_v32  ;;  %v3449_v36 = vsel %vm3305_vm2, %v3397_v6, 0.0 }
 0x2e8   : > { %v3450_v43 = vadd.f32 %v3449_v36, %v3448_v19 }
 0x2ea   : > { %v3248_v16 = vpop.f32.mrf.mxu2 }
 0x2eb   : > { %v3295_v56 = vadd.f32 %v3248_v16, %v2987_v20 }
 0x2ed   : > { %v3500_v23 = vpack.c.bf16 %v3295_v56, %v3295_v56  ;;  %v3398_v18 = vmul.f32 %v3295_v56, %v3295_v56  ;;  %v3349_v17 = vsel %vm3305_vm2, %v3295_v56, 0.0 }
 0x2ee   : > { %v3350_v0 = vadd.f32 %v3349_v17, %v3348_v11 }
 0x2ef   : > { %3532 = vst.msk [vmem:[%s5330_s18 + $0x58] sm:$0xf] %vm707_vm1, %v3500_v23  ;;  %v3451_v42 = vsel %vm3305_vm2, %v3398_v18, 0.0  ;;  %v3467_v23 = vsel %vm3305_vm2, %v3406_v29, 0.0 }
 0x2f0   : > { %v3452_v25 = vadd.f32 %v3451_v42, %v3450_v43 }
 0x2f2   : > { %v3250_v54 = vpop.f32.mrf.mxu2 }
 0x2f3   : > { %v3296_v7 = vadd.f32 %v3250_v54, %v2989_v35 }
 0x2f5   : > { %v3351_v22 = vsel %vm3305_vm2, %v3296_v7, 0.0  ;;  %v3399_v4 = vmul.f32 %v3296_v7, %v3296_v7  ;;  %v3501_v48 = vpack.c.bf16 %v3296_v7, %v3296_v7 }
 0x2f6   : > { %v3352_v47 = vadd.f32 %v3351_v22, %v3350_v0 }
 0x2f7   : > { %v3453_v46 = vsel %vm3305_vm2, %v3399_v4, 0.0  ;;  %3533 = vst.msk [vmem:[%s5330_s18 + $0x5c] sm:$0xf] %vm707_vm1, %v3501_v48 }
 0x2f8   : > { %v3354_v5 = vadd.f32 %v3353_v33, %v3352_v47  ;;  %v3454_v15 = vadd.f32 %v3453_v46, %v3452_v25 }
 0x2fa   : > { %v3356_v32 = vadd.f32 %v3355_v41, %v3354_v5  ;;  %v3456_v2 = vadd.f32 %v3455_v12, %v3454_v15 }
 0x2fc   : > { %v3358_v51 = vadd.f32 %v3357_v49, %v3356_v32  ;;  %v3458_v57 = vadd.f32 %v3457_v1, %v3456_v2 }
 0x2fe   : > { %v3360_v30 = vadd.f32 %v3359_v50, %v3358_v51  ;;  %v3460_v20 = vadd.f32 %v3459_v58, %v3458_v57 }
 0x300   : > { %v3362_v16 = vadd.f32 %v3361_v10, %v3360_v30  ;;  %v3462_v9 = vadd.f32 %v3461_v62, %v3460_v20 }
 0x302   : > { %v3364_v56 = vadd.f32 %v3363_v28, %v3362_v16  ;;  %v3464_v37 = vadd.f32 %v3463_v40, %v3462_v9 }
 0x304   : > { %v3366_v21 = vadd.f32 %v3365_v60, %v3364_v56  ;;  %v3466_v6 = vadd.f32 %v3465_v59, %v3464_v37 }
 0x306   : > { %v3368_v34 = vadd.f32 %v3367_v53, %v3366_v21  ;;  %v3468_v31 = vadd.f32 %v3467_v23, %v3466_v6 }
 0x308   : > { %v3369_v55 = vrot.slane %v3368_v34, 4  ;;  %v3470_v52 = vadd.f32 %v3469_v45, %v3468_v31 }
 0x30a   : > { %v3370_v18 = vadd.f32 %v3369_v55, %v3368_v34  ;;  %v3471_v61 = vrot.slane %v3470_v52, 4 }
 0x30c   : > { %v3371_v8 = vrot.slane %v3370_v18, 2  ;;  %v3472_v26 = vadd.f32 %v3471_v61, %v3470_v52 }
 0x30e   : > { %v3372_v38 = vadd.f32 %v3371_v8, %v3370_v18  ;;  %v3473_v35 = vrot.slane %v3472_v26, 2 }
 0x310   : > { %v3373_v36 = vrot.slane %v3372_v38, 1  ;;  %v3474_v17 = vadd.f32 %v3473_v35, %v3472_v26 }
 0x312   : > { %v3374_v24 = vadd.f32 %v3373_v36, %v3372_v38  ;;  %v3475_v19 = vrot.slane %v3474_v17, 1 }
 0x314   : > { %v3476_v11 = vadd.f32 %v3475_v19, %v3474_v17  ;;  %3543 = vst.msk [vmem:[%s228_s21] sm:$0x1] %vm5666_vm3, %v3374_v24 }
 0x316   : > { %3544 = vst.msk [vmem:[%s228_s21 + $0x1] sm:$0x1] %vm5667_vm6, %v3476_v11 }
 0x317 PF: > { %s15_s15 = sadd.s32 1, %s4005_s15  }
 0x318   : > { %p12_p4 = scmp.ge.s32.totalorder %s15_s15, 4  }
 0x31a   :  { %14 = sbr.rel (!%p12_p4) target bundleno = 1 (0x1), region = 81 }

</bundles_post_ra>
